<compile_context>
chip_gen: v6e
topology: v6e:2x2x1
jax: 0.10.0
libtpu: 0.0.40
codegen_flags: <defaults>
</compile_context>

<pallas_src>
import jax
import jax.numpy as jnp
from jax import lax
from jax.experimental import pallas as pl
from jax.experimental.pallas import tpu as pltpu


# ---------------------------------------------------------------------------
# Fused ResBlock kernel: one batch element per grid step, everything in VMEM.
# ---------------------------------------------------------------------------
def _resblock_kernel(x_ref, w1_ref, b1_ref, w2_ref, b2_ref, o_ref,
                     xpad_ref, mid_ref):
    H, W, Cout = o_ref.shape[1], o_ref.shape[2], o_ref.shape[3]
    Cin = x_ref.shape[3]
    Cmid = w1_ref.shape[2]

    def conv3x3(pad_ref, w_ref, cin):
        """3x3 conv over a zero-padded (H+2, W+2, cin) VMEM buffer.

        One full-width slab load per kh; the three kw windows are value
        slices of that slab. Weights already carry the folded BN scale.
        Accumulates in f32 on the MXU.
        """
        acc = None
        for kh in range(3):
            slab = pad_ref[kh:kh + H, :, :]                      # (H, W+2, cin)
            for kw in range(3):
                win = slab[:, kw:kw + W, :].reshape(H * W, cin)  # (H*W, cin)
                d = jnp.dot(win, w_ref[kh * 3 + kw],
                            preferred_element_type=jnp.float32)
                acc = d if acc is None else acc + d
        return acc                                               # (H*W, Co) f32

    # Stage the input tile into a zero-padded VMEM halo buffer (no HBM pad).
    xpad_ref[...] = jnp.zeros_like(xpad_ref)
    xpad_ref[pl.ds(1, H), pl.ds(1, W), :] = x_ref[0]

    # conv1 (+ BN1 scale folded into weights) + bias + ReLU — stays in VMEM.
    h1 = jnp.maximum(conv3x3(xpad_ref, w1_ref, Cin) + b1_ref[...], 0.0)
    mid_ref[...] = jnp.zeros_like(mid_ref)
    mid_ref[pl.ds(1, H), pl.ds(1, W), :] = (
        h1.reshape(H, W, Cmid).astype(mid_ref.dtype))

    # conv2 (+ BN2 folded) + bias + identity residual + ReLU — one HBM store.
    h2 = conv3x3(mid_ref, w2_ref, Cmid) + b2_ref[...]
    h2 = h2 + x_ref[0].reshape(H * W, Cout)   # re-read identity (VMEM, cheap)
    o_ref[0] = jnp.maximum(h2, 0.0).reshape(H, W, Cout).astype(o_ref.dtype)


# ---------------------------------------------------------------------------
# Wrapper: fold eval-mode BN into the convs, launch the fused kernel.
# ---------------------------------------------------------------------------
def _fold_bn_into_conv(w9, gamma, beta, mean, var, eps=1e-5):
    """Fold eval-mode BN into the conv: scale into weights, rest into a bias."""
    scale = gamma / jnp.sqrt(var + eps)                          # (Cout,)
    bias = beta - mean * scale                                   # (Cout,)
    return w9 * scale[None, None, :], bias.reshape(1, -1)


def resblock_forward_nhwc(x, p):
    """Fused ResBlock forward on NHWC input (N, H, W, C). stride=1, no downsample."""
    N, H, W, Cin = x.shape
    w1, b1 = _fold_bn_into_conv(p["w1"], p["bn1_gamma"], p["bn1_beta"],
                                p["bn1_mean"], p["bn1_var"])
    w2, b2 = _fold_bn_into_conv(p["w2"], p["bn2_gamma"], p["bn2_beta"],
                                p["bn2_mean"], p["bn2_var"])
    Cmid, Cout = w1.shape[2], w2.shape[2]
    assert Cout == Cin, "identity residual needs inplanes == planes (stride=1)"

    return pl.pallas_call(
        _resblock_kernel,
        out_shape=jax.ShapeDtypeStruct((N, H, W, Cout), x.dtype),
        grid=(N,),
        in_specs=[
            pl.BlockSpec((1, H, W, Cin), lambda b: (b, 0, 0, 0)),
            pl.BlockSpec((9, Cin, Cmid), lambda b: (0, 0, 0)),   # resident weights
            pl.BlockSpec((1, Cmid), lambda b: (0, 0)),
            pl.BlockSpec((9, Cmid, Cout), lambda b: (0, 0, 0)),  # resident weights
            pl.BlockSpec((1, Cout), lambda b: (0, 0)),
        ],
        out_specs=pl.BlockSpec((1, H, W, Cout), lambda b: (b, 0, 0, 0)),
        scratch_shapes=[
            pltpu.VMEM((H + 2, W + 2, Cin), x.dtype),            # padded input
            pltpu.VMEM((H + 2, W + 2, Cmid), x.dtype),           # padded out1
        ],
        compiler_params=pltpu.CompilerParams(
            dimension_semantics=("parallel",),                   # megacore on v7x
            vmem_limit_bytes=32 * 1024 * 1024,                   # fits v5e..v7x
        ),
    )(x, w1, b1, w2, b2)


def resblock_forward(x_nchw, p):
    # NCHW <-> NHWC only at the boundary; drop these if the caller is NHWC.
    x = jnp.transpose(x_nchw, (0, 2, 3, 1))
    y = resblock_forward_nhwc(x, p)
    return jnp.transpose(y, (0, 3, 1, 2))


# ---------------------------------------------------------------------------
# Pure-JAX reference (for correctness check)
# ---------------------------------------------------------------------------
def resblock_ref(x_nchw, p):
    x = jnp.transpose(x_nchw, (0, 2, 3, 1))

    def conv(inp, w9):
        Cin, Cout = w9.shape[1], w9.shape[2]
        w = w9.reshape(3, 3, Cin, Cout)                          # HWIO
        return lax.conv_general_dilated(
            inp, w, (1, 1), "SAME",
            dimension_numbers=("NHWC", "HWIO", "NHWC"))

    def bn(y, g, b, m, v, eps=1e-5):
        return (y - m) * g / jnp.sqrt(v + eps) + b

    o = jax.nn.relu(bn(conv(x, p["w1"]),
                       p["bn1_gamma"], p["bn1_beta"], p["bn1_mean"], p["bn1_var"]))
    o = bn(conv(o, p["w2"]),
           p["bn2_gamma"], p["bn2_beta"], p["bn2_mean"], p["bn2_var"])
    o = jax.nn.relu(o + x)
    return jnp.transpose(o, (0, 3, 1, 2))


if __name__ == "__main__":
    key = jax.random.PRNGKey(0)
    N, C, H, W = 2, 4, 16, 16                                    # inplanes = planes = 4
    ks = jax.random.split(key, 11)

    x = jax.random.normal(ks[0], (N, C, H, W), jnp.float32)

    # PyTorch conv weights are (Cout, Cin, 3, 3); kernel expects (9, Cin, Cout).
    def to_kernel_layout(w_oihw):
        return jnp.transpose(w_oihw, (2, 3, 1, 0)).reshape(
            9, w_oihw.shape[1], w_oihw.shape[0])

    w1_oihw = 0.1 * jax.random.normal(ks[1], (C, C, 3, 3), jnp.float32)
    w2_oihw = 0.1 * jax.random.normal(ks[2], (C, C, 3, 3), jnp.float32)

    params = dict(
        w1=to_kernel_layout(w1_oihw),
        w2=to_kernel_layout(w2_oihw),
        bn1_gamma=jax.random.uniform(ks[3], (C,), minval=0.5, maxval=1.5),
        bn1_beta=0.1 * jax.random.normal(ks[4], (C,), jnp.float32),
        bn1_mean=0.1 * jax.random.normal(ks[5], (C,), jnp.float32),
        bn1_var=jax.random.uniform(ks[6], (C,), minval=0.5, maxval=1.5),
        bn2_gamma=jax.random.uniform(ks[7], (C,), minval=0.5, maxval=1.5),
        bn2_beta=0.1 * jax.random.normal(ks[8], (C,), jnp.float32),
        bn2_mean=0.1 * jax.random.normal(ks[9], (C,), jnp.float32),
        bn2_var=jax.random.uniform(ks[10], (C,), minval=0.5, maxval=1.5),
    )

    fwd = jax.jit(resblock_forward)
    out = jax.block_until_ready(fwd(x, params))
    ref = jax.block_until_ready(resblock_ref(x, params))

    assert out.shape == (N, C, H, W), out.shape
    max_err = float(jnp.max(jnp.abs(out - ref)))
    assert max_err < 1e-4, f"max abs err {max_err}"
    print("KERNEL_OK")
</pallas_src>

<mosaic_0001>
module attributes {stable_mosaic.version = 11 : i64} {
  func.func @_resblock_kernel(%arg0: i32, %arg1: memref<1x16x16x4xf32, #tpu.memory_space<vmem>>, %arg2: memref<9x4x4xf32, #tpu.memory_space<vmem>>, %arg3: memref<1x4xf32, #tpu.memory_space<vmem>>, %arg4: memref<9x4x4xf32, #tpu.memory_space<vmem>>, %arg5: memref<1x4xf32, #tpu.memory_space<vmem>>, %arg6: memref<1x16x16x4xf32, #tpu.memory_space<vmem>>, %arg7: memref<18x18x4xf32, #tpu.memory_space<vmem>>, %arg8: memref<18x18x4xf32, #tpu.memory_space<vmem>>) attributes {dimension_semantics = [#tpu.dimension_semantics<parallel>], iteration_bounds = array<i64: 2>, scalar_prefetch = 0 : i64, scratch_operands = 2 : i64, tpu.core_type = #tpu.core_type<tc>, window_params = [{transform_indices = @transform_0, window_bounds = array<i64: 1, 16, 16, 4>}, {pipeline_mode = #tpu.pipeline_mode<synchronous>, transform_indices = @transform_1, window_bounds = array<i64: 9, 4, 4>}, {pipeline_mode = #tpu.pipeline_mode<synchronous>, transform_indices = @transform_2, window_bounds = array<i64: 1, 4>}, {pipeline_mode = #tpu.pipeline_mode<synchronous>, transform_indices = @transform_3, window_bounds = array<i64: 9, 4, 4>}, {pipeline_mode = #tpu.pipeline_mode<synchronous>, transform_indices = @transform_4, window_bounds = array<i64: 1, 4>}, {transform_indices = @transform_5, window_bounds = array<i64: 1, 16, 16, 4>}]} {
    %cst = arith.constant 0.000000e+00 : f32
    %0 = vector.broadcast %cst : f32 to vector<18x18x4xf32>
    %c0 = arith.constant 0 : index
    %c0_0 = arith.constant 0 : index
    %c0_1 = arith.constant 0 : index
    %1 = vector.load %arg7[%c0, %c0_0, %c0_1] : memref<18x18x4xf32, #tpu.memory_space<vmem>>, vector<18x18x4xf32>
    tpu.vector_store %arg7[%c0, %c0_0, %c0_1], %0 {strides = array<i32>} : memref<18x18x4xf32, #tpu.memory_space<vmem>>, vector<18x18x4xf32>,
    %c0_2 = arith.constant 0 : index
    %c0_3 = arith.constant 0 : index
    %c0_4 = arith.constant 0 : index
    %c0_5 = arith.constant 0 : index
    %2 = vector.load %arg1[%c0_2, %c0_3, %c0_4, %c0_5] : memref<1x16x16x4xf32, #tpu.memory_space<vmem>>, vector<1x16x16x4xf32>
    %3 = vector.shape_cast %2 : vector<1x16x16x4xf32> to vector<16x16x4xf32>
    %c1 = arith.constant 1 : index
    %c1_6 = arith.constant 1 : index
    %c0_7 = arith.constant 0 : index
    %4 = vector.load %arg7[%c1, %c1_6, %c0_7] : memref<18x18x4xf32, #tpu.memory_space<vmem>>, vector<16x16x4xf32>
    tpu.vector_store %arg7[%c1, %c1_6, %c0_7], %3 {strides = array<i32>} : memref<18x18x4xf32, #tpu.memory_space<vmem>>, vector<16x16x4xf32>,
    %c0_8 = arith.constant 0 : index
    %c0_9 = arith.constant 0 : index
    %c0_10 = arith.constant 0 : index
    %5 = vector.load %arg7[%c0_8, %c0_9, %c0_10] : memref<18x18x4xf32, #tpu.memory_space<vmem>>, vector<16x18x4xf32>
    %6 = vector.extract_strided_slice %5 {offsets = [0, 0, 0], sizes = [16, 16, 4], strides = [1, 1, 1]} : vector<16x18x4xf32> to vector<16x16x4xf32>
    %7 = vector.shape_cast %6 : vector<16x16x4xf32> to vector<256x4xf32>
    %c0_11 = arith.constant 0 : index
    %c0_12 = arith.constant 0 : index
    %c0_13 = arith.constant 0 : index
    %8 = vector.load %arg2[%c0_11, %c0_12, %c0_13] : memref<9x4x4xf32, #tpu.memory_space<vmem>>, vector<1x4x4xf32>
    %9 = vector.shape_cast %8 : vector<1x4x4xf32> to vector<4x4xf32>
    %cst_14 = arith.constant dense<0.000000e+00> : vector<256x4xf32>
    %10 = tpu.matmul %7, %9, %cst_14 {dimension_numbers = #tpu.dot_dimension_numbers<[1], [0], [0], [1], [0, 0, 1, 1], [], []>} : vector<256x4xf32>, vector<4x4xf32>, vector<256x4xf32> -> vector<256x4xf32>
    %11 = vector.extract_strided_slice %5 {offsets = [0, 1, 0], sizes = [16, 16, 4], strides = [1, 1, 1]} : vector<16x18x4xf32> to vector<16x16x4xf32>
    %12 = vector.shape_cast %11 : vector<16x16x4xf32> to vector<256x4xf32>
    %c1_15 = arith.constant 1 : index
    %c0_16 = arith.constant 0 : index
    %c0_17 = arith.constant 0 : index
    %13 = vector.load %arg2[%c1_15, %c0_16, %c0_17] : memref<9x4x4xf32, #tpu.memory_space<vmem>>, vector<1x4x4xf32>
    %14 = vector.shape_cast %13 : vector<1x4x4xf32> to vector<4x4xf32>
    %cst_18 = arith.constant dense<0.000000e+00> : vector<256x4xf32>
    %15 = tpu.matmul %12, %14, %cst_18 {dimension_numbers = #tpu.dot_dimension_numbers<[1], [0], [0], [1], [0, 0, 1, 1], [], []>} : vector<256x4xf32>, vector<4x4xf32>, vector<256x4xf32> -> vector<256x4xf32>
    %16 = arith.addf %10, %15 : vector<256x4xf32>
    %17 = vector.extract_strided_slice %5 {offsets = [0, 2, 0], sizes = [16, 16, 4], strides = [1, 1, 1]} : vector<16x18x4xf32> to vector<16x16x4xf32>
    %18 = vector.shape_cast %17 : vector<16x16x4xf32> to vector<256x4xf32>
    %c2 = arith.constant 2 : index
    %c0_19 = arith.constant 0 : index
    %c0_20 = arith.constant 0 : index
    %19 = vector.load %arg2[%c2, %c0_19, %c0_20] : memref<9x4x4xf32, #tpu.memory_space<vmem>>, vector<1x4x4xf32>
    %20 = vector.shape_cast %19 : vector<1x4x4xf32> to vector<4x4xf32>
    %cst_21 = arith.constant dense<0.000000e+00> : vector<256x4xf32>
    %21 = tpu.matmul %18, %20, %cst_21 {dimension_numbers = #tpu.dot_dimension_numbers<[1], [0], [0], [1], [0, 0, 1, 1], [], []>} : vector<256x4xf32>, vector<4x4xf32>, vector<256x4xf32> -> vector<256x4xf32>
    %22 = arith.addf %16, %21 : vector<256x4xf32>
    %c1_22 = arith.constant 1 : index
    %c0_23 = arith.constant 0 : index
    %c0_24 = arith.constant 0 : index
    %23 = vector.load %arg7[%c1_22, %c0_23, %c0_24] : memref<18x18x4xf32, #tpu.memory_space<vmem>>, vector<16x18x4xf32>
    %24 = vector.extract_strided_slice %23 {offsets = [0, 0, 0], sizes = [16, 16, 4], strides = [1, 1, 1]} : vector<16x18x4xf32> to vector<16x16x4xf32>
    %25 = vector.shape_cast %24 : vector<16x16x4xf32> to vector<256x4xf32>
    %c3 = arith.constant 3 : index
    %c0_25 = arith.constant 0 : index
    %c0_26 = arith.constant 0 : index
    %26 = vector.load %arg2[%c3, %c0_25, %c0_26] : memref<9x4x4xf32, #tpu.memory_space<vmem>>, vector<1x4x4xf32>
    %27 = vector.shape_cast %26 : vector<1x4x4xf32> to vector<4x4xf32>
    %cst_27 = arith.constant dense<0.000000e+00> : vector<256x4xf32>
    %28 = tpu.matmul %25, %27, %cst_27 {dimension_numbers = #tpu.dot_dimension_numbers<[1], [0], [0], [1], [0, 0, 1, 1], [], []>} : vector<256x4xf32>, vector<4x4xf32>, vector<256x4xf32> -> vector<256x4xf32>
    %29 = arith.addf %22, %28 : vector<256x4xf32>
    %30 = vector.extract_strided_slice %23 {offsets = [0, 1, 0], sizes = [16, 16, 4], strides = [1, 1, 1]} : vector<16x18x4xf32> to vector<16x16x4xf32>
    %31 = vector.shape_cast %30 : vector<16x16x4xf32> to vector<256x4xf32>
    %c4 = arith.constant 4 : index
    %c0_28 = arith.constant 0 : index
    %c0_29 = arith.constant 0 : index
    %32 = vector.load %arg2[%c4, %c0_28, %c0_29] : memref<9x4x4xf32, #tpu.memory_space<vmem>>, vector<1x4x4xf32>
    %33 = vector.shape_cast %32 : vector<1x4x4xf32> to vector<4x4xf32>
    %cst_30 = arith.constant dense<0.000000e+00> : vector<256x4xf32>
    %34 = tpu.matmul %31, %33, %cst_30 {dimension_numbers = #tpu.dot_dimension_numbers<[1], [0], [0], [1], [0, 0, 1, 1], [], []>} : vector<256x4xf32>, vector<4x4xf32>, vector<256x4xf32> -> vector<256x4xf32>
    %35 = arith.addf %29, %34 : vector<256x4xf32>
    %36 = vector.extract_strided_slice %23 {offsets = [0, 2, 0], sizes = [16, 16, 4], strides = [1, 1, 1]} : vector<16x18x4xf32> to vector<16x16x4xf32>
    %37 = vector.shape_cast %36 : vector<16x16x4xf32> to vector<256x4xf32>
    %c5 = arith.constant 5 : index
    %c0_31 = arith.constant 0 : index
    %c0_32 = arith.constant 0 : index
    %38 = vector.load %arg2[%c5, %c0_31, %c0_32] : memref<9x4x4xf32, #tpu.memory_space<vmem>>, vector<1x4x4xf32>
    %39 = vector.shape_cast %38 : vector<1x4x4xf32> to vector<4x4xf32>
    %cst_33 = arith.constant dense<0.000000e+00> : vector<256x4xf32>
    %40 = tpu.matmul %37, %39, %cst_33 {dimension_numbers = #tpu.dot_dimension_numbers<[1], [0], [0], [1], [0, 0, 1, 1], [], []>} : vector<256x4xf32>, vector<4x4xf32>, vector<256x4xf32> -> vector<256x4xf32>
    %41 = arith.addf %35, %40 : vector<256x4xf32>
    %c2_34 = arith.constant 2 : index
    %c0_35 = arith.constant 0 : index
    %c0_36 = arith.constant 0 : index
    %42 = vector.load %arg7[%c2_34, %c0_35, %c0_36] : memref<18x18x4xf32, #tpu.memory_space<vmem>>, vector<16x18x4xf32>
    %43 = vector.extract_strided_slice %42 {offsets = [0, 0, 0], sizes = [16, 16, 4], strides = [1, 1, 1]} : vector<16x18x4xf32> to vector<16x16x4xf32>
    %44 = vector.shape_cast %43 : vector<16x16x4xf32> to vector<256x4xf32>
    %c6 = arith.constant 6 : index
    %c0_37 = arith.constant 0 : index
    %c0_38 = arith.constant 0 : index
    %45 = vector.load %arg2[%c6, %c0_37, %c0_38] : memref<9x4x4xf32, #tpu.memory_space<vmem>>, vector<1x4x4xf32>
    %46 = vector.shape_cast %45 : vector<1x4x4xf32> to vector<4x4xf32>
    %cst_39 = arith.constant dense<0.000000e+00> : vector<256x4xf32>
    %47 = tpu.matmul %44, %46, %cst_39 {dimension_numbers = #tpu.dot_dimension_numbers<[1], [0], [0], [1], [0, 0, 1, 1], [], []>} : vector<256x4xf32>, vector<4x4xf32>, vector<256x4xf32> -> vector<256x4xf32>
    %48 = arith.addf %41, %47 : vector<256x4xf32>
    %49 = vector.extract_strided_slice %42 {offsets = [0, 1, 0], sizes = [16, 16, 4], strides = [1, 1, 1]} : vector<16x18x4xf32> to vector<16x16x4xf32>
    %50 = vector.shape_cast %49 : vector<16x16x4xf32> to vector<256x4xf32>
    %c7 = arith.constant 7 : index
    %c0_40 = arith.constant 0 : index
    %c0_41 = arith.constant 0 : index
    %51 = vector.load %arg2[%c7, %c0_40, %c0_41] : memref<9x4x4xf32, #tpu.memory_space<vmem>>, vector<1x4x4xf32>
    %52 = vector.shape_cast %51 : vector<1x4x4xf32> to vector<4x4xf32>
    %cst_42 = arith.constant dense<0.000000e+00> : vector<256x4xf32>
    %53 = tpu.matmul %50, %52, %cst_42 {dimension_numbers = #tpu.dot_dimension_numbers<[1], [0], [0], [1], [0, 0, 1, 1], [], []>} : vector<256x4xf32>, vector<4x4xf32>, vector<256x4xf32> -> vector<256x4xf32>
    %54 = arith.addf %48, %53 : vector<256x4xf32>
    %55 = vector.extract_strided_slice %42 {offsets = [0, 2, 0], sizes = [16, 16, 4], strides = [1, 1, 1]} : vector<16x18x4xf32> to vector<16x16x4xf32>
    %56 = vector.shape_cast %55 : vector<16x16x4xf32> to vector<256x4xf32>
    %c8 = arith.constant 8 : index
    %c0_43 = arith.constant 0 : index
    %c0_44 = arith.constant 0 : index
    %57 = vector.load %arg2[%c8, %c0_43, %c0_44] : memref<9x4x4xf32, #tpu.memory_space<vmem>>, vector<1x4x4xf32>
    %58 = vector.shape_cast %57 : vector<1x4x4xf32> to vector<4x4xf32>
    %cst_45 = arith.constant dense<0.000000e+00> : vector<256x4xf32>
    %59 = tpu.matmul %56, %58, %cst_45 {dimension_numbers = #tpu.dot_dimension_numbers<[1], [0], [0], [1], [0, 0, 1, 1], [], []>} : vector<256x4xf32>, vector<4x4xf32>, vector<256x4xf32> -> vector<256x4xf32>
    %60 = arith.addf %54, %59 : vector<256x4xf32>
    %c0_46 = arith.constant 0 : index
    %c0_47 = arith.constant 0 : index
    %61 = vector.load %arg3[%c0_46, %c0_47] : memref<1x4xf32, #tpu.memory_space<vmem>>, vector<1x4xf32>
    %62 = vector.broadcast %61 : vector<1x4xf32> to vector<256x4xf32>
    %63 = arith.addf %60, %62 : vector<256x4xf32>
    %cst_48 = arith.constant 0.000000e+00 : f32
    %64 = vector.broadcast %cst_48 : f32 to vector<256x4xf32>
    %65 = arith.maximumf %63, %64 : vector<256x4xf32>
    %cst_49 = arith.constant 0.000000e+00 : f32
    %66 = vector.broadcast %cst_49 : f32 to vector<18x18x4xf32>
    %c0_50 = arith.constant 0 : index
    %c0_51 = arith.constant 0 : index
    %c0_52 = arith.constant 0 : index
    %67 = vector.load %arg8[%c0_50, %c0_51, %c0_52] : memref<18x18x4xf32, #tpu.memory_space<vmem>>, vector<18x18x4xf32>
    tpu.vector_store %arg8[%c0_50, %c0_51, %c0_52], %66 {strides = array<i32>} : memref<18x18x4xf32, #tpu.memory_space<vmem>>, vector<18x18x4xf32>,
    %68 = vector.shape_cast %65 : vector<256x4xf32> to vector<16x16x4xf32>
    %c1_53 = arith.constant 1 : index
    %c1_54 = arith.constant 1 : index
    %c0_55 = arith.constant 0 : index
    %69 = vector.load %arg8[%c1_53, %c1_54, %c0_55] : memref<18x18x4xf32, #tpu.memory_space<vmem>>, vector<16x16x4xf32>
    tpu.vector_store %arg8[%c1_53, %c1_54, %c0_55], %68 {strides = array<i32>} : memref<18x18x4xf32, #tpu.memory_space<vmem>>, vector<16x16x4xf32>,
    %c0_56 = arith.constant 0 : index
    %c0_57 = arith.constant 0 : index
    %c0_58 = arith.constant 0 : index
    %70 = vector.load %arg8[%c0_56, %c0_57, %c0_58] : memref<18x18x4xf32, #tpu.memory_space<vmem>>, vector<16x18x4xf32>
    %71 = vector.extract_strided_slice %70 {offsets = [0, 0, 0], sizes = [16, 16, 4], strides = [1, 1, 1]} : vector<16x18x4xf32> to vector<16x16x4xf32>
    %72 = vector.shape_cast %71 : vector<16x16x4xf32> to vector<256x4xf32>
    %c0_59 = arith.constant 0 : index
    %c0_60 = arith.constant 0 : index
    %c0_61 = arith.constant 0 : index
    %73 = vector.load %arg4[%c0_59, %c0_60, %c0_61] : memref<9x4x4xf32, #tpu.memory_space<vmem>>, vector<1x4x4xf32>
    %74 = vector.shape_cast %73 : vector<1x4x4xf32> to vector<4x4xf32>
    %cst_62 = arith.constant dense<0.000000e+00> : vector<256x4xf32>
    %75 = tpu.matmul %72, %74, %cst_62 {dimension_numbers = #tpu.dot_dimension_numbers<[1], [0], [0], [1], [0, 0, 1, 1], [], []>} : vector<256x4xf32>, vector<4x4xf32>, vector<256x4xf32> -> vector<256x4xf32>
    %76 = vector.extract_strided_slice %70 {offsets = [0, 1, 0], sizes = [16, 16, 4], strides = [1, 1, 1]} : vector<16x18x4xf32> to vector<16x16x4xf32>
    %77 = vector.shape_cast %76 : vector<16x16x4xf32> to vector<256x4xf32>
    %c1_63 = arith.constant 1 : index
    %c0_64 = arith.constant 0 : index
    %c0_65 = arith.constant 0 : index
    %78 = vector.load %arg4[%c1_63, %c0_64, %c0_65] : memref<9x4x4xf32, #tpu.memory_space<vmem>>, vector<1x4x4xf32>
    %79 = vector.shape_cast %78 : vector<1x4x4xf32> to vector<4x4xf32>
    %cst_66 = arith.constant dense<0.000000e+00> : vector<256x4xf32>
    %80 = tpu.matmul %77, %79, %cst_66 {dimension_numbers = #tpu.dot_dimension_numbers<[1], [0], [0], [1], [0, 0, 1, 1], [], []>} : vector<256x4xf32>, vector<4x4xf32>, vector<256x4xf32> -> vector<256x4xf32>
    %81 = arith.addf %75, %80 : vector<256x4xf32>
    %82 = vector.extract_strided_slice %70 {offsets = [0, 2, 0], sizes = [16, 16, 4], strides = [1, 1, 1]} : vector<16x18x4xf32> to vector<16x16x4xf32>
    %83 = vector.shape_cast %82 : vector<16x16x4xf32> to vector<256x4xf32>
    %c2_67 = arith.constant 2 : index
    %c0_68 = arith.constant 0 : index
    %c0_69 = arith.constant 0 : index
    %84 = vector.load %arg4[%c2_67, %c0_68, %c0_69] : memref<9x4x4xf32, #tpu.memory_space<vmem>>, vector<1x4x4xf32>
    %85 = vector.shape_cast %84 : vector<1x4x4xf32> to vector<4x4xf32>
    %cst_70 = arith.constant dense<0.000000e+00> : vector<256x4xf32>
    %86 = tpu.matmul %83, %85, %cst_70 {dimension_numbers = #tpu.dot_dimension_numbers<[1], [0], [0], [1], [0, 0, 1, 1], [], []>} : vector<256x4xf32>, vector<4x4xf32>, vector<256x4xf32> -> vector<256x4xf32>
    %87 = arith.addf %81, %86 : vector<256x4xf32>
    %c1_71 = arith.constant 1 : index
    %c0_72 = arith.constant 0 : index
    %c0_73 = arith.constant 0 : index
    %88 = vector.load %arg8[%c1_71, %c0_72, %c0_73] : memref<18x18x4xf32, #tpu.memory_space<vmem>>, vector<16x18x4xf32>
    %89 = vector.extract_strided_slice %88 {offsets = [0, 0, 0], sizes = [16, 16, 4], strides = [1, 1, 1]} : vector<16x18x4xf32> to vector<16x16x4xf32>
    %90 = vector.shape_cast %89 : vector<16x16x4xf32> to vector<256x4xf32>
    %c3_74 = arith.constant 3 : index
    %c0_75 = arith.constant 0 : index
    %c0_76 = arith.constant 0 : index
    %91 = vector.load %arg4[%c3_74, %c0_75, %c0_76] : memref<9x4x4xf32, #tpu.memory_space<vmem>>, vector<1x4x4xf32>
    %92 = vector.shape_cast %91 : vector<1x4x4xf32> to vector<4x4xf32>
    %cst_77 = arith.constant dense<0.000000e+00> : vector<256x4xf32>
    %93 = tpu.matmul %90, %92, %cst_77 {dimension_numbers = #tpu.dot_dimension_numbers<[1], [0], [0], [1], [0, 0, 1, 1], [], []>} : vector<256x4xf32>, vector<4x4xf32>, vector<256x4xf32> -> vector<256x4xf32>
    %94 = arith.addf %87, %93 : vector<256x4xf32>
    %95 = vector.extract_strided_slice %88 {offsets = [0, 1, 0], sizes = [16, 16, 4], strides = [1, 1, 1]} : vector<16x18x4xf32> to vector<16x16x4xf32>
    %96 = vector.shape_cast %95 : vector<16x16x4xf32> to vector<256x4xf32>
    %c4_78 = arith.constant 4 : index
    %c0_79 = arith.constant 0 : index
    %c0_80 = arith.constant 0 : index
    %97 = vector.load %arg4[%c4_78, %c0_79, %c0_80] : memref<9x4x4xf32, #tpu.memory_space<vmem>>, vector<1x4x4xf32>
    %98 = vector.shape_cast %97 : vector<1x4x4xf32> to vector<4x4xf32>
    %cst_81 = arith.constant dense<0.000000e+00> : vector<256x4xf32>
    %99 = tpu.matmul %96, %98, %cst_81 {dimension_numbers = #tpu.dot_dimension_numbers<[1], [0], [0], [1], [0, 0, 1, 1], [], []>} : vector<256x4xf32>, vector<4x4xf32>, vector<256x4xf32> -> vector<256x4xf32>
    %100 = arith.addf %94, %99 : vector<256x4xf32>
    %101 = vector.extract_strided_slice %88 {offsets = [0, 2, 0], sizes = [16, 16, 4], strides = [1, 1, 1]} : vector<16x18x4xf32> to vector<16x16x4xf32>
    %102 = vector.shape_cast %101 : vector<16x16x4xf32> to vector<256x4xf32>
    %c5_82 = arith.constant 5 : index
    %c0_83 = arith.constant 0 : index
    %c0_84 = arith.constant 0 : index
    %103 = vector.load %arg4[%c5_82, %c0_83, %c0_84] : memref<9x4x4xf32, #tpu.memory_space<vmem>>, vector<1x4x4xf32>
    %104 = vector.shape_cast %103 : vector<1x4x4xf32> to vector<4x4xf32>
    %cst_85 = arith.constant dense<0.000000e+00> : vector<256x4xf32>
    %105 = tpu.matmul %102, %104, %cst_85 {dimension_numbers = #tpu.dot_dimension_numbers<[1], [0], [0], [1], [0, 0, 1, 1], [], []>} : vector<256x4xf32>, vector<4x4xf32>, vector<256x4xf32> -> vector<256x4xf32>
    %106 = arith.addf %100, %105 : vector<256x4xf32>
    %c2_86 = arith.constant 2 : index
    %c0_87 = arith.constant 0 : index
    %c0_88 = arith.constant 0 : index
    %107 = vector.load %arg8[%c2_86, %c0_87, %c0_88] : memref<18x18x4xf32, #tpu.memory_space<vmem>>, vector<16x18x4xf32>
    %108 = vector.extract_strided_slice %107 {offsets = [0, 0, 0], sizes = [16, 16, 4], strides = [1, 1, 1]} : vector<16x18x4xf32> to vector<16x16x4xf32>
    %109 = vector.shape_cast %108 : vector<16x16x4xf32> to vector<256x4xf32>
    %c6_89 = arith.constant 6 : index
    %c0_90 = arith.constant 0 : index
    %c0_91 = arith.constant 0 : index
    %110 = vector.load %arg4[%c6_89, %c0_90, %c0_91] : memref<9x4x4xf32, #tpu.memory_space<vmem>>, vector<1x4x4xf32>
    %111 = vector.shape_cast %110 : vector<1x4x4xf32> to vector<4x4xf32>
    %cst_92 = arith.constant dense<0.000000e+00> : vector<256x4xf32>
    %112 = tpu.matmul %109, %111, %cst_92 {dimension_numbers = #tpu.dot_dimension_numbers<[1], [0], [0], [1], [0, 0, 1, 1], [], []>} : vector<256x4xf32>, vector<4x4xf32>, vector<256x4xf32> -> vector<256x4xf32>
    %113 = arith.addf %106, %112 : vector<256x4xf32>
    %114 = vector.extract_strided_slice %107 {offsets = [0, 1, 0], sizes = [16, 16, 4], strides = [1, 1, 1]} : vector<16x18x4xf32> to vector<16x16x4xf32>
    %115 = vector.shape_cast %114 : vector<16x16x4xf32> to vector<256x4xf32>
    %c7_93 = arith.constant 7 : index
    %c0_94 = arith.constant 0 : index
    %c0_95 = arith.constant 0 : index
    %116 = vector.load %arg4[%c7_93, %c0_94, %c0_95] : memref<9x4x4xf32, #tpu.memory_space<vmem>>, vector<1x4x4xf32>
    %117 = vector.shape_cast %116 : vector<1x4x4xf32> to vector<4x4xf32>
    %cst_96 = arith.constant dense<0.000000e+00> : vector<256x4xf32>
    %118 = tpu.matmul %115, %117, %cst_96 {dimension_numbers = #tpu.dot_dimension_numbers<[1], [0], [0], [1], [0, 0, 1, 1], [], []>} : vector<256x4xf32>, vector<4x4xf32>, vector<256x4xf32> -> vector<256x4xf32>
    %119 = arith.addf %113, %118 : vector<256x4xf32>
    %120 = vector.extract_strided_slice %107 {offsets = [0, 2, 0], sizes = [16, 16, 4], strides = [1, 1, 1]} : vector<16x18x4xf32> to vector<16x16x4xf32>
    %121 = vector.shape_cast %120 : vector<16x16x4xf32> to vector<256x4xf32>
    %c8_97 = arith.constant 8 : index
    %c0_98 = arith.constant 0 : index
    %c0_99 = arith.constant 0 : index
    %122 = vector.load %arg4[%c8_97, %c0_98, %c0_99] : memref<9x4x4xf32, #tpu.memory_space<vmem>>, vector<1x4x4xf32>
    %123 = vector.shape_cast %122 : vector<1x4x4xf32> to vector<4x4xf32>
    %cst_100 = arith.constant dense<0.000000e+00> : vector<256x4xf32>
    %124 = tpu.matmul %121, %123, %cst_100 {dimension_numbers = #tpu.dot_dimension_numbers<[1], [0], [0], [1], [0, 0, 1, 1], [], []>} : vector<256x4xf32>, vector<4x4xf32>, vector<256x4xf32> -> vector<256x4xf32>
    %125 = arith.addf %119, %124 : vector<256x4xf32>
    %c0_101 = arith.constant 0 : index
    %c0_102 = arith.constant 0 : index
    %126 = vector.load %arg5[%c0_101, %c0_102] : memref<1x4xf32, #tpu.memory_space<vmem>>, vector<1x4xf32>
    %127 = vector.broadcast %126 : vector<1x4xf32> to vector<256x4xf32>
    %128 = arith.addf %125, %127 : vector<256x4xf32>
    %c0_103 = arith.constant 0 : index
    %c0_104 = arith.constant 0 : index
    %c0_105 = arith.constant 0 : index
    %c0_106 = arith.constant 0 : index
    %129 = vector.load %arg1[%c0_103, %c0_104, %c0_105, %c0_106] : memref<1x16x16x4xf32, #tpu.memory_space<vmem>>, vector<1x16x16x4xf32>
    %130 = vector.shape_cast %129 : vector<1x16x16x4xf32> to vector<16x16x4xf32>
    %131 = vector.shape_cast %130 : vector<16x16x4xf32> to vector<256x4xf32>
    %132 = arith.addf %128, %131 : vector<256x4xf32>
    %cst_107 = arith.constant 0.000000e+00 : f32
    %133 = vector.broadcast %cst_107 : f32 to vector<256x4xf32>
    %134 = arith.maximumf %132, %133 : vector<256x4xf32>
    %135 = vector.shape_cast %134 : vector<256x4xf32> to vector<16x16x4xf32>
    %c0_108 = arith.constant 0 : index
    %c0_109 = arith.constant 0 : index
    %c0_110 = arith.constant 0 : index
    %c0_111 = arith.constant 0 : index
    %136 = vector.load %arg6[%c0_108, %c0_109, %c0_110, %c0_111] : memref<1x16x16x4xf32, #tpu.memory_space<vmem>>, vector<1x16x16x4xf32>
    %137 = vector.shape_cast %136 : vector<1x16x16x4xf32> to vector<16x16x4xf32>
    %138 = vector.shape_cast %135 : vector<16x16x4xf32> to vector<1x16x16x4xf32>
    tpu.vector_store %arg6[%c0_108, %c0_109, %c0_110, %c0_111], %138 {strides = array<i32>} : memref<1x16x16x4xf32, #tpu.memory_space<vmem>>, vector<1x16x16x4xf32>,
    return
  }
  func.func @transform_0(%arg0: i32) -> (i32, i32, i32, i32) {
    %c0_i32 = arith.constant 0 : i32
    %c0_i32_0 = arith.constant 0 : i32
    %c0_i32_1 = arith.constant 0 : i32
    %c0_i32_2 = arith.constant 0 : i32
    return %arg0, %c0_i32, %c0_i32_0, %c0_i32_1 : i32, i32, i32, i32
  }
  func.func @transform_1(%arg0: i32) -> (i32, i32, i32) {
    %c0_i32 = arith.constant 0 : i32
    %c0_i32_0 = arith.constant 0 : i32
    %c0_i32_1 = arith.constant 0 : i32
    %c0_i32_2 = arith.constant 0 : i32
    return %c0_i32, %c0_i32_0, %c0_i32_1 : i32, i32, i32
  }
  func.func @transform_2(%arg0: i32) -> (i32, i32) {
    %c0_i32 = arith.constant 0 : i32
    %c0_i32_0 = arith.constant 0 : i32
    %c0_i32_1 = arith.constant 0 : i32
    return %c0_i32, %c0_i32_0 : i32, i32
  }
  func.func @transform_3(%arg0: i32) -> (i32, i32, i32) {
    %c0_i32 = arith.constant 0 : i32
    %c0_i32_0 = arith.constant 0 : i32
    %c0_i32_1 = arith.constant 0 : i32
    %c0_i32_2 = arith.constant 0 : i32
    return %c0_i32, %c0_i32_0, %c0_i32_1 : i32, i32, i32
  }
  func.func @transform_4(%arg0: i32) -> (i32, i32) {
    %c0_i32 = arith.constant 0 : i32
    %c0_i32_0 = arith.constant 0 : i32
    %c0_i32_1 = arith.constant 0 : i32
    return %c0_i32, %c0_i32_0 : i32, i32
  }
  func.func @transform_5(%arg0: i32) -> (i32, i32, i32, i32) {
    %c0_i32 = arith.constant 0 : i32
    %c0_i32_0 = arith.constant 0 : i32
    %c0_i32_1 = arith.constant 0 : i32
    %c0_i32_2 = arith.constant 0 : i32
    return %arg0, %c0_i32, %c0_i32_0, %c0_i32_1 : i32, i32, i32, i32
  }
}

</mosaic_0001>

<bundles_post_ra>
// kernel: resblock_forward.1
= control target key start
LH: loop header
LB: loop body
LE: loop exit
PB: predicated region body
PF: predicated region fallthrough
CT: control target
= control target key end

     0   :  { %s10178_s18 = smov 0   ;;  %s14533_s0 = inlined_call_operand.vmem [shape: f32[2,16,16,4], index: 0, kind: input, shape index: {}]   ;;  %s14534_s1 = inlined_call_operand.vmem [shape: f32[9,4,4], index: 1, kind: input, shape index: {}]   ;;  %s14535_s2 = inlined_call_operand.vmem [shape: f32[1,4], index: 2, kind: input, shape index: {}]   ;;  %s14536_s3 = inlined_call_operand.vmem [shape: f32[9,4,4], index: 3, kind: input, shape index: {}]   ;;  %s14537_s4 = inlined_call_operand.vmem [shape: f32[1,4], index: 4, kind: input, shape index: {}]   ;;  %s14538_s5 = inlined_call_operand.vmem [shape: f32[2,16,16,4], index: 5, kind: output, shape index: {}]  }
   0x1 LB: > { %s8005_s19 = sadd.s32 4294967295, %s10145_s18   ;;  %p8009_p0 = scmp.ge.s32.totalorder %s10145_s18, 1  ;;  %s10145_s18 = sphi %s10178_s18, %s15_s18  }
   0x2   : > { %p187_p1 = scmp.lt.s32.totalorder %s10145_s18, 3 }
   0x4   : > { %p188_p2 = pnand %p8009_p0, %p187_p1 }
   0x6   : > { %191 = sbr.rel (%p188_p2) target bundleno = 1061 (0x425), region = 40 }
   0xb   : > { %v8014_v0 = vld [vmem:[%s14534_s1 + $0x4] sm:$0xf]  ;;  %vm590_vm0 = vcmask 1043456   ;;  %v10192_v1 = vld [vmem:[%s14534_s1] sm:$0xf]  ;;  %vm225_vm1 = vcmask 31744  }
   0xc   : > { %9224 = vmatprep.subr.msk.mxu0 %vm590_vm0, %v8014_v0  ;;  %9274 = vmatprep.subr.msk.mxu1 %vm590_vm0, %v10192_v1  ;;  %vm228_vm2 = vcmask 25600   ;;  %v10200_v2 = vld [vmem:[%s14534_s1 + $0x8] sm:$0xf]  ;;  %p10204_p3 = scmp.lt.s32.totalorder %s8005_s19, 1  ;;  %v10147_v3 = vmov 0.0   ;;  %vm443_vm3 = vcmask 1046528  }
   0xd   : > { %9225 = vmatpush3.msk.msra.mxu0 %vm590_vm0, %v8014_v0  ;;  %226 = vst.msk [vmem:[#allocation2] sm:$0xff] %vm225_vm1, %v10147_v3  ;;  %227 = vst.msk [vmem:[#allocation2 + $0x8] sm:$0xff] %vm225_vm1, %v10147_v3  ;;  %9275 = vmatpush3.msk.msra.mxu1 %vm590_vm0, %v10192_v1  ;;  %v8115_v4 = vld [vmem:[%s14534_s1 + $0xc] sm:$0xf]  ;;  %vm1111_vm4 = vcmask 1045504  }
   0xe   : > { %230 = vst.msk [vmem:[#allocation2 + $0x18] sm:$0xff] %vm225_vm1, %v10147_v3  ;;  %231 = vst.msk [vmem:[#allocation2 + $0x20] sm:$0xff] %vm225_vm1, %v10147_v3  ;;  %9324 = vmatprep.subr.msk.mxu0 %vm590_vm0, %v10200_v2  ;;  %s15190_s19 = smov (!%p10204_p3, %s8005_s19), 1  ;;  %9374 = vmatprep.subr.msk.mxu1 %vm590_vm0, %v8115_v4  ;;  %v10471_v25 = vld [vmem:[%s14534_s1 + $0x10] sm:$0xf] }
   0xf   : > { %233 = vst.msk [vmem:[#allocation2 + $0x30] sm:$0xff] %vm225_vm1, %v10147_v3  ;;  %234 = vst.msk [vmem:[#allocation2 + $0x38] sm:$0xff] %vm225_vm1, %v10147_v3  ;;  %s8628_s29 = sshll.u32 %s15190_s19, 8 }
  0x10   : > { %236 = vst.msk [vmem:[#allocation2 + $0x48] sm:$0xff] %vm225_vm1, %v10147_v3  ;;  %237 = vst.msk [vmem:[#allocation2 + $0x50] sm:$0xff] %vm225_vm1, %v10147_v3  ;;  %s10445_s7 = scalar_lea.vmem %s14533_s0, %s8628_s29  ;;  %s14293_s25 = scalar_lea.vmem %s14538_s5, %s8628_s29 }
  0x11   : > { %239 = vst.msk [vmem:[#allocation2 + $0x60] sm:$0xff] %vm225_vm1, %v10147_v3  ;;  %240 = vst.msk [vmem:[#allocation2 + $0x68] sm:$0xff] %vm225_vm1, %v10147_v3  ;;  %v281_v5 = vld [vmem:[%s10445_s7] sm:$0xff]  ;;  %v282_v6 = vld [vmem:[%s10445_s7 + $0x8] sm:$0xff] }
  0x12   : > { %242 = vst.msk [vmem:[#allocation2 + $0x78] sm:$0xff] %vm225_vm1, %v10147_v3  ;;  %243 = vst.msk [vmem:[#allocation2 + $0x80] sm:$0xff] %vm225_vm1, %v10147_v3  ;;  %v283_v7 = vld [vmem:[%s10445_s7 + $0x10] sm:$0xff]  ;;  %v284_v8 = vld [vmem:[%s10445_s7 + $0x18] sm:$0xff] }
  0x13   : > { %245 = vst.msk [vmem:[#allocation2 + $0x90] sm:$0xff] %vm225_vm1, %v10147_v3  ;;  %246 = vst.msk [vmem:[#allocation2 + $0x98] sm:$0xff] %vm225_vm1, %v10147_v3  ;;  %v285_v9 = vld [vmem:[%s10445_s7 + $0x20] sm:$0xff]  ;;  %v286_v10 = vld [vmem:[%s10445_s7 + $0x28] sm:$0xff] }
  0x14   : > { %248 = vst.msk [vmem:[#allocation2 + $0xa8] sm:$0xff] %vm225_vm1, %v10147_v3  ;;  %249 = vst.msk [vmem:[#allocation2 + $0xb0] sm:$0xff] %vm225_vm1, %v10147_v3  ;;  %v346_v11 = vld [vmem:[#allocation2] sm:$0xff]  ;;  %v347_v12 = vld [vmem:[#allocation2 + $0x8] sm:$0xff] }
  0x15   : > { %251 = vst.msk [vmem:[#allocation2 + $0xc0] sm:$0xff] %vm225_vm1, %v10147_v3  ;;  %252 = vst.msk [vmem:[#allocation2 + $0xc8] sm:$0xff] %vm225_vm1, %v10147_v3  ;;  %v444_v14 = vrot.slane %v346_v11, 1  ;;  %v445_v15 = vrot.slane %v347_v12, 1  ;;  %9276 = vmatprep.mubr.msk.f32.mxu1 %vm225_vm1, %v346_v11  ;;  %v287_v18 = vld [vmem:[%s10445_s7 + $0x30] sm:$0xff]  ;;  %v288_v19 = vld [vmem:[%s10445_s7 + $0x38] sm:$0xff] }
  0x16   : > { %254 = vst.msk [vmem:[#allocation2 + $0xd8] sm:$0xff] %vm225_vm1, %v10147_v3  ;;  %255 = vst.msk [vmem:[#allocation2 + $0xe0] sm:$0xff] %vm225_vm1, %v10147_v3  ;;  %9277 = vmatmul.mubr.msk.f32.vlgmr.msra.gmra.mxu1 %vm225_vm1, %v347_v12  ;;  %v289_v20 = vld [vmem:[%s10445_s7 + $0x40] sm:$0xff]  ;;  %v290_v21 = vld [vmem:[%s10445_s7 + $0x48] sm:$0xff]  ;;  %v1112_v23 = vrot.slane %v346_v11, 2  ;;  %v1113_v24 = vrot.slane %v347_v12, 2 }
  0x17   : > { %257 = vst.msk [vmem:[#allocation2 + $0xf0] sm:$0xff] %vm225_vm1, %v10147_v3  ;;  %258 = vst.msk [vmem:[#allocation2 + $0xf8] sm:$0xff] %vm225_vm1, %v10147_v3  ;;  %v291_v22 = vld [vmem:[%s10445_s7 + $0x50] sm:$0xff]  ;;  %v446_v26 = vsel %vm443_vm3, %v444_v14, %v445_v15  ;;  %v292_v28 = vld [vmem:[%s10445_s7 + $0x58] sm:$0xff]  ;;  %9375 = vmatpush3.msk.msra.mxu1 %vm590_vm0, %v8115_v4 }
  0x18   : > { %260 = vst.msk [vmem:[#allocation2 + $0x108] sm:$0xff] %vm225_vm1, %v10147_v3  ;;  %261 = vst.msk [vmem:[#allocation2 + $0x110] sm:$0xff] %vm225_vm1, %v10147_v3  ;;  %v293_v29 = vld [vmem:[%s10445_s7 + $0x60] sm:$0xff]  ;;  %v294_v30 = vld [vmem:[%s10445_s7 + $0x68] sm:$0xff]  ;;  %9226 = vmatprep.mubr.msk.f32.mxu0 %vm225_vm1, %v446_v26  ;;  %v10490_v34 = vsel %vm1111_vm4, %v1112_v23, %v1113_v24 }
  0x19   : > { %263 = vst.msk [vmem:[#allocation2 + $0x120] sm:$0xff] %vm225_vm1, %v10147_v3  ;;  %264 = vst.msk [vmem:[#allocation2 + $0x128] sm:$0xff] %vm225_vm1, %v10147_v3  ;;  %v295_v31 = vld [vmem:[%s10445_s7 + $0x70] sm:$0xff]  ;;  %v296_v32 = vld [vmem:[%s10445_s7 + $0x78] sm:$0xff] }
  0x1a   : > { %266 = vst.msk [vmem:[#allocation2 + $0x138] sm:$0xff] %vm225_vm1, %v10147_v3  ;;  %267 = vst.msk [vmem:[#allocation2 + $0x140] sm:$0xff] %vm225_vm1, %v10147_v3  ;;  %v297_v33 = vld [vmem:[%s10445_s7 + $0x80] sm:$0xff]  ;;  %v298_v36 = vld [vmem:[%s10445_s7 + $0x88] sm:$0xff] }
  0x1b   : > { %269 = vst.msk [vmem:[#allocation2 + $0x150] sm:$0xff] %vm225_vm1, %v10147_v3  ;;  %270 = vst.msk [vmem:[#allocation2 + $0x158] sm:$0xff] %vm225_vm1, %v10147_v3  ;;  %v299_v37 = vld [vmem:[%s10445_s7 + $0x90] sm:$0xff]  ;;  %v300_v38 = vld [vmem:[%s10445_s7 + $0x98] sm:$0xff] }
  0x1c   : > { %272 = vst.msk [vmem:[#allocation2 + $0x168] sm:$0xff] %vm225_vm1, %v10147_v3  ;;  %273 = vst.msk [vmem:[#allocation2 + $0x170] sm:$0xff] %vm225_vm1, %v10147_v3  ;;  %v304_v23 = vld [vmem:[%s10445_s7 + $0xb8] sm:$0xff] }
  0x1d   : > { %275 = vst.msk [vmem:[#allocation2 + $0x180] sm:$0xff] %vm225_vm1, %v10147_v3  ;;  %276 = vst.msk [vmem:[#allocation2 + $0x188] sm:$0xff] %vm225_vm1, %v10147_v3 }
  0x1e   : > { %278 = vst.msk [vmem:[#allocation2 + $0x198] sm:$0xff] %vm225_vm1, %v10147_v3  ;;  %279 = vst.msk [vmem:[#allocation2 + $0x1a0] sm:$0xff] %vm225_vm1, %v10147_v3 }
  0x1f   : > { %4058 = vst.msk [vmem:[#allocation3] sm:$0xff] %vm225_vm1, %v10147_v3  ;;  %4059 = vst.msk [vmem:[#allocation3 + $0x8] sm:$0xff] %vm225_vm1, %v10147_v3 }
  0x20   : > { %4061 = vst.msk [vmem:[#allocation3 + $0x18] sm:$0xff] %vm225_vm1, %v10147_v3  ;;  %4062 = vst.msk [vmem:[#allocation3 + $0x20] sm:$0xff] %vm225_vm1, %v10147_v3 }
  0x21   : > { %4064 = vst.msk [vmem:[#allocation3 + $0x30] sm:$0xff] %vm225_vm1, %v10147_v3  ;;  %4065 = vst.msk [vmem:[#allocation3 + $0x38] sm:$0xff] %vm225_vm1, %v10147_v3 }
  0x22   : > { %4067 = vst.msk [vmem:[#allocation3 + $0x48] sm:$0xff] %vm225_vm1, %v10147_v3  ;;  %4068 = vst.msk [vmem:[#allocation3 + $0x50] sm:$0xff] %vm225_vm1, %v10147_v3 }
  0x23   : > { %4070 = vst.msk [vmem:[#allocation3 + $0x60] sm:$0xff] %vm225_vm1, %v10147_v3  ;;  %4071 = vst.msk [vmem:[#allocation3 + $0x68] sm:$0xff] %vm225_vm1, %v10147_v3 }
  0x24   : > { %4073 = vst.msk [vmem:[#allocation3 + $0x78] sm:$0xff] %vm225_vm1, %v10147_v3  ;;  %4074 = vst.msk [vmem:[#allocation3 + $0x80] sm:$0xff] %vm225_vm1, %v10147_v3 }
  0x25   : > { %4076 = vst.msk [vmem:[#allocation3 + $0x90] sm:$0xff] %vm225_vm1, %v10147_v3  ;;  %4077 = vst.msk [vmem:[#allocation3 + $0x98] sm:$0xff] %vm225_vm1, %v10147_v3 }
  0x26   : > { %4079 = vst.msk [vmem:[#allocation3 + $0xa8] sm:$0xff] %vm225_vm1, %v10147_v3  ;;  %4080 = vst.msk [vmem:[#allocation3 + $0xb0] sm:$0xff] %vm225_vm1, %v10147_v3 }
  0x27   : > { %4082 = vst.msk [vmem:[#allocation3 + $0xc0] sm:$0xff] %vm225_vm1, %v10147_v3  ;;  %4083 = vst.msk [vmem:[#allocation3 + $0xc8] sm:$0xff] %vm225_vm1, %v10147_v3 }
  0x28   : > { %4085 = vst.msk [vmem:[#allocation3 + $0xd8] sm:$0xff] %vm225_vm1, %v10147_v3  ;;  %4086 = vst.msk [vmem:[#allocation3 + $0xe0] sm:$0xff] %vm225_vm1, %v10147_v3 }
  0x29   : > { %4088 = vst.msk [vmem:[#allocation3 + $0xf0] sm:$0xff] %vm225_vm1, %v10147_v3  ;;  %4089 = vst.msk [vmem:[#allocation3 + $0xf8] sm:$0xff] %vm225_vm1, %v10147_v3 }
  0x2a   : > { %4091 = vst.msk [vmem:[#allocation3 + $0x108] sm:$0xff] %vm225_vm1, %v10147_v3  ;;  %4092 = vst.msk [vmem:[#allocation3 + $0x110] sm:$0xff] %vm225_vm1, %v10147_v3 }
  0x2b   : > { %4094 = vst.msk [vmem:[#allocation3 + $0x120] sm:$0xff] %vm225_vm1, %v10147_v3  ;;  %4095 = vst.msk [vmem:[#allocation3 + $0x128] sm:$0xff] %vm225_vm1, %v10147_v3 }
  0x2c   : > { %4097 = vst.msk [vmem:[#allocation3 + $0x138] sm:$0xff] %vm225_vm1, %v10147_v3  ;;  %4098 = vst.msk [vmem:[#allocation3 + $0x140] sm:$0xff] %vm225_vm1, %v10147_v3 }
  0x2d   : > { %4100 = vst.msk [vmem:[#allocation3 + $0x150] sm:$0xff] %vm225_vm1, %v10147_v3  ;;  %4101 = vst.msk [vmem:[#allocation3 + $0x158] sm:$0xff] %vm225_vm1, %v10147_v3 }
  0x2e   : > { %4103 = vst.msk [vmem:[#allocation3 + $0x168] sm:$0xff] %vm225_vm1, %v10147_v3  ;;  %4104 = vst.msk [vmem:[#allocation3 + $0x170] sm:$0xff] %vm225_vm1, %v10147_v3 }
  0x2f   : > { %4106 = vst.msk [vmem:[#allocation3 + $0x180] sm:$0xff] %vm225_vm1, %v10147_v3  ;;  %4107 = vst.msk [vmem:[#allocation3 + $0x188] sm:$0xff] %vm225_vm1, %v10147_v3 }
  0x30   : > { %4109 = vst.msk [vmem:[#allocation3 + $0x198] sm:$0xff] %vm225_vm1, %v10147_v3  ;;  %4110 = vst.msk [vmem:[#allocation3 + $0x1a0] sm:$0xff] %vm225_vm1, %v10147_v3 }
  0x31   : > { %229 = vst.msk [vmem:[#allocation2 + $0x10] sm:$0x3] %vm228_vm2, %v10147_v3  ;;  %232 = vst.msk [vmem:[#allocation2 + $0x28] sm:$0x3] %vm228_vm2, %v10147_v3 }
  0x32   : > { %235 = vst.msk [vmem:[#allocation2 + $0x40] sm:$0x3] %vm228_vm2, %v10147_v3  ;;  %238 = vst.msk [vmem:[#allocation2 + $0x58] sm:$0x3] %vm228_vm2, %v10147_v3 }
  0x33   : > { %241 = vst.msk [vmem:[#allocation2 + $0x70] sm:$0x3] %vm228_vm2, %v10147_v3  ;;  %244 = vst.msk [vmem:[#allocation2 + $0x88] sm:$0x3] %vm228_vm2, %v10147_v3 }
  0x34   : > { %247 = vst.msk [vmem:[#allocation2 + $0xa0] sm:$0x3] %vm228_vm2, %v10147_v3  ;;  %250 = vst.msk [vmem:[#allocation2 + $0xb8] sm:$0x3] %vm228_vm2, %v10147_v3 }
  0x35   : > { %253 = vst.msk [vmem:[#allocation2 + $0xd0] sm:$0x3] %vm228_vm2, %v10147_v3  ;;  %256 = vst.msk [vmem:[#allocation2 + $0xe8] sm:$0x3] %vm228_vm2, %v10147_v3 }
  0x36   : > { %259 = vst.msk [vmem:[#allocation2 + $0x100] sm:$0x3] %vm228_vm2, %v10147_v3  ;;  %262 = vst.msk [vmem:[#allocation2 + $0x118] sm:$0x3] %vm228_vm2, %v10147_v3 }
  0x37   : > { %265 = vst.msk [vmem:[#allocation2 + $0x130] sm:$0x3] %vm228_vm2, %v10147_v3  ;;  %268 = vst.msk [vmem:[#allocation2 + $0x148] sm:$0x3] %vm228_vm2, %v10147_v3 }
  0x38   : > { %271 = vst.msk [vmem:[#allocation2 + $0x160] sm:$0x3] %vm228_vm2, %v10147_v3  ;;  %274 = vst.msk [vmem:[#allocation2 + $0x178] sm:$0x3] %vm228_vm2, %v10147_v3  ;;  %v348_v13 = vld [vmem:[#allocation2 + $0x10] sm:$0x3] }
  0x39   : > { %277 = vst.msk [vmem:[#allocation2 + $0x190] sm:$0x3] %vm228_vm2, %v10147_v3  ;;  %280 = vst.msk [vmem:[#allocation2 + $0x1a8] sm:$0x3] %vm228_vm2, %v10147_v3  ;;  %v447_v16 = vrot.slane %v348_v13, 1  ;;  %v1115_v17 = vrot.slane %v348_v13, 2 }
  0x3a   : > { %4060 = vst.msk [vmem:[#allocation3 + $0x10] sm:$0x3] %vm228_vm2, %v10147_v3  ;;  %4063 = vst.msk [vmem:[#allocation3 + $0x28] sm:$0x3] %vm228_vm2, %v10147_v3 }
  0x3b   : > { %4066 = vst.msk [vmem:[#allocation3 + $0x40] sm:$0x3] %vm228_vm2, %v10147_v3  ;;  %4069 = vst.msk [vmem:[#allocation3 + $0x58] sm:$0x3] %vm228_vm2, %v10147_v3  ;;  %v448_v27 = vsel %vm443_vm3, %v445_v15, %v447_v16  ;;  %v10493_v35 = vsel %vm1111_vm4, %v1113_v24, %v1115_v17  ;;  %v301_v15 = vld [vmem:[%s10445_s7 + $0xa0] sm:$0xff] }
  0x3c   : > { %4072 = vst.msk [vmem:[#allocation3 + $0x70] sm:$0x3] %vm228_vm2, %v10147_v3  ;;  %4075 = vst.msk [vmem:[#allocation3 + $0x88] sm:$0x3] %vm228_vm2, %v10147_v3  ;;  %9227 = vmatmul.mubr.msk.f32.vlgmr.msra.gmra.mxu0 %vm225_vm1, %v448_v27  ;;  %v305_v24 = vld [vmem:[%s10445_s7 + $0xc0] sm:$0xff] }
  0x3d   : > { %4078 = vst.msk [vmem:[#allocation3 + $0xa0] sm:$0x3] %vm228_vm2, %v10147_v3  ;;  %4081 = vst.msk [vmem:[#allocation3 + $0xb8] sm:$0x3] %vm228_vm2, %v10147_v3  ;;  %9325 = vmatpush3.msk.msra.mxu0 %vm590_vm0, %v10200_v2 }
  0x3e   : > { %4084 = vst.msk [vmem:[#allocation3 + $0xd0] sm:$0x3] %vm228_vm2, %v10147_v3  ;;  %4087 = vst.msk [vmem:[#allocation3 + $0xe8] sm:$0x3] %vm228_vm2, %v10147_v3  ;;  %9424 = vmatprep.subr.msk.mxu0 %vm590_vm0, %v10471_v25 }
  0x3f   : > { %4090 = vst.msk [vmem:[#allocation3 + $0x100] sm:$0x3] %vm228_vm2, %v10147_v3  ;;  %4093 = vst.msk [vmem:[#allocation3 + $0x118] sm:$0x3] %vm228_vm2, %v10147_v3 }
  0x40   : > { %4096 = vst.msk [vmem:[#allocation3 + $0x130] sm:$0x3] %vm228_vm2, %v10147_v3  ;;  %4099 = vst.msk [vmem:[#allocation3 + $0x148] sm:$0x3] %vm228_vm2, %v10147_v3 }
  0x41   : > { %4102 = vst.msk [vmem:[#allocation3 + $0x160] sm:$0x3] %vm228_vm2, %v10147_v3  ;;  %4105 = vst.msk [vmem:[#allocation3 + $0x178] sm:$0x3] %vm228_vm2, %v10147_v3 }
  0x42   : > { %4108 = vst.msk [vmem:[#allocation3 + $0x190] sm:$0x3] %vm228_vm2, %v10147_v3  ;;  %4111 = vst.msk [vmem:[#allocation3 + $0x1a8] sm:$0x3] %vm228_vm2, %v10147_v3 }
  0x43   : > { %314 = vst.msk [vmem:[#allocation2 + $0x19] sm:$0xff] %vm225_vm1, %v281_v5  ;;  %315 = vst.msk [vmem:[#allocation2 + $0x21] sm:$0xff] %vm225_vm1, %v282_v6 }
  0x44   : > { %316 = vst.msk [vmem:[#allocation2 + $0x31] sm:$0xff] %vm225_vm1, %v283_v7  ;;  %317 = vst.msk [vmem:[#allocation2 + $0x39] sm:$0xff] %vm225_vm1, %v284_v8 }
  0x45   : > { %318 = vst.msk [vmem:[#allocation2 + $0x49] sm:$0xff] %vm225_vm1, %v285_v9  ;;  %319 = vst.msk [vmem:[#allocation2 + $0x51] sm:$0xff] %vm225_vm1, %v286_v10 }
  0x46   : > { %320 = vst.msk [vmem:[#allocation2 + $0x61] sm:$0xff] %vm225_vm1, %v287_v18  ;;  %321 = vst.msk [vmem:[#allocation2 + $0x69] sm:$0xff] %vm225_vm1, %v288_v19 }
  0x47   : > { %322 = vst.msk [vmem:[#allocation2 + $0x79] sm:$0xff] %vm225_vm1, %v289_v20  ;;  %323 = vst.msk [vmem:[#allocation2 + $0x81] sm:$0xff] %vm225_vm1, %v290_v21  ;;  %v302_v21 = vld [vmem:[%s10445_s7 + $0xa8] sm:$0xff] }
  0x48   : > { %324 = vst.msk [vmem:[#allocation2 + $0x91] sm:$0xff] %vm225_vm1, %v291_v22  ;;  %325 = vst.msk [vmem:[#allocation2 + $0x99] sm:$0xff] %vm225_vm1, %v292_v28  ;;  %v303_v22 = vld [vmem:[%s10445_s7 + $0xb0] sm:$0xff] }
  0x49   : > { %326 = vst.msk [vmem:[#allocation2 + $0xa9] sm:$0xff] %vm225_vm1, %v293_v29  ;;  %327 = vst.msk [vmem:[#allocation2 + $0xb1] sm:$0xff] %vm225_vm1, %v294_v30  ;;  %v306_v29 = vld [vmem:[%s10445_s7 + $0xc8] sm:$0xff]  ;;  %v307_v30 = vld [vmem:[%s10445_s7 + $0xd0] sm:$0xff] }
  0x4a   : > { %328 = vst.msk [vmem:[#allocation2 + $0xc1] sm:$0xff] %vm225_vm1, %v295_v31  ;;  %329 = vst.msk [vmem:[#allocation2 + $0xc9] sm:$0xff] %vm225_vm1, %v296_v32  ;;  %v10504_v39 = vld [vmem:[#allocation2 + $0x18] sm:$0xff]  ;;  %v10506_v40 = vld [vmem:[#allocation2 + $0x20] sm:$0xff] }
  0x4b   : > { %330 = vst.msk [vmem:[#allocation2 + $0xd9] sm:$0xff] %vm225_vm1, %v297_v33  ;;  %v10508_v41 = vld [vmem:[#allocation2 + $0x28] sm:$0x3]  ;;  %331 = vst.msk [vmem:[#allocation2 + $0xe1] sm:$0xff] %vm225_vm1, %v298_v36  ;;  %v449_v42 = vrot.slane %v10504_v39, 1  ;;  %v10515_v43 = vrot.slane %v10506_v40, 1  ;;  %9279 = vmatprep.mubr.msk.f32.mxu1 %vm225_vm1, %v10504_v39 }
  0x4c   : > { %332 = vst.msk [vmem:[#allocation2 + $0xf1] sm:$0xff] %vm225_vm1, %v299_v37  ;;  %333 = vst.msk [vmem:[#allocation2 + $0xf9] sm:$0xff] %vm225_vm1, %v300_v38  ;;  %v452_v44 = vrot.slane %v10508_v41, 1  ;;  %v10520_v45 = vld [vmem:[#allocation2 + $0x30] sm:$0xff]  ;;  %v10522_v46 = vld [vmem:[#allocation2 + $0x38] sm:$0xff]  ;;  %9280 = vmatmul.mubr.msk.f32.gmra.mxu1 %vm225_vm1, %v10506_v40 }
  0x4d   : > { %14629 = vst [vmem:[#allocation4_spill] sm:$0xff] %v10515_v43  ;;  %v10524_v47 = vld [vmem:[#allocation2 + $0x48] sm:$0xff]  ;;  %v454_v48 = vrot.slane %v10520_v45, 1  ;;  %v10532_v49 = vrot.slane %v10522_v46, 1  ;;  %v10534_v50 = vld [vmem:[#allocation2 + $0x40] sm:$0x3]  ;;  %v10541_v53 = vsel %vm443_vm3, %v449_v42, %v10515_v43  ;;  %9282 = vmatprep.mubr.msk.f32.mxu1 %vm225_vm1, %v10520_v45 }
  0x4e   : > { %v10536_v51 = vld [vmem:[#allocation2 + $0x50] sm:$0xff]  ;;  %v459_v52 = vrot.slane %v10524_v47, 1  ;;  %14631 = vst [vmem:[#allocation6_spill] sm:$0xff] %v10541_v53  ;;  %v453_v54 = vsel %vm443_vm3, %v10515_v43, %v452_v44  ;;  %v457_v55 = vrot.slane %v10534_v50, 1  ;;  %v10551_v57 = vld [vmem:[#allocation2 + $0x58] sm:$0x3]  ;;  %9229 = vmatprep.mubr.msk.f32.mxu0 %vm225_vm1, %v10541_v53 }
  0x4f   : > { %14630 = vst [vmem:[#allocation5_spill] sm:$0xff] %v10532_v49  ;;  %v10549_v56 = vrot.slane %v10536_v51, 1  ;;  %v10557_v58 = vsel %vm443_vm3, %v454_v48, %v10532_v49  ;;  %v10559_v59 = vld [vmem:[#allocation2 + $0x60] sm:$0xff]  ;;  %v10561_v60 = vld [vmem:[#allocation2 + $0x68] sm:$0xff]  ;;  %9230 = vmatmul.mubr.msk.f32.gmra.mxu0 %vm225_vm1, %v453_v54  ;;  %v462_v62 = vrot.slane %v10551_v57, 1  ;;  %v10573_v0 = vld [vmem:[#allocation2 + $0x78] sm:$0xff] }
  0x50   : > { %14633 = vst [vmem:[#allocation8_spill] sm:$0xff] %v10557_v58  ;;  %9232 = vmatprep.mubr.msk.f32.mxu0 %vm225_vm1, %v10557_v58  ;;  %v458_v61 = vsel %vm443_vm3, %v10532_v49, %v457_v55  ;;  %9283 = vmatmul.mubr.msk.f32.gmra.mxu1 %vm225_vm1, %v10522_v46  ;;  %v10571_v63 = vld [vmem:[#allocation2 + $0x70] sm:$0x3]  ;;  %v10575_v1 = vld [vmem:[#allocation2 + $0x80] sm:$0xff]  ;;  %v464_v3 = vrot.slane %v10559_v59, 1  ;;  %v10585_v4 = vrot.slane %v10561_v60, 1 }
  0x51   : > { %14632 = vst [vmem:[#allocation7_spill] sm:$0xff] %v10549_v56  ;;  %v10579_v2 = vsel %vm443_vm3, %v459_v52, %v10549_v56  ;;  %9285 = vmatprep.mubr.msk.f32.mxu1 %vm225_vm1, %v10524_v47  ;;  %v10587_v5 = vld [vmem:[#allocation2 + $0x88] sm:$0x3]  ;;  %v10589_v6 = vld [vmem:[#allocation2 + $0x90] sm:$0xff]  ;;  %v10591_v7 = vld [vmem:[#allocation2 + $0x98] sm:$0xff]  ;;  %v467_v8 = vrot.slane %v10571_v63, 1  ;;  %v463_v11 = vsel %vm443_vm3, %v10549_v56, %v462_v62 }
  0x52   : > { %14634 = vst [vmem:[#allocation9_spill] sm:$0xff] %v10579_v2  ;;  %14635 = vst [vmem:[#allocation10_spill] sm:$0xff] %v10585_v4  ;;  %v469_v9 = vrot.slane %v10573_v0, 1  ;;  %v10597_v10 = vrot.slane %v10575_v1, 1  ;;  %v472_v12 = vrot.slane %v10587_v5, 1  ;;  %v10608_v14 = vld [vmem:[#allocation2 + $0xa8] sm:$0xff]  ;;  %v10613_v16 = vsel %vm443_vm3, %v464_v3, %v10585_v4 }
  0x53   : > { %9233 = vmatmul.mubr.msk.f32.gmra.mxu0 %vm225_vm1, %v458_v61  ;;  %v10606_v13 = vld [vmem:[#allocation2 + $0xa0] sm:$0x3]  ;;  %14637 = vst [vmem:[#allocation12_spill] sm:$0xff] %v10613_v16  ;;  %v474_v17 = vrot.slane %v10589_v6, 1  ;;  %v10619_v18 = vrot.slane %v10591_v7, 1  ;;  %v10621_v19 = vld [vmem:[#allocation2 + $0xb0] sm:$0xff]  ;;  %v468_v26 = vsel %vm443_vm3, %v10585_v4, %v467_v8 }
  0x54   : > { %14636 = vst [vmem:[#allocation11_spill] sm:$0xff] %v10597_v10  ;;  %9235 = vmatprep.mubr.msk.f32.mxu0 %vm225_vm1, %v10579_v2  ;;  %9286 = vmatmul.mubr.msk.f32.gmra.mxu1 %vm225_vm1, %v10536_v51  ;;  %v10623_v20 = vld [vmem:[#allocation2 + $0xb8] sm:$0x3]  ;;  %334 = vst.msk [vmem:[#allocation2 + $0x109] sm:$0xff] %vm225_vm1, %v301_v15  ;;  %v10636_v27 = vsel %vm443_vm3, %v469_v9, %v10597_v10  ;;  %v473_v32 = vsel %vm443_vm3, %v10597_v10, %v472_v12  ;;  %v10653_v36 = vrot.slane %v10621_v19, 1  ;;  %v309_v37 = vld [vmem:[%s10445_s7 + $0xe0] sm:$0xff] }
  0x55   : > { %9288 = vmatprep.mubr.msk.f32.mxu1 %vm225_vm1, %v10559_v59  ;;  %14638 = vst [vmem:[#allocation13_spill] sm:$0xff] %v10619_v18  ;;  %335 = vst.msk [vmem:[#allocation2 + $0x111] sm:$0xff] %vm225_vm1, %v302_v21  ;;  %v308_v31 = vld [vmem:[%s10445_s7 + $0xd8] sm:$0xff]  ;;  %v310_v38 = vld [vmem:[%s10445_s7 + $0xe8] sm:$0xff]  ;;  %v2351_v42 = vrot.slane %v10520_v45, 2  ;;  %v10666_v48 = vsel %vm443_vm3, %v474_v17, %v10619_v18  ;;  %v10671_v52 = vrot.slane %v10522_v46, 2 }
  0x56   : > { %14639 = vst [vmem:[#allocation14_spill] sm:$0xff] %v10636_v27  ;;  %336 = vst.msk [vmem:[#allocation2 + $0x121] sm:$0xff] %vm225_vm1, %v303_v22  ;;  %v311_v44 = vld [vmem:[%s10445_s7 + $0xf0] sm:$0xff]  ;;  %v1125_v54 = vrot.slane %v10534_v50, 2  ;;  %v2356_v55 = vrot.slane %v10524_v47, 2  ;;  %v312_v62 = vld [vmem:[%s10445_s7 + $0xf8] sm:$0xff] }
  0x57   : > { %9236 = vmatmul.mubr.msk.f32.gmra.mxu0 %vm225_vm1, %v463_v11  ;;  %337 = vst.msk [vmem:[#allocation2 + $0x129] sm:$0xff] %vm225_vm1, %v304_v23  ;;  %338 = vst.msk [vmem:[#allocation2 + $0x139] sm:$0xff] %vm225_vm1, %v305_v24  ;;  %v10679_v61 = vld [vmem:[%s14534_s1 + $0x14] sm:$0xf]  ;;  %v482_v3 = vrot.slane %v10623_v20, 1  ;;  %v10683_v8 = vld [vmem:[#allocation2 + $0xc0] sm:$0xff]  ;;  %v10700_v17 = vsel %vm1111_vm4, %v2351_v42, %v10671_v52 }
  0x58   : > { %9238 = vmatprep.mubr.msk.f32.mxu0 %vm225_vm1, %v10613_v16  ;;  %9289 = vmatmul.mubr.msk.f32.gmra.mxu1 %vm225_vm1, %v10561_v60  ;;  %14640 = vst [vmem:[#allocation15_spill] sm:$0xff] %v10653_v36  ;;  %339 = vst.msk [vmem:[#allocation2 + $0x141] sm:$0xff] %vm225_vm1, %v306_v29  ;;  %v10686_v9 = vrot.slane %v10536_v51, 2  ;;  %v1130_v11 = vrot.slane %v10551_v57, 2  ;;  %v2361_v50 = vrot.slane %v10559_v59, 2  ;;  %v10694_v12 = vld [vmem:[#allocation2 + $0xc8] sm:$0xff]  ;;  %v10704_v57 = vsel %vm1111_vm4, %v10671_v52, %v1125_v54 }
  0x59   : > { %340 = vst.msk [vmem:[#allocation2 + $0x151] sm:$0xff] %vm225_vm1, %v307_v30  ;;  %341 = vst.msk [vmem:[#allocation2 + $0x159] sm:$0xff] %vm225_vm1, %v308_v31  ;;  %9291 = vmatprep.mubr.msk.f32.mxu1 %vm225_vm1, %v10573_v0  ;;  %9474 = vmatprep.subr.msk.mxu1 %vm590_vm0, %v10679_v61  ;;  %v10696_v15 = vld [vmem:[#allocation2 + $0xd0] sm:$0x3]  ;;  %v10707_v21 = vrot.slane %v10561_v60, 2  ;;  %v1135_v22 = vrot.slane %v10571_v63, 2 }
  0x5a   : > { %14641 = vst [vmem:[#allocation16_spill] sm:$0xff] %v10666_v48  ;;  %342 = vst.msk [vmem:[#allocation2 + $0x169] sm:$0xff] %vm225_vm1, %v309_v37  ;;  %v10714_v23 = vld [vmem:[#allocation2 + $0xd8] sm:$0xff]  ;;  %v10716_v24 = vld [vmem:[#allocation2 + $0xe0] sm:$0xff]  ;;  %v10722_v29 = vsel %vm1111_vm4, %v2356_v55, %v10686_v9  ;;  %v10726_v30 = vsel %vm1111_vm4, %v10686_v9, %v1130_v11  ;;  %v2366_v63 = vrot.slane %v10573_v0, 2  ;;  %v10730_v31 = vrot.slane %v10575_v1, 2 }
  0x5b   : > { %343 = vst.msk [vmem:[#allocation2 + $0x171] sm:$0xff] %vm225_vm1, %v310_v38  ;;  %14642 = vst [vmem:[#allocation17_spill] sm:$0xff] %v10671_v52  ;;  %9239 = vmatmul.mubr.msk.f32.gmra.mxu0 %vm225_vm1, %v468_v26  ;;  %v10718_v26 = vld [vmem:[#allocation2 + $0xe8] sm:$0x3]  ;;  %v484_v37 = vrot.slane %v10683_v8, 1  ;;  %v10735_v38 = vld [vmem:[#allocation2 + $0xf0] sm:$0xff]  ;;  %v10743_v54 = vsel %vm1111_vm4, %v2361_v50, %v10707_v21  ;;  %v10747_v55 = vsel %vm1111_vm4, %v10707_v21, %v1135_v22 }
  0x5c   : > { %344 = vst.msk [vmem:[#allocation2 + $0x181] sm:$0xff] %vm225_vm1, %v311_v44  ;;  %14643 = vst [vmem:[#allocation18_spill] sm:$0xff] %v10686_v9  ;;  %9241 = vmatprep.mubr.msk.f32.mxu0 %vm225_vm1, %v10636_v27  ;;  %9292 = vmatmul.mubr.msk.f32.gmra.mxu1 %vm225_vm1, %v10575_v1  ;;  %v10737_v42 = vld [vmem:[#allocation2 + $0xf8] sm:$0xff]  ;;  %v10739_v44 = vld [vmem:[#allocation2 + $0x100] sm:$0x3]  ;;  %v10751_v11 = vrot.slane %v10694_v12, 1  ;;  %v10756_v28 = vsel %vm1111_vm4, %v2366_v63, %v10730_v31 }
  0x5d   : > { %345 = vst.msk [vmem:[#allocation2 + $0x189] sm:$0xff] %vm225_vm1, %v312_v62  ;;  %14644 = vst [vmem:[#allocation19_spill] sm:$0xff] %v10707_v21  ;;  %9294 = vmatprep.mubr.msk.f32.mxu1 %vm225_vm1, %v10589_v6  ;;  %v1140_v62 = vrot.slane %v10587_v5, 2  ;;  %v487_v33 = vrot.slane %v10696_v15, 1  ;;  %v489_v50 = vrot.slane %v10714_v23, 1  ;;  %v10761_v10 = vrot.slane %v10716_v24, 1 }
  0x5e   : > { %14645 = vst [vmem:[#allocation20_spill] sm:$0xff] %v10714_v23  ;;  %14646 = vst [vmem:[#allocation21_spill] sm:$0xff] %v10716_v24  ;;  %v492_v22 = vrot.slane %v10718_v26, 1  ;;  %v14651_v27 = vrot.slane %v10606_v13, 1  ;;  %v10778_v4 = vrot.slane %v10737_v42, 1  ;;  %v497_v16 = vrot.slane %v10739_v44, 1 }
  0x5f   : > { %14647 = vst [vmem:[#allocation22_spill] sm:$0xff] %v10730_v31  ;;  %14648 = vst [vmem:[#allocation23_spill] sm:$0xff] %v10735_v38  ;;  %9242 = vmatmul.mubr.msk.f32.gmra.mxu0 %vm225_vm1, %v473_v32  ;;  %v10766_v5 = vsel %vm1111_vm4, %v10730_v31, %v1140_v62  ;;  %v494_v32 = vrot.slane %v10735_v38, 1  ;;  %v14653_v62 = vrot.slane %v10608_v14, 1  ;;  %v10795_v31 = vld [vmem:[#allocation2 + $0x108] sm:$0xff]  ;;  %v10797_v21 = vld [vmem:[#allocation2 + $0x110] sm:$0xff]  ;;  %v10804_v56 = vsel %vm443_vm3, %v489_v50, %v10761_v10 }
  0x60   : > { %14649 = vst [vmem:[#allocation24_spill] sm:$0xff] %v10751_v11  ;;  %14650 = vst [vmem:[#allocation25_spill] sm:$0xff] %v10761_v10  ;;  %9244 = vmatprep.mubr.msk.f32.mxu0 %vm225_vm1, %v10666_v48  ;;  %v478_v63 = vsel %vm443_vm3, %v10619_v18, %v14651_v27  ;;  %9295 = vmatmul.mubr.msk.f32.gmra.mxu1 %vm225_vm1, %v10591_v7  ;;  %v483_v27 = vsel %vm443_vm3, %v10653_v36, %v482_v3  ;;  %v10824_v50 = vrot.slane %v10591_v7, 2  ;;  %v10886_v49 = vld [vmem:[#allocation2 + $0x128] sm:$0xff]  ;;  %v10901_v52 = vld [vmem:[#allocation2 + $0x138] sm:$0xff] }
  0x61   : > { %14652 = vst [vmem:[#allocation26_spill] sm:$0xff] %v10778_v4  ;;  %v10785_v48 = vsel %vm443_vm3, %v14653_v62, %v10653_v36  ;;  %9297 = vmatprep.mubr.msk.f32.mxu1 %vm225_vm1, %v10608_v14  ;;  %v10793_v18 = vsel %vm443_vm3, %v484_v37, %v10751_v11  ;;  %v488_v62 = vsel %vm443_vm3, %v10751_v11, %v487_v33  ;;  %14656 = vst [vmem:[#allocation29_spill] sm:$0xff] %v10804_v56  ;;  %v10903_v43 = vld [vmem:[#allocation2 + $0x140] sm:$0xff] }
  0x62   : > { %14654 = vst [vmem:[#allocation27_spill] sm:$0xff] %v10785_v48  ;;  %14655 = vst [vmem:[#allocation28_spill] sm:$0xff] %v10793_v18  ;;  %v10808_v3 = vsel %vm443_vm3, %v10761_v10, %v492_v22  ;;  %v2371_v37 = vrot.slane %v10589_v6, 2  ;;  %v10821_v33 = vsel %vm443_vm3, %v10778_v4, %v497_v16  ;;  %v1145_v22 = vrot.slane %v10606_v13, 2 }
  0x63   : > { %9245 = vmatmul.mubr.msk.f32.gmra.mxu0 %vm225_vm1, %v478_v63  ;;  %v10817_v63 = vsel %vm443_vm3, %v494_v32, %v10778_v4  ;;  %14658 = vst [vmem:[#allocation31_spill] sm:$0xff] %v10824_v50  ;;  %v10831_v11 = vrot.slane %v10797_v21, 1  ;;  %v2376_v32 = vrot.slane %v10608_v14, 2  ;;  %v10835_v36 = vrot.slane %v10621_v19, 2 }
  0x64   : > { %9247 = vmatprep.mubr.msk.f32.mxu0 %vm225_vm1, %v10785_v48  ;;  %9298 = vmatmul.mubr.msk.f32.gmra.mxu1 %vm225_vm1, %v10621_v19  ;;  %14657 = vst [vmem:[#allocation30_spill] sm:$0xff] %v10817_v63  ;;  %v10839_v16 = vsel %vm1111_vm4, %v2371_v37, %v10824_v50  ;;  %v10843_v13 = vsel %vm1111_vm4, %v10824_v50, %v1145_v22  ;;  %v1150_v4 = vrot.slane %v10623_v20, 2  ;;  %v2381_v10 = vrot.slane %v10683_v8, 2  ;;  %v381_v50 = vld [vmem:[#allocation2 + $0x118] sm:$0x3] }
  0x65   : > { %9300 = vmatprep.mubr.msk.f32.mxu1 %vm225_vm1, %v10683_v8  ;;  %14659 = vst [vmem:[#allocation32_spill] sm:$0xff] %v10835_v36  ;;  %v10850_v48 = vsel %vm1111_vm4, %v2376_v32, %v10835_v36  ;;  %v10853_v2 = vrot.slane %v10694_v12, 2  ;;  %v1155_v37 = vrot.slane %v10696_v15, 2  ;;  %v2386_v9 = vrot.slane %v10714_v23, 2 }
  0x66   : > { %v10863_v20 = vsel %vm1111_vm4, %v10835_v36, %v1150_v4  ;;  %v1160_v22 = vrot.slane %v10718_v26, 2  ;;  %v2391_v32 = vrot.slane %v10735_v38, 2  ;;  %v10881_v4 = vrot.slane %v10737_v42, 2  ;;  %v10884_v26 = vld [vmem:[#allocation2 + $0x120] sm:$0xff] }
  0x67   : > { %9248 = vmatmul.mubr.msk.f32.gmra.mxu0 %vm225_vm1, %v483_v27  ;;  %14660 = vst [vmem:[#allocation33_spill] sm:$0xff] %v10853_v2  ;;  %14661 = vst [vmem:[#allocation34_spill] sm:$0xff] %v10863_v20  ;;  %v10866_v27 = vrot.slane %v10716_v24, 2  ;;  %v10874_v15 = vsel %vm1111_vm4, %v2381_v10, %v10853_v2  ;;  %v1165_v36 = vrot.slane %v10739_v44, 2  ;;  %v384_v44 = vld [vmem:[#allocation2 + $0x130] sm:$0x3] }
  0x68   : > { %9250 = vmatprep.mubr.msk.f32.mxu0 %vm225_vm1, %v10793_v18  ;;  %9301 = vmatmul.mubr.msk.f32.gmra.mxu1 %vm225_vm1, %v10694_v12  ;;  %14663 = vst [vmem:[#allocation36_spill] sm:$0xff] %v10874_v15  ;;  %v10878_v18 = vsel %vm1111_vm4, %v10853_v2, %v1155_v37  ;;  %14665 = vst [vmem:[#allocation38_spill] sm:$0xff] %v10881_v4  ;;  %v2396_v37 = vrot.slane %v10795_v31, 2  ;;  %v10898_v2 = vrot.slane %v10797_v21, 2  ;;  %v2401_v53 = vrot.slane %v10884_v26, 2  ;;  %v10942_v15 = vld [vmem:[#allocation2 + $0x170] sm:$0xff] }
  0x69   : > { %14662 = vst [vmem:[#allocation35_spill] sm:$0xff] %v10866_v27  ;;  %9303 = vmatprep.mubr.msk.f32.mxu1 %vm225_vm1, %v10714_v23  ;;  %14664 = vst [vmem:[#allocation37_spill] sm:$0xff] %v10878_v18  ;;  %v10890_v58 = vsel %vm1111_vm4, %v2386_v9, %v10866_v27  ;;  %v10894_v10 = vsel %vm1111_vm4, %v10866_v27, %v1160_v22  ;;  %v10907_v9 = vsel %vm1111_vm4, %v2391_v32, %v10881_v4 }
  0x6a   : > { %14666 = vst [vmem:[#allocation39_spill] sm:$0xff] %v10890_v58  ;;  %14667 = vst [vmem:[#allocation40_spill] sm:$0xff] %v10894_v10  ;;  %v10911_v22 = vsel %vm1111_vm4, %v10881_v4, %v1165_v36  ;;  %v1170_v27 = vrot.slane %v381_v50, 2  ;;  %v10918_v10 = vld [vmem:[#allocation2 + $0x150] sm:$0xff]  ;;  %v10922_v32 = vsel %vm1111_vm4, %v2396_v37, %v10898_v2  ;;  %v1175_v36 = vrot.slane %v384_v44, 2 }
  0x6b   : > { %14668 = vst [vmem:[#allocation41_spill] sm:$0xff] %v10898_v2  ;;  %9251 = vmatmul.mubr.msk.f32.gmra.mxu0 %vm225_vm1, %v488_v62  ;;  %14669 = vst [vmem:[#allocation42_spill] sm:$0xff] %v10907_v9  ;;  %v387_v62 = vld [vmem:[#allocation2 + $0x148] sm:$0x3]  ;;  %v10925_v9 = vrot.slane %v10886_v49, 2  ;;  %v2406_v4 = vrot.slane %v10901_v52, 2 }
  0x6c   : > { %14670 = vst [vmem:[#allocation43_spill] sm:$0xff] %v10911_v22  ;;  %9253 = vmatprep.mubr.msk.f32.mxu0 %vm225_vm1, %v10804_v56  ;;  %9304 = vmatmul.mubr.msk.f32.gmra.mxu1 %vm225_vm1, %v10716_v24  ;;  %14671 = vst [vmem:[#allocation44_spill] sm:$0xff] %v10922_v32  ;;  %v10930_v56 = vld [vmem:[#allocation2 + $0x158] sm:$0xff]  ;;  %v390_v22 = vld [vmem:[#allocation2 + $0x160] sm:$0x3]  ;;  %v10934_v58 = vsel %vm1111_vm4, %v10898_v2, %v1170_v27  ;;  %v10937_v18 = vrot.slane %v10903_v43, 2 }
  0x6d   : > { %14672 = vst [vmem:[#allocation45_spill] sm:$0xff] %v10925_v9  ;;  %9306 = vmatprep.mubr.msk.f32.mxu1 %vm225_vm1, %v10735_v38  ;;  %14673 = vst [vmem:[#allocation46_spill] sm:$0xff] %v10934_v58  ;;  %v1180_v37 = vrot.slane %v387_v62, 2  ;;  %v2411_v32 = vrot.slane %v10918_v10, 2  ;;  %v10940_v24 = vld [vmem:[#allocation2 + $0x168] sm:$0xff]  ;;  %v10946_v38 = vsel %vm1111_vm4, %v2401_v53, %v10925_v9  ;;  %v10950_v20 = vsel %vm1111_vm4, %v10925_v9, %v1175_v36 }
  0x6e   : > { %14674 = vst [vmem:[#allocation47_spill] sm:$0xff] %v10937_v18  ;;  %14675 = vst [vmem:[#allocation48_spill] sm:$0xff] %v10946_v38  ;;  %v10953_v27 = vrot.slane %v10930_v56, 2  ;;  %v1185_v2 = vrot.slane %v390_v22, 2  ;;  %v393_v58 = vld [vmem:[#allocation2 + $0x178] sm:$0x3]  ;;  %v10959_v23 = vsel %vm1111_vm4, %v2406_v4, %v10937_v18 }
  0x6f   : > { %9254 = vmatmul.mubr.msk.f32.gmra.mxu0 %vm225_vm1, %v10808_v3  ;;  %v10963_v53 = vsel %vm1111_vm4, %v10937_v18, %v1180_v37  ;;  %v2416_v38 = vrot.slane %v10940_v24, 2  ;;  %v10967_v36 = vrot.slane %v10942_v15, 2  ;;  %v502_v3 = vrot.slane %v381_v50, 1 }
  0x70   : > { %14676 = vst [vmem:[#allocation49_spill] sm:$0xff] %v10953_v27  ;;  %14677 = vst [vmem:[#allocation50_spill] sm:$0xff] %v10963_v53  ;;  %9256 = vmatprep.mubr.msk.f32.mxu0 %vm225_vm1, %v10817_v63  ;;  %9307 = vmatmul.mubr.msk.f32.gmra.mxu1 %vm225_vm1, %v10737_v42  ;;  %v10975_v4 = vsel %vm1111_vm4, %v2411_v32, %v10953_v27  ;;  %v10979_v37 = vsel %vm1111_vm4, %v10953_v27, %v1185_v2  ;;  %v1190_v18 = vrot.slane %v393_v58, 2 }
  0x71   : > { %14678 = vst [vmem:[#allocation51_spill] sm:$0xff] %v10967_v36  ;;  %v14679_v9 = vrot.slane %v10795_v31, 1  ;;  %9309 = vmatprep.mubr.msk.f32.mxu1 %vm225_vm1, %v10795_v31  ;;  %v504_v50 = vrot.slane %v10884_v26, 1  ;;  %v10991_v63 = vrot.slane %v10886_v49, 1  ;;  %v10995_v32 = vsel %vm1111_vm4, %v2416_v38, %v10967_v36 }
  0x72   : > { %v10999_v2 = vsel %vm1111_vm4, %v10967_v36, %v1190_v18  ;;  %v507_v27 = vrot.slane %v384_v44, 1  ;;  %v509_v18 = vrot.slane %v10901_v52, 1  ;;  %v514_v36 = vrot.slane %v10918_v10, 1 }
  0x73   : > { %v10985_v53 = vsel %vm443_vm3, %v14679_v9, %v10831_v11  ;;  %14680 = vst [vmem:[#allocation52_spill] sm:$0xff] %v10991_v63  ;;  %9257 = vmatmul.mubr.msk.f32.gmra.mxu0 %vm225_vm1, %v10821_v33  ;;  %v503_v9 = vsel %vm443_vm3, %v10831_v11, %v502_v3  ;;  %v11011_v38 = vsel %vm443_vm3, %v504_v50, %v10991_v63  ;;  %v11017_v33 = vrot.slane %v10903_v43, 1 }
  0x74   : > { %9259 = vmatprep.mubr.msk.f32.mxu0 %vm225_vm1, %v10985_v53  ;;  %9310 = vmatmul.mubr.msk.f32.gmra.mxu1 %vm225_vm1, %v10797_v21  ;;  %v508_v44 = vsel %vm443_vm3, %v10991_v63, %v507_v27  ;;  %v512_v3 = vrot.slane %v387_v62, 1  ;;  %v517_v27 = vrot.slane %v390_v22, 1  ;;  %v519_v63 = vrot.slane %v10940_v24, 1 }
  0x75   : > { %9312 = vmatprep.mubr.msk.f32.mxu1 %vm225_vm1, %v10884_v26  ;;  %v11028_v50 = vsel %vm443_vm3, %v509_v18, %v11017_v33 }
  0x76   : > { %v513_v62 = vsel %vm443_vm3, %v11017_v33, %v512_v3 }
  0x77   : > { %9260 = vmatmul.mubr.msk.f32.gmra.mxu0 %vm225_vm1, %v503_v9  ;;  %v11034_v9 = vrot.slane %v10930_v56, 1 }
  0x78   : > { %9262 = vmatprep.mubr.msk.f32.mxu0 %vm225_vm1, %v11011_v38  ;;  %9313 = vmatmul.mubr.msk.f32.gmra.mxu1 %vm225_vm1, %v10886_v49 }
  0x79   : > { %9315 = vmatprep.mubr.msk.f32.mxu1 %vm225_vm1, %v10901_v52  ;;  %v11045_v18 = vsel %vm443_vm3, %v514_v36, %v11034_v9  ;;  %v518_v22 = vsel %vm443_vm3, %v11034_v9, %v517_v27  ;;  %v522_v36 = vrot.slane %v393_v58, 1  ;;  %v2346_v58 = vrot.slane %v10504_v39, 2  ;;  %v11083_v27 = vld [vmem:[%s14534_s1 + $0x1c] sm:$0xf] }
  0x7b   : > { %9263 = vmatmul.mubr.msk.f32.gmra.mxu0 %vm225_vm1, %v508_v44  ;;  %v11051_v44 = vrot.slane %v10942_v15, 1 }
  0x7c   : > { %9265 = vmatprep.mubr.msk.f32.mxu0 %vm225_vm1, %v11028_v50  ;;  %9316 = vmatmul.mubr.msk.f32.gmra.mxu1 %vm225_vm1, %v10903_v43 }
  0x7d   : > { %9318 = vmatprep.mubr.msk.f32.mxu1 %vm225_vm1, %v10918_v10  ;;  %v11062_v3 = vsel %vm443_vm3, %v519_v63, %v11051_v44  ;;  %v11077_v63 = vrot.slane %v10506_v40, 2 }
  0x7f   : > { %9266 = vmatmul.mubr.msk.f32.gmra.mxu0 %vm225_vm1, %v513_v62  ;;  %v523_v62 = vsel %vm443_vm3, %v11051_v44, %v522_v36  ;;  %v11101_v36 = vld [vmem:[%s14534_s1 + $0x18] sm:$0xf] }
  0x80   : > { %9268 = vmatprep.mubr.msk.f32.mxu0 %vm225_vm1, %v11045_v18  ;;  %9319 = vmatmul.mubr.msk.f32.gmra.mxu1 %vm225_vm1, %v10930_v56 }
  0x81   : > { %9321 = vmatprep.mubr.msk.f32.mxu1 %vm225_vm1, %v10940_v24 }
  0x83   : > { %9269 = vmatmul.mubr.msk.f32.gmra.mxu0 %vm225_vm1, %v518_v22  ;;  %v1120_v22 = vrot.slane %v10508_v41, 2  ;;  %v14684_v41 = vld [vmem:[#allocation21_spill] sm:$0xff] }
  0x84   : > { %9271 = vmatprep.mubr.msk.f32.mxu0 %vm225_vm1, %v11062_v3  ;;  %9322 = vmatmul.mubr.msk.f32.gmra.mxu1 %vm225_vm1, %v10942_v15 }
  0x85   : > { %9376 = vmatprep.mubr.msk.f32.mxu1 %vm225_vm1, %v10504_v39  ;;  %v11092_v39 = vsel %vm1111_vm4, %v2346_v58, %v11077_v63  ;;  %v14702_v58 = vld [vmem:[#allocation7_spill] sm:$0xff] }
  0x87   : > { %9272 = vmatmul.mubr.msk.f32.gmra.mxu0 %vm225_vm1, %v523_v62  ;;  %v14701_v62 = vld [vmem:[#allocation9_spill] sm:$0xff] }
  0x88   : > { %9326 = vmatprep.mubr.msk.f32.mxu0 %vm225_vm1, %v10490_v34  ;;  %9377 = vmatmul.mubr.msk.f32.vlgmr.msra.gmra.mxu1 %vm225_vm1, %v10506_v40  ;;  %v1121_v34 = vsel %vm1111_vm4, %v11077_v63, %v1120_v22  ;;  %v14683_v40 = vld [vmem:[#allocation36_spill] sm:$0xff]  ;;  %v1532_v22 = vld [vmem:[#allocation2 + $0x88] sm:$0x3] }
  0x89   : > { %9379 = vmatprep.mubr.msk.f32.mxu1 %vm225_vm1, %v10520_v45  ;;  %9475 = vmatpush3.msk.msra.mxu1 %vm590_vm0, %v10679_v61  ;;  %v14685_v45 = vld [vmem:[#allocation23_spill] sm:$0xff] }
  0x8a   : > { %9574 = vmatprep.subr.msk.mxu1 %vm590_vm0, %v11083_v27 }
  0x8b   : > { %9327 = vmatmul.mubr.msk.f32.vlgmr.msra.gmra.mxu0 %vm225_vm1, %v10493_v35  ;;  %v14682_v35 = vld [vmem:[#allocation34_spill] sm:$0xff] }
  0x8c   : > { %9425 = vmatpush3.msk.msra.mxu0 %vm590_vm0, %v10471_v25  ;;  %9329 = vmatprep.mubr.msk.f32.mxu0 %vm225_vm1, %v11092_v39  ;;  %v14681_v25 = vld [vmem:[#allocation20_spill] sm:$0xff] }
  0x8d   : > { %9380 = vmatmul.mubr.msk.f32.gmra.mxu1 %vm225_vm1, %v10522_v46  ;;  %9524 = vmatprep.subr.msk.mxu0 %vm590_vm0, %v11101_v36  ;;  %v14686_v46 = vld [vmem:[#allocation37_spill] sm:$0xff] }
  0x8e   : > { %9382 = vmatprep.mubr.msk.f32.mxu1 %vm225_vm1, %v10524_v47  ;;  %v14687_v47 = vld [vmem:[#allocation39_spill] sm:$0xff] }
  0x8f   : > { %9330 = vmatmul.mubr.msk.f32.gmra.mxu0 %vm225_vm1, %v1121_v34  ;;  %v14704_v34 = vld [vmem:[#allocation12_spill] sm:$0xff] }
  0x90   : > { %9332 = vmatprep.mubr.msk.f32.mxu0 %vm225_vm1, %v10700_v17 }
  0x91   : > { %9383 = vmatmul.mubr.msk.f32.gmra.mxu1 %vm225_vm1, %v10536_v51  ;;  %v14688_v51 = vld [vmem:[#allocation40_spill] sm:$0xff] }
  0x92   : > { %9385 = vmatprep.mubr.msk.f32.mxu1 %vm225_vm1, %v10559_v59  ;;  %v14689_v59 = vld [vmem:[#allocation42_spill] sm:$0xff] }
  0x93   : > { %9333 = vmatmul.mubr.msk.f32.gmra.mxu0 %vm225_vm1, %v10704_v57  ;;  %v14696_v57 = vld [vmem:[#allocation4_spill] sm:$0xff] }
  0x94   : > { %9335 = vmatprep.mubr.msk.f32.mxu0 %vm225_vm1, %v10722_v29 }
  0x95   : > { %9386 = vmatmul.mubr.msk.f32.gmra.mxu1 %vm225_vm1, %v10561_v60  ;;  %v14690_v60 = vld [vmem:[#allocation43_spill] sm:$0xff] }
  0x96   : > { %9388 = vmatprep.mubr.msk.f32.mxu1 %vm225_vm1, %v10573_v0  ;;  %v14691_v0 = vld [vmem:[#allocation44_spill] sm:$0xff] }
  0x97   : > { %9336 = vmatmul.mubr.msk.f32.gmra.mxu0 %vm225_vm1, %v10726_v30  ;;  %v1526_v30 = vld [vmem:[#allocation2 + $0x58] sm:$0x3] }
  0x98   : > { %9338 = vmatprep.mubr.msk.f32.mxu0 %vm225_vm1, %v10743_v54 }
  0x99   : > { %9389 = vmatmul.mubr.msk.f32.gmra.mxu1 %vm225_vm1, %v10575_v1  ;;  %v14692_v1 = vld [vmem:[#allocation46_spill] sm:$0xff] }
  0x9a   : > { %9391 = vmatprep.mubr.msk.f32.mxu1 %vm225_vm1, %v10589_v6  ;;  %v14693_v6 = vld [vmem:[#allocation48_spill] sm:$0xff] }
  0x9b   : > { %9339 = vmatmul.mubr.msk.f32.gmra.mxu0 %vm225_vm1, %v10747_v55  ;;  %v2359_v55 = vrot.slane %v1526_v30, 2 }
  0x9c   : > { %9341 = vmatprep.mubr.msk.f32.mxu0 %vm225_vm1, %v10756_v28 }
  0x9d   : > { %9392 = vmatmul.mubr.msk.f32.gmra.mxu1 %vm225_vm1, %v10591_v7  ;;  %v11216_v7 = vld [vmem:[#allocation2 + $0x180] sm:$0xff] }
  0x9e   : > { %9394 = vmatprep.mubr.msk.f32.mxu1 %vm225_vm1, %v10608_v14  ;;  %v11224_v14 = vld [vmem:[#allocation2 + $0x188] sm:$0xff] }
  0x9f   : > { %9342 = vmatmul.mubr.msk.f32.gmra.mxu0 %vm225_vm1, %v10766_v5  ;;  %v11252_v5 = vld [vmem:[%s14534_s1 + $0x20] sm:$0xf] }
  0xa0   : > { %9344 = vmatprep.mubr.msk.f32.mxu0 %vm225_vm1, %v10839_v16 }
  0xa1   : > { %9395 = vmatmul.mubr.msk.f32.gmra.mxu1 %vm225_vm1, %v10621_v19 }
  0xa2   : > { %9397 = vmatprep.mubr.msk.f32.mxu1 %vm225_vm1, %v10683_v8 }
  0xa3   : > { %9345 = vmatmul.mubr.msk.f32.gmra.mxu0 %vm225_vm1, %v10843_v13  ;;  %v14698_v13 = vld [vmem:[#allocation8_spill] sm:$0xff] }
  0xa4   : > { %9347 = vmatprep.mubr.msk.f32.mxu0 %vm225_vm1, %v10850_v48 }
  0xa5   : > { %9398 = vmatmul.mubr.msk.f32.gmra.mxu1 %vm225_vm1, %v10694_v12  ;;  %v14695_v12 = vld [vmem:[#allocation6_spill] sm:$0xff] }
  0xa6   : > { %9400 = vmatprep.mubr.msk.f32.mxu1 %vm225_vm1, %v14681_v25  ;;  %v14705_v25 = vld [vmem:[#allocation10_spill] sm:$0xff] }
  0xa7   : > { %9348 = vmatmul.mubr.msk.f32.gmra.mxu0 %vm225_vm1, %v14682_v35 }
  0xa8   : > { %9350 = vmatprep.mubr.msk.f32.mxu0 %vm225_vm1, %v14683_v40 }
  0xa9   : > { %9401 = vmatmul.mubr.msk.f32.gmra.mxu1 %vm225_vm1, %v14684_v41  ;;  %v1963_v41 = vrot.slane %v1532_v22, 1 }
  0xaa   : > { %9403 = vmatprep.mubr.msk.f32.mxu1 %vm225_vm1, %v14685_v45  ;;  %v1535_v45 = vld [vmem:[#allocation2 + $0xa0] sm:$0x3] }
  0xab   : > { %9351 = vmatmul.mubr.msk.f32.gmra.mxu0 %vm225_vm1, %v14686_v46 }
  0xac   : > { %9353 = vmatprep.mubr.msk.f32.mxu0 %vm225_vm1, %v14687_v47 }
  0xad   : > { %9404 = vmatmul.mubr.msk.f32.gmra.mxu1 %vm225_vm1, %v10737_v42 }
  0xae   : > { %9406 = vmatprep.mubr.msk.f32.mxu1 %vm225_vm1, %v10795_v31  ;;  %v14697_v31 = vld [vmem:[#allocation17_spill] sm:$0xff] }
  0xaf   : > { %9354 = vmatmul.mubr.msk.f32.gmra.mxu0 %vm225_vm1, %v14688_v51  ;;  %v2374_v51 = vrot.slane %v1535_v45, 2 }
  0xb0   : > { %9356 = vmatprep.mubr.msk.f32.mxu0 %vm225_vm1, %v14689_v59 }
  0xb1   : > { %9407 = vmatmul.mubr.msk.f32.gmra.mxu1 %vm225_vm1, %v10797_v21 }
  0xb2   : > { %9409 = vmatprep.mubr.msk.f32.mxu1 %vm225_vm1, %v10884_v26  ;;  %v1529_v26 = vld [vmem:[#allocation2 + $0x70] sm:$0x3] }
  0xb3   : > { %9357 = vmatmul.mubr.msk.f32.gmra.mxu0 %vm225_vm1, %v14690_v60  ;;  %v14707_v60 = vld [vmem:[#allocation14_spill] sm:$0xff] }
  0xb4   : > { %9359 = vmatprep.mubr.msk.f32.mxu0 %vm225_vm1, %v14691_v0 }
  0xb5   : > { %9410 = vmatmul.mubr.msk.f32.gmra.mxu1 %vm225_vm1, %v10886_v49  ;;  %v14694_v49 = vld [vmem:[#allocation50_spill] sm:$0xff] }
  0xb6   : > { %9412 = vmatprep.mubr.msk.f32.mxu1 %vm225_vm1, %v10901_v52  ;;  %v1523_v52 = vld [vmem:[#allocation2 + $0x40] sm:$0x3] }
  0xb7   : > { %9360 = vmatmul.mubr.msk.f32.gmra.mxu0 %vm225_vm1, %v14692_v1  ;;  %v2354_v8 = vrot.slane %v1523_v52, 2  ;;  %v14708_v1 = vld [vmem:[#allocation11_spill] sm:$0xff] }
  0xb8   : > { %9362 = vmatprep.mubr.msk.f32.mxu0 %vm225_vm1, %v14693_v6 }
  0xb9   : > { %9413 = vmatmul.mubr.msk.f32.gmra.mxu1 %vm225_vm1, %v10903_v43  ;;  %v1520_v43 = vld [vmem:[#allocation2 + $0x28] sm:$0x3]  ;;  %v2355_v42 = vsel %vm1111_vm4, %v14697_v31, %v2354_v8  ;;  %v14713_v31 = vld [vmem:[#allocation27_spill] sm:$0xff] }
  0xba   : > { %9415 = vmatprep.mubr.msk.f32.mxu1 %vm225_vm1, %v10918_v10  ;;  %v1943_v19 = vrot.slane %v1520_v43, 1  ;;  %v14700_v10 = vld [vmem:[#allocation18_spill] sm:$0xff]  ;;  %v14711_v8 = vld [vmem:[#allocation13_spill] sm:$0xff] }
  0xbb   : > { %9363 = vmatmul.mubr.msk.f32.gmra.mxu0 %vm225_vm1, %v10950_v20 }
  0xbc   : > { %9365 = vmatprep.mubr.msk.f32.mxu0 %vm225_vm1, %v10959_v23  ;;  %v1944_v21 = vsel %vm443_vm3, %v14696_v57, %v1943_v19 }
  0xbd   : > { %9416 = vmatmul.mubr.msk.f32.gmra.mxu1 %vm225_vm1, %v10930_v56  ;;  %v2349_v56 = vrot.slane %v1520_v43, 2  ;;  %v1968_v43 = vrot.slane %v1535_v45, 1 }
  0xbe   : > { %9418 = vmatprep.mubr.msk.f32.mxu1 %vm225_vm1, %v10940_v24  ;;  %v1948_v24 = vrot.slane %v1523_v52, 1 }
  0xbf   : > { %9366 = vmatmul.mubr.msk.f32.gmra.mxu0 %vm225_vm1, %v14694_v49  ;;  %v2350_v61 = vsel %vm1111_vm4, %v11077_v63, %v2349_v56  ;;  %v1964_v49 = vsel %vm443_vm3, %v14708_v1, %v1963_v41  ;;  %v1538_v56 = vld [vmem:[#allocation2 + $0xb8] sm:$0x3]  ;;  %v14723_v41 = vld [vmem:[#allocation26_spill] sm:$0xff] }
  0xc0   : > { %9368 = vmatprep.mubr.msk.f32.mxu0 %vm225_vm1, %v10975_v4  ;;  %v2379_v52 = vrot.slane %v1538_v56, 2  ;;  %v1973_v57 = vrot.slane %v1538_v56, 1 }
  0xc1   : > { %9419 = vmatmul.mubr.msk.f32.gmra.mxu1 %vm225_vm1, %v10942_v15  ;;  %v1953_v15 = vrot.slane %v1526_v30, 1 }
  0xc2   : > { %9421 = vmatprep.mubr.msk.f32.mxu1 %vm225_vm1, %v11216_v7 }
  0xc3   : > { %9369 = vmatmul.mubr.msk.f32.gmra.mxu0 %vm225_vm1, %v10979_v37  ;;  %v2360_v37 = vsel %vm1111_vm4, %v14700_v10, %v2359_v55  ;;  %v1954_v63 = vsel %vm443_vm3, %v14702_v58, %v1953_v15  ;;  %v14717_v10 = vld [vmem:[#allocation24_spill] sm:$0xff] }
  0xc4   : > { %9371 = vmatprep.mubr.msk.f32.mxu0 %vm225_vm1, %v10995_v32 }
  0xc5   : > { %9422 = vmatmul.mubr.msk.f32.gmra.mxu1 %vm225_vm1, %v11224_v14 }
  0xc6   : > { %9476 = vmatprep.mubr.msk.f32.mxu1 %vm225_vm1, %v11092_v39 }
  0xc7   : > { %9372 = vmatmul.mubr.msk.f32.gmra.mxu0 %vm225_vm1, %v10999_v2  ;;  %v2364_v2 = vrot.slane %v1529_v26, 2 }
  0xc8   : > { %9426 = vmatprep.mubr.msk.f32.mxu0 %vm225_vm1, %v14695_v12  ;;  %v1969_v12 = vsel %vm443_vm3, %v14711_v8, %v1968_v43  ;;  %v1556_v43 = vld [vmem:[#allocation2 + $0x148] sm:$0x3] }
  0xc9   : > { %9477 = vmatmul.mubr.msk.f32.vlgmr.msra.gmra.mxu1 %vm225_vm1, %v2350_v61  ;;  %v14710_v61 = vld [vmem:[#allocation16_spill] sm:$0xff] }
  0xca   : > { %9479 = vmatprep.mubr.msk.f32.mxu1 %vm225_vm1, %v10700_v17  ;;  %9575 = vmatpush3.msk.msra.mxu1 %vm590_vm0, %v11083_v27  ;;  %v14699_v17 = vld [vmem:[#allocation5_spill] sm:$0xff]  ;;  %v1958_v27 = vrot.slane %v1529_v26, 1  ;;  %v14716_v26 = vld [vmem:[#allocation28_spill] sm:$0xff] }
  0xcb   : > { %9427 = vmatmul.mubr.msk.f32.vlgmr.msra.gmra.mxu0 %vm225_vm1, %v1944_v21  ;;  %v1949_v20 = vsel %vm443_vm3, %v14699_v17, %v1948_v24  ;;  %v1541_v21 = vld [vmem:[#allocation2 + $0xd0] sm:$0x3]  ;;  %v1544_v17 = vld [vmem:[#allocation2 + $0xe8] sm:$0x3] }
  0xcc   : > { %9525 = vmatpush3.msk.msra.mxu0 %vm590_vm0, %v11101_v36  ;;  %9429 = vmatprep.mubr.msk.f32.mxu0 %vm225_vm1, %v14698_v13  ;;  %v2369_v36 = vrot.slane %v1532_v22, 2  ;;  %v1959_v35 = vsel %vm443_vm3, %v14705_v25, %v1958_v27  ;;  %v2384_v30 = vrot.slane %v1541_v21, 2  ;;  %v1978_v13 = vrot.slane %v1541_v21, 1  ;;  %v14719_v27 = vld [vmem:[#allocation29_spill] sm:$0xff] }
  0xcd   : > { %9480 = vmatmul.mubr.msk.f32.gmra.mxu1 %vm225_vm1, %v2355_v42  ;;  %9624 = vmatprep.subr.msk.mxu0 %vm590_vm0, %v11252_v5  ;;  %v14714_v42 = vld [vmem:[#allocation15_spill] sm:$0xff]  ;;  %v2389_v15 = vrot.slane %v1544_v17, 2  ;;  %v14720_v22 = vld [vmem:[#allocation25_spill] sm:$0xff] }
  0xce   : > { %9482 = vmatprep.mubr.msk.f32.mxu1 %vm225_vm1, %v10722_v29  ;;  %v14703_v29 = vld [vmem:[#allocation19_spill] sm:$0xff]  ;;  %v1974_v55 = vsel %vm443_vm3, %v14714_v42, %v1973_v57  ;;  %v2015_v42 = vrot.slane %v11216_v7, 1 }
  0xcf   : > { %9430 = vmatmul.mubr.msk.f32.gmra.mxu0 %vm225_vm1, %v1949_v20  ;;  %v2365_v39 = vsel %vm1111_vm4, %v14703_v29, %v2364_v2  ;;  %v1983_v2 = vrot.slane %v1544_v17, 1  ;;  %v1562_v57 = vld [vmem:[#allocation2 + $0x178] sm:$0x3] }
  0xd0   : > { %9432 = vmatprep.mubr.msk.f32.mxu0 %vm225_vm1, %v14701_v62  ;;  %v1547_v62 = vld [vmem:[#allocation2 + $0x100] sm:$0x3] }
  0xd1   : > { %9483 = vmatmul.mubr.msk.f32.gmra.mxu1 %vm225_vm1, %v2360_v37  ;;  %v1979_v37 = vsel %vm443_vm3, %v14717_v10, %v1978_v13  ;;  %v1984_v29 = vsel %vm443_vm3, %v14720_v22, %v1983_v2  ;;  %v1565_v13 = vld [vmem:[#allocation2 + $0x190] sm:$0x3] }
  0xd2   : > { %9485 = vmatprep.mubr.msk.f32.mxu1 %vm225_vm1, %v10743_v54  ;;  %v14706_v54 = vld [vmem:[#allocation22_spill] sm:$0xff]  ;;  %v2018_v10 = vrot.slane %v1565_v13, 1 }
  0xd3   : > { %9433 = vmatmul.mubr.msk.f32.gmra.mxu0 %vm225_vm1, %v1954_v63  ;;  %v2370_v46 = vsel %vm1111_vm4, %v14706_v54, %v2369_v36  ;;  %v2394_v63 = vrot.slane %v1547_v62, 2  ;;  %v1550_v36 = vld [vmem:[#allocation2 + $0x118] sm:$0x3]  ;;  %v11412_v2 = vld [vmem:[#allocation2 + $0x50] sm:$0xff] }
  0xd4   : > { %9435 = vmatprep.mubr.msk.f32.mxu0 %vm225_vm1, %v14704_v34  ;;  %v2399_v25 = vrot.slane %v1550_v36, 2  ;;  %v1993_v54 = vrot.slane %v1550_v36, 1 }
  0xd5   : > { %9486 = vmatmul.mubr.msk.f32.gmra.mxu1 %vm225_vm1, %v2365_v39  ;;  %v1988_v39 = vrot.slane %v1547_v62, 1 }
  0xd6   : > { %9488 = vmatprep.mubr.msk.f32.mxu1 %vm225_vm1, %v10756_v28  ;;  %v14709_v28 = vld [vmem:[#allocation31_spill] sm:$0xff]  ;;  %v1994_v1 = vsel %vm443_vm3, %v10831_v11, %v1993_v54  ;;  %v2003_v11 = vrot.slane %v1556_v43, 1  ;;  %v9278_v36 = vpop.f32.mrf.mxu1 }
  0xd7   : > { %9436 = vmatmul.mubr.msk.f32.gmra.mxu0 %vm225_vm1, %v1959_v35  ;;  %v2375_v19 = vsel %vm1111_vm4, %v14709_v28, %v2374_v51  ;;  %v14722_v35 = vld [vmem:[#allocation30_spill] sm:$0xff]  ;;  %v1989_v45 = vsel %vm443_vm3, %v14723_v41, %v1988_v39  ;;  %v2409_v28 = vrot.slane %v1556_v43, 2  ;;  %v11434_v39 = vld [vmem:[#allocation2 + $0x68] sm:$0xff]  ;;  %v11448_v54 = vld [vmem:[#allocation2 + $0x78] sm:$0xff] }
  0xd8   : > { %9438 = vmatprep.mubr.msk.f32.mxu0 %vm225_vm1, %v14707_v60  ;;  %v3186_v41 = vrot.slane %v11434_v39, 1 }
  0xd9   : > { %9489 = vmatmul.mubr.msk.f32.gmra.mxu1 %vm225_vm1, %v2370_v46  ;;  %v1553_v46 = vld [vmem:[#allocation2 + $0x130] sm:$0x3] }
  0xda   : > { %9491 = vmatprep.mubr.msk.f32.mxu1 %vm225_vm1, %v10839_v16  ;;  %v14712_v16 = vld [vmem:[#allocation32_spill] sm:$0xff]  ;;  %v2404_v60 = vrot.slane %v1553_v46, 2 }
  0xdb   : > { %9439 = vmatmul.mubr.msk.f32.gmra.mxu0 %vm225_vm1, %v1964_v49  ;;  %v2380_v24 = vsel %vm1111_vm4, %v14712_v16, %v2379_v52  ;;  %v1998_v49 = vrot.slane %v1553_v46, 1  ;;  %v1559_v52 = vld [vmem:[#allocation2 + $0x160] sm:$0x3]  ;;  %v2419_v16 = vrot.slane %v1562_v57, 2 }
  0xdc   : > { %9441 = vmatprep.mubr.msk.f32.mxu0 %vm225_vm1, %v14710_v61  ;;  %v2414_v8 = vrot.slane %v1559_v52, 2  ;;  %v11450_v46 = vld [vmem:[#allocation2 + $0x80] sm:$0xff] }
  0xdd   : > { %9492 = vmatmul.mubr.msk.f32.gmra.mxu1 %vm225_vm1, %v2375_v19 }
  0xde   : > { %9494 = vmatprep.mubr.msk.f32.mxu1 %vm225_vm1, %v10850_v48  ;;  %v14715_v48 = vld [vmem:[#allocation33_spill] sm:$0xff] }
  0xdf   : > { %9442 = vmatmul.mubr.msk.f32.gmra.mxu0 %vm225_vm1, %v1969_v12  ;;  %v2385_v20 = vsel %vm1111_vm4, %v14715_v48, %v2384_v30  ;;  %v2008_v12 = vrot.slane %v1559_v52, 1  ;;  %v2422_v30 = vrot.slane %v11224_v14, 2  ;;  %v11471_v52 = vld [vmem:[#allocation2 + $0x90] sm:$0xff] }
  0xe0   : > { %9444 = vmatprep.mubr.msk.f32.mxu0 %vm225_vm1, %v14713_v31  ;;  %v11385_v31 = vld [vmem:[#allocation2 + $0x30] sm:$0xff] }
  0xe1   : > { %9495 = vmatmul.mubr.msk.f32.gmra.mxu1 %vm225_vm1, %v2380_v24  ;;  %v14582_v24 = vrot.slane %v11216_v7, 2 }
  0xe2   : > { %9497 = vmatprep.mubr.msk.f32.mxu1 %vm225_vm1, %v14683_v40  ;;  %v14718_v40 = vld [vmem:[#allocation35_spill] sm:$0xff] }
  0xe3   : > { %9445 = vmatmul.mubr.msk.f32.gmra.mxu0 %vm225_vm1, %v1974_v55  ;;  %v2390_v58 = vsel %vm1111_vm4, %v14718_v40, %v2389_v15  ;;  %v11391_v55 = vrot.slane %v11224_v14, 1  ;;  %v2423_v48 = vsel %vm1111_vm4, %v14582_v24, %v2422_v30 }
  0xe4   : > { %9447 = vmatprep.mubr.msk.f32.mxu0 %vm225_vm1, %v14716_v26  ;;  %v11404_v26 = vld [vmem:[#allocation2 + $0x40] sm:$0x3] }
  0xe5   : > { %9498 = vmatmul.mubr.msk.f32.gmra.mxu1 %vm225_vm1, %v2385_v20  ;;  %v3175_v20 = vrot.slane %v11385_v31, 1  ;;  %v11417_v62 = vsel %vm443_vm3, %v2015_v42, %v11391_v55  ;;  %v2019_v22 = vsel %vm443_vm3, %v11391_v55, %v2018_v10  ;;  %v11505_v10 = vld [vmem:[#allocation2 + $0xb8] sm:$0x3] }
  0xe6   : > { %9500 = vmatprep.mubr.msk.f32.mxu1 %vm225_vm1, %v14687_v47  ;;  %v14721_v47 = vld [vmem:[#allocation38_spill] sm:$0xff] }
  0xe7   : > { %9448 = vmatmul.mubr.msk.f32.gmra.mxu0 %vm225_vm1, %v1979_v37  ;;  %v2395_v34 = vsel %vm1111_vm4, %v14721_v47, %v2394_v63  ;;  %v11410_v37 = vld [vmem:[#allocation2 + $0x48] sm:$0xff]  ;;  %v3181_v63 = vrot.slane %v11412_v2, 1 }
  0xe8   : > { %9450 = vmatprep.mubr.msk.f32.mxu0 %vm225_vm1, %v14719_v27  ;;  %v11426_v27 = vld [vmem:[#allocation2 + $0x58] sm:$0x3] }
  0xe9   : > { %9501 = vmatmul.mubr.msk.f32.gmra.mxu1 %vm225_vm1, %v2390_v58  ;;  %v3180_v58 = vrot.slane %v11410_v37, 1 }
  0xea   : > { %9503 = vmatprep.mubr.msk.f32.mxu1 %vm225_vm1, %v14689_v59  ;;  %v14724_v59 = vld [vmem:[#allocation41_spill] sm:$0xff] }
  0xeb   : > { %9451 = vmatmul.mubr.msk.f32.gmra.mxu0 %vm225_vm1, %v1984_v29  ;;  %v2400_v51 = vsel %vm1111_vm4, %v14724_v59, %v2399_v25  ;;  %v11432_v29 = vld [vmem:[#allocation2 + $0x60] sm:$0xff]  ;;  %v3182_v25 = vsel %vm443_vm3, %v3180_v58, %v3181_v63  ;;  %v11513_v58 = vld [vmem:[#allocation2 + $0xc8] sm:$0xff] }
  0xec   : > { %9453 = vmatprep.mubr.msk.f32.mxu0 %vm225_vm1, %v14722_v35  ;;  %v3185_v35 = vrot.slane %v11432_v29, 1 }
  0xed   : > { %9504 = vmatmul.mubr.msk.f32.gmra.mxu1 %vm225_vm1, %v2395_v34  ;;  %v3183_v34 = vrot.slane %v11426_v27, 1 }
  0xee   : > { %9506 = vmatprep.mubr.msk.f32.mxu1 %vm225_vm1, %v14691_v0  ;;  %v14725_v0 = vld [vmem:[#allocation45_spill] sm:$0xff] }
  0xef   : > { %9454 = vmatmul.mubr.msk.f32.gmra.mxu0 %vm225_vm1, %v1989_v45  ;;  %v2405_v56 = vsel %vm1111_vm4, %v14725_v0, %v2404_v60  ;;  %v11444_v45 = vld [vmem:[#allocation2 + $0x70] sm:$0x3]  ;;  %v3187_v0 = vsel %vm443_vm3, %v3185_v35, %v3186_v41 }
  0xf0   : > { %9456 = vmatprep.mubr.msk.f32.mxu0 %vm225_vm1, %v10985_v53  ;;  %v14726_v53 = vld [vmem:[#allocation52_spill] sm:$0xff] }
  0xf1   : > { %9507 = vmatmul.mubr.msk.f32.gmra.mxu1 %vm225_vm1, %v2400_v51  ;;  %v1999_v19 = vsel %vm443_vm3, %v14726_v53, %v1998_v49  ;;  %v952_v51 = vpop.f32.mrf.mxu1  ;;  %v3188_v49 = vrot.slane %v11444_v45, 1  ;;  %v11463_v53 = vld [vmem:[#allocation2 + $0x88] sm:$0x3] }
  0xf2   : > { %9509 = vmatprep.mubr.msk.f32.mxu1 %vm225_vm1, %v14693_v6  ;;  %v14727_v6 = vld [vmem:[#allocation47_spill] sm:$0xff] }
  0xf3   : > { %9457 = vmatmul.mubr.msk.f32.gmra.mxu0 %vm225_vm1, %v1994_v1  ;;  %v2410_v61 = vsel %vm1111_vm4, %v14727_v6, %v2409_v28  ;;  %v3184_v1 = vsel %vm443_vm3, %v3181_v63, %v3183_v34  ;;  %v3191_v28 = vrot.slane %v11450_v46, 1  ;;  %v11473_v6 = vld [vmem:[#allocation2 + $0x98] sm:$0xff]  ;;  %v3203_v34 = vrot.slane %v11505_v10, 1 }
  0xf4   : > { %9459 = vmatprep.mubr.msk.f32.mxu0 %vm225_vm1, %v11011_v38  ;;  %v2004_v38 = vsel %vm443_vm3, %v11017_v33, %v2003_v11  ;;  %v2009_v33 = vsel %vm443_vm3, %v11034_v9, %v2008_v12  ;;  %v2424_v9 = vrot.slane %v1565_v13, 2 }
  0xf5   : > { %9510 = vmatmul.mubr.msk.f32.gmra.mxu1 %vm225_vm1, %v2405_v56  ;;  %v3190_v56 = vrot.slane %v11448_v54, 1 }
  0xf6   : > { %9512 = vmatprep.mubr.msk.f32.mxu1 %vm225_vm1, %v10959_v23  ;;  %v14728_v23 = vld [vmem:[#allocation49_spill] sm:$0xff]  ;;  %v2425_v40 = vsel %vm1111_vm4, %v2422_v30, %v2424_v9 }
  0xf7   : > { %9460 = vmatmul.mubr.msk.f32.gmra.mxu0 %vm225_vm1, %v1999_v19  ;;  %v2415_v21 = vsel %vm1111_vm4, %v14728_v23, %v2414_v8  ;;  %v3189_v8 = vsel %vm443_vm3, %v3186_v41, %v3188_v49  ;;  %v3196_v23 = vrot.slane %v11473_v6, 1 }
  0xf8   : > { %9462 = vmatprep.mubr.msk.f32.mxu0 %vm225_vm1, %v11028_v50  ;;  %v2013_v50 = vrot.slane %v1562_v57, 1  ;;  %v3195_v57 = vrot.slane %v11471_v52, 1 }
  0xf9   : > { %9513 = vmatmul.mubr.msk.f32.gmra.mxu1 %vm225_vm1, %v2410_v61 }
  0xfa   : > { %9515 = vmatprep.mubr.msk.f32.mxu1 %vm225_vm1, %v10975_v4  ;;  %v11387_v4 = vld [vmem:[#allocation2 + $0x38] sm:$0xff] }
  0xfb   : > { %9463 = vmatmul.mubr.msk.f32.gmra.mxu0 %vm225_vm1, %v2004_v38  ;;  %v3176_v15 = vrot.slane %v11387_v4, 1  ;;  %v3193_v38 = vrot.slane %v11463_v53, 1 }
  0xfc   : > { %9465 = vmatprep.mubr.msk.f32.mxu0 %vm225_vm1, %v11045_v18  ;;  %v14729_v18 = vld [vmem:[#allocation51_spill] sm:$0xff]  ;;  %v9228_v59 = vpop.f32.mrf.mxu0 }
  0xfd   : > { %9516 = vmatmul.mubr.msk.f32.gmra.mxu1 %vm225_vm1, %v2415_v21  ;;  %v2420_v17 = vsel %vm1111_vm4, %v14729_v18, %v2419_v16  ;;  %v11453_v60 = vadd.f32 %v9278_v36, %v9228_v59  ;;  %v11484_v21 = vld [vmem:[#allocation2 + $0xa0] sm:$0x3]  ;;  %v3206_v59 = vrot.slane %v11513_v58, 1 }
  0xfe   : > { %9518 = vmatprep.mubr.msk.f32.mxu1 %vm225_vm1, %v10995_v32  ;;  %v2014_v32 = vsel %vm443_vm3, %v11051_v44, %v2013_v50  ;;  %v3177_v44 = vsel %vm443_vm3, %v3175_v20, %v3176_v15  ;;  %v660_v43 = vpop.f32.mrf.mxu0  ;;  %v11492_v50 = vld [vmem:[#allocation2 + $0xb0] sm:$0xff]  ;;  %v3198_v9 = vrot.slane %v11484_v21, 1  ;;  %v3197_v20 = vsel %vm443_vm3, %v3195_v57, %v3196_v23 }
  0xff   : > { %9466 = vmatmul.mubr.msk.f32.gmra.mxu0 %vm225_vm1, %v2009_v33  ;;  %v11465_v19 = vadd.f32 %v952_v51, %v660_v43  ;;  %v11490_v33 = vld [vmem:[#allocation2 + $0xa8] sm:$0xff]  ;;  %v11526_v51 = vld [vmem:[#allocation2 + $0xd0] sm:$0x3]  ;;  %v11532_v43 = vld [vmem:[#allocation2 + $0xd8] sm:$0xff] }
 0x100   : > { %9468 = vmatprep.mubr.msk.f32.mxu0 %vm225_vm1, %v11062_v3  ;;  %v3178_v3 = vrot.slane %v11404_v26, 1 }
 0x101   : > { %9519 = vmatmul.mubr.msk.f32.gmra.mxu1 %vm225_vm1, %v2420_v17  ;;  %v3194_v17 = vsel %vm443_vm3, %v3191_v28, %v3193_v38 }
 0x102   : > { %9521 = vmatprep.mubr.msk.f32.mxu1 %vm225_vm1, %v2423_v48  ;;  %v3179_v47 = vsel %vm443_vm3, %v3176_v15, %v3178_v3  ;;  %v3200_v15 = vrot.slane %v11490_v33, 1 }
 0x103   : > { %9469 = vmatmul.mubr.msk.f32.gmra.mxu0 %vm225_vm1, %v2014_v32  ;;  %v3201_v32 = vrot.slane %v11492_v50, 1 }
 0x104   : > { %9471 = vmatprep.mubr.msk.f32.mxu0 %vm225_vm1, %v11417_v62 }
 0x105   : > { %9522 = vmatmul.mubr.msk.f32.gmra.mxu1 %vm225_vm1, %v2425_v40  ;;  %v3202_v35 = vsel %vm443_vm3, %v3200_v15, %v3201_v32 }
 0x106   : > { %9576 = vmatprep.mubr.msk.f32.mxu1 %vm225_vm1, %v3177_v44  ;;  %v11511_v44 = vld [vmem:[#allocation2 + $0xc0] sm:$0xff] }
 0x107   : > { %9472 = vmatmul.mubr.msk.f32.gmra.mxu0 %vm225_vm1, %v2019_v22  ;;  %v3205_v41 = vrot.slane %v11511_v44, 1 }
 0x108   : > { %9526 = vmatprep.mubr.msk.f32.mxu0 %vm225_vm1, %v11385_v31 }
 0x109   : > { %9577 = vmatmul.mubr.msk.f32.vlgmr.msra.gmra.mxu1 %vm225_vm1, %v3179_v47  ;;  %v3199_v47 = vsel %vm443_vm3, %v3196_v23, %v3198_v9  ;;  %v11547_v23 = vld [vmem:[#allocation2 + $0xe8] sm:$0x3] }
 0x10a   : > { %9579 = vmatprep.mubr.msk.f32.mxu1 %vm225_vm1, %v3182_v25 }
 0x10b   : > { %9527 = vmatmul.mubr.msk.f32.vlgmr.msra.gmra.mxu0 %vm225_vm1, %v11387_v4 }
 0x10c   : > { %9625 = vmatpush3.msk.msra.mxu0 %vm590_vm0, %v11252_v5  ;;  %9529 = vmatprep.mubr.msk.f32.mxu0 %vm225_vm1, %v11410_v37  ;;  %v9281_v11 = vpop.f32.mrf.mxu1  ;;  %v3192_v5 = vsel %vm443_vm3, %v3190_v56, %v3191_v28 }
 0x10d   : > { %9580 = vmatmul.mubr.msk.f32.gmra.mxu1 %vm225_vm1, %v3184_v1 }
 0x10e   : > { %v962_v61 = vpop.f32.mrf.mxu1  ;;  %9582 = vmatprep.mubr.msk.f32.mxu1 %vm225_vm1, %v3187_v0  ;;  %v11534_v0 = vld [vmem:[#allocation2 + $0xe0] sm:$0xff] }
 0x10f   : > { %v9231_v12 = vpop.f32.mrf.mxu0  ;;  %9530 = vmatmul.mubr.msk.f32.gmra.mxu0 %vm225_vm1, %v11412_v2  ;;  %v3211_v57 = vrot.slane %v11534_v0, 1 }
 0x110   : > { %v11486_v16 = vadd.f32 %v9281_v11, %v9231_v12  ;;  %9532 = vmatprep.mubr.msk.f32.mxu0 %vm225_vm1, %v11432_v29  ;;  %v9284_v30 = vpop.f32.mrf.mxu1  ;;  %v3207_v12 = vsel %vm443_vm3, %v3205_v41, %v3206_v59  ;;  %v11574_v41 = vld [vmem:[#allocation2 + $0x108] sm:$0xff] }
 0x111   : > { %v670_v42 = vpop.f32.mrf.mxu0  ;;  %9583 = vmatmul.mubr.msk.f32.gmra.mxu1 %vm225_vm1, %v3189_v8  ;;  %v3208_v8 = vrot.slane %v11526_v51, 1  ;;  %14731 = vst [vmem:[#allocation34_spill] sm:$0xff] %v11574_v41 }
 0x112   : > { %v11495_v13 = vadd.f32 %v962_v61, %v670_v42  ;;  %v972_v18 = vpop.f32.mrf.mxu1  ;;  %9585 = vmatprep.mubr.msk.f32.mxu1 %vm225_vm1, %v3192_v5  ;;  %v3204_v61 = vsel %vm443_vm3, %v3201_v32, %v3203_v34  ;;  %v3210_v5 = vrot.slane %v11532_v43, 1  ;;  %v3213_v32 = vrot.slane %v11547_v23, 1  ;;  %v11568_v34 = vld [vmem:[#allocation2 + $0x100] sm:$0x3] }
 0x113   : > { %v9234_v48 = vpop.f32.mrf.mxu0  ;;  %9533 = vmatmul.mubr.msk.f32.gmra.mxu0 %vm225_vm1, %v11434_v39  ;;  %v3209_v15 = vsel %vm443_vm3, %v3206_v59, %v3208_v8  ;;  %14730 = vst [vmem:[#allocation20_spill] sm:$0xff] %v11568_v34  ;;  %v11576_v59 = vld [vmem:[#allocation2 + $0x110] sm:$0xff]  ;;  %v3218_v8 = vrot.slane %v11568_v34, 1 }
 0x114   : > { %v11507_v40 = vadd.f32 %v9284_v30, %v9234_v48  ;;  %9535 = vmatprep.mubr.msk.f32.mxu0 %vm225_vm1, %v11448_v54  ;;  %v9287_v3 = vpop.f32.mrf.mxu1  ;;  %14732 = vst [vmem:[#allocation36_spill] sm:$0xff] %v11576_v59 }
 0x115   : > { %v680_v63 = vpop.f32.mrf.mxu0  ;;  %9586 = vmatmul.mubr.msk.f32.gmra.mxu1 %vm225_vm1, %v3194_v17  ;;  %v11555_v17 = vld [vmem:[#allocation2 + $0xf8] sm:$0xff] }
 0x116   : > { %v11516_v22 = vadd.f32 %v972_v18, %v680_v63  ;;  %v982_v36 = vpop.f32.mrf.mxu1  ;;  %9588 = vmatprep.mubr.msk.f32.mxu1 %vm225_vm1, %v3197_v20  ;;  %v11553_v18 = vld [vmem:[#allocation2 + $0xf0] sm:$0xff]  ;;  %v3212_v63 = vsel %vm443_vm3, %v3210_v5, %v3211_v57  ;;  %v3220_v5 = vrot.slane %v11574_v41, 1 }
 0x117   : > { %v9237_v25 = vpop.f32.mrf.mxu0  ;;  %9536 = vmatmul.mubr.msk.f32.gmra.mxu0 %vm225_vm1, %v11450_v46 }
 0x118   : > { %v11528_v1 = vadd.f32 %v9287_v3, %v9237_v25  ;;  %9538 = vmatprep.mubr.msk.f32.mxu0 %vm225_vm1, %v11471_v52  ;;  %v9290_v49 = vpop.f32.mrf.mxu1 }
 0x119   : > { %v690_v56 = vpop.f32.mrf.mxu0  ;;  %9589 = vmatmul.mubr.msk.f32.gmra.mxu1 %vm225_vm1, %v3199_v47  ;;  %v3216_v47 = vrot.slane %v11555_v17, 1 }
 0x11a   : > { %v11537_v28 = vadd.f32 %v982_v36, %v690_v56  ;;  %v992_v11 = vpop.f32.mrf.mxu1  ;;  %9591 = vmatprep.mubr.msk.f32.mxu1 %vm225_vm1, %v3202_v35  ;;  %v3215_v36 = vrot.slane %v11553_v18, 1 }
 0x11b   : > { %v9240_v38 = vpop.f32.mrf.mxu0  ;;  %9539 = vmatmul.mubr.msk.f32.gmra.mxu0 %vm225_vm1, %v11473_v6 }
 0x11c   : > { %v11549_v30 = vadd.f32 %v9290_v49, %v9240_v38  ;;  %9541 = vmatprep.mubr.msk.f32.mxu0 %vm225_vm1, %v11490_v33  ;;  %v9293_v42 = vpop.f32.mrf.mxu1 }
 0x11d   : > { %v700_v9 = vpop.f32.mrf.mxu0  ;;  %9592 = vmatmul.mubr.msk.f32.gmra.mxu1 %vm225_vm1, %v3204_v61  ;;  %v3214_v61 = vsel %vm443_vm3, %v3211_v57, %v3213_v32  ;;  %v11597_v32 = vld [vmem:[#allocation2 + $0x128] sm:$0xff] }
 0x11e   : > { %v11558_v48 = vadd.f32 %v992_v11, %v700_v9  ;;  %v1002_v20 = vpop.f32.mrf.mxu1  ;;  %9594 = vmatprep.mubr.msk.f32.mxu1 %vm225_vm1, %v3207_v12  ;;  %v3217_v12 = vsel %vm443_vm3, %v3215_v36, %v3216_v47  ;;  %v11589_v9 = vld [vmem:[#allocation2 + $0x118] sm:$0x3] }
 0x11f   : > { %v9243_v3 = vpop.f32.mrf.mxu0  ;;  %9542 = vmatmul.mubr.msk.f32.gmra.mxu0 %vm225_vm1, %v11492_v50  ;;  %14734 = vst [vmem:[#allocation23_spill] sm:$0xff] %v11589_v9 }
 0x120   : > { %v11570_v25 = vadd.f32 %v9293_v42, %v9243_v3  ;;  %9544 = vmatprep.mubr.msk.f32.mxu0 %vm225_vm1, %v11511_v44  ;;  %v9296_v35 = vpop.f32.mrf.mxu1  ;;  %v3221_v42 = vrot.slane %v11576_v59, 1 }
 0x121   : > { %v710_v49 = vpop.f32.mrf.mxu0  ;;  %9595 = vmatmul.mubr.msk.f32.gmra.mxu1 %vm225_vm1, %v3209_v15  ;;  %v11595_v15 = vld [vmem:[#allocation2 + $0x120] sm:$0xff] }
 0x122   : > { %v11579_v56 = vadd.f32 %v1002_v20, %v710_v49  ;;  %v1012_v11 = vpop.f32.mrf.mxu1  ;;  %9597 = vmatprep.mubr.msk.f32.mxu1 %vm225_vm1, %v3212_v63  ;;  %14736 = vst [vmem:[#allocation39_spill] sm:$0xff] %v11595_v15  ;;  %v3219_v49 = vsel %vm443_vm3, %v3216_v47, %v3218_v8  ;;  %v3222_v24 = vsel %vm443_vm3, %v3220_v5, %v3221_v42  ;;  %v3225_v34 = vrot.slane %v11595_v15, 1  ;;  %v11616_v8 = vld [vmem:[#allocation2 + $0x138] sm:$0xff] }
 0x123   : > { %v9246_v38 = vpop.f32.mrf.mxu0  ;;  %9545 = vmatmul.mubr.msk.f32.gmra.mxu0 %vm225_vm1, %v11513_v58 }
 0x124   : > { %14733 = vst [vmem:[#allocation21_spill] sm:$0xff] %v11579_v56  ;;  %v11591_v20 = vadd.f32 %v9296_v35, %v9246_v38  ;;  %9547 = vmatprep.mubr.msk.f32.mxu0 %vm225_vm1, %v11532_v43  ;;  %v9299_v57 = vpop.f32.mrf.mxu1  ;;  %v3223_v35 = vrot.slane %v11589_v9, 1  ;;  %v3230_v56 = vrot.slane %v11616_v8, 1 }
 0x125   : > { %v720_v3 = vpop.f32.mrf.mxu0  ;;  %9598 = vmatmul.mubr.msk.f32.gmra.mxu1 %vm225_vm1, %v3214_v61  ;;  %v11610_v61 = vld [vmem:[#allocation2 + $0x130] sm:$0x3] }
 0x126   : > { %14735 = vst [vmem:[#allocation37_spill] sm:$0xff] %v11591_v20  ;;  %v11600_v63 = vadd.f32 %v1012_v11, %v720_v3  ;;  %v1022_v36 = vpop.f32.mrf.mxu1  ;;  %9600 = vmatprep.mubr.msk.f32.mxu1 %vm225_vm1, %v3217_v12  ;;  %v3226_v20 = vrot.slane %v11597_v32, 1  ;;  %14738 = vst [vmem:[#allocation42_spill] sm:$0xff] %v11610_v61  ;;  %v11618_v12 = vld [vmem:[#allocation2 + $0x140] sm:$0xff] }
 0x127   : > { %v9249_v38 = vpop.f32.mrf.mxu0  ;;  %9548 = vmatmul.mubr.msk.f32.gmra.mxu0 %vm225_vm1, %v11534_v0 }
 0x128   : > { %14737 = vst [vmem:[#allocation40_spill] sm:$0xff] %v11600_v63  ;;  %v11612_v11 = vadd.f32 %v9299_v57, %v9249_v38  ;;  %9550 = vmatprep.mubr.msk.f32.mxu0 %vm225_vm1, %v11553_v18  ;;  %v9302_v47 = vpop.f32.mrf.mxu1  ;;  %v3224_v57 = vsel %vm443_vm3, %v3221_v42, %v3223_v35  ;;  %v3228_v38 = vrot.slane %v11610_v61, 1  ;;  %v3227_v63 = vsel %vm443_vm3, %v3225_v34, %v3226_v20  ;;  %v11639_v42 = vld [vmem:[#allocation2 + $0x150] sm:$0xff]  ;;  %v11641_v35 = vld [vmem:[#allocation2 + $0x158] sm:$0xff] }
 0x129   : > { %v730_v3 = vpop.f32.mrf.mxu0  ;;  %9601 = vmatmul.mubr.msk.f32.gmra.mxu1 %vm225_vm1, %v3219_v49  ;;  %v3231_v49 = vrot.slane %v11618_v12, 1 }
 0x12a   : > { %14739 = vst [vmem:[#allocation43_spill] sm:$0xff] %v11612_v11  ;;  %v11621_v5 = vadd.f32 %v1022_v36, %v730_v3  ;;  %v11623_v9 = vpop.f32.mrf.mxu1  ;;  %9603 = vmatprep.mubr.msk.f32.mxu1 %vm225_vm1, %v3222_v24  ;;  %v11633_v36 = vld [vmem:[#allocation2 + $0x148] sm:$0x3] }
 0x12b   : > { %14741 = vst [vmem:[#allocation46_spill] sm:$0xff] %v11623_v9  ;;  %v9252_v11 = vpop.f32.mrf.mxu0  ;;  %9551 = vmatmul.mubr.msk.f32.gmra.mxu0 %vm225_vm1, %v11555_v17  ;;  %14742 = vst [vmem:[#allocation48_spill] sm:$0xff] %v11633_v36  ;;  %v3229_v9 = vsel %vm443_vm3, %v3226_v20, %v3228_v38  ;;  %v11664_v38 = vld [vmem:[#allocation2 + $0x170] sm:$0xff] }
 0x12c   : > { %14740 = vst [vmem:[#allocation44_spill] sm:$0xff] %v11621_v5  ;;  %v11635_v3 = vadd.f32 %v9302_v47, %v9252_v11  ;;  %9553 = vmatprep.mubr.msk.f32.mxu0 %vm225_vm1, %v11574_v41  ;;  %v9305_v24 = vpop.f32.mrf.mxu1  ;;  %v3233_v11 = vrot.slane %v11633_v36, 1  ;;  %v3235_v5 = vrot.slane %v11639_v42, 1  ;;  %v11656_v41 = vld [vmem:[#allocation2 + $0x160] sm:$0x3] }
 0x12d   : > { %v11643_v61 = vpop.f32.mrf.mxu0  ;;  %9604 = vmatmul.mubr.msk.f32.gmra.mxu1 %vm225_vm1, %v3224_v57  ;;  %14746 = vst [vmem:[#allocation17_spill] sm:$0xff] %v11656_v41 }
 0x12e   : > { %14743 = vst [vmem:[#allocation50_spill] sm:$0xff] %v11635_v3  ;;  %14744 = vst [vmem:[#allocation6_spill] sm:$0xff] %v11643_v61  ;;  %v11646_v34 = vpop.f32.mrf.mxu1  ;;  %9606 = vmatprep.mubr.msk.f32.mxu1 %vm225_vm1, %v3227_v63  ;;  %v3232_v3 = vsel %vm443_vm3, %v3230_v56, %v3231_v49  ;;  %v3236_v61 = vrot.slane %v11641_v35, 1  ;;  %v11662_v63 = vld [vmem:[#allocation2 + $0x168] sm:$0xff]  ;;  %v3234_v36 = vsel %vm443_vm3, %v3231_v49, %v3233_v11 }
 0x12f   : > { %14745 = vst [vmem:[#allocation4_spill] sm:$0xff] %v11646_v34  ;;  %v9255_v47 = vpop.f32.mrf.mxu0  ;;  %9554 = vmatmul.mubr.msk.f32.gmra.mxu0 %vm225_vm1, %v11576_v59  ;;  %v11679_v59 = vld [vmem:[#allocation2 + $0x178] sm:$0x3] }
 0x130   : > { %v11658_v57 = vadd.f32 %v9305_v24, %v9255_v47  ;;  %9556 = vmatprep.mubr.msk.f32.mxu0 %vm225_vm1, %v11595_v15  ;;  %v9308_v20 = vpop.f32.mrf.mxu1  ;;  %v3238_v24 = vrot.slane %v11656_v41, 1  ;;  %v3240_v15 = vrot.slane %v11662_v63, 1  ;;  %14750 = vst [vmem:[#allocation9_spill] sm:$0xff] %v11679_v59 }
 0x131   : > { %v11666_v34 = vpop.f32.mrf.mxu0  ;;  %9607 = vmatmul.mubr.msk.f32.gmra.mxu1 %vm225_vm1, %v3229_v9 }
 0x132   : > { %14747 = vst [vmem:[#allocation8_spill] sm:$0xff] %v11658_v57  ;;  %14748 = vst [vmem:[#allocation5_spill] sm:$0xff] %v11666_v34  ;;  %v11669_v56 = vpop.f32.mrf.mxu1  ;;  %9609 = vmatprep.mubr.msk.f32.mxu1 %vm225_vm1, %v3232_v3  ;;  %v3237_v57 = vsel %vm443_vm3, %v3235_v5, %v3236_v61  ;;  %v3241_v34 = vrot.slane %v11664_v38, 1  ;;  %v3239_v5 = vsel %vm443_vm3, %v3236_v61, %v3238_v24 }
 0x133   : > { %14749 = vst [vmem:[#allocation18_spill] sm:$0xff] %v11669_v56  ;;  %v9258_v47 = vpop.f32.mrf.mxu0  ;;  %9557 = vmatmul.mubr.msk.f32.gmra.mxu0 %vm225_vm1, %v11597_v32  ;;  %v3243_v56 = vrot.slane %v11679_v59, 1 }
 0x134   : > { %v11681_v9 = vadd.f32 %v9308_v20, %v9258_v47  ;;  %9559 = vmatprep.mubr.msk.f32.mxu0 %vm225_vm1, %v11616_v8  ;;  %v9311_v49 = vpop.f32.mrf.mxu1  ;;  %v3242_v20 = vsel %vm443_vm3, %v3240_v15, %v3241_v34  ;;  %v11696_v47 = vld [vmem:[#allocation2 + $0x190] sm:$0x3] }
 0x135   : > { %v11685_v3 = vpop.f32.mrf.mxu0  ;;  %9610 = vmatmul.mubr.msk.f32.gmra.mxu1 %vm225_vm1, %v3234_v36  ;;  %14754 = vst [vmem:[#allocation10_spill] sm:$0xff] %v11696_v47  ;;  %v3244_v15 = vsel %vm443_vm3, %v3241_v34, %v3243_v56 }
 0x136   : > { %14751 = vst [vmem:[#allocation7_spill] sm:$0xff] %v11681_v9  ;;  %14752 = vst [vmem:[#allocation19_spill] sm:$0xff] %v11685_v3  ;;  %v11688_v11 = vpop.f32.mrf.mxu1  ;;  %9612 = vmatprep.mubr.msk.f32.mxu1 %vm225_vm1, %v3237_v57  ;;  %v11704_v57 = vld [vmem:[#allocation2 + $0x1a0] sm:$0xff] }
 0x137   : > { %14753 = vst [vmem:[#allocation12_spill] sm:$0xff] %v11688_v11  ;;  %v9261_v41 = vpop.f32.mrf.mxu0  ;;  %9560 = vmatmul.mubr.msk.f32.gmra.mxu0 %vm225_vm1, %v11618_v12  ;;  %v11702_v11 = vld [vmem:[#allocation2 + $0x198] sm:$0xff]  ;;  %v3251_v59 = vrot.slane %v11704_v57, 1 }
 0x138   : > { %v11698_v9 = vadd.f32 %v9311_v49, %v9261_v41  ;;  %9562 = vmatprep.mubr.msk.f32.mxu0 %vm225_vm1, %v11639_v42  ;;  %v9314_v36 = vpop.f32.mrf.mxu1  ;;  %v3248_v41 = vrot.slane %v11696_v47, 1  ;;  %v3250_v3 = vrot.slane %v11702_v11, 1 }
 0x139   : > { %v11706_v61 = vpop.f32.mrf.mxu0  ;;  %9613 = vmatmul.mubr.msk.f32.gmra.mxu1 %vm225_vm1, %v3239_v5 }
 0x13a   : > { %14755 = vst [vmem:[#allocation22_spill] sm:$0xff] %v11698_v9  ;;  %14756 = vst [vmem:[#allocation14_spill] sm:$0xff] %v11706_v61  ;;  %v11709_v24 = vpop.f32.mrf.mxu1  ;;  %9615 = vmatprep.mubr.msk.f32.mxu1 %vm225_vm1, %v3242_v20  ;;  %v11718_v9 = vld [vmem:[#allocation2 + $0x1a8] sm:$0x3]  ;;  %v3249_v56 = vsel %vm443_vm3, %v11391_v55, %v3248_v41  ;;  %v3582_v55 = vrot.slane %v11387_v4, 2  ;;  %v3586_v4 = vrot.slane %v11410_v37, 2 }
 0x13b   : > { %14757 = vst [vmem:[#allocation11_spill] sm:$0xff] %v11709_v24  ;;  %v9264_v49 = vpop.f32.mrf.mxu0  ;;  %9563 = vmatmul.mubr.msk.f32.gmra.mxu0 %vm225_vm1, %v11641_v35  ;;  %v3253_v24 = vrot.slane %v11718_v9, 1 }
 0x13c   : > { %v11720_v61 = vadd.f32 %v9314_v36, %v9264_v49  ;;  %9565 = vmatprep.mubr.msk.f32.mxu0 %vm225_vm1, %v11662_v63  ;;  %v9317_v5 = vpop.f32.mrf.mxu1  ;;  %v3252_v49 = vsel %vm443_vm3, %v3250_v3, %v3251_v59 }
 0x13d   : > { %v11724_v20 = vpop.f32.mrf.mxu0  ;;  %9616 = vmatmul.mubr.msk.f32.gmra.mxu1 %vm225_vm1, %v3244_v15  ;;  %v3254_v3 = vsel %vm443_vm3, %v3251_v59, %v3253_v24 }
 0x13e   : > { %14758 = vst [vmem:[#allocation31_spill] sm:$0xff] %v11724_v20  ;;  %v11727_v34 = vpop.f32.mrf.mxu1  ;;  %9618 = vmatprep.mubr.msk.f32.mxu1 %vm225_vm1, %v11417_v62 }
 0x13f   : > { %14759 = vst [vmem:[#allocation16_spill] sm:$0xff] %v11727_v34  ;;  %v9267_v36 = vpop.f32.mrf.mxu0  ;;  %9566 = vmatmul.mubr.msk.f32.gmra.mxu0 %vm225_vm1, %v11664_v38  ;;  %v3581_v34 = vrot.slane %v11385_v31, 2 }
 0x140   : > { %v11737_v47 = vadd.f32 %v9317_v5, %v9267_v36  ;;  %9568 = vmatprep.mubr.msk.f32.mxu0 %vm225_vm1, %v11216_v7  ;;  %v9320_v15 = vpop.f32.mrf.mxu1  ;;  %v3584_v36 = vrot.slane %v11404_v26, 2  ;;  %v3589_v26 = vrot.slane %v11426_v27, 2  ;;  %v3594_v27 = vrot.slane %v11444_v45, 2 }
 0x141   : > { %v11742_v62 = vpop.f32.mrf.mxu0  ;;  %9619 = vmatmul.mubr.msk.f32.gmra.mxu1 %vm225_vm1, %v3249_v56  ;;  %v3587_v56 = vrot.slane %v11412_v2, 2  ;;  %v3583_v59 = vsel %vm1111_vm4, %v3581_v34, %v3582_v55 }
 0x142   : > { %v11746_v41 = vpop.f32.mrf.mxu1  ;;  %9621 = vmatprep.mubr.msk.f32.mxu1 %vm225_vm1, %v3252_v49  ;;  %v3585_v37 = vsel %vm1111_vm4, %v3582_v55, %v3584_v36 }
 0x143   : > { %14760 = vst [vmem:[#allocation13_spill] sm:$0xff] %v11746_v41  ;;  %v9270_v5 = vpop.f32.mrf.mxu0  ;;  %9569 = vmatmul.mubr.msk.f32.gmra.mxu0 %vm225_vm1, %v11224_v14  ;;  %v3590_v55 = vsel %vm1111_vm4, %v3587_v56, %v3589_v26 }
 0x144   : > { %v11753_v20 = vadd.f32 %v9320_v15, %v9270_v5  ;;  %9571 = vmatprep.mubr.msk.f32.mxu0 %vm225_vm1, %v11702_v11  ;;  %v9323_v31 = vpop.f32.mrf.mxu1  ;;  %v3591_v15 = vrot.slane %v11432_v29, 2  ;;  %v3588_v5 = vsel %vm1111_vm4, %v3586_v4, %v3587_v56  ;;  %v3596_v29 = vrot.slane %v11448_v54, 2 }
 0x145   : > { %v11759_v41 = vpop.f32.mrf.mxu0  ;;  %9622 = vmatmul.mubr.msk.f32.gmra.mxu1 %vm225_vm1, %v3254_v3  ;;  %v3592_v3 = vrot.slane %v11434_v39, 2  ;;  %v3597_v39 = vrot.slane %v11450_v46, 2  ;;  %v3601_v56 = vrot.slane %v11471_v52, 2 }
 0x146   : > { %14761 = vst [vmem:[#allocation32_spill] sm:$0xff] %v11759_v41  ;;  %v11763_v24 = vpop.f32.mrf.mxu1 }
 0x147   : > { %14762 = vst [vmem:[#allocation27_spill] sm:$0xff] %v11763_v24  ;;  %v9273_v14 = vpop.f32.mrf.mxu0  ;;  %9572 = vmatmul.mubr.msk.f32.gmra.mxu0 %vm225_vm1, %v11704_v57  ;;  %v3593_v4 = vsel %vm1111_vm4, %v3591_v15, %v3592_v3  ;;  %v3595_v46 = vsel %vm1111_vm4, %v3592_v3, %v3594_v27  ;;  %v3598_v15 = vsel %vm1111_vm4, %v3596_v29, %v3597_v39  ;;  %v3604_v3 = vrot.slane %v11484_v21, 2 }
 0x148   : > { %v11768_v49 = vadd.f32 %v9323_v31, %v9273_v14  ;;  %9626 = vmatprep.mubr.msk.f32.mxu0 %vm225_vm1, %v3583_v59  ;;  %v9378_v2 = vpop.f32.mrf.mxu1  ;;  %v3606_v27 = vrot.slane %v11490_v33, 2 }
 0x149   : > { %v11774_v34 = vpop.f32.mrf.mxu0 }
 0x14a   : > { %v11777_v24 = vpop.f32.mrf.mxu1 }
 0x14b   : > { %v9328_v41 = vpop.f32.mrf.mxu0  ;;  %9627 = vmatmul.mubr.msk.f32.vlgmr.msra.gmra.mxu0 %vm225_vm1, %v3585_v37 }
 0x14c   : > { %v1487_v31 = vadd.f32 %v9328_v41, %v11453_v60  ;;  %9629 = vmatprep.mubr.msk.f32.mxu0 %vm225_vm1, %v3588_v5  ;;  %v3599_v41 = vrot.slane %v11463_v53, 2 }
 0x14d   : > { %v1327_v36 = vpop.f32.mrf.mxu0  ;;  %v9381_v59 = vpop.f32.mrf.mxu1 }
 0x14e   : > { %v11788_v14 = vadd.f32 %v1327_v36, %v11465_v19  ;;  %v11790_v37 = vadd.f32 %v9378_v2, %v1487_v31  ;;  %v3602_v19 = vrot.slane %v11473_v6, 2  ;;  %v3600_v6 = vsel %vm1111_vm4, %v3597_v39, %v3599_v41 }
 0x14f   : > { %v9331_v45 = vpop.f32.mrf.mxu0  ;;  %9630 = vmatmul.mubr.msk.f32.gmra.mxu0 %vm225_vm1, %v3590_v55  ;;  %v11793_v60 = vpop.f32.mrf.mxu1  ;;  %v3609_v39 = vrot.slane %v11505_v10, 2 }
 0x150   : > { %v1489_v54 = vadd.f32 %v9331_v45, %v11486_v16  ;;  %9632 = vmatprep.mubr.msk.f32.mxu0 %vm225_vm1, %v3593_v4  ;;  %v3603_v36 = vsel %vm1111_vm4, %v3601_v56, %v3602_v19  ;;  %v3611_v45 = vrot.slane %v11511_v44, 2 }
 0x151   : > { %v1337_v26 = vpop.f32.mrf.mxu0  ;;  %v9384_v2 = vpop.f32.mrf.mxu1 }
 0x152   : > { %v11803_v5 = vadd.f32 %v1337_v26, %v11495_v13  ;;  %v11805_v31 = vadd.f32 %v9381_v59, %v1489_v54  ;;  %v3607_v13 = vrot.slane %v11492_v50, 2  ;;  %v3605_v50 = vsel %vm1111_vm4, %v3602_v19, %v3604_v3 }
 0x153   : > { %v9334_v53 = vpop.f32.mrf.mxu0  ;;  %9633 = vmatmul.mubr.msk.f32.gmra.mxu0 %vm225_vm1, %v3595_v46  ;;  %v11808_v16 = vpop.f32.mrf.mxu1  ;;  %v3614_v19 = vrot.slane %v11526_v51, 2 }
 0x154   : > { %v1491_v52 = vadd.f32 %v9334_v53, %v11507_v40  ;;  %9635 = vmatprep.mubr.msk.f32.mxu0 %vm225_vm1, %v3598_v15  ;;  %v3608_v46 = vsel %vm1111_vm4, %v3606_v27, %v3607_v13  ;;  %v3617_v15 = vrot.slane %v11534_v0, 2 }
 0x155   : > { %v1347_v55 = vpop.f32.mrf.mxu0  ;;  %v9387_v29 = vpop.f32.mrf.mxu1 }
 0x156   : > { %v11818_v59 = vadd.f32 %v1347_v55, %v11516_v22  ;;  %v11820_v4 = vadd.f32 %v9384_v2, %v1491_v52  ;;  %v3612_v22 = vrot.slane %v11513_v58, 2  ;;  %v3610_v58 = vsel %vm1111_vm4, %v3607_v13, %v3609_v39  ;;  %v14763_v39 = vld [vmem:[#allocation21_spill] sm:$0xff] }
 0x157   : > { %v9337_v21 = vpop.f32.mrf.mxu0  ;;  %9636 = vmatmul.mubr.msk.f32.gmra.mxu0 %vm225_vm1, %v3600_v6  ;;  %v11823_v40 = vpop.f32.mrf.mxu1  ;;  %v3616_v2 = vrot.slane %v11532_v43, 2  ;;  %v3619_v43 = vrot.slane %v11547_v23, 2 }
 0x158   : > { %v1493_v33 = vadd.f32 %v9337_v21, %v11528_v1  ;;  %9638 = vmatprep.mubr.msk.f32.mxu0 %vm225_vm1, %v3603_v36  ;;  %v3613_v52 = vsel %vm1111_vm4, %v3611_v45, %v3612_v22  ;;  %v3615_v13 = vsel %vm1111_vm4, %v3612_v22, %v3614_v19  ;;  %v3622_v21 = vrot.slane %v11555_v17, 2  ;;  %v14764_v45 = vld [vmem:[#allocation37_spill] sm:$0xff] }
 0x159   : > { %v1357_v41 = vpop.f32.mrf.mxu0  ;;  %v9390_v54 = vpop.f32.mrf.mxu1  ;;  %v3618_v36 = vsel %vm1111_vm4, %v3616_v2, %v3617_v15  ;;  %v14768_v2 = vld [vmem:[#allocation40_spill] sm:$0xff] }
 0x15a   : > { %v11833_v56 = vadd.f32 %v1357_v41, %v11537_v28  ;;  %v11835_v26 = vadd.f32 %v9387_v29, %v1493_v33  ;;  %v8320_v28 = vld [vmem:[%s14536_s3 + $0x4] sm:$0xf] }
 0x15b   : > { %v9340_v10 = vpop.f32.mrf.mxu0  ;;  %9639 = vmatmul.mubr.msk.f32.gmra.mxu0 %vm225_vm1, %v3605_v50  ;;  %v11838_v1 = vpop.f32.mrf.mxu1  ;;  %9674 = vmatprep.subr.msk.mxu1 %vm590_vm0, %v8320_v28  ;;  %v14765_v41 = vld [vmem:[#allocation20_spill] sm:$0xff] }
 0x15c   : > { %v1495_v44 = vadd.f32 %v9340_v10, %v11549_v30  ;;  %9641 = vmatprep.mubr.msk.f32.mxu0 %vm225_vm1, %v3608_v46  ;;  %9675 = vmatpush3.msk.msra.mxu1 %vm590_vm0, %v8320_v28  ;;  %v14766_v46 = vld [vmem:[#allocation34_spill] sm:$0xff] }
 0x15d   : > { %v1367_v53 = vpop.f32.mrf.mxu0  ;;  %v9393_v3 = vpop.f32.mrf.mxu1  ;;  %v3626_v17 = vrot.slane %v14766_v46, 2 }
 0x15e   : > { %v11852_v51 = vadd.f32 %v1367_v53, %v11558_v48  ;;  %v11854_v30 = vadd.f32 %v9390_v54, %v1495_v44  ;;  %v3621_v48 = vrot.slane %v11553_v18, 2  ;;  %v3620_v18 = vsel %vm1111_vm4, %v3617_v15, %v3619_v43  ;;  %v14769_v15 = vld [vmem:[#allocation43_spill] sm:$0xff] }
 0x15f   : > { %v9343_v6 = vpop.f32.mrf.mxu0  ;;  %9642 = vmatmul.mubr.msk.f32.gmra.mxu0 %vm225_vm1, %v3610_v58  ;;  %v11858_v27 = vpop.f32.mrf.mxu1  ;;  %v3624_v54 = vrot.slane %v14765_v41, 2  ;;  %v14767_v58 = vld [vmem:[#allocation36_spill] sm:$0xff] }
 0x160   : > { %v1497_v0 = vadd.f32 %v9343_v6, %v11570_v25  ;;  %9644 = vmatprep.mubr.msk.f32.mxu0 %vm225_vm1, %v3613_v52  ;;  %v3623_v44 = vsel %vm1111_vm4, %v3621_v48, %v3622_v21  ;;  %v3627_v28 = vrot.slane %v14767_v58, 2  ;;  %v14775_v58 = vld [vmem:[#allocation50_spill] sm:$0xff] }
 0x161   : > { %v1377_v55 = vpop.f32.mrf.mxu0  ;;  %v9396_v29 = vpop.f32.mrf.mxu1 }
 0x162   : > { %v11868_v33 = vadd.f32 %v1377_v55, %v14763_v39  ;;  %v11870_v50 = vadd.f32 %v9393_v3, %v1497_v0  ;;  %v3625_v0 = vsel %vm1111_vm4, %v3622_v21, %v3624_v54  ;;  %v14771_v55 = vld [vmem:[#allocation39_spill] sm:$0xff]  ;;  %v14773_v21 = vld [vmem:[#allocation6_spill] sm:$0xff] }
 0x163   : > { %v9346_v23 = vpop.f32.mrf.mxu0  ;;  %9645 = vmatmul.mubr.msk.f32.gmra.mxu0 %vm225_vm1, %v3615_v13  ;;  %v11873_v25 = vpop.f32.mrf.mxu1  ;;  %v14770_v13 = vld [vmem:[#allocation23_spill] sm:$0xff]  ;;  %v14774_v54 = vld [vmem:[#allocation46_spill] sm:$0xff] }
 0x164   : > { %v1499_v22 = vadd.f32 %v9346_v23, %v14764_v45  ;;  %9647 = vmatprep.mubr.msk.f32.mxu0 %vm225_vm1, %v3618_v36  ;;  %v3629_v48 = vrot.slane %v14770_v13, 2  ;;  %v3631_v36 = vrot.slane %v14771_v55, 2  ;;  %v3632_v45 = vrot.slane %v11597_v32, 2  ;;  %v14776_v32 = vld [vmem:[#allocation42_spill] sm:$0xff] }
 0x165   : > { %v1387_v10 = vpop.f32.mrf.mxu0  ;;  %v9399_v19 = vpop.f32.mrf.mxu1 }
 0x166   : > { %v11883_v53 = vadd.f32 %v1387_v10, %v14768_v2  ;;  %v11885_v3 = vadd.f32 %v9396_v29, %v1499_v22  ;;  %v3628_v29 = vsel %vm1111_vm4, %v3626_v17, %v3627_v28  ;;  %v14772_v22 = vld [vmem:[#allocation44_spill] sm:$0xff]  ;;  %v3630_v17 = vsel %vm1111_vm4, %v3627_v28, %v3629_v48 }
 0x167   : > { %v9349_v52 = vpop.f32.mrf.mxu0  ;;  %9648 = vmatmul.mubr.msk.f32.gmra.mxu0 %vm225_vm1, %v3620_v18  ;;  %v11888_v6 = vpop.f32.mrf.mxu1  ;;  %v3633_v13 = vsel %vm1111_vm4, %v3631_v36, %v3632_v45  ;;  %v14777_v28 = vld [vmem:[#allocation8_spill] sm:$0xff]  ;;  %v3641_v36 = vrot.slane %v11639_v42, 2 }
 0x168   : > { %v1501_v43 = vadd.f32 %v9349_v52, %v14769_v15  ;;  %9650 = vmatprep.mubr.msk.f32.mxu0 %vm225_vm1, %v3623_v44  ;;  %v1033_v44 = vadd.f32 %v14774_v54, %v14773_v21  ;;  %v3634_v52 = vrot.slane %v14776_v32, 2  ;;  %v3636_v15 = vrot.slane %v11616_v8, 2  ;;  %v14779_v32 = vld [vmem:[#allocation7_spill] sm:$0xff] }
 0x169   : > { %v1397_v39 = vpop.f32.mrf.mxu0  ;;  %v9402_v23 = vpop.f32.mrf.mxu1 }
 0x16a   : > { %v11898_v18 = vadd.f32 %v1397_v39, %v14772_v22  ;;  %v11900_v41 = vadd.f32 %v9399_v19, %v1501_v43  ;;  %v3635_v8 = vsel %vm1111_vm4, %v3632_v45, %v3634_v52  ;;  %v14780_v52 = vld [vmem:[#allocation17_spill] sm:$0xff] }
 0x16b   : > { %v9352_v46 = vpop.f32.mrf.mxu0  ;;  %9651 = vmatmul.mubr.msk.f32.gmra.mxu0 %vm225_vm1, %v3625_v0  ;;  %v11903_v10 = vpop.f32.mrf.mxu1  ;;  %v3637_v0 = vrot.slane %v11618_v12, 2 }
 0x16c   : > { %v1503_v2 = vadd.f32 %v9352_v46, %v14775_v58  ;;  %9653 = vmatprep.mubr.msk.f32.mxu0 %vm225_vm1, %v3628_v29  ;;  %v14778_v46 = vld [vmem:[#allocation48_spill] sm:$0xff] }
 0x16d   : > { %v1407_v19 = vpop.f32.mrf.mxu0  ;;  %v9405_v43 = vpop.f32.mrf.mxu1  ;;  %v3639_v21 = vrot.slane %v14778_v46, 2  ;;  %v14781_v46 = vld [vmem:[#allocation22_spill] sm:$0xff] }
 0x16e   : > { %v11914_v55 = vadd.f32 %v1407_v19, %v1033_v44  ;;  %v11916_v39 = vadd.f32 %v9402_v23, %v1503_v2  ;;  %v3638_v23 = vsel %vm1111_vm4, %v3636_v15, %v3637_v0  ;;  %v3642_v44 = vrot.slane %v11641_v35, 2 }
 0x16f   : > { %v9355_v22 = vpop.f32.mrf.mxu0  ;;  %9654 = vmatmul.mubr.msk.f32.gmra.mxu0 %vm225_vm1, %v3630_v17  ;;  %v11919_v29 = vpop.f32.mrf.mxu1  ;;  %v3640_v42 = vsel %vm1111_vm4, %v3637_v0, %v3639_v21  ;;  %v3644_v19 = vrot.slane %v14780_v52, 2  ;;  %v14782_v21 = vld [vmem:[#allocation9_spill] sm:$0xff] }
 0x170   : > { %v1505_v48 = vadd.f32 %v9355_v22, %v14777_v28  ;;  %9656 = vmatprep.mubr.msk.f32.mxu0 %vm225_vm1, %v3633_v13  ;;  %v3646_v13 = vrot.slane %v11662_v63, 2  ;;  %v3647_v22 = vrot.slane %v11664_v38, 2 }
 0x171   : > { %v11926_v12 = vpop.f32.mrf.mxu0  ;;  %v9408_v54 = vpop.f32.mrf.mxu1  ;;  %v3645_v63 = vsel %vm1111_vm4, %v3642_v44, %v3644_v19  ;;  %v14784_v19 = vld [vmem:[#allocation10_spill] sm:$0xff] }
 0x172   : > { %v11930_v58 = vadd.f32 %v9405_v43, %v1505_v48  ;;  %v3643_v43 = vsel %vm1111_vm4, %v3641_v36, %v3642_v44  ;;  %v3648_v38 = vsel %vm1111_vm4, %v3646_v13, %v3647_v22 }
 0x173   : > { %v9358_v2 = vpop.f32.mrf.mxu0  ;;  %9657 = vmatmul.mubr.msk.f32.gmra.mxu0 %vm225_vm1, %v3635_v8  ;;  %v11933_v17 = vpop.f32.mrf.mxu1 }
 0x174   : > { %v1507_v45 = vadd.f32 %v9358_v2, %v14779_v32  ;;  %9659 = vmatprep.mubr.msk.f32.mxu0 %vm225_vm1, %v3638_v23  ;;  %v3649_v23 = vrot.slane %v14782_v21, 2 }
 0x175   : > { %v11940_v15 = vpop.f32.mrf.mxu0  ;;  %v9411_v35 = vpop.f32.mrf.mxu1 }
 0x176   : > { %v11944_v28 = vadd.f32 %v9408_v54, %v1507_v45  ;;  %v10133_v54 = vld [vmem:[#allocation2 + $0x188] sm:$0xff]  ;;  %v3650_v44 = vsel %vm1111_vm4, %v3647_v22, %v3649_v23  ;;  %v3659_v23 = vrot.slane %v11718_v9, 2 }
 0x177   : > { %v9361_v48 = vpop.f32.mrf.mxu0  ;;  %9660 = vmatmul.mubr.msk.f32.gmra.mxu0 %vm225_vm1, %v3640_v42  ;;  %v11947_v8 = vpop.f32.mrf.mxu1  ;;  %v3652_v32 = vrot.slane %v10133_v54, 2 }
 0x178   : > { %v1509_v0 = vadd.f32 %v9361_v48, %v14781_v46  ;;  %9662 = vmatprep.mubr.msk.f32.mxu0 %vm225_vm1, %v3643_v43  ;;  %v3654_v48 = vrot.slane %v14784_v19, 2  ;;  %v3656_v46 = vrot.slane %v11702_v11, 2 }
 0x179   : > { %v11953_v2 = vpop.f32.mrf.mxu0  ;;  %v9414_v36 = vpop.f32.mrf.mxu1 }
 0x17a   : > { %v11956_v45 = vadd.f32 %v9411_v35, %v1509_v0  ;;  %v14785_v35 = vrot.slane %v11216_v7, 2  ;;  %v3655_v11 = vsel %vm1111_vm4, %v3652_v32, %v3654_v48 }
 0x17b   : > { %v9364_v42 = vpop.f32.mrf.mxu0  ;;  %9663 = vmatmul.mubr.msk.f32.gmra.mxu0 %vm225_vm1, %v3645_v63  ;;  %v11959_v52 = vpop.f32.mrf.mxu1  ;;  %v3657_v63 = vrot.slane %v11704_v57, 2 }
 0x17c   : > { %14783 = vst [vmem:[#allocation15_spill] sm:$0xff] %v11959_v52  ;;  %v1511_v43 = vadd.f32 %v9364_v42, %v11720_v61  ;;  %9665 = vmatprep.mubr.msk.f32.mxu0 %vm225_vm1, %v3648_v38  ;;  %v3653_v0 = vsel %vm1111_vm4, %v14785_v35, %v3652_v32 }
 0x17d   : > { %v11966_v13 = vpop.f32.mrf.mxu0  ;;  %v9417_v21 = vpop.f32.mrf.mxu1  ;;  %v3658_v57 = vsel %vm1111_vm4, %v3656_v46, %v3657_v63  ;;  %v3660_v32 = vsel %vm1111_vm4, %v3657_v63, %v3659_v23 }
 0x17e   : > { %v11972_v54 = vadd.f32 %v9414_v36, %v1511_v43 }
 0x17f   : > { %v9367_v61 = vpop.f32.mrf.mxu0  ;;  %9666 = vmatmul.mubr.msk.f32.gmra.mxu0 %vm225_vm1, %v3650_v44  ;;  %v11975_v38 = vpop.f32.mrf.mxu1 }
 0x180   : > { %14786 = vst [vmem:[#allocation33_spill] sm:$0xff] %v11975_v38  ;;  %v1513_v22 = vadd.f32 %v9367_v61, %v11737_v47  ;;  %9668 = vmatprep.mubr.msk.f32.mxu0 %vm225_vm1, %v3653_v0 }
 0x181   : > { %v11981_v7 = vpop.f32.mrf.mxu0  ;;  %v9420_v42 = vpop.f32.mrf.mxu1 }
 0x182   : > { %v11984_v36 = vadd.f32 %v9417_v21, %v1513_v22 }
 0x183   : > { %v9370_v43 = vpop.f32.mrf.mxu0  ;;  %9669 = vmatmul.mubr.msk.f32.gmra.mxu0 %vm225_vm1, %v3655_v11  ;;  %v11987_v44 = vpop.f32.mrf.mxu1 }
 0x184   : > { %14787 = vst [vmem:[#allocation28_spill] sm:$0xff] %v11987_v44  ;;  %v1515_v47 = vadd.f32 %v9370_v43, %v11753_v20  ;;  %9671 = vmatprep.mubr.msk.f32.mxu0 %vm225_vm1, %v3658_v57  ;;  %v4146_v44 = vld [vmem:[#allocation3 + $0x8] sm:$0xff] }
 0x185   : > { %v11992_v19 = vpop.f32.mrf.mxu0  ;;  %v9423_v9 = vpop.f32.mrf.mxu1 }
 0x186   : > { %v11994_v48 = vadd.f32 %v9420_v42, %v1515_v47 }
 0x187   : > { %v9373_v35 = vpop.f32.mrf.mxu0  ;;  %9672 = vmatmul.mubr.msk.f32.gmra.mxu0 %vm225_vm1, %v3660_v32  ;;  %v11997_v46 = vpop.f32.mrf.mxu1 }
 0x188   : > { %14788 = vst [vmem:[#allocation24_spill] sm:$0xff] %v11997_v46  ;;  %v1517_v21 = vadd.f32 %v9373_v35, %v11768_v49  ;;  %v4145_v46 = vld [vmem:[#allocation3] sm:$0xff] }
 0x189   : > { %v12000_v0 = vpop.f32.mrf.mxu0  ;;  %v12002_v61 = vpop.f32.mrf.mxu1  ;;  %9726 = vmatprep.mubr.msk.f32.mxu0 %vm225_vm1, %v4145_v46 }
 0x18a   : > { %v12004_v20 = vadd.f32 %v9423_v9, %v1517_v21 }
 0x18b   : > { %v9428_v22 = vpop.f32.mrf.mxu0  ;;  %v12006_v63 = vpop.f32.mrf.mxu1 }
 0x18c   : > { %v12009_v11 = vadd.f32 %v9428_v22, %v11790_v37 }
 0x18d   : > { %v12011_v23 = vpop.f32.mrf.mxu0  ;;  %v12013_v42 = vpop.f32.mrf.mxu1 }
 0x18f   : > { %v9431_v57 = vpop.f32.mrf.mxu0  ;;  %v12015_v43 = vpop.f32.mrf.mxu1 }
 0x190   : > { %14789 = vst [vmem:[#allocation35_spill] sm:$0xff] %v12015_v43  ;;  %v12018_v49 = vadd.f32 %v9431_v57, %v11805_v31  ;;  %v4193_v31 = vld [vmem:[%s14536_s3] sm:$0xf]  ;;  %v4242_v57 = vrot.slane %v4145_v46, 1 }
 0x191   : > { %v12020_v47 = vpop.f32.mrf.mxu0  ;;  %v12022_v32 = vpop.f32.mrf.mxu1  ;;  %v4147_v43 = vld [vmem:[#allocation3 + $0x10] sm:$0x3]  ;;  %9724 = vmatprep.subr.msk.mxu0 %vm590_vm0, %v4193_v31 }
 0x192   : > { %14790 = vst [vmem:[#allocation29_spill] sm:$0xff] %v12022_v32  ;;  %v4243_v32 = vrot.slane %v4146_v44, 1  ;;  %9725 = vmatpush3.msk.msra.mxu0 %vm590_vm0, %v4193_v31 }
 0x193   : > { %v9434_v9 = vpop.f32.mrf.mxu0  ;;  %v12024_v35 = vpop.f32.mrf.mxu1  ;;  %9727 = vmatmul.mubr.msk.f32.vlgmr.msra.gmra.mxu0 %vm225_vm1, %v4146_v44 }
 0x194   : > { %14791 = vst [vmem:[#allocation25_spill] sm:$0xff] %v12024_v35  ;;  %v12027_v37 = vadd.f32 %v9434_v9, %v11820_v4  ;;  %v4245_v4 = vrot.slane %v4147_v43, 1 }
 0x195   : > { %v12029_v21 = vpop.f32.mrf.mxu0  ;;  %v12031_v22 = vpop.f32.mrf.mxu1 }
 0x196   : > { %14792 = vst [vmem:[#allocation38_spill] sm:$0xff] %v12027_v37  ;;  %14793 = vst [vmem:[#allocation30_spill] sm:$0xff] %v12031_v22  ;;  %v4244_v22 = vsel %vm443_vm3, %v4242_v57, %v4243_v32  ;;  %v4246_v46 = vsel %vm443_vm3, %v4243_v32, %v4245_v4  ;;  %v8387_v4 = vld [vmem:[%s14536_s3 + $0x8] sm:$0xf] }
 0x197   : > { %v9437_v38 = vpop.f32.mrf.mxu0  ;;  %v12037_v35 = vpop.f32.mrf.mxu1  ;;  %9676 = vmatprep.mubr.msk.f32.mxu1 %vm225_vm1, %v4244_v22  ;;  %9774 = vmatprep.subr.msk.mxu1 %vm590_vm0, %v8387_v4 }
 0x198   : > { %14794 = vst [vmem:[#allocation26_spill] sm:$0xff] %v12037_v35  ;;  %v12041_v9 = vadd.f32 %v9437_v38, %v11835_v26  ;;  %9677 = vmatmul.mubr.msk.f32.vlgmr.msra.gmra.mxu1 %vm225_vm1, %v4246_v46 }
 0x199   : > { %v12045_v37 = vpop.f32.mrf.mxu0  ;;  %v12047_v52 = vpop.f32.mrf.mxu1  ;;  %9775 = vmatpush3.msk.msra.mxu1 %vm590_vm0, %v8387_v4 }
 0x19a   : > { %14795 = vst [vmem:[#allocation41_spill] sm:$0xff] %v12047_v52 }
 0x19b   : > { %v9440_v43 = vpop.f32.mrf.mxu0  ;;  %v12053_v35 = vpop.f32.mrf.mxu1 }
 0x19c   : > { %14796 = vst [vmem:[#allocation45_spill] sm:$0xff] %v12053_v35  ;;  %v12056_v26 = vadd.f32 %v9440_v43, %v11854_v30 }
 0x19d   : > { %v12058_v38 = vpop.f32.mrf.mxu0  ;;  %v12060_v31 = vpop.f32.mrf.mxu1 }
 0x19e   : > { %14797 = vst [vmem:[#allocation52_spill] sm:$0xff] %v12056_v26  ;;  %14798 = vst [vmem:[#allocation47_spill] sm:$0xff] %v12060_v31 }
 0x19f   : > { %v9443_v57 = vpop.f32.mrf.mxu0  ;;  %v12062_v52 = vpop.f32.mrf.mxu1 }
 0x1a0   : > { %14799 = vst [vmem:[#allocation49_spill] sm:$0xff] %v12062_v52  ;;  %v12065_v22 = vadd.f32 %v9443_v57, %v11870_v50 }
 0x1a1   : > { %v12067_v44 = vpop.f32.mrf.mxu0  ;;  %v12069_v32 = vpop.f32.mrf.mxu1 }
 0x1a2   : > { %14800 = vst [vmem:[#allocation51_spill] sm:$0xff] %v12065_v22  ;;  %14801 = vst [vmem:[#allocation21_spill] sm:$0xff] %v12069_v32 }
 0x1a3   : > { %v9446_v30 = vpop.f32.mrf.mxu0  ;;  %v12074_v46 = vpop.f32.mrf.mxu1 }
 0x1a4   : > { %14802 = vst [vmem:[#allocation37_spill] sm:$0xff] %v12074_v46  ;;  %v12078_v43 = vadd.f32 %v9446_v30, %v11885_v3 }
 0x1a5   : > { %v12081_v50 = vpop.f32.mrf.mxu0  ;;  %v12083_v57 = vpop.f32.mrf.mxu1 }
 0x1a6   : > { %14803 = vst [vmem:[#allocation20_spill] sm:$0xff] %v12078_v43  ;;  %14804 = vst [vmem:[#allocation34_spill] sm:$0xff] %v12081_v50 }
 0x1a7   : > { %14805 = vst [vmem:[#allocation36_spill] sm:$0xff] %v12083_v57  ;;  %v9449_v52 = vpop.f32.mrf.mxu0  ;;  %v12085_v32 = vpop.f32.mrf.mxu1 }
 0x1a8   : > { %14806 = vst [vmem:[#allocation40_spill] sm:$0xff] %v12085_v32  ;;  %v12088_v31 = vadd.f32 %v9449_v52, %v11900_v41 }
 0x1a9   : > { %v12090_v22 = vpop.f32.mrf.mxu0  ;;  %v12092_v46 = vpop.f32.mrf.mxu1 }
 0x1aa   : > { %14807 = vst [vmem:[#allocation43_spill] sm:$0xff] %v12088_v31  ;;  %14808 = vst [vmem:[#allocation23_spill] sm:$0xff] %v12090_v22  ;;  %v14881_v22 = vld [vmem:[#allocation18_spill] sm:$0xff] }
 0x1ab   : > { %14809 = vst [vmem:[#allocation39_spill] sm:$0xff] %v12092_v46  ;;  %v9452_v35 = vpop.f32.mrf.mxu0  ;;  %v12094_v26 = vpop.f32.mrf.mxu1 }
 0x1ac   : > { %14810 = vst [vmem:[#allocation44_spill] sm:$0xff] %v12094_v26  ;;  %v12097_v3 = vadd.f32 %v9452_v35, %v11916_v39 }
 0x1ad   : > { %v12099_v4 = vpop.f32.mrf.mxu0  ;;  %v12101_v30 = vpop.f32.mrf.mxu1 }
 0x1ae   : > { %14811 = vst [vmem:[#allocation6_spill] sm:$0xff] %v12097_v3  ;;  %14812 = vst [vmem:[#allocation46_spill] sm:$0xff] %v12099_v4 }
 0x1af   : > { %14813 = vst [vmem:[#allocation50_spill] sm:$0xff] %v12101_v30  ;;  %v9455_v57 = vpop.f32.mrf.mxu0  ;;  %v12103_v43 = vpop.f32.mrf.mxu1 }
 0x1b0   : > { %14814 = vst [vmem:[#allocation42_spill] sm:$0xff] %v12103_v43  ;;  %v12106_v41 = vadd.f32 %v9455_v57, %v11930_v58 }
 0x1b1   : > { %v12108_v52 = vpop.f32.mrf.mxu0  ;;  %v12110_v32 = vpop.f32.mrf.mxu1 }
 0x1b2   : > { %14815 = vst [vmem:[#allocation8_spill] sm:$0xff] %v12106_v41  ;;  %14816 = vst [vmem:[#allocation48_spill] sm:$0xff] %v12108_v52 }
 0x1b3   : > { %14817 = vst [vmem:[#allocation7_spill] sm:$0xff] %v12110_v32  ;;  %v9458_v46 = vpop.f32.mrf.mxu0  ;;  %v12112_v31 = vpop.f32.mrf.mxu1 }
 0x1b4   : > { %14818 = vst [vmem:[#allocation17_spill] sm:$0xff] %v12112_v31  ;;  %v12115_v39 = vadd.f32 %v9458_v46, %v11944_v28 }
 0x1b5   : > { %v12117_v35 = vpop.f32.mrf.mxu0  ;;  %v12119_v26 = vpop.f32.mrf.mxu1 }
 0x1b6   : > { %14819 = vst [vmem:[#allocation22_spill] sm:$0xff] %v12115_v39  ;;  %14820 = vst [vmem:[#allocation9_spill] sm:$0xff] %v12117_v35 }
 0x1b7   : > { %14821 = vst [vmem:[#allocation10_spill] sm:$0xff] %v12119_v26  ;;  %v9461_v30 = vpop.f32.mrf.mxu0  ;;  %v12121_v3 = vpop.f32.mrf.mxu1 }
 0x1b8   : > { %14822 = vst [vmem:[#allocation53_spill] sm:$0xff] %v12121_v3  ;;  %v12124_v58 = vadd.f32 %v9461_v30, %v11956_v45 }
 0x1b9   : > { %v12126_v57 = vpop.f32.mrf.mxu0  ;;  %v12128_v43 = vpop.f32.mrf.mxu1 }
 0x1ba   : > { %14823 = vst [vmem:[#allocation54_spill] sm:$0xff] %v12124_v58  ;;  %14824 = vst [vmem:[#allocation55_spill] sm:$0xff] %v12126_v57 }
 0x1bb   : > { %14825 = vst [vmem:[#allocation56_spill] sm:$0xff] %v12128_v43  ;;  %v9464_v32 = vpop.f32.mrf.mxu0  ;;  %v12130_v41 = vpop.f32.mrf.mxu1 }
 0x1bc   : > { %14826 = vst [vmem:[#allocation57_spill] sm:$0xff] %v12130_v41  ;;  %v12133_v28 = vadd.f32 %v9464_v32, %v11972_v54 }
 0x1bd   : > { %v12135_v46 = vpop.f32.mrf.mxu0  ;;  %v12137_v31 = vpop.f32.mrf.mxu1 }
 0x1be   : > { %14827 = vst [vmem:[#allocation58_spill] sm:$0xff] %v12133_v28  ;;  %14828 = vst [vmem:[#allocation59_spill] sm:$0xff] %v12135_v46 }
 0x1bf   : > { %14829 = vst [vmem:[#allocation60_spill] sm:$0xff] %v12137_v31  ;;  %v9467_v26 = vpop.f32.mrf.mxu0  ;;  %v12139_v39 = vpop.f32.mrf.mxu1 }
 0x1c0   : > { %14830 = vst [vmem:[#allocation61_spill] sm:$0xff] %v12139_v39  ;;  %v12142_v45 = vadd.f32 %v9467_v26, %v11984_v36 }
 0x1c1   : > { %v12144_v30 = vpop.f32.mrf.mxu0  ;;  %v12146_v3 = vpop.f32.mrf.mxu1 }
 0x1c2   : > { %14831 = vst [vmem:[#allocation62_spill] sm:$0xff] %v12142_v45  ;;  %14832 = vst [vmem:[#allocation63_spill] sm:$0xff] %v12144_v30  ;;  %v8455_v30 = vld [vmem:[%s14536_s3 + $0x10] sm:$0xf] }
 0x1c3   : > { %14833 = vst [vmem:[#allocation64_spill] sm:$0xff] %v12146_v3  ;;  %v9470_v43 = vpop.f32.mrf.mxu0  ;;  %v12148_v58 = vpop.f32.mrf.mxu1  ;;  %9874 = vmatprep.subr.msk.mxu1 %vm590_vm0, %v8455_v30 }
 0x1c4   : > { %14834 = vst [vmem:[#allocation65_spill] sm:$0xff] %v12148_v58  ;;  %v12151_v54 = vadd.f32 %v9470_v43, %v11994_v48 }
 0x1c5   : > { %v12153_v32 = vpop.f32.mrf.mxu0  ;;  %v12155_v41 = vpop.f32.mrf.mxu1 }
 0x1c6   : > { %14835 = vst [vmem:[#allocation66_spill] sm:$0xff] %v12151_v54  ;;  %14836 = vst [vmem:[#allocation67_spill] sm:$0xff] %v12153_v32 }
 0x1c7   : > { %14837 = vst [vmem:[#allocation68_spill] sm:$0xff] %v12155_v41  ;;  %v9473_v31 = vpop.f32.mrf.mxu0  ;;  %v12157_v28 = vpop.f32.mrf.mxu1 }
 0x1c8   : > { %14838 = vst [vmem:[#allocation69_spill] sm:$0xff] %v12157_v28  ;;  %v12160_v36 = vadd.f32 %v9473_v31, %v12004_v20 }
 0x1c9   : > { %v12162_v26 = vpop.f32.mrf.mxu0  ;;  %v12164_v39 = vpop.f32.mrf.mxu1 }
 0x1ca   : > { %14839 = vst [vmem:[#allocation70_spill] sm:$0xff] %v12160_v36  ;;  %14840 = vst [vmem:[#allocation71_spill] sm:$0xff] %v12162_v26  ;;  %v8421_v26 = vld [vmem:[%s14536_s3 + $0xc] sm:$0xf] }
 0x1cb   : > { %v12166_v3 = vpop.f32.mrf.mxu0  ;;  %v12168_v58 = vpop.f32.mrf.mxu1  ;;  %9824 = vmatprep.subr.msk.mxu0 %vm590_vm0, %v8421_v26 }
 0x1cc   : > { %14841 = vst [vmem:[#allocation72_spill] sm:$0xff] %v12168_v58  ;;  %9825 = vmatpush3.msk.msra.mxu0 %vm590_vm0, %v8421_v26  ;;  %v14888_v58 = vld [vmem:[#allocation13_spill] sm:$0xff] }
 0x1cd   : > { %v12170_v48 = vpop.f32.mrf.mxu0  ;;  %v12174_v54 = vpop.f32.mrf.mxu1 }
 0x1ce   : > { %14842 = vst [vmem:[#allocation73_spill] sm:$0xff] %v12174_v54  ;;  %v14883_v54 = vld [vmem:[#allocation12_spill] sm:$0xff] }
 0x1cf   : > { %v12172_v43 = vpop.f32.mrf.mxu0  ;;  %v12180_v20 = vpop.f32.mrf.mxu1 }
 0x1d0   : > { %14845 = vst [vmem:[#allocation76_spill] sm:$0xff] %v12180_v20 }
 0x1d1   : > { %v12176_v41 = vpop.f32.mrf.mxu0  ;;  %v12189_v32 = vpop.f32.mrf.mxu1 }
 0x1d2   : > { %14843 = vst [vmem:[#allocation74_spill] sm:$0xff] %v12176_v41  ;;  %14848 = vst [vmem:[#allocation79_spill] sm:$0xff] %v12189_v32  ;;  %v14887_v41 = vld [vmem:[#allocation32_spill] sm:$0xff] }
 0x1d3   : > { %v12178_v28 = vpop.f32.mrf.mxu0  ;;  %v12201_v57 = vpop.f32.mrf.mxu1 }
 0x1d4   : > { %14844 = vst [vmem:[#allocation75_spill] sm:$0xff] %v12178_v28  ;;  %14851 = vst [vmem:[#allocation82_spill] sm:$0xff] %v12201_v57  ;;  %v14884_v28 = vld [vmem:[#allocation31_spill] sm:$0xff] }
 0x1d5   : > { %v12182_v31 = vpop.f32.mrf.mxu0 }
 0x1d6   : > { %14846 = vst [vmem:[#allocation77_spill] sm:$0xff] %v12182_v31 }
 0x1d7   : > { %v12184_v36 = vpop.f32.mrf.mxu0 }
 0x1d8   : > { %14847 = vst [vmem:[#allocation78_spill] sm:$0xff] %v12184_v36  ;;  %v12207_v36 = vpop.f32.mrf.mxu1 }
 0x1d9   : > { %v12192_v45 = vpop.f32.mrf.mxu0  ;;  %14854 = vst [vmem:[#allocation85_spill] sm:$0xff] %v12207_v36 }
 0x1da   : > { %14849 = vst [vmem:[#allocation80_spill] sm:$0xff] %v12192_v45  ;;  %v12213_v26 = vpop.f32.mrf.mxu1 }
 0x1db   : > { %v12198_v46 = vpop.f32.mrf.mxu0  ;;  %14857 = vst [vmem:[#allocation88_spill] sm:$0xff] %v12213_v26 }
 0x1dc   : > { %14850 = vst [vmem:[#allocation81_spill] sm:$0xff] %v12198_v46  ;;  %v12219_v46 = vpop.f32.mrf.mxu1 }
 0x1dd   : > { %v12203_v35 = vpop.f32.mrf.mxu0  ;;  %14860 = vst [vmem:[#allocation91_spill] sm:$0xff] %v12219_v46 }
 0x1de   : > { %14852 = vst [vmem:[#allocation83_spill] sm:$0xff] %v12203_v35  ;;  %v12225_v35 = vpop.f32.mrf.mxu1 }
 0x1df   : > { %v12205_v52 = vpop.f32.mrf.mxu0  ;;  %14863 = vst [vmem:[#allocation94_spill] sm:$0xff] %v12225_v35 }
 0x1e0   : > { %14853 = vst [vmem:[#allocation84_spill] sm:$0xff] %v12205_v52 }
 0x1e1   : > { %v12209_v32 = vpop.f32.mrf.mxu0 }
 0x1e2   : > { %14855 = vst [vmem:[#allocation86_spill] sm:$0xff] %v12209_v32  ;;  %v12231_v32 = vpop.f32.mrf.mxu1 }
 0x1e3   : > { %v12211_v45 = vpop.f32.mrf.mxu0  ;;  %14866 = vst [vmem:[#allocation97_spill] sm:$0xff] %v12231_v32 }
 0x1e4   : > { %14856 = vst [vmem:[#allocation87_spill] sm:$0xff] %v12211_v45 }
 0x1e5   : > { %v12215_v4 = vpop.f32.mrf.mxu0 }
 0x1e6   : > { %14858 = vst [vmem:[#allocation89_spill] sm:$0xff] %v12215_v4  ;;  %v12237_v4 = vpop.f32.mrf.mxu1 }
 0x1e7   : > { %v12217_v20 = vpop.f32.mrf.mxu0  ;;  %14869 = vst [vmem:[#allocation100_spill] sm:$0xff] %v12237_v4  ;;  %v14880_v4 = vld [vmem:[#allocation19_spill] sm:$0xff] }
 0x1e8   : > { %14859 = vst [vmem:[#allocation90_spill] sm:$0xff] %v12217_v20 }
 0x1e9   : > { %v12221_v30 = vpop.f32.mrf.mxu0 }
 0x1ea   : > { %14861 = vst [vmem:[#allocation92_spill] sm:$0xff] %v12221_v30  ;;  %v12243_v30 = vpop.f32.mrf.mxu1 }
 0x1eb   : > { %v12223_v57 = vpop.f32.mrf.mxu0  ;;  %14872 = vst [vmem:[#allocation103_spill] sm:$0xff] %v12243_v30 }
 0x1ec   : > { %14862 = vst [vmem:[#allocation93_spill] sm:$0xff] %v12223_v57 }
 0x1ed   : > { %v12227_v52 = vpop.f32.mrf.mxu0 }
 0x1ee   : > { %14864 = vst [vmem:[#allocation95_spill] sm:$0xff] %v12227_v52  ;;  %v12249_v52 = vpop.f32.mrf.mxu1 }
 0x1ef   : > { %v12229_v36 = vpop.f32.mrf.mxu0  ;;  %14875 = vst [vmem:[#allocation106_spill] sm:$0xff] %v12249_v52  ;;  %v14885_v52 = vld [vmem:[#allocation11_spill] sm:$0xff] }
 0x1f0   : > { %14865 = vst [vmem:[#allocation96_spill] sm:$0xff] %v12229_v36  ;;  %v12261_v30 = vpop.f32.mrf.mxu1  ;;  %v1073_v50 = vadd.f32 %v14885_v52, %v14884_v28  ;;  %v1898_v52 = vadd.f32 %v11823_v40, %v11833_v56  ;;  %v1906_v40 = vadd.f32 %v11888_v6, %v11898_v18 }
 0x1f1   : > { %v12233_v45 = vpop.f32.mrf.mxu0 }
 0x1f2   : > { %14867 = vst [vmem:[#allocation98_spill] sm:$0xff] %v12233_v45  ;;  %v14878_v45 = vld [vmem:[#allocation5_spill] sm:$0xff]  ;;  %v1510_v56 = vadd.f32 %v11966_v13, %v1073_v50 }
 0x1f3   : > { %v12235_v26 = vpop.f32.mrf.mxu0 }
 0x1f4   : > { %14868 = vst [vmem:[#allocation99_spill] sm:$0xff] %v12235_v26  ;;  %v14879_v26 = vld [vmem:[#allocation4_spill] sm:$0xff] }
 0x1f5   : > { %v12239_v20 = vpop.f32.mrf.mxu0  ;;  %v1043_v31 = vadd.f32 %v14879_v26, %v14878_v45  ;;  %v1093_v45 = vadd.f32 %v14888_v58, %v14887_v41 }
 0x1f6   : > { %14870 = vst [vmem:[#allocation101_spill] sm:$0xff] %v12239_v20  ;;  %v1053_v20 = vadd.f32 %v14881_v22, %v14880_v4  ;;  %v14889_v22 = vld [vmem:[#allocation27_spill] sm:$0xff] }
 0x1f7   : > { %v12241_v46 = vpop.f32.mrf.mxu0  ;;  %v1103_v4 = vadd.f32 %v14889_v22, %v11774_v34  ;;  %v1504_v41 = vadd.f32 %v11926_v12, %v1043_v31  ;;  %v1902_v34 = vadd.f32 %v11858_v27, %v11868_v33  ;;  %v14899_v22 = vld [vmem:[#allocation26_spill] sm:$0xff] }
 0x1f8   : > { %14871 = vst [vmem:[#allocation102_spill] sm:$0xff] %v12241_v46  ;;  %v1892_v46 = vadd.f32 %v11777_v24, %v11788_v14  ;;  %v1894_v24 = vadd.f32 %v11793_v60, %v11803_v5  ;;  %v1896_v14 = vadd.f32 %v11808_v16, %v11818_v59  ;;  %v1506_v58 = vadd.f32 %v11940_v15, %v1053_v20  ;;  %v12295_v59 = vpop.f32.mrf.mxu1 }
 0x1f9   : > { %v12245_v57 = vpop.f32.mrf.mxu0  ;;  %v1904_v60 = vadd.f32 %v11873_v25, %v11883_v53  ;;  %v2721_v16 = vadd.f32 %v12002_v61, %v12009_v11  ;;  %v1516_v33 = vadd.f32 %v12000_v0, %v1103_v4  ;;  %v1908_v15 = vadd.f32 %v11903_v10, %v11914_v55  ;;  %v14890_v55 = vld [vmem:[#allocation15_spill] sm:$0xff]  ;;  %v14892_v11 = vld [vmem:[#allocation28_spill] sm:$0xff] }
 0x1fa   : > { %14873 = vst [vmem:[#allocation104_spill] sm:$0xff] %v12245_v57  ;;  %v14882_v57 = vld [vmem:[#allocation14_spill] sm:$0xff]  ;;  %v2316_v53 = vadd.f32 %v12020_v47, %v1894_v24  ;;  %v1910_v6 = vadd.f32 %v11919_v29, %v1504_v41  ;;  %v12312_v18 = vadd.f32 %v11933_v17, %v1506_v58  ;;  %v2320_v0 = vadd.f32 %v12045_v37, %v1898_v52  ;;  %v12324_v10 = vpop.f32.mrf.mxu1  ;;  %v14891_v17 = vld [vmem:[#allocation33_spill] sm:$0xff]  ;;  %v14894_v37 = vld [vmem:[#allocation35_spill] sm:$0xff] }
 0x1fb   : > { %v12247_v35 = vpop.f32.mrf.mxu0  ;;  %v3128_v12 = vadd.f32 %v12166_v3, %v2721_v16  ;;  %v12327_v29 = vadd.f32 %v14890_v55, %v1510_v56  ;;  %v14900_v4 = vld [vmem:[#allocation72_spill] sm:$0xff]  ;;  %v14901_v24 = vld [vmem:[#allocation74_spill] sm:$0xff]  ;;  %v14903_v41 = vld [vmem:[#allocation41_spill] sm:$0xff] }
 0x1fc   : > { %14874 = vst [vmem:[#allocation105_spill] sm:$0xff] %v12247_v35  ;;  %v1063_v35 = vadd.f32 %v14883_v54, %v14882_v57  ;;  %v2314_v57 = vadd.f32 %v12011_v23, %v1892_v46  ;;  %v14896_v46 = vld [vmem:[#allocation29_spill] sm:$0xff]  ;;  %v14906_v16 = vld [vmem:[#allocation75_spill] sm:$0xff]  ;;  %v14911_v55 = vld [vmem:[#allocation20_spill] sm:$0xff] }
 0x1fd   : > { %v12251_v36 = vpop.f32.mrf.mxu0  ;;  %v3550_v50 = vadd.f32 %v12164_v39, %v3128_v12  ;;  %v2726_v39 = vadd.f32 %v14899_v22, %v2320_v0  ;;  %v14904_v58 = vld [vmem:[#allocation45_spill] sm:$0xff]  ;;  %v14918_v22 = vld [vmem:[#allocation36_spill] sm:$0xff] }
 0x1fe   : > { %14876 = vst [vmem:[#allocation107_spill] sm:$0xff] %v12251_v36  ;;  %v14886_v36 = vld [vmem:[#allocation16_spill] sm:$0xff]  ;;  %v1508_v5 = vadd.f32 %v11953_v2, %v1063_v35  ;;  %v2720_v25 = vadd.f32 %v12006_v63, %v2314_v57  ;;  %v2318_v2 = vadd.f32 %v12029_v21, %v1896_v14  ;;  %v2722_v21 = vadd.f32 %v14894_v37, %v2316_v53  ;;  %v14895_v35 = vld [vmem:[#allocation38_spill] sm:$0xff]  ;;  %v12358_v57 = vpop.f32.mrf.mxu1  ;;  %v14909_v53 = vld [vmem:[#allocation73_spill] sm:$0xff] }
 0x1ff   : > { %v12253_v32 = vpop.f32.mrf.mxu0  ;;  %v2725_v54 = vadd.f32 %v14896_v46, %v14895_v35  ;;  %v14910_v0 = vld [vmem:[#allocation49_spill] sm:$0xff] }
 0x200   : > { %14877 = vst [vmem:[#allocation108_spill] sm:$0xff] %v12253_v32  ;;  %v1083_v32 = vadd.f32 %v14886_v36, %v11742_v62  ;;  %v1900_v62 = vadd.f32 %v11838_v1, %v11852_v51  ;;  %v1514_v51 = vadd.f32 %v11992_v19, %v1093_v45  ;;  %v2723_v19 = vadd.f32 %v12013_v42, %v12018_v49  ;;  %v14893_v42 = vld [vmem:[#allocation24_spill] sm:$0xff]  ;;  %v12381_v46 = vpop.f32.mrf.mxu1 }
 0x201   : > { %v12271_v26 = vpop.f32.mrf.mxu0  ;;  %v3127_v61 = vadd.f32 %v12170_v48, %v2720_v25  ;;  %v12339_v49 = vadd.f32 %v14893_v42, %v1516_v33  ;;  %v14898_v48 = vld [vmem:[#allocation30_spill] sm:$0xff]  ;;  %v12353_v45 = vld [vmem:[%s14535_s2] ss:$0 sm:$0xff]  ;;  %v3129_v14 = vadd.f32 %v14901_v24, %v2722_v21  ;;  %v3132_v56 = vadd.f32 %v14906_v16, %v2725_v54  ;;  %v14908_v33 = vld [vmem:[#allocation47_spill] sm:$0xff] }
 0x202   : > { %v1512_v1 = vadd.f32 %v11981_v7, %v1083_v32  ;;  %v12318_v7 = vadd.f32 %v11947_v8, %v1508_v5  ;;  %v12333_v23 = vadd.f32 %v14892_v11, %v1514_v51  ;;  %v2322_v8 = vadd.f32 %v12058_v38, %v1900_v62  ;;  %v14897_v32 = vld [vmem:[#allocation25_spill] sm:$0xff]  ;;  %v14902_v62 = vld [vmem:[#allocation52_spill] sm:$0xff]  ;;  %v14907_v51 = vld [vmem:[#allocation51_spill] sm:$0xff] }
 0x203   : > { %v12286_v28 = vpop.f32.mrf.mxu0  ;;  %v3130_v3 = vadd.f32 %v12172_v43, %v2723_v19  ;;  %v2724_v36 = vadd.f32 %v14897_v32, %v2318_v2  ;;  %v2727_v20 = vadd.f32 %v14898_v48, %v12041_v9  ;;  %v2324_v38 = vadd.f32 %v12067_v44, %v1902_v34  ;;  %v14905_v34 = vld [vmem:[#allocation34_spill] sm:$0xff]  ;;  %v14914_v42 = vld [vmem:[#allocation77_spill] sm:$0xff]  ;;  %v14920_v24 = vld [vmem:[#allocation79_spill] sm:$0xff] }
 0x204   : > { %v12330_v63 = vadd.f32 %v14891_v17, %v1512_v1  ;;  %v3549_v43 = vadd.f32 %v14900_v4, %v3127_v61  ;;  %v2729_v9 = vadd.f32 %v14903_v41, %v14902_v62  ;;  %v2728_v44 = vadd.f32 %v14904_v58, %v2322_v8  ;;  %v14912_v17 = vld [vmem:[#allocation21_spill] sm:$0xff]  ;;  %v14921_v62 = vld [vmem:[#allocation78_spill] sm:$0xff]  ;;  %v14922_v16 = vld [vmem:[#allocation40_spill] sm:$0xff] }
 0x205   : > { %v12302_v27 = vpop.f32.mrf.mxu0  ;;  %v2326_v5 = vadd.f32 %v14905_v34, %v1904_v60  ;;  %v12367_v25 = vadd.f32 %v14908_v33, %v14907_v51  ;;  %v3552_v12 = vadd.f32 %v14909_v53, %v3130_v3  ;;  %v12372_v61 = vadd.f32 %v14910_v0, %v2324_v38  ;;  %v14913_v60 = vld [vmem:[#allocation23_spill] sm:$0xff]  ;;  %v14916_v48 = vld [vmem:[#allocation37_spill] sm:$0xff]  ;;  %v14925_v53 = vld [vmem:[#allocation48_spill] sm:$0xff]  ;;  %v12406_v0 = vpop.f32.mrf.mxu1 }
 0x206   : > { %v12376_v11 = vadd.f32 %v14912_v17, %v14911_v55  ;;  %v2328_v8 = vadd.f32 %v14913_v60, %v1906_v40  ;;  %v3131_v37 = vadd.f32 %v14914_v42, %v2724_v36  ;;  %v3554_v36 = vadd.f32 %v14920_v24, %v3132_v56  ;;  %v14924_v51 = vld [vmem:[#allocation39_spill] sm:$0xff]  ;;  %v14934_v24 = vld [vmem:[#allocation42_spill] sm:$0xff] }
 0x207   : > { %v12315_v13 = vpop.f32.mrf.mxu0  ;;  %v12385_v38 = vadd.f32 %v14916_v48, %v2326_v5 }
 0x208   : > { %v12397_v5 = vadd.f32 %v14922_v16, %v2328_v8  ;;  %v14928_v8 = vld [vmem:[#allocation44_spill] sm:$0xff] }
 0x209   : > { %v12336_v47 = vpop.f32.mrf.mxu0  ;;  %v14939_v16 = vld [vmem:[#allocation88_spill] sm:$0xff] }
 0x20b   : > { %v9628_v31 = vpop.f32.mrf.mxu0 }
 0x20c   : > { %v3956_v52 = vadd.f32 %v9628_v31, %v3550_v50  ;;  %v14915_v50 = vld [vmem:[#allocation76_spill] sm:$0xff]  ;;  %v14917_v31 = vld [vmem:[#allocation43_spill] sm:$0xff] }
 0x20d   : > { %v3796_v1 = vpop.f32.mrf.mxu0  ;;  %v3551_v35 = vadd.f32 %v14915_v50, %v3129_v14  ;;  %v12389_v4 = vadd.f32 %v14918_v22, %v14917_v31  ;;  %v3134_v14 = vadd.f32 %v14921_v62, %v2727_v20  ;;  %v14930_v50 = vld [vmem:[#allocation50_spill] sm:$0xff]  ;;  %v14937_v62 = vld [vmem:[#allocation55_spill] sm:$0xff] }
 0x20e   : > { %v3995_v2 = vadd.f32 %v12353_v45, %v3956_v52  ;;  %v3955_v19 = vadd.f32 %v3796_v1, %v3549_v43  ;;  %v14919_v43 = vld [vmem:[#allocation46_spill] sm:$0xff] }
 0x20f   : > { %v9631_v21 = vpop.f32.mrf.mxu0  ;;  %v2330_v40 = vadd.f32 %v14919_v43, %v1908_v15  ;;  %v14923_v1 = vld [vmem:[#allocation6_spill] sm:$0xff]  ;;  %v2332_v15 = vadd.f32 %v14925_v53, %v1910_v6  ;;  %v14931_v6 = vld [vmem:[#allocation9_spill] sm:$0xff] }
 0x210   : > { %v4027_v3 = vmax.f32 %v3995_v2, 0.0  ;;  %v3994_v54 = vadd.f32 %v12353_v45, %v3955_v19  ;;  %v3958_v32 = vadd.f32 %v9631_v21, %v3552_v12  ;;  %v12401_v33 = vadd.f32 %v14924_v51, %v14923_v1  ;;  %v14926_v12 = vld [vmem:[#allocation82_spill] sm:$0xff]  ;;  %v14927_v19 = vld [vmem:[#allocation80_spill] sm:$0xff]  ;;  %v12441_v51 = vpop.f32.mrf.mxu1 }
 0x211   : > { %v3806_v52 = vpop.f32.mrf.mxu0  ;;  %v3553_v56 = vadd.f32 %v14926_v12, %v3131_v37  ;;  %v3133_v20 = vadd.f32 %v14927_v19, %v2726_v39  ;;  %v12411_v42 = vadd.f32 %v14928_v8, %v2330_v40  ;;  %v14929_v21 = vld [vmem:[#allocation8_spill] sm:$0xff]  ;;  %v2334_v37 = vadd.f32 %v14931_v6, %v12312_v18  ;;  %v12426_v40 = vld [vmem:[%s14536_s3 + $0x14] sm:$0xf] }
 0x212   : > { %4114 = vst.msk [vmem:[#allocation3 + $0x21] sm:$0xff] %vm225_vm1, %v4027_v3  ;;  %v4026_v41 = vmax.f32 %v3994_v54, 0.0  ;;  %v3997_v58 = vadd.f32 %v12353_v45, %v3958_v32  ;;  %v3957_v34 = vadd.f32 %v3806_v52, %v3551_v35  ;;  %v12415_v35 = vadd.f32 %v14930_v50, %v14929_v21  ;;  %v14932_v3 = vld [vmem:[#allocation81_spill] sm:$0xff]  ;;  %v14935_v18 = vld [vmem:[#allocation22_spill] sm:$0xff]  ;;  %v14936_v52 = vld [vmem:[#allocation7_spill] sm:$0xff]  ;;  %9924 = vmatprep.subr.msk.mxu0 %vm590_vm0, %v12426_v40 }
 0x213   : > { %v9634_v2 = vpop.f32.mrf.mxu0  ;;  %v3136_v39 = vadd.f32 %v14932_v3, %v2729_v9  ;;  %v14933_v32 = vld [vmem:[#allocation85_spill] sm:$0xff]  ;;  %v12433_v9 = vadd.f32 %v14936_v52, %v14935_v18  ;;  %v3555_v1 = vadd.f32 %v14939_v16, %v3133_v20  ;;  %v14942_v19 = vld [vmem:[#allocation10_spill] sm:$0xff]  ;;  %v14945_v21 = vld [vmem:[#allocation84_spill] sm:$0xff] }
 0x214   : > { %4113 = vst.msk [vmem:[#allocation3 + $0x19] sm:$0xff] %vm225_vm1, %v4026_v41  ;;  %v4029_v55 = vmax.f32 %v3997_v58, 0.0  ;;  %v3996_v17 = vadd.f32 %v12353_v45, %v3957_v34  ;;  %v3960_v60 = vadd.f32 %v9634_v2, %v3554_v36  ;;  %v3556_v48 = vadd.f32 %v14933_v32, %v3134_v14  ;;  %v14938_v41 = vld [vmem:[#allocation83_spill] sm:$0xff]  ;;  %v14946_v32 = vld [vmem:[#allocation53_spill] sm:$0xff] }
 0x215   : > { %v3816_v54 = vpop.f32.mrf.mxu0  ;;  %v12429_v36 = vadd.f32 %v14934_v24, %v2332_v15  ;;  %v2336_v14 = vadd.f32 %v14937_v62, %v12318_v7  ;;  %v3135_v58 = vadd.f32 %v14938_v41, %v2728_v44  ;;  %v14941_v7 = vld [vmem:[#allocation54_spill] sm:$0xff]  ;;  %v3138_v50 = vadd.f32 %v14945_v21, %v12367_v25  ;;  %v12475_v41 = vpop.f32.mrf.mxu1 }
 0x216   : > { %4116 = vst.msk [vmem:[#allocation3 + $0x39] sm:$0xff] %vm225_vm1, %v4029_v55  ;;  %v4028_v31 = vmax.f32 %v3996_v17, 0.0  ;;  %v3999_v22 = vadd.f32 %v12353_v45, %v3960_v60  ;;  %v3959_v43 = vadd.f32 %v3816_v54, %v3553_v56  ;;  %v14940_v56 = vld [vmem:[#allocation17_spill] sm:$0xff]  ;;  %v12450_v44 = vadd.f32 %v14942_v19, %v14941_v7  ;;  %v14943_v55 = vld [vmem:[#allocation59_spill] sm:$0xff]  ;;  %v14950_v24 = vld [vmem:[#allocation86_spill] sm:$0xff] }
 0x217   : > { %v9637_v34 = vpop.f32.mrf.mxu0  ;;  %v12446_v2 = vadd.f32 %v14940_v56, %v2334_v37  ;;  %v2338_v17 = vadd.f32 %v14943_v55, %v12327_v29  ;;  %v14944_v60 = vld [vmem:[#allocation91_spill] sm:$0xff]  ;;  %v3137_v25 = vadd.f32 %v14950_v24, %v12372_v61  ;;  %v14953_v19 = vld [vmem:[#allocation97_spill] sm:$0xff] }
 0x218   : > { %4115 = vst.msk [vmem:[#allocation3 + $0x31] sm:$0xff] %vm225_vm1, %v4028_v31  ;;  %v4031_v53 = vmax.f32 %v3999_v22, 0.0  ;;  %v3998_v15 = vadd.f32 %v12353_v45, %v3959_v43  ;;  %v3962_v12 = vadd.f32 %v9637_v34, %v3556_v48  ;;  %v3558_v20 = vadd.f32 %v14944_v60, %v3136_v39  ;;  %v14947_v31 = vld [vmem:[#allocation58_spill] sm:$0xff]  ;;  %v14948_v22 = vld [vmem:[#allocation56_spill] sm:$0xff] }
 0x219   : > { %v3826_v8 = vpop.f32.mrf.mxu0  ;;  %v12459_v54 = vld [vmem:[#allocation3 + $0x28] sm:$0x3]  ;;  %v12462_v48 = vadd.f32 %v14946_v32, %v2336_v14  ;;  %v12466_v29 = vadd.f32 %v14948_v22, %v14947_v31  ;;  %v14949_v39 = vld [vmem:[#allocation94_spill] sm:$0xff]  ;;  %v3560_v55 = vadd.f32 %v14953_v19, %v3138_v50 }
 0x21a   : > { %4118 = vst.msk [vmem:[#allocation3 + $0x51] sm:$0xff] %vm225_vm1, %v4031_v53  ;;  %v4030_v6 = vmax.f32 %v3998_v15, 0.0  ;;  %v4001_v3 = vadd.f32 %v12353_v45, %v3962_v12  ;;  %v3961_v37 = vadd.f32 %v3826_v8, %v3555_v1  ;;  %v3557_v43 = vadd.f32 %v14949_v39, %v3135_v58  ;;  %v14951_v58 = vld [vmem:[#allocation57_spill] sm:$0xff]  ;;  %v14952_v53 = vld [vmem:[#allocation87_spill] sm:$0xff]  ;;  %v12511_v39 = vpop.f32.mrf.mxu1 }
 0x21b   : > { %v9640_v18 = vpop.f32.mrf.mxu0  ;;  %v12471_v52 = vld [vmem:[#allocation3 + $0x18] sm:$0xff]  ;;  %v12473_v62 = vld [vmem:[#allocation3 + $0x20] sm:$0xff]  ;;  %v12483_v61 = vadd.f32 %v14951_v58, %v2338_v17  ;;  %v3140_v15 = vadd.f32 %v14952_v53, %v12376_v11  ;;  %v4250_v7 = vrot.slane %v12459_v54, 1  ;;  %v14954_v11 = vld [vmem:[#allocation100_spill] sm:$0xff] }
 0x21c   : > { %4117 = vst.msk [vmem:[#allocation3 + $0x49] sm:$0xff] %vm225_vm1, %v4030_v6  ;;  %v4033_v14 = vmax.f32 %v4001_v3, 0.0  ;;  %v4000_v34 = vadd.f32 %v12353_v45, %v3961_v37  ;;  %v3964_v16 = vadd.f32 %v9640_v18, %v3558_v20  ;;  %v4247_v1 = vrot.slane %v12471_v52, 1  ;;  %9729 = vmatprep.mubr.msk.f32.mxu0 %vm225_vm1, %v12471_v52  ;;  %v14955_v6 = vld [vmem:[#allocation89_spill] sm:$0xff]  ;;  %v14956_v18 = vld [vmem:[#allocation63_spill] sm:$0xff] }
 0x21d   : > { %v3836_v12 = vpop.f32.mrf.mxu0  ;;  %9730 = vmatmul.mubr.msk.f32.gmra.mxu0 %vm225_vm1, %v12473_v62  ;;  %v12490_v56 = vrot.slane %v12473_v62, 1  ;;  %v12496_v8 = vld [vmem:[#allocation3 + $0x40] sm:$0x3]  ;;  %v3559_v21 = vadd.f32 %v14954_v11, %v3137_v25  ;;  %v3139_v3 = vadd.f32 %v14955_v6, %v12385_v38 }
 0x21e   : > { %4120 = vst.msk [vmem:[#allocation3 + $0x69] sm:$0xff] %vm225_vm1, %v4033_v14  ;;  %v4032_v60 = vmax.f32 %v4000_v34, 0.0  ;;  %v4003_v17 = vadd.f32 %v12353_v45, %v3964_v16  ;;  %v3963_v20 = vadd.f32 %v3836_v12, %v3557_v43  ;;  %v2340_v14 = vadd.f32 %v14956_v18, %v12330_v63  ;;  %v14957_v34 = vld [vmem:[#allocation103_spill] sm:$0xff]  ;;  %v14959_v12 = vld [vmem:[#allocation90_spill] sm:$0xff]  ;;  %v14963_v18 = vld [vmem:[#allocation60_spill] sm:$0xff] }
 0x21f   : > { %v9643_v37 = vpop.f32.mrf.mxu0  ;;  %v12503_v32 = vsel %vm443_vm3, %v4247_v1, %v12490_v56  ;;  %v4251_v50 = vsel %vm443_vm3, %v12490_v56, %v4250_v7  ;;  %v12507_v31 = vld [vmem:[#allocation3 + $0x30] sm:$0xff]  ;;  %v12509_v22 = vld [vmem:[#allocation3 + $0x38] sm:$0xff]  ;;  %v3562_v16 = vadd.f32 %v14957_v34, %v3140_v15  ;;  %v4255_v53 = vrot.slane %v12496_v8, 1 }
 0x220   : > { %4119 = vst.msk [vmem:[#allocation3 + $0x61] sm:$0xff] %vm225_vm1, %v4032_v60  ;;  %v4035_v43 = vmax.f32 %v4003_v17, 0.0  ;;  %v4002_v24 = vadd.f32 %v12353_v45, %v3963_v20  ;;  %v3966_v38 = vadd.f32 %v9643_v37, %v3560_v55  ;;  %9679 = vmatprep.mubr.msk.f32.mxu1 %vm225_vm1, %v12503_v32  ;;  %v4252_v25 = vrot.slane %v12507_v31, 1  ;;  %9732 = vmatprep.mubr.msk.f32.mxu0 %vm225_vm1, %v12507_v31  ;;  %v14960_v60 = vld [vmem:[#allocation106_spill] sm:$0xff]  ;;  %v14961_v20 = vld [vmem:[#allocation92_spill] sm:$0xff] }
 0x221   : > { %9680 = vmatmul.mubr.msk.f32.gmra.mxu1 %vm225_vm1, %v4251_v50  ;;  %v3846_v1 = vpop.f32.mrf.mxu0  ;;  %9733 = vmatmul.mubr.msk.f32.gmra.mxu0 %vm225_vm1, %v12509_v22  ;;  %v12527_v58 = vrot.slane %v12509_v22, 1  ;;  %v3142_v7 = vadd.f32 %v14959_v12, %v12389_v4  ;;  %v12534_v55 = vld [vmem:[#allocation3 + $0x58] sm:$0x3]  ;;  %v3561_v17 = vadd.f32 %v14960_v60, %v3139_v3  ;;  %v3141_v11 = vadd.f32 %v14961_v20, %v12397_v5 }
 0x222   : > { %4122 = vst.msk [vmem:[#allocation3 + $0x81] sm:$0xff] %vm225_vm1, %v4035_v43  ;;  %v4034_v19 = vmax.f32 %v4002_v24, 0.0  ;;  %v4005_v63 = vadd.f32 %v12353_v45, %v3966_v38  ;;  %v3965_v15 = vadd.f32 %v3846_v1, %v3559_v21  ;;  %v12549_v21 = vpop.f32.mrf.mxu1  ;;  %v14964_v1 = vld [vmem:[#allocation93_spill] sm:$0xff] }
 0x223   : > { %14958 = vst [vmem:[#allocation5_spill] sm:$0xff] %v12527_v58  ;;  %v9646_v6 = vpop.f32.mrf.mxu0  ;;  %v12541_v37 = vsel %vm443_vm3, %v4252_v25, %v12527_v58  ;;  %v4256_v4 = vsel %vm443_vm3, %v12527_v58, %v4255_v53  ;;  %v12545_v50 = vld [vmem:[#allocation3 + $0x48] sm:$0xff]  ;;  %v12547_v43 = vld [vmem:[#allocation3 + $0x50] sm:$0xff]  ;;  %v14962_v25 = vld [vmem:[#allocation62_spill] sm:$0xff]  ;;  %v3144_v53 = vadd.f32 %v14964_v1, %v12401_v33 }
 0x224   : > { %4121 = vst.msk [vmem:[#allocation3 + $0x79] sm:$0xff] %vm225_vm1, %v4034_v19  ;;  %v4037_v3 = vmax.f32 %v4005_v63, 0.0  ;;  %v4004_v24 = vadd.f32 %v12353_v45, %v3965_v15  ;;  %v3968_v5 = vadd.f32 %v9646_v6, %v3562_v16  ;;  %9682 = vmatprep.mubr.msk.f32.mxu1 %vm225_vm1, %v12541_v37  ;;  %v4257_v38 = vrot.slane %v12545_v50, 1  ;;  %9735 = vmatprep.mubr.msk.f32.mxu0 %vm225_vm1, %v12545_v50 }
 0x225   : > { %v12560_v34 = vadd.f32 %v14963_v18, %v14962_v25  ;;  %9683 = vmatmul.mubr.msk.f32.gmra.mxu1 %vm225_vm1, %v4256_v4  ;;  %v3856_v12 = vpop.f32.mrf.mxu0  ;;  %9736 = vmatmul.mubr.msk.f32.gmra.mxu0 %vm225_vm1, %v12547_v43  ;;  %v12568_v16 = vrot.slane %v12547_v43, 1  ;;  %v4260_v19 = vrot.slane %v12534_v55, 1  ;;  %v3564_v63 = vadd.f32 %v12261_v30, %v3142_v7  ;;  %v12574_v33 = vld [vmem:[#allocation3 + $0x70] sm:$0x3]  ;;  %v14966_v4 = vld [vmem:[#allocation95_spill] sm:$0xff] }
 0x226   : > { %4124 = vst.msk [vmem:[#allocation3 + $0x99] sm:$0xff] %vm225_vm1, %v4037_v3  ;;  %v4036_v15 = vmax.f32 %v4004_v24, 0.0  ;;  %v4007_v60 = vadd.f32 %v12353_v45, %v3968_v5  ;;  %v3967_v20 = vadd.f32 %v3856_v12, %v3561_v17  ;;  %v3563_v6 = vadd.f32 %v12295_v59, %v3141_v11  ;;  %v12589_v17 = vpop.f32.mrf.mxu1  ;;  %v14968_v5 = vld [vmem:[#allocation61_spill] sm:$0xff] }
 0x227   : > { %14965 = vst [vmem:[#allocation4_spill] sm:$0xff] %v12568_v16  ;;  %v3143_v25 = vadd.f32 %v14966_v4, %v12411_v42  ;;  %v9649_v18 = vpop.f32.mrf.mxu0  ;;  %v12581_v1 = vsel %vm443_vm3, %v4257_v38, %v12568_v16  ;;  %v4261_v30 = vsel %vm443_vm3, %v12568_v16, %v4260_v19  ;;  %v12585_v7 = vld [vmem:[#allocation3 + $0x60] sm:$0xff]  ;;  %v12587_v3 = vld [vmem:[#allocation3 + $0x68] sm:$0xff]  ;;  %v12599_v38 = vadd.f32 %v14968_v5, %v2340_v14 }
 0x228   : > { %14967 = vst [vmem:[#allocation19_spill] sm:$0xff] %v12581_v1  ;;  %4123 = vst.msk [vmem:[#allocation3 + $0x91] sm:$0xff] %vm225_vm1, %v4036_v15  ;;  %v4039_v59 = vmax.f32 %v4007_v60, 0.0  ;;  %v4006_v11 = vadd.f32 %v12353_v45, %v3967_v20  ;;  %v3970_v42 = vadd.f32 %v9649_v18, %v3564_v63  ;;  %9685 = vmatprep.mubr.msk.f32.mxu1 %vm225_vm1, %v12581_v1  ;;  %v4262_v24 = vrot.slane %v12585_v7, 1  ;;  %v14970_v60 = vld [vmem:[#allocation96_spill] sm:$0xff] }
 0x229   : > { %9738 = vmatprep.mubr.msk.f32.mxu0 %vm225_vm1, %v12585_v7  ;;  %v3566_v12 = vadd.f32 %v12324_v10, %v3144_v53  ;;  %9686 = vmatmul.mubr.msk.f32.gmra.mxu1 %vm225_vm1, %v4261_v30  ;;  %v3866_v19 = vpop.f32.mrf.mxu0  ;;  %v12606_v63 = vrot.slane %v12587_v3, 1  ;;  %v4265_v15 = vrot.slane %v12574_v33, 1  ;;  %v3146_v20 = vadd.f32 %v14970_v60, %v12415_v35  ;;  %v12613_v53 = vld [vmem:[#allocation3 + $0x88] sm:$0x3]  ;;  %v14971_v30 = vld [vmem:[#allocation98_spill] sm:$0xff] }
 0x22a   : > { %9739 = vmatmul.mubr.msk.f32.gmra.mxu0 %vm225_vm1, %v12587_v3  ;;  %4126 = vst.msk [vmem:[#allocation3 + $0xb1] sm:$0xff] %vm225_vm1, %v4039_v59  ;;  %v4038_v14 = vmax.f32 %v4006_v11, 0.0  ;;  %v4009_v4 = vadd.f32 %v12353_v45, %v3970_v42  ;;  %v3969_v10 = vadd.f32 %v3866_v19, %v3563_v6  ;;  %v3565_v18 = vadd.f32 %v12358_v57, %v3143_v25  ;;  %v12628_v6 = vpop.f32.mrf.mxu1 }
 0x22b   : > { %14969 = vst [vmem:[#allocation18_spill] sm:$0xff] %v12606_v63  ;;  %v3145_v5 = vadd.f32 %v14971_v30, %v12429_v36  ;;  %v9652_v16 = vpop.f32.mrf.mxu0  ;;  %v12620_v1 = vsel %vm443_vm3, %v4262_v24, %v12606_v63  ;;  %v4266_v35 = vsel %vm443_vm3, %v12606_v63, %v4265_v15  ;;  %v12624_v59 = vld [vmem:[#allocation3 + $0x78] sm:$0xff]  ;;  %v12626_v11 = vld [vmem:[#allocation3 + $0x80] sm:$0xff]  ;;  %v14973_v24 = vld [vmem:[#allocation67_spill] sm:$0xff] }
 0x22c   : > { %14972 = vst [vmem:[#allocation14_spill] sm:$0xff] %v12620_v1  ;;  %4125 = vst.msk [vmem:[#allocation3 + $0xa9] sm:$0xff] %vm225_vm1, %v4038_v14  ;;  %v4041_v57 = vmax.f32 %v4009_v4, 0.0  ;;  %v4008_v25 = vadd.f32 %v12353_v45, %v3969_v10  ;;  %v3972_v36 = vadd.f32 %v9652_v16, %v3566_v12  ;;  %9688 = vmatprep.mubr.msk.f32.mxu1 %vm225_vm1, %v12620_v1  ;;  %v4267_v42 = vrot.slane %v12624_v59, 1  ;;  %v14974_v15 = vld [vmem:[#allocation99_spill] sm:$0xff] }
 0x22d   : > { %9741 = vmatprep.mubr.msk.f32.mxu0 %vm225_vm1, %v12624_v59  ;;  %v2342_v19 = vadd.f32 %v14973_v24, %v12333_v23  ;;  %v3148_v60 = vadd.f32 %v14974_v15, %v12433_v9  ;;  %9689 = vmatmul.mubr.msk.f32.gmra.mxu1 %vm225_vm1, %v4266_v35  ;;  %v3876_v14 = vpop.f32.mrf.mxu0  ;;  %v12645_v16 = vrot.slane %v12626_v11, 1  ;;  %v4270_v12 = vrot.slane %v12613_v53, 1  ;;  %v12651_v9 = vld [vmem:[#allocation3 + $0xa0] sm:$0x3]  ;;  %v14976_v24 = vld [vmem:[#allocation101_spill] sm:$0xff] }
 0x22e   : > { %9742 = vmatmul.mubr.msk.f32.gmra.mxu0 %vm225_vm1, %v12626_v11  ;;  %v3568_v4 = vadd.f32 %v12381_v46, %v3146_v20  ;;  %4128 = vst.msk [vmem:[#allocation3 + $0xc9] sm:$0xff] %vm225_vm1, %v4041_v57  ;;  %v4040_v10 = vmax.f32 %v4008_v25, 0.0  ;;  %v4011_v23 = vadd.f32 %v12353_v45, %v3972_v36  ;;  %v3971_v30 = vadd.f32 %v3876_v14, %v3565_v18  ;;  %v12666_v18 = vpop.f32.mrf.mxu1  ;;  %v14978_v36 = vld [vmem:[#allocation66_spill] sm:$0xff] }
 0x22f   : > { %14975 = vst [vmem:[#allocation12_spill] sm:$0xff] %v12645_v16  ;;  %v3567_v35 = vadd.f32 %v12406_v0, %v3145_v5  ;;  %v3147_v15 = vadd.f32 %v14976_v24, %v12446_v2  ;;  %v9655_v63 = vpop.f32.mrf.mxu0  ;;  %v12658_v1 = vsel %vm443_vm3, %v4267_v42, %v12645_v16  ;;  %v4271_v46 = vsel %vm443_vm3, %v12645_v16, %v4270_v12  ;;  %v12662_v20 = vld [vmem:[#allocation3 + $0x90] sm:$0xff]  ;;  %v12664_v57 = vld [vmem:[#allocation3 + $0x98] sm:$0xff] }
 0x230   : > { %14977 = vst [vmem:[#allocation31_spill] sm:$0xff] %v12658_v1  ;;  %4127 = vst.msk [vmem:[#allocation3 + $0xc1] sm:$0xff] %vm225_vm1, %v4040_v10  ;;  %v4043_v0 = vmax.f32 %v4011_v23, 0.0  ;;  %v4010_v5 = vadd.f32 %v12353_v45, %v3971_v30  ;;  %v3974_v2 = vadd.f32 %v9655_v63, %v3568_v4  ;;  %9691 = vmatprep.mubr.msk.f32.mxu1 %vm225_vm1, %v12658_v1  ;;  %v4272_v25 = vrot.slane %v12662_v20, 1  ;;  %v14979_v42 = vld [vmem:[#allocation64_spill] sm:$0xff]  ;;  %v14981_v23 = vld [vmem:[#allocation102_spill] sm:$0xff] }
 0x231   : > { %9744 = vmatprep.mubr.msk.f32.mxu0 %vm225_vm1, %v12662_v20  ;;  %v12677_v14 = vadd.f32 %v14979_v42, %v14978_v36  ;;  %v3570_v12 = vadd.f32 %v12441_v51, %v3148_v60  ;;  %9692 = vmatmul.mubr.msk.f32.gmra.mxu1 %vm225_vm1, %v4271_v46  ;;  %v3886_v10 = vpop.f32.mrf.mxu0  ;;  %v12684_v63 = vrot.slane %v12664_v57, 1  ;;  %v4275_v4 = vrot.slane %v12651_v9, 1  ;;  %v12691_v60 = vld [vmem:[#allocation3 + $0xb8] sm:$0x3]  ;;  %v14982_v42 = vld [vmem:[#allocation104_spill] sm:$0xff] }
 0x232   : > { %9745 = vmatmul.mubr.msk.f32.gmra.mxu0 %vm225_vm1, %v12664_v57  ;;  %v3150_v30 = vadd.f32 %v14981_v23, %v12450_v44  ;;  %4130 = vst.msk [vmem:[#allocation3 + $0xe1] sm:$0xff] %vm225_vm1, %v4043_v0  ;;  %v4042_v24 = vmax.f32 %v4010_v5, 0.0  ;;  %v4013_v36 = vadd.f32 %v12353_v45, %v3974_v2  ;;  %v3973_v51 = vadd.f32 %v3886_v10, %v3567_v35  ;;  %v12706_v35 = vpop.f32.mrf.mxu1 }
 0x233   : > { %14980 = vst [vmem:[#allocation11_spill] sm:$0xff] %v12684_v63  ;;  %v3569_v46 = vadd.f32 %v12475_v41, %v3147_v15  ;;  %v3149_v16 = vadd.f32 %v14982_v42, %v12462_v48  ;;  %v9658_v1 = vpop.f32.mrf.mxu0  ;;  %v12698_v58 = vsel %vm443_vm3, %v4272_v25, %v12684_v63  ;;  %v4276_v44 = vsel %vm443_vm3, %v12684_v63, %v4275_v4  ;;  %v12702_v0 = vld [vmem:[#allocation3 + $0xa8] sm:$0xff]  ;;  %v12704_v5 = vld [vmem:[#allocation3 + $0xb0] sm:$0xff]  ;;  %v14984_v25 = vld [vmem:[#allocation65_spill] sm:$0xff] }
 0x234   : > { %14983 = vst [vmem:[#allocation16_spill] sm:$0xff] %v12698_v58  ;;  %4129 = vst.msk [vmem:[#allocation3 + $0xd9] sm:$0xff] %vm225_vm1, %v4042_v24  ;;  %v4045_v41 = vmax.f32 %v4013_v36, 0.0  ;;  %v4012_v15 = vadd.f32 %v12353_v45, %v3973_v51  ;;  %v3976_v48 = vadd.f32 %v9658_v1, %v3570_v12  ;;  %9694 = vmatprep.mubr.msk.f32.mxu1 %vm225_vm1, %v12698_v58  ;;  %v4277_v2 = vrot.slane %v12702_v0, 1  ;;  %v14985_v4 = vld [vmem:[#allocation105_spill] sm:$0xff] }
 0x235   : > { %9747 = vmatprep.mubr.msk.f32.mxu0 %vm225_vm1, %v12702_v0  ;;  %v12716_v10 = vadd.f32 %v14984_v25, %v2342_v19  ;;  %v3152_v23 = vadd.f32 %v14985_v4, %v12466_v29  ;;  %9695 = vmatmul.mubr.msk.f32.gmra.mxu1 %vm225_vm1, %v4276_v44  ;;  %v3896_v24 = vpop.f32.mrf.mxu0  ;;  %v12724_v1 = vrot.slane %v12704_v5, 1  ;;  %v4280_v12 = vrot.slane %v12691_v60, 1  ;;  %v12730_v29 = vld [vmem:[#allocation3 + $0xd0] sm:$0x3]  ;;  %v14987_v25 = vld [vmem:[#allocation107_spill] sm:$0xff] }
 0x236   : > { %9748 = vmatmul.mubr.msk.f32.gmra.mxu0 %vm225_vm1, %v12704_v5  ;;  %v3572_v36 = vadd.f32 %v12511_v39, %v3150_v30  ;;  %4132 = vst.msk [vmem:[#allocation3 + $0xf9] sm:$0xff] %vm225_vm1, %v4045_v41  ;;  %v4044_v19 = vmax.f32 %v4012_v15, 0.0  ;;  %v4015_v51 = vadd.f32 %v12353_v45, %v3976_v48  ;;  %v3975_v42 = vadd.f32 %v3896_v24, %v3569_v46  ;;  %v12745_v46 = vpop.f32.mrf.mxu1  ;;  %v14988_v48 = vld [vmem:[#allocation71_spill] sm:$0xff] }
 0x237   : > { %14986 = vst [vmem:[#allocation32_spill] sm:$0xff] %v12724_v1  ;;  %v3571_v44 = vadd.f32 %v12549_v21, %v3149_v16  ;;  %v3151_v4 = vadd.f32 %v14987_v25, %v12483_v61  ;;  %v9661_v63 = vpop.f32.mrf.mxu0  ;;  %v12737_v58 = vsel %vm443_vm3, %v4277_v2, %v12724_v1  ;;  %v4281_v39 = vsel %vm443_vm3, %v12724_v1, %v4280_v12  ;;  %v12741_v30 = vld [vmem:[#allocation3 + $0xc0] sm:$0xff]  ;;  %v12743_v41 = vld [vmem:[#allocation3 + $0xc8] sm:$0xff] }
 0x238   : > { %4131 = vst.msk [vmem:[#allocation3 + $0xf1] sm:$0xff] %vm225_vm1, %v4044_v19  ;;  %v4047_v21 = vmax.f32 %v4015_v51, 0.0  ;;  %v4014_v16 = vadd.f32 %v12353_v45, %v3975_v42  ;;  %v3978_v61 = vadd.f32 %v9661_v63, %v3572_v36  ;;  %9697 = vmatprep.mubr.msk.f32.mxu1 %vm225_vm1, %v12737_v58  ;;  %v4282_v15 = vrot.slane %v12741_v30, 1  ;;  %9750 = vmatprep.mubr.msk.f32.mxu0 %vm225_vm1, %v12741_v30  ;;  %v14990_v19 = vld [vmem:[#allocation108_spill] sm:$0xff] }
 0x239   : > { %v2344_v2 = vadd.f32 %v14988_v48, %v12339_v49  ;;  %v3574_v24 = vadd.f32 %v12589_v17, %v3152_v23  ;;  %9698 = vmatmul.mubr.msk.f32.gmra.mxu1 %vm225_vm1, %v4281_v39  ;;  %v3906_v12 = vpop.f32.mrf.mxu0  ;;  %v12761_v63 = vrot.slane %v12743_v41, 1  ;;  %v4285_v36 = vrot.slane %v12730_v29, 1  ;;  %v12768_v23 = vld [vmem:[#allocation3 + $0xe8] sm:$0x3] }
 0x23a   : > { %9751 = vmatmul.mubr.msk.f32.gmra.mxu0 %vm225_vm1, %v12743_v41  ;;  %v3154_v51 = vadd.f32 %v14990_v19, %v12560_v34  ;;  %4134 = vst.msk [vmem:[#allocation3 + $0x111] sm:$0xff] %vm225_vm1, %v4047_v21  ;;  %v4046_v42 = vmax.f32 %v4014_v16, 0.0  ;;  %v4017_v49 = vadd.f32 %v12353_v45, %v3978_v61  ;;  %v3977_v17 = vadd.f32 %v3906_v12, %v3571_v44  ;;  %v3530_v44 = vpop.f32.mrf.mxu1 }
 0x23b   : > { %14989 = vst [vmem:[#allocation13_spill] sm:$0xff] %v12761_v63  ;;  %v3573_v25 = vadd.f32 %v12628_v6, %v3151_v4  ;;  %v3153_v39 = vadd.f32 %v12271_v26, %v12599_v38  ;;  %v9664_v48 = vpop.f32.mrf.mxu0  ;;  %v12775_v1 = vsel %vm443_vm3, %v4282_v15, %v12761_v63  ;;  %v4286_v34 = vsel %vm443_vm3, %v12761_v63, %v4285_v36  ;;  %v12779_v21 = vld [vmem:[#allocation3 + $0xd8] sm:$0xff]  ;;  %v12781_v16 = vld [vmem:[#allocation3 + $0xe0] sm:$0xff]  ;;  %v14992_v15 = vld [vmem:[#allocation68_spill] sm:$0xff] }
 0x23c   : > { %4133 = vst.msk [vmem:[#allocation3 + $0x109] sm:$0xff] %vm225_vm1, %v4046_v42  ;;  %v4049_v61 = vmax.f32 %v4017_v49, 0.0  ;;  %v4016_v6 = vadd.f32 %v12353_v45, %v3977_v17  ;;  %v3980_v4 = vadd.f32 %v9664_v48, %v3574_v24  ;;  %9700 = vmatprep.mubr.msk.f32.mxu1 %vm225_vm1, %v12775_v1  ;;  %v4287_v26 = vrot.slane %v12779_v21, 1  ;;  %9753 = vmatprep.mubr.msk.f32.mxu0 %vm225_vm1, %v12779_v21  ;;  %v14991_v38 = vld [vmem:[#allocation70_spill] sm:$0xff] }
 0x23d   : > { %v2751_v12 = vadd.f32 %v14992_v15, %v14991_v38  ;;  %v3156_v36 = vadd.f32 %v12286_v28, %v12677_v14  ;;  %9701 = vmatmul.mubr.msk.f32.gmra.mxu1 %vm225_vm1, %v4286_v34  ;;  %v3916_v19 = vpop.f32.mrf.mxu0  ;;  %v12798_v24 = vrot.slane %v12781_v16, 1  ;;  %v4290_v42 = vrot.slane %v12768_v23, 1  ;;  %v12804_v28 = vld [vmem:[#allocation3 + $0x100] sm:$0x3] }
 0x23e   : > { %9754 = vmatmul.mubr.msk.f32.gmra.mxu0 %vm225_vm1, %v12781_v16  ;;  %v3576_v49 = vadd.f32 %v12666_v18, %v3154_v51  ;;  %4136 = vst.msk [vmem:[#allocation3 + $0x129] sm:$0xff] %vm225_vm1, %v4049_v61  ;;  %v4048_v17 = vmax.f32 %v4016_v6, 0.0  ;;  %v4019_v48 = vadd.f32 %v12353_v45, %v3980_v4  ;;  %v3979_v38 = vadd.f32 %v3916_v19, %v3573_v25  ;;  %v9623_v25 = vpop.f32.mrf.mxu1 }
 0x23f   : > { %14993 = vst [vmem:[#allocation27_spill] sm:$0xff] %v12798_v24  ;;  %v3575_v14 = vadd.f32 %v12706_v35, %v3153_v39  ;;  %v3155_v34 = vadd.f32 %v12302_v27, %v12716_v10  ;;  %v9667_v15 = vpop.f32.mrf.mxu0  ;;  %v12811_v63 = vsel %vm443_vm3, %v4287_v26, %v12798_v24  ;;  %v4291_v18 = vsel %vm443_vm3, %v12798_v24, %v4290_v42  ;;  %v12815_v51 = vld [vmem:[#allocation3 + $0xf0] sm:$0xff]  ;;  %v12817_v61 = vld [vmem:[#allocation3 + $0xf8] sm:$0xff] }
 0x240   : > { %4135 = vst.msk [vmem:[#allocation3 + $0x121] sm:$0xff] %vm225_vm1, %v4048_v17  ;;  %v4051_v6 = vmax.f32 %v4019_v48, 0.0  ;;  %v4018_v35 = vadd.f32 %v12353_v45, %v3979_v38  ;;  %v3982_v39 = vadd.f32 %v9667_v15, %v3576_v49  ;;  %9703 = vmatprep.mubr.msk.f32.mxu1 %vm225_vm1, %v12811_v63  ;;  %v4292_v27 = vrot.slane %v12815_v51, 1  ;;  %9756 = vmatprep.mubr.msk.f32.mxu0 %vm225_vm1, %v12815_v51  ;;  %v14994_v10 = vld [vmem:[#allocation69_spill] sm:$0xff] }
 0x241   : > { %v2750_v4 = vadd.f32 %v14994_v10, %v2344_v2  ;;  %v3578_v26 = vadd.f32 %v12745_v46, %v3156_v36  ;;  %9704 = vmatmul.mubr.msk.f32.gmra.mxu1 %vm225_vm1, %v4291_v18  ;;  %v3926_v19 = vpop.f32.mrf.mxu0  ;;  %v12832_v42 = vrot.slane %v12817_v61, 1  ;;  %v4295_v49 = vrot.slane %v12804_v28, 1  ;;  %v12838_v46 = vld [vmem:[#allocation3 + $0x118] sm:$0x3] }
 0x242   : > { %9757 = vmatmul.mubr.msk.f32.gmra.mxu0 %vm225_vm1, %v12817_v61  ;;  %v3158_v17 = vadd.f32 %v12315_v13, %v2751_v12  ;;  %4138 = vst.msk [vmem:[#allocation3 + $0x141] sm:$0xff] %vm225_vm1, %v4051_v6  ;;  %v4050_v48 = vmax.f32 %v4018_v35, 0.0  ;;  %v4021_v2 = vadd.f32 %v12353_v45, %v3982_v39  ;;  %v3981_v38 = vadd.f32 %v3926_v19, %v3575_v14  ;;  %v3540_v6 = vpop.f32.mrf.mxu1 }
 0x243   : > { %14995 = vst [vmem:[#allocation15_spill] sm:$0xff] %v12832_v42  ;;  %v3577_v36 = vadd.f32 %v3530_v44, %v3155_v34  ;;  %v3157_v15 = vadd.f32 %v12336_v47, %v2750_v4  ;;  %v9670_v18 = vpop.f32.mrf.mxu0  ;;  %v12843_v10 = vsel %vm443_vm3, %v4292_v27, %v12832_v42  ;;  %v4296_v24 = vsel %vm443_vm3, %v12832_v42, %v4295_v49  ;;  %v12847_v13 = vld [vmem:[#allocation3 + $0x108] sm:$0xff]  ;;  %v12849_v12 = vld [vmem:[#allocation3 + $0x110] sm:$0xff] }
 0x244   : > { %4137 = vst.msk [vmem:[#allocation3 + $0x139] sm:$0xff] %vm225_vm1, %v4050_v48  ;;  %v4053_v14 = vmax.f32 %v4021_v2, 0.0  ;;  %v4020_v44 = vadd.f32 %v12353_v45, %v3981_v38  ;;  %v3984_v34 = vadd.f32 %v9670_v18, %v3578_v26  ;;  %9706 = vmatprep.mubr.msk.f32.mxu1 %vm225_vm1, %v12843_v10  ;;  %v4297_v47 = vrot.slane %v12847_v13, 1  ;;  %9759 = vmatprep.mubr.msk.f32.mxu0 %vm225_vm1, %v12847_v13 }
 0x245   : > { %9707 = vmatmul.mubr.msk.f32.gmra.mxu1 %vm225_vm1, %v4296_v24  ;;  %v3936_v35 = vpop.f32.mrf.mxu0  ;;  %v12862_v39 = vrot.slane %v12849_v12, 1  ;;  %v4300_v27 = vrot.slane %v12838_v46, 1  ;;  %v3580_v4 = vadd.f32 %v9623_v25, %v3158_v17  ;;  %v12867_v48 = vld [vmem:[#allocation3 + $0x130] sm:$0x3]  ;;  %v3579_v2 = vadd.f32 %v3540_v6, %v3157_v15 }
 0x246   : > { %9760 = vmatmul.mubr.msk.f32.gmra.mxu0 %vm225_vm1, %v12849_v12  ;;  %4140 = vst.msk [vmem:[#allocation3 + $0x159] sm:$0xff] %vm225_vm1, %v4053_v14  ;;  %v4052_v26 = vmax.f32 %v4020_v44, 0.0  ;;  %v4023_v19 = vadd.f32 %v12353_v45, %v3984_v34  ;;  %v3983_v49 = vadd.f32 %v3936_v35, %v3577_v36  ;;  %v4305_v34 = vrot.slane %v12867_v48, 1 }
 0x247   : > { %14996 = vst [vmem:[#allocation33_spill] sm:$0xff] %v12862_v39  ;;  %v9673_v24 = vpop.f32.mrf.mxu0  ;;  %v12871_v38 = vsel %vm443_vm3, %v4297_v47, %v12862_v39  ;;  %v4301_v18 = vsel %vm443_vm3, %v12862_v39, %v4300_v27  ;;  %v12875_v42 = vld [vmem:[#allocation3 + $0x120] sm:$0xff]  ;;  %v12877_v25 = vld [vmem:[#allocation3 + $0x128] sm:$0xff] }
 0x248   : > { %14997 = vst [vmem:[#allocation28_spill] sm:$0xff] %v12871_v38  ;;  %4139 = vst.msk [vmem:[#allocation3 + $0x151] sm:$0xff] %vm225_vm1, %v4052_v26  ;;  %v4055_v17 = vmax.f32 %v4023_v19, 0.0  ;;  %v4022_v36 = vadd.f32 %v12353_v45, %v3983_v49  ;;  %v3986_v14 = vadd.f32 %v9673_v24, %v3580_v4  ;;  %9709 = vmatprep.mubr.msk.f32.mxu1 %vm225_vm1, %v12871_v38  ;;  %v4302_v15 = vrot.slane %v12875_v42, 1 }
 0x249   : > { %9762 = vmatprep.mubr.msk.f32.mxu0 %vm225_vm1, %v12875_v42  ;;  %9710 = vmatmul.mubr.msk.f32.gmra.mxu1 %vm225_vm1, %v4301_v18  ;;  %v3946_v6 = vpop.f32.mrf.mxu0  ;;  %v12890_v44 = vrot.slane %v12877_v25, 1  ;;  %v12895_v4 = vld [vmem:[#allocation3 + $0x148] sm:$0x3]  ;;  %v4913_v38 = vrot.slane %v12471_v52, 2 }
 0x24a   : > { %9763 = vmatmul.mubr.msk.f32.gmra.mxu0 %vm225_vm1, %v12877_v25  ;;  %4142 = vst.msk [vmem:[#allocation3 + $0x171] sm:$0xff] %vm225_vm1, %v4055_v17  ;;  %v4054_v47 = vmax.f32 %v4022_v36, 0.0  ;;  %v4025_v35 = vadd.f32 %v12353_v45, %v3986_v14  ;;  %v3985_v27 = vadd.f32 %v3946_v6, %v3579_v2  ;;  %v4310_v14 = vrot.slane %v12895_v4, 1 }
 0x24b   : > { %14998 = vst [vmem:[#allocation24_spill] sm:$0xff] %v12890_v44  ;;  %v12899_v26 = vsel %vm443_vm3, %v4302_v15, %v12890_v44  ;;  %v4306_v19 = vsel %vm443_vm3, %v12890_v44, %v4305_v34  ;;  %v12903_v49 = vld [vmem:[#allocation3 + $0x138] sm:$0xff]  ;;  %v12905_v24 = vld [vmem:[#allocation3 + $0x140] sm:$0xff]  ;;  %v10135_v44 = vld [vmem:[#allocation3 + $0x8] sm:$0xff] }
 0x24c   : > { %14999 = vst [vmem:[#allocation35_spill] sm:$0xff] %v12899_v26  ;;  %4141 = vst.msk [vmem:[#allocation3 + $0x169] sm:$0xff] %vm225_vm1, %v4054_v47  ;;  %v4057_v18 = vmax.f32 %v4025_v35, 0.0  ;;  %v4024_v17 = vadd.f32 %v12353_v45, %v3985_v27  ;;  %9712 = vmatprep.mubr.msk.f32.mxu1 %vm225_vm1, %v12899_v26  ;;  %v4307_v2 = vrot.slane %v12903_v49, 1  ;;  %9765 = vmatprep.mubr.msk.f32.mxu0 %vm225_vm1, %v12903_v49  ;;  %v12918_v36 = vrot.slane %v12905_v24, 1 }
 0x24d   : > { %9713 = vmatmul.mubr.msk.f32.gmra.mxu1 %vm225_vm1, %v4306_v19  ;;  %v12921_v15 = vld [vmem:[#allocation3 + $0x160] sm:$0x3]  ;;  %v4909_v26 = vrot.slane %v10135_v44, 2 }
 0x24e   : > { %9766 = vmatmul.mubr.msk.f32.gmra.mxu0 %vm225_vm1, %v12905_v24  ;;  %15000 = vst [vmem:[#allocation38_spill] sm:$0xff] %v12918_v36  ;;  %4144 = vst.msk [vmem:[#allocation3 + $0x189] sm:$0xff] %vm225_vm1, %v4057_v18  ;;  %v4056_v45 = vmax.f32 %v4024_v17, 0.0  ;;  %v12926_v6 = vsel %vm443_vm3, %v4307_v2, %v12918_v36  ;;  %v4311_v34 = vsel %vm443_vm3, %v12918_v36, %v4310_v14  ;;  %v4315_v18 = vrot.slane %v12921_v15, 1 }
 0x24f   : > { %15001 = vst [vmem:[#allocation29_spill] sm:$0xff] %v12926_v6  ;;  %v12930_v47 = vld [vmem:[#allocation3 + $0x150] sm:$0xff]  ;;  %v12932_v35 = vld [vmem:[#allocation3 + $0x158] sm:$0xff]  ;;  %9715 = vmatprep.mubr.msk.f32.mxu1 %vm225_vm1, %v12926_v6 }
 0x250   : > { %4143 = vst.msk [vmem:[#allocation3 + $0x181] sm:$0xff] %vm225_vm1, %v4056_v45  ;;  %v4312_v27 = vrot.slane %v12930_v47, 1  ;;  %9768 = vmatprep.mubr.msk.f32.mxu0 %vm225_vm1, %v12930_v47  ;;  %v12941_v19 = vrot.slane %v12932_v35, 1  ;;  %v10134_v45 = vld [vmem:[#allocation3] sm:$0xff] }
 0x251   : > { %9716 = vmatmul.mubr.msk.f32.gmra.mxu1 %vm225_vm1, %v4311_v34  ;;  %v12947_v17 = vld [vmem:[#allocation3 + $0x178] sm:$0x3]  ;;  %v4908_v36 = vrot.slane %v10134_v45, 2 }
 0x252   : > { %15002 = vst [vmem:[#allocation25_spill] sm:$0xff] %v12941_v19  ;;  %9769 = vmatmul.mubr.msk.f32.gmra.mxu0 %vm225_vm1, %v12932_v35  ;;  %v12951_v2 = vsel %vm443_vm3, %v4312_v27, %v12941_v19  ;;  %v4316_v14 = vsel %vm443_vm3, %v12941_v19, %v4315_v18  ;;  %v4320_v18 = vrot.slane %v12947_v17, 1  ;;  %v10136_v19 = vld [vmem:[#allocation3 + $0x10] sm:$0x3] }
 0x253   : > { %15003 = vst [vmem:[#allocation30_spill] sm:$0xff] %v12951_v2  ;;  %9718 = vmatprep.mubr.msk.f32.mxu1 %vm225_vm1, %v12951_v2  ;;  %v12957_v6 = vld [vmem:[#allocation3 + $0x168] sm:$0xff]  ;;  %v12959_v34 = vld [vmem:[#allocation3 + $0x170] sm:$0xff]  ;;  %v4911_v2 = vrot.slane %v10136_v19, 2 }
 0x254   : > { %v4317_v39 = vrot.slane %v12957_v6, 1  ;;  %9771 = vmatprep.mubr.msk.f32.mxu0 %vm225_vm1, %v12957_v6  ;;  %v12965_v27 = vrot.slane %v12959_v34, 1 }
 0x255   : > { %9719 = vmatmul.mubr.msk.f32.gmra.mxu1 %vm225_vm1, %v4316_v14  ;;  %v4910_v14 = vsel %vm1111_vm4, %v4908_v36, %v4909_v26  ;;  %v4918_v36 = vrot.slane %v12507_v31, 2 }
 0x256   : > { %9772 = vmatmul.mubr.msk.f32.gmra.mxu0 %vm225_vm1, %v12959_v34  ;;  %v12975_v44 = vsel %vm443_vm3, %v4317_v39, %v12965_v27  ;;  %v4321_v45 = vsel %vm443_vm3, %v12965_v27, %v4320_v18  ;;  %v12987_v39 = vrot.slane %v12473_v62, 2  ;;  %v12992_v18 = vld [vmem:[%s14536_s3 + $0x1c] sm:$0xf] }
 0x257   : > { %9826 = vmatprep.mubr.msk.f32.mxu0 %vm225_vm1, %v12471_v52  ;;  %9721 = vmatprep.mubr.msk.f32.mxu1 %vm225_vm1, %v12975_v44  ;;  %v4912_v52 = vsel %vm1111_vm4, %v4909_v26, %v4911_v2  ;;  %v10137_v26 = vld [vmem:[%s14536_s3 + $0x10] sm:$0xf] }
 0x258   : > { %v13011_v19 = vsel %vm1111_vm4, %v4913_v38, %v12987_v39  ;;  %v4923_v38 = vrot.slane %v12545_v50, 2 }
 0x259   : > { %9722 = vmatmul.mubr.msk.f32.gmra.mxu1 %vm225_vm1, %v4321_v45 }
 0x25a   : > { %9827 = vmatmul.mubr.msk.f32.vlgmr.msra.gmra.mxu0 %vm225_vm1, %v12473_v62  ;;  %9776 = vmatprep.mubr.msk.f32.mxu1 %vm225_vm1, %v4910_v14  ;;  %v13003_v62 = vld [vmem:[%s14536_s3 + $0x18] sm:$0xf]  ;;  %v9728_v14 = vpop.f32.mrf.mxu0 }
 0x25b   : > { %9829 = vmatprep.mubr.msk.f32.mxu0 %vm225_vm1, %v12507_v31  ;;  %9925 = vmatpush3.msk.msra.mxu0 %vm590_vm0, %v12426_v40  ;;  %v13016_v40 = vrot.slane %v12509_v22, 2  ;;  %v4916_v31 = vrot.slane %v12459_v54, 2  ;;  %v13040_v54 = vrot.slane %v12547_v43, 2 }
 0x25c   : > { %10024 = vmatprep.subr.msk.mxu0 %vm590_vm0, %v12992_v18 }
 0x25d   : > { %9777 = vmatmul.mubr.msk.f32.vlgmr.msra.gmra.mxu1 %vm225_vm1, %v4912_v52  ;;  %v13035_v2 = vsel %vm1111_vm4, %v4918_v36, %v13016_v40  ;;  %v9678_v52 = vpop.f32.mrf.mxu1  ;;  %v4928_v36 = vrot.slane %v12585_v7, 2 }
 0x25e   : > { %9830 = vmatmul.mubr.msk.f32.gmra.mxu0 %vm225_vm1, %v12509_v22  ;;  %9875 = vmatpush3.msk.msra.mxu1 %vm590_vm0, %v10137_v26  ;;  %v4917_v22 = vsel %vm1111_vm4, %v12987_v39, %v4916_v31  ;;  %v13058_v26 = vrot.slane %v12587_v3, 2 }
 0x25f   : > { %9779 = vmatprep.mubr.msk.f32.mxu1 %vm225_vm1, %v13011_v19  ;;  %9832 = vmatprep.mubr.msk.f32.mxu0 %vm225_vm1, %v12545_v50  ;;  %v4921_v50 = vrot.slane %v12496_v8, 2  ;;  %v13060_v8 = vadd.f32 %v9728_v14, %v9678_v52  ;;  %v4943_v14 = vrot.slane %v12702_v0, 2 }
 0x260   : > { %9974 = vmatprep.subr.msk.mxu1 %vm590_vm0, %v13003_v62 }
 0x261   : > { %9780 = vmatmul.mubr.msk.f32.gmra.mxu1 %vm225_vm1, %v4917_v22  ;;  %v4922_v45 = vsel %vm1111_vm4, %v13016_v40, %v4921_v50  ;;  %v4933_v22 = vrot.slane %v12624_v59, 2  ;;  %v4938_v50 = vrot.slane %v12662_v20, 2 }
 0x262   : > { %9833 = vmatmul.mubr.msk.f32.gmra.mxu0 %vm225_vm1, %v12547_v43  ;;  %9782 = vmatprep.mubr.msk.f32.mxu1 %vm225_vm1, %v13035_v2  ;;  %v13053_v43 = vsel %vm1111_vm4, %v4923_v38, %v13040_v54  ;;  %v13078_v38 = vrot.slane %v12626_v11, 2 }
 0x263   : > { %9835 = vmatprep.mubr.msk.f32.mxu0 %vm225_vm1, %v12585_v7  ;;  %v4926_v7 = vrot.slane %v12534_v55, 2  ;;  %v4931_v55 = vrot.slane %v12574_v33, 2  ;;  %v4936_v33 = vrot.slane %v12613_v53, 2  ;;  %v4941_v53 = vrot.slane %v12651_v9, 2 }
 0x264   : > { %v4946_v9 = vrot.slane %v12691_v60, 2  ;;  %v4951_v60 = vrot.slane %v12730_v29, 2  ;;  %v4956_v29 = vrot.slane %v12768_v23, 2  ;;  %v4961_v23 = vrot.slane %v12804_v28, 2  ;;  %v13208_v28 = vld [vmem:[#allocation3 + $0x190] sm:$0x3] }
 0x265   : > { %9783 = vmatmul.mubr.msk.f32.gmra.mxu1 %vm225_vm1, %v4922_v45  ;;  %v4927_v31 = vsel %vm1111_vm4, %v13040_v54, %v4926_v7  ;;  %v13091_v45 = vsel %vm1111_vm4, %v4933_v22, %v13078_v38 }
 0x266   : > { %9836 = vmatmul.mubr.msk.f32.gmra.mxu0 %vm225_vm1, %v12587_v3  ;;  %9785 = vmatprep.mubr.msk.f32.mxu1 %vm225_vm1, %v13053_v43  ;;  %v13073_v3 = vsel %vm1111_vm4, %v4928_v36, %v13058_v26  ;;  %v4948_v36 = vrot.slane %v12741_v30, 2 }
 0x267   : > { %9838 = vmatprep.mubr.msk.f32.mxu0 %vm225_vm1, %v12624_v59  ;;  %v4932_v59 = vsel %vm1111_vm4, %v13058_v26, %v4931_v55  ;;  %v4958_v55 = vrot.slane %v12815_v51, 2 }
 0x269   : > { %9786 = vmatmul.mubr.msk.f32.gmra.mxu1 %vm225_vm1, %v4927_v31  ;;  %v4953_v31 = vrot.slane %v12779_v21, 2 }
 0x26a   : > { %9839 = vmatmul.mubr.msk.f32.gmra.mxu0 %vm225_vm1, %v12626_v11  ;;  %9788 = vmatprep.mubr.msk.f32.mxu1 %vm225_vm1, %v13073_v3  ;;  %v13096_v11 = vrot.slane %v12664_v57, 2 }
 0x26b   : > { %9841 = vmatprep.mubr.msk.f32.mxu0 %vm225_vm1, %v12662_v20  ;;  %v4937_v20 = vsel %vm1111_vm4, %v13078_v38, %v4936_v33 }
 0x26c   : > { %v13109_v52 = vsel %vm1111_vm4, %v4938_v50, %v13096_v11  ;;  %v4963_v50 = vrot.slane %v12847_v13, 2 }
 0x26d   : > { %9789 = vmatmul.mubr.msk.f32.gmra.mxu1 %vm225_vm1, %v4932_v59 }
 0x26e   : > { %9842 = vmatmul.mubr.msk.f32.gmra.mxu0 %vm225_vm1, %v12664_v57  ;;  %9791 = vmatprep.mubr.msk.f32.mxu1 %vm225_vm1, %v13091_v45  ;;  %v13114_v57 = vrot.slane %v12704_v5, 2 }
 0x26f   : > { %9844 = vmatprep.mubr.msk.f32.mxu0 %vm225_vm1, %v12702_v0  ;;  %v4942_v0 = vsel %vm1111_vm4, %v13096_v11, %v4941_v53  ;;  %v13206_v53 = vrot.slane %v12877_v25, 2 }
 0x270   : > { %v13127_v7 = vsel %vm1111_vm4, %v4943_v14, %v13114_v57  ;;  %v4968_v14 = vrot.slane %v12875_v42, 2 }
 0x271   : > { %9792 = vmatmul.mubr.msk.f32.gmra.mxu1 %vm225_vm1, %v4937_v20 }
 0x272   : > { %9845 = vmatmul.mubr.msk.f32.gmra.mxu0 %vm225_vm1, %v12704_v5  ;;  %9794 = vmatprep.mubr.msk.f32.mxu1 %vm225_vm1, %v13109_v52  ;;  %v13132_v5 = vrot.slane %v12743_v41, 2 }
 0x273   : > { %9847 = vmatprep.mubr.msk.f32.mxu0 %vm225_vm1, %v12741_v30  ;;  %v4947_v30 = vsel %vm1111_vm4, %v13114_v57, %v4946_v9  ;;  %v7450_v9 = vrot.slane %v13208_v28, 2 }
 0x274   : > { %v13145_v22 = vsel %vm1111_vm4, %v4948_v36, %v13132_v5 }
 0x275   : > { %9795 = vmatmul.mubr.msk.f32.gmra.mxu1 %vm225_vm1, %v4942_v0 }
 0x276   : > { %9848 = vmatmul.mubr.msk.f32.gmra.mxu0 %vm225_vm1, %v12743_v41  ;;  %9797 = vmatprep.mubr.msk.f32.mxu1 %vm225_vm1, %v13127_v7  ;;  %v13150_v41 = vrot.slane %v12781_v16, 2 }
 0x277   : > { %9850 = vmatprep.mubr.msk.f32.mxu0 %vm225_vm1, %v12779_v21  ;;  %v4952_v21 = vsel %vm1111_vm4, %v13132_v5, %v4951_v60 }
 0x278   : > { %v13163_v59 = vsel %vm1111_vm4, %v4953_v31, %v13150_v41 }
 0x279   : > { %9798 = vmatmul.mubr.msk.f32.gmra.mxu1 %vm225_vm1, %v4947_v30  ;;  %v13225_v30 = vsel %vm1111_vm4, %v4968_v14, %v13206_v53  ;;  %v5319_v14 = vld [vmem:[#allocation3 + $0x40] sm:$0x3] }
 0x27a   : > { %9851 = vmatmul.mubr.msk.f32.gmra.mxu0 %vm225_vm1, %v12781_v16  ;;  %9800 = vmatprep.mubr.msk.f32.mxu1 %vm225_vm1, %v13145_v22  ;;  %v13168_v16 = vrot.slane %v12817_v61, 2 }
 0x27b   : > { %9853 = vmatprep.mubr.msk.f32.mxu0 %vm225_vm1, %v12815_v51  ;;  %v4957_v51 = vsel %vm1111_vm4, %v13150_v41, %v4956_v29  ;;  %v4983_v29 = vrot.slane %v12957_v6, 2 }
 0x27c   : > { %v13181_v33 = vsel %vm1111_vm4, %v4958_v55, %v13168_v16  ;;  %v4962_v20 = vsel %vm1111_vm4, %v13168_v16, %v4961_v23 }
 0x27d   : > { %9801 = vmatmul.mubr.msk.f32.gmra.mxu1 %vm225_vm1, %v4952_v21  ;;  %v4978_v21 = vrot.slane %v12930_v47, 2 }
 0x27e   : > { %9854 = vmatmul.mubr.msk.f32.gmra.mxu0 %vm225_vm1, %v12817_v61  ;;  %9803 = vmatprep.mubr.msk.f32.mxu1 %vm225_vm1, %v13163_v59  ;;  %v13186_v61 = vrot.slane %v12849_v12, 2 }
 0x27f   : > { %9856 = vmatprep.mubr.msk.f32.mxu0 %vm225_vm1, %v12847_v13  ;;  %v13193_v13 = vld [vmem:[#allocation3 + $0x188] sm:$0xff] }
 0x280   : > { %v13216_v0 = vrot.slane %v13193_v13, 2 }
 0x281   : > { %9804 = vmatmul.mubr.msk.f32.gmra.mxu1 %vm225_vm1, %v4957_v51 }
 0x282   : > { %9857 = vmatmul.mubr.msk.f32.gmra.mxu0 %vm225_vm1, %v12849_v12  ;;  %9806 = vmatprep.mubr.msk.f32.mxu1 %vm225_vm1, %v13181_v33  ;;  %v13201_v12 = vsel %vm1111_vm4, %v4963_v50, %v13186_v61  ;;  %15004 = vst [vmem:[#allocation26_spill] sm:$0xff] %v13216_v0  ;;  %v13239_v31 = vsel %vm1111_vm4, %v13216_v0, %v7450_v9  ;;  %v13272_v50 = vrot.slane %v12959_v34, 2  ;;  %v5322_v9 = vld [vmem:[#allocation3 + $0x58] sm:$0x3] }
 0x283   : > { %9859 = vmatprep.mubr.msk.f32.mxu0 %vm225_vm1, %v12875_v42  ;;  %v4966_v42 = vrot.slane %v12838_v46, 2  ;;  %v13230_v46 = vrot.slane %v12905_v24, 2  ;;  %15005 = vst [vmem:[#allocation72_spill] sm:$0xff] %v13239_v31 }
 0x285   : > { %9807 = vmatmul.mubr.msk.f32.gmra.mxu1 %vm225_vm1, %v4962_v20  ;;  %v4967_v36 = vsel %vm1111_vm4, %v13186_v61, %v4966_v42  ;;  %v13284_v20 = vsel %vm1111_vm4, %v4983_v29, %v13272_v50 }
 0x286   : > { %9860 = vmatmul.mubr.msk.f32.gmra.mxu0 %vm225_vm1, %v12877_v25  ;;  %9809 = vmatprep.mubr.msk.f32.mxu1 %vm225_vm1, %v13201_v12  ;;  %v4973_v25 = vrot.slane %v12903_v49, 2 }
 0x287   : > { %9862 = vmatprep.mubr.msk.f32.mxu0 %vm225_vm1, %v12903_v49  ;;  %v4971_v49 = vrot.slane %v12867_v48, 2  ;;  %v13252_v48 = vrot.slane %v12932_v35, 2 }
 0x289   : > { %9810 = vmatmul.mubr.msk.f32.gmra.mxu1 %vm225_vm1, %v4967_v36  ;;  %v4972_v60 = vsel %vm1111_vm4, %v13206_v53, %v4971_v49  ;;  %v13265_v51 = vsel %vm1111_vm4, %v4978_v21, %v13252_v48  ;;  %v13312_v49 = vld [vmem:[%s14536_s3 + $0x20] sm:$0xf]  ;;  %v5328_v21 = vld [vmem:[#allocation3 + $0x88] sm:$0x3] }
 0x28a   : > { %9863 = vmatmul.mubr.msk.f32.gmra.mxu0 %vm225_vm1, %v12905_v24  ;;  %9812 = vmatprep.mubr.msk.f32.mxu1 %vm225_vm1, %v13225_v30  ;;  %v13247_v24 = vsel %vm1111_vm4, %v4973_v25, %v13230_v46 }
 0x28b   : > { %9865 = vmatprep.mubr.msk.f32.mxu0 %vm225_vm1, %v12930_v47  ;;  %v4976_v47 = vrot.slane %v12895_v4, 2  ;;  %v4981_v4 = vrot.slane %v12921_v15, 2  ;;  %v4986_v15 = vrot.slane %v12947_v17, 2  ;;  %v6150_v17 = vrot.slane %v5319_v14, 2 }
 0x28d   : > { %9813 = vmatmul.mubr.msk.f32.gmra.mxu1 %vm225_vm1, %v4972_v60  ;;  %v4977_v55 = vsel %vm1111_vm4, %v13230_v46, %v4976_v47  ;;  %v4982_v23 = vsel %vm1111_vm4, %v13252_v48, %v4981_v4  ;;  %v4987_v42 = vsel %vm1111_vm4, %v13272_v50, %v4986_v15  ;;  %v15008_v47 = vld [vmem:[#allocation4_spill] sm:$0xff]  ;;  %v6165_v4 = vrot.slane %v5328_v21, 2 }
 0x28e   : > { %9866 = vmatmul.mubr.msk.f32.gmra.mxu0 %vm225_vm1, %v12932_v35  ;;  %9815 = vmatprep.mubr.msk.f32.mxu1 %vm225_vm1, %v13247_v24  ;;  %v13269_v35 = vld [vmem:[#allocation3 + $0x180] sm:$0xff] }
 0x28f   : > { %9868 = vmatprep.mubr.msk.f32.mxu0 %vm225_vm1, %v12957_v6  ;;  %v5316_v6 = vld [vmem:[#allocation3 + $0x28] sm:$0x3] }
 0x291   : > { %9816 = vmatmul.mubr.msk.f32.gmra.mxu1 %vm225_vm1, %v4977_v55 }
 0x292   : > { %9869 = vmatmul.mubr.msk.f32.gmra.mxu0 %vm225_vm1, %v12959_v34  ;;  %9818 = vmatprep.mubr.msk.f32.mxu1 %vm225_vm1, %v13265_v51  ;;  %v6145_v34 = vrot.slane %v5316_v6, 2 }
 0x293   : > { %9871 = vmatprep.mubr.msk.f32.mxu0 %vm225_vm1, %v13269_v35 }
 0x294   : > { %v6146_v36 = vsel %vm1111_vm4, %v12987_v39, %v6145_v34  ;;  %v6151_v39 = vsel %vm1111_vm4, %v13016_v40, %v6150_v17  ;;  %v15006_v40 = vld [vmem:[#allocation5_spill] sm:$0xff]  ;;  %v6166_v34 = vsel %vm1111_vm4, %v13078_v38, %v6165_v4  ;;  %v15013_v38 = vld [vmem:[#allocation16_spill] sm:$0xff]  ;;  %v5352_v4 = vld [vmem:[#allocation3 + $0x148] sm:$0x3] }
 0x295   : > { %9819 = vmatmul.mubr.msk.f32.gmra.mxu1 %vm225_vm1, %v4982_v23  ;;  %v15010_v23 = vld [vmem:[#allocation18_spill] sm:$0xff] }
 0x296   : > { %9872 = vmatmul.mubr.msk.f32.gmra.mxu0 %vm225_vm1, %v13193_v13  ;;  %9821 = vmatprep.mubr.msk.f32.mxu1 %vm225_vm1, %v13284_v20 }
 0x297   : > { %9926 = vmatprep.mubr.msk.f32.mxu0 %vm225_vm1, %v13011_v19  ;;  %v5739_v19 = vrot.slane %v5316_v6, 1  ;;  %v5331_v6 = vld [vmem:[#allocation3 + $0xa0] sm:$0x3] }
 0x299   : > { %9822 = vmatmul.mubr.msk.f32.gmra.mxu1 %vm225_vm1, %v4987_v42  ;;  %v5740_v25 = vsel %vm443_vm3, %v12490_v56, %v5739_v19  ;;  %v6155_v56 = vrot.slane %v5322_v9, 2  ;;  %v5334_v42 = vld [vmem:[#allocation3 + $0xb8] sm:$0x3] }
 0x29a   : > { %9927 = vmatmul.mubr.msk.f32.vlgmr.msra.gmra.mxu0 %vm225_vm1, %v6146_v36  ;;  %9876 = vmatprep.mubr.msk.f32.mxu1 %vm225_vm1, %v12503_v32  ;;  %v5744_v32 = vrot.slane %v5319_v14, 1  ;;  %v6170_v14 = vrot.slane %v5331_v6, 2  ;;  %v15012_v36 = vld [vmem:[#allocation12_spill] sm:$0xff] }
 0x29b   : > { %9929 = vmatprep.mubr.msk.f32.mxu0 %vm225_vm1, %v13035_v2  ;;  %10025 = vmatpush3.msk.msra.mxu0 %vm590_vm0, %v12992_v18  ;;  %v5325_v18 = vld [vmem:[#allocation3 + $0x70] sm:$0x3]  ;;  %v6156_v60 = vsel %vm1111_vm4, %v13040_v54, %v6155_v56  ;;  %v15009_v54 = vld [vmem:[#allocation14_spill] sm:$0xff] }
 0x29c   : > { %v5745_v2 = vsel %vm443_vm3, %v15006_v40, %v5744_v32  ;;  %v6171_v17 = vsel %vm1111_vm4, %v13096_v11, %v6170_v14  ;;  %v5769_v11 = vrot.slane %v5334_v42, 1  ;;  %v15015_v40 = vld [vmem:[#allocation32_spill] sm:$0xff] }
 0x29d   : > { %9877 = vmatmul.mubr.msk.f32.vlgmr.msra.gmra.mxu1 %vm225_vm1, %v5740_v25  ;;  %v5337_v25 = vld [vmem:[#allocation3 + $0xd0] sm:$0x3] }
 0x29e   : > { %9930 = vmatmul.mubr.msk.f32.gmra.mxu0 %vm225_vm1, %v6151_v39  ;;  %9975 = vmatpush3.msk.msra.mxu1 %vm590_vm0, %v13003_v62  ;;  %v5749_v62 = vrot.slane %v5322_v9, 1  ;;  %v6175_v9 = vrot.slane %v5334_v42, 2  ;;  %v15014_v39 = vld [vmem:[#allocation11_spill] sm:$0xff] }
 0x29f   : > { %9879 = vmatprep.mubr.msk.f32.mxu1 %vm225_vm1, %v12541_v37  ;;  %9932 = vmatprep.mubr.msk.f32.mxu0 %vm225_vm1, %v13053_v43  ;;  %v15007_v37 = vld [vmem:[#allocation19_spill] sm:$0xff]  ;;  %v6160_v43 = vrot.slane %v5325_v18, 2 }
 0x2a0   : > { %10074 = vmatprep.subr.msk.mxu1 %vm590_vm0, %v13312_v49  ;;  %v5750_v55 = vsel %vm443_vm3, %v15008_v47, %v5749_v62  ;;  %v6176_v56 = vsel %vm1111_vm4, %v13114_v57, %v6175_v9  ;;  %v15025_v9 = vld [vmem:[#allocation30_spill] sm:$0xff] }
 0x2a1   : > { %9880 = vmatmul.mubr.msk.f32.gmra.mxu1 %vm225_vm1, %v5745_v2  ;;  %v6161_v29 = vsel %vm1111_vm4, %v13058_v26, %v6160_v43  ;;  %v15011_v26 = vld [vmem:[#allocation31_spill] sm:$0xff]  ;;  %v5770_v2 = vsel %vm443_vm3, %v15015_v40, %v5769_v11  ;;  %v15026_v11 = vld [vmem:[#allocation25_spill] sm:$0xff]  ;;  %v13459_v40 = vrot.slane %v13193_v13, 1 }
 0x2a2   : > { %9933 = vmatmul.mubr.msk.f32.gmra.mxu0 %vm225_vm1, %v6156_v60  ;;  %9882 = vmatprep.mubr.msk.f32.mxu1 %vm225_vm1, %v15007_v37  ;;  %v15016_v37 = vld [vmem:[#allocation13_spill] sm:$0xff] }
 0x2a3   : > { %9935 = vmatprep.mubr.msk.f32.mxu0 %vm225_vm1, %v13073_v3  ;;  %v5754_v3 = vrot.slane %v5325_v18, 1  ;;  %v5340_v18 = vld [vmem:[#allocation3 + $0xe8] sm:$0x3] }
 0x2a4   : > { %v6185_v57 = vrot.slane %v5340_v18, 2 }
 0x2a5   : > { %9883 = vmatmul.mubr.msk.f32.gmra.mxu1 %vm225_vm1, %v5750_v55  ;;  %v5755_v15 = vsel %vm443_vm3, %v15010_v23, %v5754_v3 }
 0x2a6   : > { %9936 = vmatmul.mubr.msk.f32.gmra.mxu0 %vm225_vm1, %v6161_v29  ;;  %9885 = vmatprep.mubr.msk.f32.mxu1 %vm225_vm1, %v15009_v54  ;;  %v6186_v43 = vsel %vm1111_vm4, %v13150_v41, %v6185_v57  ;;  %v15018_v29 = vld [vmem:[#allocation15_spill] sm:$0xff] }
 0x2a7   : > { %9938 = vmatprep.mubr.msk.f32.mxu0 %vm225_vm1, %v13091_v45  ;;  %v5759_v45 = vrot.slane %v5328_v21, 1  ;;  %v15017_v21 = vld [vmem:[#allocation27_spill] sm:$0xff] }
 0x2a8   : > { %v13466_v57 = vld [vmem:[#allocation3 + $0x48] sm:$0xff] }
 0x2a9   : > { %9886 = vmatmul.mubr.msk.f32.gmra.mxu1 %vm225_vm1, %v5755_v15  ;;  %v5760_v19 = vsel %vm443_vm3, %v15012_v36, %v5759_v45  ;;  %v15022_v45 = vld [vmem:[#allocation24_spill] sm:$0xff] }
 0x2aa   : > { %9939 = vmatmul.mubr.msk.f32.gmra.mxu0 %vm225_vm1, %v6166_v34  ;;  %9888 = vmatprep.mubr.msk.f32.mxu1 %vm225_vm1, %v15011_v26  ;;  %v6205_v34 = vrot.slane %v5352_v4, 2  ;;  %v5355_v26 = vld [vmem:[#allocation3 + $0x160] sm:$0x3] }
 0x2ab   : > { %9941 = vmatprep.mubr.msk.f32.mxu0 %vm225_vm1, %v13109_v52  ;;  %v5764_v52 = vrot.slane %v5331_v6, 1  ;;  %v15020_v6 = vld [vmem:[#allocation33_spill] sm:$0xff]  ;;  %v6210_v36 = vrot.slane %v5355_v26, 2 }
 0x2ac   : > { %v6206_v42 = vsel %vm1111_vm4, %v13230_v46, %v6205_v34  ;;  %v6217_v46 = vrot.slane %v13269_v35, 2 }
 0x2ad   : > { %9889 = vmatmul.mubr.msk.f32.gmra.mxu1 %vm225_vm1, %v5760_v19  ;;  %v5765_v32 = vsel %vm443_vm3, %v15014_v39, %v5764_v52  ;;  %v5358_v19 = vld [vmem:[#allocation3 + $0x178] sm:$0x3]  ;;  %v6211_v52 = vsel %vm1111_vm4, %v13252_v48, %v6210_v36  ;;  %v13445_v39 = vld [vmem:[#allocation3 + $0x30] sm:$0xff]  ;;  %v5811_v48 = vrot.slane %v13269_v35, 1 }
 0x2ae   : > { %9942 = vmatmul.mubr.msk.f32.gmra.mxu0 %vm225_vm1, %v6171_v17  ;;  %9891 = vmatprep.mubr.msk.f32.mxu1 %vm225_vm1, %v15013_v38  ;;  %v15024_v17 = vld [vmem:[#allocation38_spill] sm:$0xff] }
 0x2af   : > { %9944 = vmatprep.mubr.msk.f32.mxu0 %vm225_vm1, %v13127_v7  ;;  %v6180_v7 = vrot.slane %v5337_v25, 2 }
 0x2b1   : > { %9892 = vmatmul.mubr.msk.f32.gmra.mxu1 %vm225_vm1, %v5765_v32  ;;  %v6181_v60 = vsel %vm1111_vm4, %v13132_v5, %v6180_v7  ;;  %v13447_v32 = vld [vmem:[#allocation3 + $0x38] sm:$0xff] }
 0x2b2   : > { %9945 = vmatmul.mubr.msk.f32.gmra.mxu0 %vm225_vm1, %v6176_v56  ;;  %9894 = vmatprep.mubr.msk.f32.mxu1 %vm225_vm1, %v12737_v58  ;;  %v5774_v58 = vrot.slane %v5337_v25, 1  ;;  %v6215_v25 = vrot.slane %v5358_v19, 2  ;;  %v5361_v56 = vld [vmem:[#allocation3 + $0x190] sm:$0x3] }
 0x2b3   : > { %9947 = vmatprep.mubr.msk.f32.mxu0 %vm225_vm1, %v13145_v22  ;;  %v5343_v22 = vld [vmem:[#allocation3 + $0x100] sm:$0x3] }
 0x2b4   : > { %v5775_v62 = vsel %vm443_vm3, %v15016_v37, %v5774_v58  ;;  %v6190_v5 = vrot.slane %v5343_v22, 2  ;;  %v6220_v58 = vrot.slane %v5361_v56, 2  ;;  %v13470_v37 = vld [vmem:[#allocation3 + $0x40] sm:$0x3] }
 0x2b5   : > { %9895 = vmatmul.mubr.msk.f32.gmra.mxu1 %vm225_vm1, %v5770_v2  ;;  %v6971_v2 = vrot.slane %v13445_v39, 1 }
 0x2b6   : > { %9948 = vmatmul.mubr.msk.f32.gmra.mxu0 %vm225_vm1, %v6181_v60  ;;  %9897 = vmatprep.mubr.msk.f32.mxu1 %vm225_vm1, %v12775_v1  ;;  %v5779_v1 = vrot.slane %v5340_v18, 1  ;;  %v6191_v55 = vsel %vm1111_vm4, %v13168_v16, %v6190_v5  ;;  %v15019_v16 = vld [vmem:[#allocation28_spill] sm:$0xff]  ;;  %v6216_v18 = vsel %vm1111_vm4, %v13272_v50, %v6215_v25  ;;  %v6972_v60 = vrot.slane %v13447_v32, 1 }
 0x2b7   : > { %9950 = vmatprep.mubr.msk.f32.mxu0 %vm225_vm1, %v13163_v59  ;;  %v5346_v59 = vld [vmem:[#allocation3 + $0x118] sm:$0x3]  ;;  %v5809_v50 = vrot.slane %v5358_v19, 1  ;;  %v6976_v5 = vrot.slane %v13466_v57, 1  ;;  %v13551_v25 = vld [vmem:[#allocation3 + $0xb0] sm:$0xff] }
 0x2b8   : > { %v5780_v47 = vsel %vm443_vm3, %v15017_v21, %v5779_v1  ;;  %v6195_v41 = vrot.slane %v5346_v59, 2  ;;  %v6973_v1 = vsel %vm443_vm3, %v6971_v2, %v6972_v60  ;;  %v6974_v21 = vrot.slane %v13470_v37, 1 }
 0x2b9   : > { %9898 = vmatmul.mubr.msk.f32.gmra.mxu1 %vm225_vm1, %v5775_v62  ;;  %v5810_v62 = vsel %vm443_vm3, %v12965_v27, %v5809_v50  ;;  %v5814_v27 = vrot.slane %v5361_v56, 1 }
 0x2ba   : > { %9951 = vmatmul.mubr.msk.f32.gmra.mxu0 %vm225_vm1, %v6186_v43  ;;  %9900 = vmatprep.mubr.msk.f32.mxu1 %vm225_vm1, %v12811_v63  ;;  %v5784_v63 = vrot.slane %v5343_v22, 1  ;;  %v6196_v3 = vsel %vm1111_vm4, %v13186_v61, %v6195_v41  ;;  %v15021_v61 = vld [vmem:[#allocation35_spill] sm:$0xff]  ;;  %v13468_v22 = vld [vmem:[#allocation3 + $0x50] sm:$0xff]  ;;  %v6221_v43 = vsel %vm1111_vm4, %v13216_v0, %v6220_v58  ;;  %v6997_v58 = vrot.slane %v13551_v25, 1 }
 0x2bb   : > { %9953 = vmatprep.mubr.msk.f32.mxu0 %vm225_vm1, %v13181_v33  ;;  %v5349_v33 = vld [vmem:[#allocation3 + $0x130] sm:$0x3]  ;;  %v5815_v41 = vsel %vm443_vm3, %v13459_v40, %v5814_v27 }
 0x2bc   : > { %v5785_v54 = vsel %vm443_vm3, %v15018_v29, %v5784_v63  ;;  %v13493_v63 = vld [vmem:[#allocation3 + $0x68] sm:$0xff] }
 0x2bd   : > { %9901 = vmatmul.mubr.msk.f32.gmra.mxu1 %vm225_vm1, %v5780_v47  ;;  %v13489_v47 = vld [vmem:[#allocation3 + $0x58] sm:$0x3] }
 0x2be   : > { %9954 = vmatmul.mubr.msk.f32.gmra.mxu0 %vm225_vm1, %v6191_v55  ;;  %9903 = vmatprep.mubr.msk.f32.mxu1 %vm225_vm1, %v12843_v10  ;;  %v5789_v10 = vrot.slane %v5346_v59, 1  ;;  %v6977_v59 = vrot.slane %v13468_v22, 1  ;;  %v13491_v55 = vld [vmem:[#allocation3 + $0x60] sm:$0xff] }
 0x2bf   : > { %9956 = vmatprep.mubr.msk.f32.mxu0 %vm225_vm1, %v13201_v12  ;;  %v6200_v12 = vrot.slane %v5349_v33, 2 }
 0x2c0   : > { %v5790_v23 = vsel %vm443_vm3, %v15020_v6, %v5789_v10  ;;  %v6978_v29 = vsel %vm443_vm3, %v6976_v5, %v6977_v59  ;;  %v6982_v10 = vrot.slane %v13493_v63, 1  ;;  %v13513_v6 = vld [vmem:[#allocation3 + $0x70] sm:$0x3]  ;;  %v13572_v5 = vld [vmem:[#allocation3 + $0xc8] sm:$0xff] }
 0x2c1   : > { %9904 = vmatmul.mubr.msk.f32.gmra.mxu1 %vm225_vm1, %v5785_v54  ;;  %v6201_v15 = vsel %vm1111_vm4, %v13206_v53, %v6200_v12  ;;  %v15023_v53 = vld [vmem:[#allocation29_spill] sm:$0xff]  ;;  %v13501_v54 = vpop.f32.mrf.mxu0 }
 0x2c2   : > { %9957 = vmatmul.mubr.msk.f32.gmra.mxu0 %vm225_vm1, %v6196_v3  ;;  %9906 = vmatprep.mubr.msk.f32.mxu1 %vm225_vm1, %v15019_v16  ;;  %v6979_v3 = vrot.slane %v13489_v47, 1  ;;  %v6981_v16 = vrot.slane %v13491_v55, 1  ;;  %v13509_v12 = vld [vmem:[#allocation3 + $0x78] sm:$0xff] }
 0x2c3   : > { %9959 = vmatprep.mubr.msk.f32.mxu0 %vm225_vm1, %v13225_v30  ;;  %v5794_v30 = vrot.slane %v5349_v33, 1  ;;  %v6975_v33 = vsel %vm443_vm3, %v6972_v60, %v6974_v21  ;;  %v13574_v21 = vld [vmem:[#allocation3 + $0xb8] sm:$0x3] }
 0x2c4   : > { %v6983_v34 = vsel %vm443_vm3, %v6981_v16, %v6982_v10 }
 0x2c5   : > { %9907 = vmatmul.mubr.msk.f32.gmra.mxu1 %vm225_vm1, %v5790_v23  ;;  %v5795_v14 = vsel %vm443_vm3, %v15022_v45, %v5794_v30  ;;  %v6980_v23 = vsel %vm443_vm3, %v6977_v59, %v6979_v3  ;;  %v13527_v45 = vld [vmem:[#allocation3 + $0x90] sm:$0xff] }
 0x2c6   : > { %9960 = vmatmul.mubr.msk.f32.gmra.mxu0 %vm225_vm1, %v6201_v15  ;;  %9909 = vmatprep.mubr.msk.f32.mxu1 %vm225_vm1, %v15021_v61  ;;  %v6986_v61 = vrot.slane %v13509_v12, 1 }
 0x2c7   : > { %9962 = vmatprep.mubr.msk.f32.mxu0 %vm225_vm1, %v13247_v24  ;;  %v5799_v24 = vrot.slane %v5352_v4, 1  ;;  %v13511_v4 = vld [vmem:[#allocation3 + $0x80] sm:$0xff] }
 0x2c8   : > { %v6987_v30 = vrot.slane %v13511_v4, 1 }
 0x2c9   : > { %9910 = vmatmul.mubr.msk.f32.gmra.mxu1 %vm225_vm1, %v5795_v14  ;;  %v5800_v38 = vsel %vm443_vm3, %v15024_v17, %v5799_v24  ;;  %v13529_v14 = vld [vmem:[#allocation3 + $0x98] sm:$0xff]  ;;  %v13534_v24 = vld [vmem:[#allocation3 + $0x88] sm:$0x3] }
 0x2ca   : > { %9963 = vmatmul.mubr.msk.f32.gmra.mxu0 %vm225_vm1, %v6206_v42  ;;  %9912 = vmatprep.mubr.msk.f32.mxu1 %vm225_vm1, %v15023_v53  ;;  %v13531_v42 = vpop.f32.mrf.mxu1  ;;  %v6988_v17 = vsel %vm443_vm3, %v6986_v61, %v6987_v30  ;;  %v6999_v61 = vrot.slane %v13574_v21, 1 }
 0x2cb   : > { %9965 = vmatprep.mubr.msk.f32.mxu0 %vm225_vm1, %v13265_v51  ;;  %v5804_v51 = vrot.slane %v5355_v26, 1  ;;  %v6984_v26 = vrot.slane %v13513_v6, 1 }
 0x2cd   : > { %9913 = vmatmul.mubr.msk.f32.gmra.mxu1 %vm225_vm1, %v5800_v38  ;;  %v5805_v7 = vsel %vm443_vm3, %v15026_v11, %v5804_v51  ;;  %v6991_v38 = vrot.slane %v13527_v45, 1  ;;  %v13549_v51 = vld [vmem:[#allocation3 + $0xa8] sm:$0xff]  ;;  %v13553_v11 = vld [vmem:[#allocation3 + $0xa0] sm:$0x3] }
 0x2ce   : > { %9966 = vmatmul.mubr.msk.f32.gmra.mxu0 %vm225_vm1, %v6211_v52  ;;  %9915 = vmatprep.mubr.msk.f32.mxu1 %vm225_vm1, %v15025_v9  ;;  %v6992_v52 = vrot.slane %v13529_v14, 1  ;;  %v6989_v9 = vrot.slane %v13534_v24, 1  ;;  %v6996_v50 = vrot.slane %v13549_v51, 1 }
 0x2cf   : > { %9968 = vmatprep.mubr.msk.f32.mxu0 %vm225_vm1, %v13284_v20  ;;  %v6219_v20 = vsel %vm1111_vm4, %v6217_v46, %v13216_v0 }
 0x2d0   : > { %v6993_v60 = vsel %vm443_vm3, %v6991_v38, %v6992_v52  ;;  %v6998_v16 = vsel %vm443_vm3, %v6996_v50, %v6997_v58 }
 0x2d1   : > { %9916 = vmatmul.mubr.msk.f32.gmra.mxu1 %vm225_vm1, %v5805_v7 }
 0x2d2   : > { %9969 = vmatmul.mubr.msk.f32.gmra.mxu0 %vm225_vm1, %v6216_v18  ;;  %9918 = vmatprep.mubr.msk.f32.mxu1 %vm225_vm1, %v12975_v44  ;;  %v13479_v44 = vsel %vm443_vm3, %v5811_v48, %v13459_v40  ;;  %v6990_v18 = vsel %vm443_vm3, %v6987_v30, %v6989_v9  ;;  %v13591_v30 = vld [vmem:[#allocation3 + $0xd8] sm:$0xff] }
 0x2d3   : > { %9971 = vmatprep.mubr.msk.f32.mxu0 %vm225_vm1, %v6219_v20  ;;  %v7006_v9 = vrot.slane %v13591_v30, 1 }
 0x2d5   : > { %9919 = vmatmul.mubr.msk.f32.gmra.mxu1 %vm225_vm1, %v5810_v62 }
 0x2d6   : > { %9972 = vmatmul.mubr.msk.f32.gmra.mxu0 %vm225_vm1, %v6221_v43  ;;  %9921 = vmatprep.mubr.msk.f32.mxu1 %vm225_vm1, %v13479_v44  ;;  %v6994_v43 = vrot.slane %v13553_v11, 1 }
 0x2d7   : > { %10026 = vmatprep.mubr.msk.f32.mxu0 %vm225_vm1, %v6973_v1  ;;  %v13570_v1 = vld [vmem:[#allocation3 + $0xc0] sm:$0xff] }
 0x2d9   : > { %9922 = vmatmul.mubr.msk.f32.gmra.mxu1 %vm225_vm1, %v5815_v41 }
 0x2da   : > { %10027 = vmatmul.mubr.msk.f32.vlgmr.msra.gmra.mxu0 %vm225_vm1, %v6975_v33  ;;  %9976 = vmatprep.mubr.msk.f32.mxu1 %vm225_vm1, %v13445_v39  ;;  %v6995_v33 = vsel %vm443_vm3, %v6992_v52, %v6994_v43 }
 0x2db   : > { %10029 = vmatprep.mubr.msk.f32.mxu0 %vm225_vm1, %v6978_v29 }
 0x2dd   : > { %9977 = vmatmul.mubr.msk.f32.vlgmr.msra.gmra.mxu1 %vm225_vm1, %v13447_v32  ;;  %v9731_v15 = vpop.f32.mrf.mxu0 }
 0x2de   : > { %10030 = vmatmul.mubr.msk.f32.gmra.mxu0 %vm225_vm1, %v6980_v23  ;;  %10075 = vmatpush3.msk.msra.mxu1 %vm590_vm0, %v13312_v49  ;;  %v6985_v49 = vsel %vm443_vm3, %v6982_v10, %v6984_v26  ;;  %v7001_v10 = vrot.slane %v13570_v1, 1  ;;  %v7002_v23 = vrot.slane %v13572_v5, 1 }
 0x2df   : > { %9979 = vmatprep.mubr.msk.f32.mxu1 %vm225_vm1, %v13466_v57  ;;  %10032 = vmatprep.mubr.msk.f32.mxu0 %vm225_vm1, %v6983_v34  ;;  %v4759_v53 = vpop.f32.mrf.mxu0  ;;  %v13593_v34 = vld [vmem:[#allocation3 + $0xe0] sm:$0xff] }
 0x2e0   : > { %v7003_v52 = vsel %vm443_vm3, %v7001_v10, %v7002_v23 }
 0x2e1   : > { %v9681_v36 = vpop.f32.mrf.mxu1  ;;  %9980 = vmatmul.mubr.msk.f32.gmra.mxu1 %vm225_vm1, %v13468_v22  ;;  %v9734_v19 = vpop.f32.mrf.mxu0 }
 0x2e2   : > { %10033 = vmatmul.mubr.msk.f32.gmra.mxu0 %vm225_vm1, %v6985_v49  ;;  %v13543_v46 = vadd.f32 %v9731_v15, %v9681_v36  ;;  %9982 = vmatprep.mubr.msk.f32.mxu1 %vm225_vm1, %v13491_v55  ;;  %v13595_v49 = vld [vmem:[#allocation3 + $0xd0] sm:$0x3] }
 0x2e3   : > { %10035 = vmatprep.mubr.msk.f32.mxu0 %vm225_vm1, %v6988_v17  ;;  %v4467_v56 = vpop.f32.mrf.mxu1  ;;  %v4769_v48 = vpop.f32.mrf.mxu0 }
 0x2e4   : > { %v13555_v7 = vadd.f32 %v4759_v53, %v4467_v56  ;;  %v7007_v56 = vrot.slane %v13593_v34, 1 }
 0x2e5   : > { %v9684_v20 = vpop.f32.mrf.mxu1  ;;  %9983 = vmatmul.mubr.msk.f32.gmra.mxu1 %vm225_vm1, %v13493_v63  ;;  %v9737_v2 = vpop.f32.mrf.mxu0 }
 0x2e6   : > { %10036 = vmatmul.mubr.msk.f32.gmra.mxu0 %vm225_vm1, %v6990_v18  ;;  %v13564_v62 = vadd.f32 %v9734_v19, %v9684_v20  ;;  %9985 = vmatprep.mubr.msk.f32.mxu1 %vm225_vm1, %v13509_v12  ;;  %v7000_v19 = vsel %vm443_vm3, %v6997_v58, %v6999_v61  ;;  %v7004_v18 = vrot.slane %v13595_v49, 1  ;;  %v13612_v20 = vld [vmem:[#allocation3 + $0xf0] sm:$0xff]  ;;  %v13616_v58 = vld [vmem:[#allocation3 + $0xe8] sm:$0x3] }
 0x2e7   : > { %10038 = vmatprep.mubr.msk.f32.mxu0 %vm225_vm1, %v6993_v60  ;;  %v4477_v59 = vpop.f32.mrf.mxu1  ;;  %v4779_v27 = vpop.f32.mrf.mxu0  ;;  %15027 = vst [vmem:[#allocation74_spill] sm:$0xff] %v13612_v20  ;;  %15029 = vst [vmem:[#allocation41_spill] sm:$0xff] %v13616_v58  ;;  %v13633_v61 = vld [vmem:[#allocation3 + $0x108] sm:$0xff] }
 0x2e8   : > { %v13576_v41 = vadd.f32 %v4769_v48, %v4477_v59  ;;  %v7005_v59 = vsel %vm443_vm3, %v7002_v23, %v7004_v18  ;;  %v7009_v23 = vrot.slane %v13616_v58, 1  ;;  %15030 = vst [vmem:[#allocation45_spill] sm:$0xff] %v13633_v61 }
 0x2e9   : > { %v9687_v29 = vpop.f32.mrf.mxu1  ;;  %9986 = vmatmul.mubr.msk.f32.gmra.mxu1 %vm225_vm1, %v13511_v4 }
 0x2ea   : > { %v9740_v3 = vpop.f32.mrf.mxu0  ;;  %10039 = vmatmul.mubr.msk.f32.gmra.mxu0 %vm225_vm1, %v6995_v33  ;;  %v13585_v15 = vadd.f32 %v9737_v2, %v9687_v29  ;;  %9988 = vmatprep.mubr.msk.f32.mxu1 %vm225_vm1, %v13527_v45  ;;  %v13614_v2 = vld [vmem:[#allocation3 + $0xf8] sm:$0xff]  ;;  %v7008_v29 = vsel %vm443_vm3, %v7006_v9, %v7007_v56 }
 0x2eb   : > { %10041 = vmatprep.mubr.msk.f32.mxu0 %vm225_vm1, %v6998_v16  ;;  %v4487_v26 = vpop.f32.mrf.mxu1  ;;  %15028 = vst [vmem:[#allocation52_spill] sm:$0xff] %v13614_v2  ;;  %v7012_v16 = vrot.slane %v13614_v2, 1 }
 0x2ec   : > { %v4789_v53 = vpop.f32.mrf.mxu0  ;;  %v13597_v36 = vadd.f32 %v4779_v27, %v4487_v26  ;;  %v13635_v26 = vld [vmem:[#allocation3 + $0x110] sm:$0xff] }
 0x2ed   : > { %v9690_v17 = vpop.f32.mrf.mxu1  ;;  %9989 = vmatmul.mubr.msk.f32.gmra.mxu1 %vm225_vm1, %v13529_v14  ;;  %15031 = vst [vmem:[#allocation34_spill] sm:$0xff] %v13635_v26 }
 0x2ee   : > { %v9743_v38 = vpop.f32.mrf.mxu0  ;;  %10042 = vmatmul.mubr.msk.f32.gmra.mxu0 %vm225_vm1, %v7000_v19  ;;  %v13606_v48 = vadd.f32 %v9740_v3, %v9690_v17  ;;  %9991 = vmatprep.mubr.msk.f32.mxu1 %vm225_vm1, %v13549_v51  ;;  %v7011_v3 = vrot.slane %v13612_v20, 1  ;;  %v13637_v17 = vld [vmem:[#allocation3 + $0x100] sm:$0x3] }
 0x2ef   : > { %10044 = vmatprep.mubr.msk.f32.mxu0 %vm225_vm1, %v7003_v52  ;;  %v4497_v60 = vpop.f32.mrf.mxu1  ;;  %15032 = vst [vmem:[#allocation75_spill] sm:$0xff] %v13637_v17 }
 0x2f0   : > { %v4799_v50 = vpop.f32.mrf.mxu0  ;;  %v13618_v43 = vadd.f32 %v4789_v53, %v4497_v60  ;;  %v7013_v60 = vsel %vm443_vm3, %v7011_v3, %v7012_v16  ;;  %v13658_v3 = vld [vmem:[#allocation3 + $0x118] sm:$0x3] }
 0x2f1   : > { %v9693_v27 = vpop.f32.mrf.mxu1  ;;  %9992 = vmatmul.mubr.msk.f32.gmra.mxu1 %vm225_vm1, %v13551_v25  ;;  %15037 = vst [vmem:[#allocation20_spill] sm:$0xff] %v13658_v3 }
 0x2f2   : > { %v9746_v33 = vpop.f32.mrf.mxu0  ;;  %10045 = vmatmul.mubr.msk.f32.gmra.mxu0 %vm225_vm1, %v7005_v59  ;;  %v13627_v10 = vadd.f32 %v9743_v38, %v9693_v27  ;;  %9994 = vmatprep.mubr.msk.f32.mxu1 %vm225_vm1, %v13570_v1  ;;  %v7010_v38 = vsel %vm443_vm3, %v7007_v56, %v7009_v23  ;;  %v7016_v59 = vrot.slane %v13633_v61, 1  ;;  %v7017_v27 = vrot.slane %v13635_v26, 1  ;;  %v13656_v23 = vld [vmem:[#allocation3 + $0x128] sm:$0xff] }
 0x2f3   : > { %10047 = vmatprep.mubr.msk.f32.mxu0 %vm225_vm1, %v7008_v29  ;;  %v4507_v53 = vpop.f32.mrf.mxu1  ;;  %v7014_v56 = vrot.slane %v13637_v17, 1  ;;  %15036 = vst [vmem:[#allocation49_spill] sm:$0xff] %v13656_v23  ;;  %v7022_v58 = vrot.slane %v13656_v23, 1 }
 0x2f4   : > { %v4809_v19 = vpop.f32.mrf.mxu0  ;;  %v13639_v52 = vadd.f32 %v4799_v50, %v4507_v53  ;;  %v13654_v50 = vld [vmem:[#allocation3 + $0x120] sm:$0xff] }
 0x2f5   : > { %v9696_v9 = vpop.f32.mrf.mxu1  ;;  %9995 = vmatmul.mubr.msk.f32.gmra.mxu1 %vm225_vm1, %v13572_v5  ;;  %15035 = vst [vmem:[#allocation73_spill] sm:$0xff] %v13654_v50  ;;  %v7021_v17 = vrot.slane %v13654_v50, 1 }
 0x2f6   : > { %15033 = vst [vmem:[#allocation51_spill] sm:$0xff] %v13639_v52  ;;  %v9749_v18 = vpop.f32.mrf.mxu0  ;;  %10048 = vmatmul.mubr.msk.f32.gmra.mxu0 %vm225_vm1, %v7010_v38  ;;  %v13648_v29 = vadd.f32 %v9746_v33, %v9696_v9  ;;  %9997 = vmatprep.mubr.msk.f32.mxu1 %vm225_vm1, %v13591_v30  ;;  %v7015_v33 = vsel %vm443_vm3, %v7012_v16, %v7014_v56  ;;  %v7019_v16 = vrot.slane %v13658_v3, 1  ;;  %v13677_v56 = vld [vmem:[#allocation3 + $0x140] sm:$0xff] }
 0x2f7   : > { %10050 = vmatprep.mubr.msk.f32.mxu0 %vm225_vm1, %v7013_v60  ;;  %v4517_v53 = vpop.f32.mrf.mxu1  ;;  %v7018_v60 = vsel %vm443_vm3, %v7016_v59, %v7017_v27  ;;  %v13679_v59 = vld [vmem:[#allocation3 + $0x130] sm:$0x3] }
 0x2f8   : > { %15034 = vst [vmem:[#allocation47_spill] sm:$0xff] %v13648_v29  ;;  %v4819_v38 = vpop.f32.mrf.mxu0  ;;  %v13660_v31 = vadd.f32 %v4809_v19, %v4517_v53  ;;  %v13675_v19 = vld [vmem:[#allocation3 + $0x138] sm:$0xff]  ;;  %15040 = vst [vmem:[#allocation77_spill] sm:$0xff] %v13679_v59 }
 0x2f9   : > { %v9699_v9 = vpop.f32.mrf.mxu1  ;;  %9998 = vmatmul.mubr.msk.f32.gmra.mxu1 %vm225_vm1, %v13593_v34  ;;  %v7026_v3 = vrot.slane %v13675_v19, 1 }
 0x2fa   : > { %15038 = vst [vmem:[#allocation21_spill] sm:$0xff] %v13660_v31  ;;  %v9752_v0 = vpop.f32.mrf.mxu0  ;;  %10051 = vmatmul.mubr.msk.f32.gmra.mxu0 %vm225_vm1, %v7015_v33  ;;  %v13669_v29 = vadd.f32 %v9749_v18, %v9699_v9  ;;  %10000 = vmatprep.mubr.msk.f32.mxu1 %vm225_vm1, %v13612_v20  ;;  %v7020_v18 = vsel %vm443_vm3, %v7017_v27, %v7019_v16  ;;  %v7027_v20 = vrot.slane %v13677_v56, 1  ;;  %v7024_v27 = vrot.slane %v13679_v59, 1  ;;  %v13698_v16 = vld [vmem:[#allocation3 + $0x158] sm:$0xff] }
 0x2fb   : > { %10053 = vmatprep.mubr.msk.f32.mxu0 %vm225_vm1, %v7018_v60  ;;  %v4527_v53 = vpop.f32.mrf.mxu1  ;;  %v7023_v60 = vsel %vm443_vm3, %v7021_v17, %v7022_v58  ;;  %v13700_v17 = vld [vmem:[#allocation3 + $0x148] sm:$0x3] }
 0x2fc   : > { %15039 = vst [vmem:[#allocation23_spill] sm:$0xff] %v13669_v29  ;;  %v4829_v33 = vpop.f32.mrf.mxu0  ;;  %v13681_v31 = vadd.f32 %v4819_v38, %v4527_v53  ;;  %v13696_v38 = vld [vmem:[#allocation3 + $0x150] sm:$0xff]  ;;  %15043 = vst [vmem:[#allocation43_spill] sm:$0xff] %v13700_v17 }
 0x2fd   : > { %v9702_v9 = vpop.f32.mrf.mxu1  ;;  %10001 = vmatmul.mubr.msk.f32.gmra.mxu1 %vm225_vm1, %v13614_v2  ;;  %v7031_v59 = vrot.slane %v13696_v38, 1 }
 0x2fe   : > { %15041 = vst [vmem:[#allocation76_spill] sm:$0xff] %v13681_v31  ;;  %v9755_v29 = vpop.f32.mrf.mxu0  ;;  %10054 = vmatmul.mubr.msk.f32.gmra.mxu0 %vm225_vm1, %v7020_v18  ;;  %v13690_v52 = vadd.f32 %v9752_v0, %v9702_v9  ;;  %10003 = vmatprep.mubr.msk.f32.mxu1 %vm225_vm1, %v13633_v61  ;;  %v7025_v0 = vsel %vm443_vm3, %v7022_v58, %v7024_v27  ;;  %v7032_v61 = vrot.slane %v13698_v16, 1  ;;  %v7029_v58 = vrot.slane %v13700_v17, 1  ;;  %v13719_v27 = vld [vmem:[#allocation3 + $0x170] sm:$0xff] }
 0x2ff   : > { %10056 = vmatprep.mubr.msk.f32.mxu0 %vm225_vm1, %v7023_v60  ;;  %v4537_v53 = vpop.f32.mrf.mxu1  ;;  %v7028_v60 = vsel %vm443_vm3, %v7026_v3, %v7027_v20  ;;  %v13721_v3 = vld [vmem:[#allocation3 + $0x160] sm:$0x3] }
 0x300   : > { %15042 = vst [vmem:[#allocation37_spill] sm:$0xff] %v13690_v52  ;;  %v4839_v18 = vpop.f32.mrf.mxu0  ;;  %v13702_v31 = vadd.f32 %v4829_v33, %v4537_v53  ;;  %v13717_v33 = vld [vmem:[#allocation3 + $0x168] sm:$0xff]  ;;  %15046 = vst [vmem:[#allocation79_spill] sm:$0xff] %v13721_v3 }
 0x301   : > { %v9705_v9 = vpop.f32.mrf.mxu1  ;;  %10004 = vmatmul.mubr.msk.f32.gmra.mxu1 %vm225_vm1, %v13635_v26  ;;  %v7036_v17 = vrot.slane %v13717_v33, 1 }
 0x302   : > { %15044 = vst [vmem:[#allocation36_spill] sm:$0xff] %v13702_v31  ;;  %v9758_v52 = vpop.f32.mrf.mxu0  ;;  %10057 = vmatmul.mubr.msk.f32.gmra.mxu0 %vm225_vm1, %v7025_v0  ;;  %v13711_v2 = vadd.f32 %v9755_v29, %v9705_v9  ;;  %10006 = vmatprep.mubr.msk.f32.mxu1 %vm225_vm1, %v13654_v50  ;;  %v7030_v29 = vsel %vm443_vm3, %v7027_v20, %v7029_v58  ;;  %v7037_v50 = vrot.slane %v13719_v27, 1  ;;  %v7034_v20 = vrot.slane %v13721_v3, 1 }
 0x303   : > { %10059 = vmatprep.mubr.msk.f32.mxu0 %vm225_vm1, %v7028_v60  ;;  %v4547_v53 = vpop.f32.mrf.mxu1  ;;  %v7033_v60 = vsel %vm443_vm3, %v7031_v59, %v7032_v61 }
 0x304   : > { %15045 = vst [vmem:[#allocation46_spill] sm:$0xff] %v13711_v2  ;;  %v4849_v0 = vpop.f32.mrf.mxu0  ;;  %v13723_v31 = vadd.f32 %v4839_v18, %v4547_v53  ;;  %v13738_v53 = vld [vmem:[#allocation3 + $0x178] sm:$0x3]  ;;  %v7035_v59 = vsel %vm443_vm3, %v7032_v61, %v7034_v20 }
 0x305   : > { %v9708_v9 = vpop.f32.mrf.mxu1  ;;  %10007 = vmatmul.mubr.msk.f32.gmra.mxu1 %vm225_vm1, %v13656_v23  ;;  %15049 = vst [vmem:[#allocation6_spill] sm:$0xff] %v13738_v53  ;;  %v13745_v23 = vld [vmem:[#allocation3 + $0x1a0] sm:$0xff]  ;;  %v7039_v61 = vrot.slane %v13738_v53, 1 }
 0x306   : > { %15047 = vst [vmem:[#allocation78_spill] sm:$0xff] %v13723_v31  ;;  %v9761_v2 = vpop.f32.mrf.mxu0  ;;  %10060 = vmatmul.mubr.msk.f32.gmra.mxu0 %vm225_vm1, %v7030_v29  ;;  %v13732_v26 = vadd.f32 %v9758_v52, %v9708_v9  ;;  %10009 = vmatprep.mubr.msk.f32.mxu1 %vm225_vm1, %v13675_v19  ;;  %v13743_v31 = vld [vmem:[#allocation3 + $0x198] sm:$0xff] }
 0x307   : > { %10062 = vmatprep.mubr.msk.f32.mxu0 %vm225_vm1, %v7033_v60  ;;  %v4557_v18 = vpop.f32.mrf.mxu1  ;;  %v7038_v60 = vsel %vm443_vm3, %v7036_v17, %v7037_v50 }
 0x308   : > { %15048 = vst [vmem:[#allocation40_spill] sm:$0xff] %v13732_v26  ;;  %v4859_v58 = vpop.f32.mrf.mxu0  ;;  %v13740_v29 = vadd.f32 %v4849_v0, %v4557_v18  ;;  %v7046_v18 = vrot.slane %v13743_v31, 1  ;;  %v13759_v26 = vld [vmem:[#allocation3 + $0x1a8] sm:$0x3] }
 0x309   : > { %v9711_v52 = vpop.f32.mrf.mxu1  ;;  %10010 = vmatmul.mubr.msk.f32.gmra.mxu1 %vm225_vm1, %v13677_v56 }
 0x30a   : > { %15050 = vst [vmem:[#allocation39_spill] sm:$0xff] %v13740_v29  ;;  %v9764_v9 = vpop.f32.mrf.mxu0  ;;  %10063 = vmatmul.mubr.msk.f32.gmra.mxu0 %vm225_vm1, %v7035_v59  ;;  %v13751_v3 = vadd.f32 %v9761_v2, %v9711_v52  ;;  %10012 = vmatprep.mubr.msk.f32.mxu1 %vm225_vm1, %v13696_v38  ;;  %v7047_v29 = vrot.slane %v13745_v23, 1  ;;  %v7040_v2 = vsel %vm443_vm3, %v7037_v50, %v7039_v61 }
 0x30b   : > { %10065 = vmatprep.mubr.msk.f32.mxu0 %vm225_vm1, %v7038_v60  ;;  %v4567_v0 = vpop.f32.mrf.mxu1 }
 0x30c   : > { %v4869_v20 = vpop.f32.mrf.mxu0  ;;  %v13761_v59 = vadd.f32 %v4859_v58, %v4567_v0  ;;  %v7044_v58 = vrot.slane %v13208_v28, 1  ;;  %v7049_v0 = vrot.slane %v13759_v26, 1  ;;  %v7048_v53 = vsel %vm443_vm3, %v7046_v18, %v7047_v29 }
 0x30d   : > { %v9714_v17 = vpop.f32.mrf.mxu1  ;;  %10013 = vmatmul.mubr.msk.f32.gmra.mxu1 %vm225_vm1, %v13698_v16 }
 0x30e   : > { %15051 = vst [vmem:[#allocation48_spill] sm:$0xff] %v13761_v59  ;;  %v9767_v52 = vpop.f32.mrf.mxu0  ;;  %10066 = vmatmul.mubr.msk.f32.gmra.mxu0 %vm225_vm1, %v7040_v2  ;;  %v13767_v60 = vadd.f32 %v9764_v9, %v9714_v17  ;;  %10015 = vmatprep.mubr.msk.f32.mxu1 %vm225_vm1, %v13717_v33  ;;  %v7045_v9 = vsel %vm443_vm3, %v13459_v40, %v7044_v58 }
 0x30f   : > { %10068 = vmatprep.mubr.msk.f32.mxu0 %vm225_vm1, %v13479_v44  ;;  %v4577_v50 = vpop.f32.mrf.mxu1  ;;  %v7050_v28 = vsel %vm443_vm3, %v7047_v29, %v7049_v0 }
 0x310   : > { %v4879_v61 = vpop.f32.mrf.mxu0  ;;  %v13776_v59 = vadd.f32 %v4869_v20, %v4577_v50 }
 0x311   : > { %v9717_v2 = vpop.f32.mrf.mxu1  ;;  %10016 = vmatmul.mubr.msk.f32.gmra.mxu1 %vm225_vm1, %v13719_v27 }
 0x312   : > { %v9770_v17 = vpop.f32.mrf.mxu0  ;;  %10069 = vmatmul.mubr.msk.f32.gmra.mxu0 %vm225_vm1, %v7045_v9  ;;  %v13783_v44 = vadd.f32 %v9767_v52, %v9717_v2  ;;  %10018 = vmatprep.mubr.msk.f32.mxu1 %vm225_vm1, %v13269_v35  ;;  %v7377_v9 = vrot.slane %v13445_v39, 2  ;;  %v7378_v52 = vrot.slane %v13447_v32, 2  ;;  %v7382_v32 = vrot.slane %v13466_v57, 2 }
 0x313   : > { %10071 = vmatprep.mubr.msk.f32.mxu0 %vm225_vm1, %v7048_v53  ;;  %v4587_v20 = vpop.f32.mrf.mxu1  ;;  %v7383_v2 = vrot.slane %v13468_v22, 2  ;;  %v7387_v22 = vrot.slane %v13491_v55, 2 }
 0x314   : > { %v4889_v18 = vpop.f32.mrf.mxu0  ;;  %v13789_v50 = vadd.f32 %v4879_v61, %v4587_v20  ;;  %v7379_v39 = vsel %vm1111_vm4, %v7377_v9, %v7378_v52 }
 0x315   : > { %v9720_v40 = vpop.f32.mrf.mxu1  ;;  %10019 = vmatmul.mubr.msk.f32.gmra.mxu1 %vm225_vm1, %v13193_v13  ;;  %v7384_v57 = vsel %vm1111_vm4, %v7382_v32, %v7383_v2 }
 0x316   : > { %v9773_v58 = vpop.f32.mrf.mxu0  ;;  %10072 = vmatmul.mubr.msk.f32.gmra.mxu0 %vm225_vm1, %v7050_v28  ;;  %v13796_v35 = vadd.f32 %v9770_v17, %v9720_v40  ;;  %10021 = vmatprep.mubr.msk.f32.mxu1 %vm225_vm1, %v13743_v31  ;;  %v7380_v28 = vrot.slane %v13470_v37, 2 }
 0x317   : > { %v4597_v53 = vpop.f32.mrf.mxu1 }
 0x318   : > { %v4899_v29 = vpop.f32.mrf.mxu0  ;;  %v13800_v0 = vadd.f32 %v4889_v18, %v4597_v53  ;;  %v7381_v53 = vsel %vm1111_vm4, %v7378_v52, %v7380_v28 }
 0x319   : > { %v9723_v61 = vpop.f32.mrf.mxu1  ;;  %10022 = vmatmul.mubr.msk.f32.gmra.mxu1 %vm225_vm1, %v13745_v23 }
 0x31a   : > { %15052 = vst [vmem:[#allocation82_spill] sm:$0xff] %v13800_v0  ;;  %v9828_v13 = vpop.f32.mrf.mxu0  ;;  %v13807_v17 = vadd.f32 %v9773_v58, %v9723_v61  ;;  %10076 = vmatprep.mubr.msk.f32.mxu1 %vm225_vm1, %v7379_v39  ;;  %v7388_v58 = vrot.slane %v13493_v63, 2  ;;  %v4750_v61 = vadd.f32 %v13501_v54, %v13531_v42  ;;  %v7392_v54 = vrot.slane %v13509_v12, 2 }
 0x31b   : > { %v4607_v20 = vpop.f32.mrf.mxu1 }
 0x31c   : > { %v5529_v18 = vpop.f32.mrf.mxu0  ;;  %v13811_v40 = vadd.f32 %v4899_v29, %v4607_v20  ;;  %v7385_v29 = vrot.slane %v13489_v47, 2  ;;  %v7389_v63 = vsel %vm1111_vm4, %v7387_v22, %v7388_v58  ;;  %v7390_v47 = vrot.slane %v13513_v6, 2 }
 0x31d   : > { %v9778_v0 = vpop.f32.mrf.mxu1  ;;  %10077 = vmatmul.mubr.msk.f32.vlgmr.msra.gmra.mxu1 %vm225_vm1, %v7381_v53  ;;  %v7398_v6 = vrot.slane %v13529_v14, 2 }
 0x31e   : > { %v9831_v9 = vpop.f32.mrf.mxu0  ;;  %v5283_v37 = vadd.f32 %v9778_v0, %v13060_v8  ;;  %10079 = vmatprep.mubr.msk.f32.mxu1 %vm225_vm1, %v7384_v57  ;;  %v7386_v20 = vsel %vm1111_vm4, %v7383_v2, %v7385_v29  ;;  %v7393_v8 = vrot.slane %v13511_v4, 2 }
 0x31f   : > { %v5123_v52 = vpop.f32.mrf.mxu1 }
 0x320   : > { %v5539_v39 = vpop.f32.mrf.mxu0  ;;  %v5282_v28 = vadd.f32 %v5123_v52, %v4750_v61  ;;  %v13824_v53 = vadd.f32 %v9828_v13, %v5283_v37  ;;  %v7391_v61 = vsel %vm1111_vm4, %v7388_v58, %v7390_v47  ;;  %v7394_v4 = vsel %vm1111_vm4, %v7392_v54, %v7393_v8 }
 0x321   : > { %v9781_v32 = vpop.f32.mrf.mxu1  ;;  %10080 = vmatmul.mubr.msk.f32.gmra.mxu1 %vm225_vm1, %v7386_v20 }
 0x322   : > { %v9834_v55 = vpop.f32.mrf.mxu0  ;;  %v5285_v42 = vadd.f32 %v9781_v32, %v13543_v46  ;;  %10082 = vmatprep.mubr.msk.f32.mxu1 %vm225_vm1, %v7389_v63  ;;  %v13833_v0 = vadd.f32 %v5529_v18, %v5282_v28  ;;  %v7397_v46 = vrot.slane %v13527_v45, 2 }
 0x323   : > { %v5133_v13 = vpop.f32.mrf.mxu1 }
 0x324   : > { %v5549_v2 = vpop.f32.mrf.mxu0  ;;  %v5284_v57 = vadd.f32 %v5133_v13, %v13555_v7  ;;  %v13837_v37 = vadd.f32 %v9831_v9, %v5285_v42  ;;  %v7395_v7 = vrot.slane %v13534_v24, 2  ;;  %v7399_v14 = vsel %vm1111_vm4, %v7397_v46, %v7398_v6 }
 0x325   : > { %v9784_v22 = vpop.f32.mrf.mxu1  ;;  %10083 = vmatmul.mubr.msk.f32.gmra.mxu1 %vm225_vm1, %v7391_v61  ;;  %v7403_v24 = vrot.slane %v13551_v25, 2 }
 0x326   : > { %v9837_v12 = vpop.f32.mrf.mxu0  ;;  %v5287_v18 = vadd.f32 %v9784_v22, %v13564_v62  ;;  %10085 = vmatprep.mubr.msk.f32.mxu1 %vm225_vm1, %v7394_v4  ;;  %v13846_v29 = vadd.f32 %v5539_v39, %v5284_v57  ;;  %v7396_v28 = vsel %vm1111_vm4, %v7393_v8, %v7395_v7  ;;  %v7402_v62 = vrot.slane %v13549_v51, 2 }
 0x327   : > { %v5143_v9 = vpop.f32.mrf.mxu1 }
 0x328   : > { %v5559_v58 = vpop.f32.mrf.mxu0  ;;  %v5286_v52 = vadd.f32 %v5143_v9, %v13576_v41  ;;  %v13850_v20 = vadd.f32 %v9834_v55, %v5287_v18  ;;  %v7400_v41 = vrot.slane %v13553_v11, 2  ;;  %v7404_v25 = vsel %vm1111_vm4, %v7402_v62, %v7403_v24 }
 0x329   : > { %v9787_v32 = vpop.f32.mrf.mxu1  ;;  %10086 = vmatmul.mubr.msk.f32.gmra.mxu1 %vm225_vm1, %v7396_v28  ;;  %v7408_v11 = vrot.slane %v13572_v5, 2 }
 0x32a   : > { %v9840_v45 = vpop.f32.mrf.mxu0  ;;  %v5289_v39 = vadd.f32 %v9787_v32, %v13585_v15  ;;  %10088 = vmatprep.mubr.msk.f32.mxu1 %vm225_vm1, %v7399_v14  ;;  %v13859_v63 = vadd.f32 %v5549_v2, %v5286_v52  ;;  %v7401_v42 = vsel %vm1111_vm4, %v7398_v6, %v7400_v41  ;;  %v7407_v15 = vrot.slane %v13570_v1, 2  ;;  %v15053_v52 = vld [vmem:[#allocation51_spill] sm:$0xff] }
 0x32b   : > { %v5153_v55 = vpop.f32.mrf.mxu1 }
 0x32c   : > { %v5569_v54 = vpop.f32.mrf.mxu0  ;;  %v5288_v8 = vadd.f32 %v5153_v55, %v13597_v36  ;;  %v13863_v47 = vadd.f32 %v9837_v12, %v5289_v39  ;;  %v7405_v36 = vrot.slane %v13574_v21, 2  ;;  %v7409_v5 = vsel %vm1111_vm4, %v7407_v15, %v7408_v11  ;;  %v15056_v39 = vld [vmem:[#allocation47_spill] sm:$0xff]  ;;  %v15057_v55 = vld [vmem:[#allocation41_spill] sm:$0xff] }
 0x32d   : > { %v9790_v13 = vpop.f32.mrf.mxu1  ;;  %10089 = vmatmul.mubr.msk.f32.gmra.mxu1 %vm225_vm1, %v7401_v42  ;;  %v7413_v21 = vrot.slane %v13593_v34, 2 }
 0x32e   : > { %v9843_v51 = vpop.f32.mrf.mxu0  ;;  %v5291_v2 = vadd.f32 %v9790_v13, %v13606_v48  ;;  %10091 = vmatprep.mubr.msk.f32.mxu1 %vm225_vm1, %v7404_v25  ;;  %v13872_v57 = vadd.f32 %v5559_v58, %v5288_v8  ;;  %v7406_v4 = vsel %vm1111_vm4, %v7403_v24, %v7405_v36  ;;  %v7412_v48 = vrot.slane %v13591_v30, 2  ;;  %v15055_v24 = vld [vmem:[#allocation52_spill] sm:$0xff] }
 0x32f   : > { %v5163_v61 = vpop.f32.mrf.mxu1 }
 0x330   : > { %v5579_v22 = vpop.f32.mrf.mxu0  ;;  %v5290_v12 = vadd.f32 %v5163_v61, %v13618_v43  ;;  %v13876_v46 = vadd.f32 %v9840_v45, %v5291_v2  ;;  %v7410_v43 = vrot.slane %v13595_v49, 2  ;;  %v7414_v34 = vsel %vm1111_vm4, %v7412_v48, %v7413_v21 }
 0x331   : > { %v9793_v6 = vpop.f32.mrf.mxu1  ;;  %10092 = vmatmul.mubr.msk.f32.gmra.mxu1 %vm225_vm1, %v7406_v4  ;;  %v7418_v49 = vrot.slane %v15055_v24, 2  ;;  %v15064_v24 = vld [vmem:[#allocation73_spill] sm:$0xff] }
 0x332   : > { %v9846_v1 = vpop.f32.mrf.mxu0  ;;  %v5293_v18 = vadd.f32 %v9793_v6, %v13627_v10  ;;  %10094 = vmatprep.mubr.msk.f32.mxu1 %vm225_vm1, %v7409_v5  ;;  %v13885_v7 = vadd.f32 %v5569_v54, %v5290_v12  ;;  %v7411_v32 = vsel %vm1111_vm4, %v7408_v11, %v7410_v43  ;;  %v15054_v10 = vld [vmem:[#allocation74_spill] sm:$0xff]  ;;  %v7415_v54 = vrot.slane %v15057_v55, 2  ;;  %v15059_v12 = vld [vmem:[#allocation45_spill] sm:$0xff] }
 0x333   : > { %v5173_v9 = vpop.f32.mrf.mxu1  ;;  %v7417_v62 = vrot.slane %v15054_v10, 2  ;;  %v7422_v4 = vrot.slane %v15059_v12, 2  ;;  %v15060_v6 = vld [vmem:[#allocation34_spill] sm:$0xff] }
 0x334   : > { %v5589_v58 = vpop.f32.mrf.mxu0  ;;  %v5292_v28 = vadd.f32 %v5173_v9, %v15053_v52  ;;  %v13889_v45 = vadd.f32 %v9843_v51, %v5293_v18  ;;  %v15058_v51 = vld [vmem:[#allocation21_spill] sm:$0xff]  ;;  %v7416_v15 = vsel %vm1111_vm4, %v7413_v21, %v7415_v54  ;;  %v7423_v5 = vrot.slane %v15060_v6, 2  ;;  %v15062_v18 = vld [vmem:[#allocation75_spill] sm:$0xff]  ;;  %v15063_v52 = vld [vmem:[#allocation76_spill] sm:$0xff] }
 0x335   : > { %v9796_v14 = vpop.f32.mrf.mxu1  ;;  %10095 = vmatmul.mubr.msk.f32.gmra.mxu1 %vm225_vm1, %v7411_v32  ;;  %v7419_v61 = vsel %vm1111_vm4, %v7417_v62, %v7418_v49  ;;  %v7420_v43 = vrot.slane %v15062_v18, 2  ;;  %v7433_v18 = vrot.slane %v13677_v56, 2 }
 0x336   : > { %v9849_v30 = vpop.f32.mrf.mxu0  ;;  %v5295_v41 = vadd.f32 %v9796_v14, %v15056_v39  ;;  %10097 = vmatprep.mubr.msk.f32.mxu1 %vm225_vm1, %v7414_v34  ;;  %v13898_v8 = vadd.f32 %v5579_v22, %v5292_v28  ;;  %v15061_v22 = vld [vmem:[#allocation23_spill] sm:$0xff]  ;;  %v7424_v62 = vsel %vm1111_vm4, %v7422_v4, %v7423_v5  ;;  %v7427_v39 = vrot.slane %v15064_v24, 2 }
 0x337   : > { %v5183_v42 = vpop.f32.mrf.mxu1  ;;  %v7421_v32 = vsel %vm1111_vm4, %v7418_v49, %v7420_v43 }
 0x338   : > { %v5599_v13 = vpop.f32.mrf.mxu0  ;;  %v5294_v25 = vadd.f32 %v5183_v42, %v15058_v51  ;;  %v13902_v11 = vadd.f32 %v9846_v1, %v5295_v41  ;;  %v15065_v41 = vld [vmem:[#allocation49_spill] sm:$0xff]  ;;  %v15067_v42 = vld [vmem:[#allocation20_spill] sm:$0xff] }
 0x339   : > { %v9799_v2 = vpop.f32.mrf.mxu1  ;;  %10098 = vmatmul.mubr.msk.f32.gmra.mxu1 %vm225_vm1, %v7416_v15  ;;  %v7428_v55 = vrot.slane %v15065_v41, 2  ;;  %v7425_v51 = vrot.slane %v15067_v42, 2  ;;  %v15068_v15 = vld [vmem:[#allocation36_spill] sm:$0xff]  ;;  %v7437_v41 = vrot.slane %v13696_v38, 2  ;;  %v15073_v42 = vld [vmem:[#allocation43_spill] sm:$0xff] }
 0x33a   : > { %v9852_v36 = vpop.f32.mrf.mxu0  ;;  %v5297_v48 = vadd.f32 %v9799_v2, %v15061_v22  ;;  %10100 = vmatprep.mubr.msk.f32.mxu1 %vm225_vm1, %v7419_v61  ;;  %v13911_v9 = vadd.f32 %v5589_v58, %v5294_v25  ;;  %v15066_v58 = vld [vmem:[#allocation37_spill] sm:$0xff] }
 0x33b   : > { %v5193_v1 = vpop.f32.mrf.mxu1  ;;  %v7426_v61 = vsel %vm1111_vm4, %v7423_v5, %v7425_v51  ;;  %v7429_v22 = vsel %vm1111_vm4, %v7427_v39, %v7428_v55  ;;  %v7435_v51 = vrot.slane %v15073_v42, 2 }
 0x33c   : > { %v5609_v21 = vpop.f32.mrf.mxu0  ;;  %v5296_v28 = vadd.f32 %v5193_v1, %v15063_v52  ;;  %v13915_v14 = vadd.f32 %v9849_v30, %v5297_v48  ;;  %v7432_v48 = vrot.slane %v13675_v19, 2  ;;  %v15070_v1 = vld [vmem:[#allocation77_spill] sm:$0xff] }
 0x33d   : > { %v9802_v34 = vpop.f32.mrf.mxu1  ;;  %10101 = vmatmul.mubr.msk.f32.gmra.mxu1 %vm225_vm1, %v7421_v32  ;;  %v7430_v52 = vrot.slane %v15070_v1, 2  ;;  %v15071_v32 = vld [vmem:[#allocation78_spill] sm:$0xff] }
 0x33e   : > { %v9855_v10 = vpop.f32.mrf.mxu0  ;;  %v5299_v54 = vadd.f32 %v9802_v34, %v15066_v58  ;;  %10103 = vmatprep.mubr.msk.f32.mxu1 %vm225_vm1, %v7424_v62  ;;  %v13924_v25 = vadd.f32 %v5599_v13, %v5296_v28  ;;  %v15069_v13 = vld [vmem:[#allocation46_spill] sm:$0xff]  ;;  %v7434_v56 = vsel %vm1111_vm4, %v7432_v48, %v7433_v18  ;;  %v7438_v58 = vrot.slane %v13698_v16, 2 }
 0x33f   : > { %v5203_v30 = vpop.f32.mrf.mxu1  ;;  %v7431_v62 = vsel %vm1111_vm4, %v7428_v55, %v7430_v52  ;;  %v7442_v48 = vrot.slane %v13717_v33, 2 }
 0x340   : > { %v5619_v49 = vpop.f32.mrf.mxu0  ;;  %v5298_v2 = vadd.f32 %v5203_v30, %v15068_v15  ;;  %v13928_v12 = vadd.f32 %v9852_v36, %v5299_v54  ;;  %v15074_v15 = vld [vmem:[#allocation39_spill] sm:$0xff]  ;;  %v7439_v16 = vsel %vm1111_vm4, %v7437_v41, %v7438_v58 }
 0x341   : > { %v9805_v4 = vpop.f32.mrf.mxu1  ;;  %10104 = vmatmul.mubr.msk.f32.gmra.mxu1 %vm225_vm1, %v7426_v61  ;;  %v7436_v61 = vsel %vm1111_vm4, %v7433_v18, %v7435_v51  ;;  %v7453_v51 = vrot.slane %v13745_v23, 2 }
 0x342   : > { %v9858_v6 = vpop.f32.mrf.mxu0  ;;  %v5301_v43 = vadd.f32 %v9805_v4, %v15069_v13  ;;  %10106 = vmatprep.mubr.msk.f32.mxu1 %vm225_vm1, %v7429_v22  ;;  %v13937_v28 = vadd.f32 %v5609_v21, %v5298_v2  ;;  %v15072_v21 = vld [vmem:[#allocation40_spill] sm:$0xff]  ;;  %v7443_v13 = vrot.slane %v13719_v27, 2 }
 0x343   : > { %v5213_v36 = vpop.f32.mrf.mxu1 }
 0x344   : > { %v5629_v5 = vpop.f32.mrf.mxu0  ;;  %v5300_v34 = vadd.f32 %v5213_v36, %v15071_v32  ;;  %v13941_v24 = vadd.f32 %v9855_v10, %v5301_v43  ;;  %v15075_v43 = vld [vmem:[#allocation79_spill] sm:$0xff]  ;;  %v15076_v36 = vld [vmem:[#allocation48_spill] sm:$0xff]  ;;  %v7444_v27 = vsel %vm1111_vm4, %v7442_v48, %v7443_v13 }
 0x345   : > { %v9808_v39 = vpop.f32.mrf.mxu1  ;;  %10107 = vmatmul.mubr.msk.f32.gmra.mxu1 %vm225_vm1, %v7431_v62  ;;  %v7440_v1 = vrot.slane %v15075_v43, 2 }
 0x346   : > { %v9861_v19 = vpop.f32.mrf.mxu0  ;;  %v5303_v54 = vadd.f32 %v9808_v39, %v15072_v21  ;;  %10109 = vmatprep.mubr.msk.f32.mxu1 %vm225_vm1, %v7434_v56  ;;  %v13950_v30 = vadd.f32 %v5619_v49, %v5300_v34 }
 0x347   : > { %v5223_v10 = vpop.f32.mrf.mxu1  ;;  %v7441_v34 = vsel %vm1111_vm4, %v7438_v58, %v7440_v1  ;;  %v7452_v58 = vrot.slane %v13743_v31, 2  ;;  %v7455_v31 = vrot.slane %v13759_v26, 2  ;;  %v15079_v1 = vld [vmem:[#allocation72_spill] sm:$0xff] }
 0x348   : > { %v5639_v55 = vpop.f32.mrf.mxu0  ;;  %v5302_v2 = vadd.f32 %v5223_v10, %v15074_v15  ;;  %v13954_v4 = vadd.f32 %v9858_v6, %v5303_v54 }
 0x349   : > { %v9811_v22 = vpop.f32.mrf.mxu1  ;;  %10110 = vmatmul.mubr.msk.f32.gmra.mxu1 %vm225_vm1, %v7436_v61  ;;  %v7456_v26 = vsel %vm1111_vm4, %v7453_v51, %v7455_v31 }
 0x34a   : > { %v9864_v38 = vpop.f32.mrf.mxu0  ;;  %v5305_v49 = vadd.f32 %v9811_v22, %v13751_v3  ;;  %10112 = vmatprep.mubr.msk.f32.mxu1 %vm225_vm1, %v7439_v16  ;;  %v13963_v52 = vadd.f32 %v5629_v5, %v5302_v2  ;;  %v10138_v3 = vld [vmem:[#allocation3 + $0x180] sm:$0xff] }
 0x34b   : > { %v5233_v6 = vpop.f32.mrf.mxu1  ;;  %v7447_v56 = vrot.slane %v10138_v3, 2  ;;  %v15077_v5 = vld [vmem:[#allocation6_spill] sm:$0xff] }
 0x34c   : > { %v5649_v18 = vpop.f32.mrf.mxu0  ;;  %v5304_v32 = vadd.f32 %v5233_v6, %v15076_v36  ;;  %v13967_v62 = vadd.f32 %v9861_v19, %v5305_v49  ;;  %v7445_v21 = vrot.slane %v15077_v5, 2  ;;  %v15078_v22 = vld [vmem:[#allocation26_spill] sm:$0xff] }
 0x34d   : > { %v9814_v39 = vpop.f32.mrf.mxu1  ;;  %10113 = vmatmul.mubr.msk.f32.gmra.mxu1 %vm225_vm1, %v7441_v34  ;;  %v15080_v34 = vld [vmem:[#allocation82_spill] sm:$0xff] }
 0x34e   : > { %v9867_v33 = vpop.f32.mrf.mxu0  ;;  %v5307_v41 = vadd.f32 %v9814_v39, %v13767_v60  ;;  %10115 = vmatprep.mubr.msk.f32.mxu1 %vm225_vm1, %v7444_v27  ;;  %v13974_v54 = vadd.f32 %v5639_v55, %v5304_v32  ;;  %v7446_v15 = vsel %vm1111_vm4, %v7443_v13, %v7445_v21  ;;  %v7449_v55 = vsel %vm1111_vm4, %v7447_v56, %v15078_v22 }
 0x34f   : > { %v5243_v19 = vpop.f32.mrf.mxu1 }
 0x350   : > { %v5659_v42 = vpop.f32.mrf.mxu0  ;;  %v5306_v10 = vadd.f32 %v5243_v19, %v13776_v59  ;;  %v13980_v2 = vadd.f32 %v9864_v38, %v5307_v41  ;;  %v7454_v38 = vsel %vm1111_vm4, %v7452_v58, %v7453_v51 }
 0x351   : > { %v9817_v61 = vpop.f32.mrf.mxu1  ;;  %10116 = vmatmul.mubr.msk.f32.gmra.mxu1 %vm225_vm1, %v7446_v15 }
 0x352   : > { %v9870_v60 = vpop.f32.mrf.mxu0  ;;  %v5309_v16 = vadd.f32 %v9817_v61, %v13783_v44  ;;  %10118 = vmatprep.mubr.msk.f32.mxu1 %vm225_vm1, %v7449_v55  ;;  %v13988_v23 = vadd.f32 %v5649_v18, %v5306_v10 }
 0x353   : > { %v5253_v59 = vpop.f32.mrf.mxu1 }
 0x354   : > { %v5669_v48 = vpop.f32.mrf.mxu0  ;;  %v5308_v13 = vadd.f32 %v5253_v59, %v13789_v50  ;;  %v13992_v49 = vadd.f32 %v9867_v33, %v5309_v16 }
 0x355   : > { %v9820_v43 = vpop.f32.mrf.mxu1  ;;  %10119 = vmatmul.mubr.msk.f32.gmra.mxu1 %vm225_vm1, %v15079_v1 }
 0x356   : > { %v9873_v6 = vpop.f32.mrf.mxu0  ;;  %v5311_v44 = vadd.f32 %v9820_v43, %v13796_v35  ;;  %10121 = vmatprep.mubr.msk.f32.mxu1 %vm225_vm1, %v7454_v38  ;;  %v13999_v18 = vadd.f32 %v5659_v42, %v5308_v13 }
 0x357   : > { %v5263_v36 = vpop.f32.mrf.mxu1 }
 0x358   : > { %v5679_v32 = vpop.f32.mrf.mxu0  ;;  %v5310_v39 = vadd.f32 %v5263_v36, %v15080_v34  ;;  %v14002_v50 = vadd.f32 %v9870_v60, %v5311_v44 }
 0x359   : > { %v9823_v33 = vpop.f32.mrf.mxu1  ;;  %10122 = vmatmul.mubr.msk.f32.gmra.mxu1 %vm225_vm1, %v7456_v26 }
 0x35a   : > { %v14005_v27 = vpop.f32.mrf.mxu0  ;;  %v5313_v3 = vadd.f32 %v9823_v33, %v13807_v17  ;;  %v14008_v35 = vadd.f32 %v5669_v48, %v5310_v39 }
 0x35b   : > { %v5273_v56 = vpop.f32.mrf.mxu1 }
 0x35c   : > { %v14010_v41 = vpop.f32.mrf.mxu0  ;;  %v5312_v5 = vadd.f32 %v5273_v56, %v13811_v40  ;;  %v14013_v21 = vadd.f32 %v9873_v6, %v5313_v3 }
 0x35d   : > { %v9878_v58 = vpop.f32.mrf.mxu1 }
 0x35e   : > { %v14015_v19 = vpop.f32.mrf.mxu0  ;;  %v14018_v42 = vadd.f32 %v9878_v58, %v13824_v53  ;;  %v14020_v51 = vadd.f32 %v5679_v32, %v5312_v5 }
 0x35f   : > { %v5951_v10 = vpop.f32.mrf.mxu1 }
 0x360   : > { %v14022_v15 = vpop.f32.mrf.mxu0  ;;  %v14025_v17 = vadd.f32 %v5951_v10, %v13833_v0 }
 0x361   : > { %v9881_v61 = vpop.f32.mrf.mxu1 }
 0x362   : > { %v14027_v60 = vpop.f32.mrf.mxu0  ;;  %v14030_v40 = vadd.f32 %v9881_v61, %v13837_v37 }
 0x363   : > { %v5961_v22 = vpop.f32.mrf.mxu1 }
 0x364   : > { %v14032_v55 = vpop.f32.mrf.mxu0  ;;  %v14035_v53 = vadd.f32 %v5961_v22, %v13846_v29 }
 0x365   : > { %v9884_v16 = vpop.f32.mrf.mxu1 }
 0x366   : > { %v14037_v31 = vpop.f32.mrf.mxu0  ;;  %v14040_v59 = vadd.f32 %v9884_v16, %v13850_v20 }
 0x367   : > { %v5971_v0 = vpop.f32.mrf.mxu1 }
 0x368   : > { %v14042_v48 = vpop.f32.mrf.mxu0  ;;  %v14045_v38 = vadd.f32 %v5971_v0, %v13859_v63 }
 0x369   : > { %v9887_v37 = vpop.f32.mrf.mxu1 }
 0x36a   : > { %v14047_v13 = vpop.f32.mrf.mxu0  ;;  %v14050_v43 = vadd.f32 %v9887_v37, %v13863_v47 }
 0x36b   : > { %v5981_v29 = vpop.f32.mrf.mxu1 }
 0x36c   : > { %v14052_v1 = vpop.f32.mrf.mxu0  ;;  %v14055_v6 = vadd.f32 %v5981_v29, %v13872_v57 }
 0x36d   : > { %v9890_v20 = vpop.f32.mrf.mxu1 }
 0x36e   : > { %v14057_v44 = vpop.f32.mrf.mxu0  ;;  %v14060_v26 = vadd.f32 %v9890_v20, %v13876_v46 }
 0x36f   : > { %v5991_v63 = vpop.f32.mrf.mxu1 }
 0x370   : > { %v14062_v36 = vpop.f32.mrf.mxu0  ;;  %v14065_v32 = vadd.f32 %v5991_v63, %v13885_v7 }
 0x371   : > { %v9893_v47 = vpop.f32.mrf.mxu1 }
 0x372   : > { %v14067_v34 = vpop.f32.mrf.mxu0  ;;  %v14070_v39 = vadd.f32 %v9893_v47, %v13889_v45 }
 0x373   : > { %v6001_v57 = vpop.f32.mrf.mxu1 }
 0x374   : > { %v14072_v33 = vpop.f32.mrf.mxu0  ;;  %v14075_v3 = vadd.f32 %v6001_v57, %v13898_v8 }
 0x375   : > { %v9896_v46 = vpop.f32.mrf.mxu1 }
 0x376   : > { %v14077_v56 = vpop.f32.mrf.mxu0  ;;  %v14080_v5 = vadd.f32 %v9896_v46, %v13902_v11 }
 0x377   : > { %15081 = vst [vmem:[#allocation80_spill] sm:$0xff] %v14077_v56  ;;  %v6011_v7 = vpop.f32.mrf.mxu1 }
 0x378   : > { %v14082_v58 = vpop.f32.mrf.mxu0  ;;  %v14085_v10 = vadd.f32 %v6011_v7, %v13911_v9 }
 0x379   : > { %15082 = vst [vmem:[#allocation44_spill] sm:$0xff] %v14082_v58  ;;  %v9899_v45 = vpop.f32.mrf.mxu1 }
 0x37a   : > { %v14087_v61 = vpop.f32.mrf.mxu0  ;;  %v14090_v22 = vadd.f32 %v9899_v45, %v13915_v14 }
 0x37b   : > { %15083 = vst [vmem:[#allocation8_spill] sm:$0xff] %v14087_v61  ;;  %v6021_v8 = vpop.f32.mrf.mxu1 }
 0x37c   : > { %15084 = vst [vmem:[#allocation50_spill] sm:$0xff] %v14090_v22  ;;  %v14092_v16 = vpop.f32.mrf.mxu0  ;;  %v14095_v0 = vadd.f32 %v6021_v8, %v13924_v25 }
 0x37d   : > { %15085 = vst [vmem:[#allocation9_spill] sm:$0xff] %v14092_v16  ;;  %v9902_v11 = vpop.f32.mrf.mxu1 }
 0x37e   : > { %15086 = vst [vmem:[#allocation81_spill] sm:$0xff] %v14095_v0  ;;  %v14097_v37 = vpop.f32.mrf.mxu0  ;;  %v14100_v29 = vadd.f32 %v9902_v11, %v13928_v12 }
 0x37f   : > { %15087 = vst [vmem:[#allocation85_spill] sm:$0xff] %v14097_v37  ;;  %v6031_v9 = vpop.f32.mrf.mxu1 }
 0x380   : > { %15088 = vst [vmem:[#allocation42_spill] sm:$0xff] %v14100_v29  ;;  %v14102_v20 = vpop.f32.mrf.mxu0  ;;  %v14105_v63 = vadd.f32 %v6031_v9, %v13937_v28 }
 0x381   : > { %15089 = vst [vmem:[#allocation22_spill] sm:$0xff] %v14102_v20  ;;  %v9905_v14 = vpop.f32.mrf.mxu1 }
 0x382   : > { %15090 = vst [vmem:[#allocation7_spill] sm:$0xff] %v14105_v63  ;;  %v14107_v47 = vpop.f32.mrf.mxu0  ;;  %v14110_v57 = vadd.f32 %v9905_v14, %v13941_v24 }
 0x383   : > { %15091 = vst [vmem:[#allocation55_spill] sm:$0xff] %v14107_v47  ;;  %v6041_v25 = vpop.f32.mrf.mxu1 }
 0x384   : > { %15092 = vst [vmem:[#allocation83_spill] sm:$0xff] %v14110_v57  ;;  %v14112_v46 = vpop.f32.mrf.mxu0  ;;  %v14115_v7 = vadd.f32 %v6041_v25, %v13950_v30 }
 0x385   : > { %15093 = vst [vmem:[#allocation88_spill] sm:$0xff] %v14112_v46  ;;  %v9908_v12 = vpop.f32.mrf.mxu1 }
 0x386   : > { %15094 = vst [vmem:[#allocation17_spill] sm:$0xff] %v14115_v7  ;;  %v14117_v45 = vpop.f32.mrf.mxu0  ;;  %v14120_v8 = vadd.f32 %v9908_v12, %v13954_v4 }
 0x387   : > { %15095 = vst [vmem:[#allocation54_spill] sm:$0xff] %v14117_v45  ;;  %v6051_v28 = vpop.f32.mrf.mxu1 }
 0x388   : > { %15096 = vst [vmem:[#allocation10_spill] sm:$0xff] %v14120_v8  ;;  %v14122_v11 = vpop.f32.mrf.mxu0  ;;  %v14125_v9 = vadd.f32 %v6051_v28, %v13963_v52 }
 0x389   : > { %15097 = vst [vmem:[#allocation59_spill] sm:$0xff] %v14122_v11  ;;  %v9911_v24 = vpop.f32.mrf.mxu1 }
 0x38a   : > { %15098 = vst [vmem:[#allocation91_spill] sm:$0xff] %v14125_v9  ;;  %v14127_v14 = vpop.f32.mrf.mxu0  ;;  %v14130_v46 = vadd.f32 %v9911_v24, %v13967_v62 }
 0x38b   : > { %15099 = vst [vmem:[#allocation84_spill] sm:$0xff] %v14127_v14  ;;  %v6061_v30 = vpop.f32.mrf.mxu1 }
 0x38c   : > { %15100 = vst [vmem:[#allocation53_spill] sm:$0xff] %v14130_v46  ;;  %v14132_v25 = vpop.f32.mrf.mxu0  ;;  %v14135_v45 = vadd.f32 %v6061_v30, %v13974_v54 }
 0x38d   : > { %15101 = vst [vmem:[#allocation58_spill] sm:$0xff] %v14132_v25  ;;  %v9914_v4 = vpop.f32.mrf.mxu1 }
 0x38e   : > { %15102 = vst [vmem:[#allocation56_spill] sm:$0xff] %v14135_v45  ;;  %v14137_v12 = vpop.f32.mrf.mxu0  ;;  %v14140_v11 = vadd.f32 %v9914_v4, %v13980_v2 }
 0x38f   : > { %15103 = vst [vmem:[#allocation94_spill] sm:$0xff] %v14137_v12  ;;  %v6071_v52 = vpop.f32.mrf.mxu1 }
 0x390   : > { %15104 = vst [vmem:[#allocation86_spill] sm:$0xff] %v14140_v11  ;;  %v14142_v28 = vpop.f32.mrf.mxu0  ;;  %v14145_v14 = vadd.f32 %v6071_v52, %v13988_v23 }
 0x391   : > { %15105 = vst [vmem:[#allocation57_spill] sm:$0xff] %v14142_v28  ;;  %v9917_v62 = vpop.f32.mrf.mxu1 }
 0x392   : > { %15106 = vst [vmem:[#allocation87_spill] sm:$0xff] %v14145_v14  ;;  %v14147_v24 = vpop.f32.mrf.mxu0  ;;  %v14150_v25 = vadd.f32 %v9917_v62, %v13992_v49 }
 0x393   : > { %15107 = vst [vmem:[#allocation97_spill] sm:$0xff] %v14147_v24  ;;  %v6081_v54 = vpop.f32.mrf.mxu1 }
 0x394   : > { %15108 = vst [vmem:[#allocation100_spill] sm:$0xff] %v14150_v25  ;;  %v14152_v30 = vpop.f32.mrf.mxu0  ;;  %v14155_v12 = vadd.f32 %v6081_v54, %v13999_v18 }
 0x395   : > { %15109 = vst [vmem:[#allocation89_spill] sm:$0xff] %v14152_v30  ;;  %v9920_v2 = vpop.f32.mrf.mxu1 }
 0x396   : > { %15110 = vst [vmem:[#allocation63_spill] sm:$0xff] %v14155_v12  ;;  %v14157_v4 = vpop.f32.mrf.mxu0  ;;  %v14160_v28 = vadd.f32 %v9920_v2, %v14002_v50 }
 0x397   : > { %15111 = vst [vmem:[#allocation103_spill] sm:$0xff] %v14157_v4  ;;  %v6091_v23 = vpop.f32.mrf.mxu1 }
 0x398   : > { %15112 = vst [vmem:[#allocation90_spill] sm:$0xff] %v14160_v28  ;;  %v14163_v52 = vadd.f32 %v6091_v23, %v14008_v35  ;;  %v14165_v24 = vpop.f32.mrf.mxu0 }
 0x399   : > { %15114 = vst [vmem:[#allocation92_spill] sm:$0xff] %v14165_v24  ;;  %v9923_v49 = vpop.f32.mrf.mxu1 }
 0x39a   : > { %15113 = vst [vmem:[#allocation106_spill] sm:$0xff] %v14163_v52  ;;  %v14168_v62 = vadd.f32 %v9923_v49, %v14013_v21  ;;  %v10028_v25 = vpop.f32.mrf.mxu0 }
 0x39b   : > { %v6101_v30 = vpop.f32.mrf.mxu1 }
 0x39c   : > { %15115 = vst [vmem:[#allocation62_spill] sm:$0xff] %v14168_v62  ;;  %v14171_v18 = vadd.f32 %v6101_v30, %v14020_v51  ;;  %v7186_v12 = vpop.f32.mrf.mxu0 }
 0x39d   : > { %v9978_v54 = vpop.f32.mrf.mxu1 }
 0x39e   : > { %15116 = vst [vmem:[#allocation60_spill] sm:$0xff] %v14171_v18  ;;  %v14173_v28 = vpop.f32.mrf.mxu0 }
 0x39f   : > { %v6764_v4 = vpop.f32.mrf.mxu1 }
 0x3a0   : > { %v14177_v24 = vpop.f32.mrf.mxu0 }
 0x3a1   : > { %v9981_v50 = vpop.f32.mrf.mxu1 }
 0x3a2   : > { %v14183_v49 = vpop.f32.mrf.mxu0 }
 0x3a3   : > { %v6774_v2 = vpop.f32.mrf.mxu1 }
 0x3a4   : > { %v14189_v18 = vpop.f32.mrf.mxu0 }
 0x3a5   : > { %v9984_v35 = vpop.f32.mrf.mxu1 }
 0x3a6   : > { %v14195_v11 = vpop.f32.mrf.mxu0 }
 0x3a7   : > { %v14175_v23 = vpop.f32.mrf.mxu1 }
 0x3a8   : > { %v14201_v9 = vpop.f32.mrf.mxu0 }
 0x3a9   : > { %v14179_v52 = vpop.f32.mrf.mxu1 }
 0x3aa   : > { %v14207_v20 = vpop.f32.mrf.mxu0 }
 0x3ab   : > { %v14181_v21 = vpop.f32.mrf.mxu1 }
 0x3ac   : > { %v14213_v57 = vpop.f32.mrf.mxu0 }
 0x3ad   : > { %v14185_v51 = vpop.f32.mrf.mxu1 }
 0x3ae   : > { %v14219_v61 = vpop.f32.mrf.mxu0 }
 0x3af   : > { %v14187_v30 = vpop.f32.mrf.mxu1 }
 0x3b0   : > { %v14225_v0 = vpop.f32.mrf.mxu0 }
 0x3b1   : > { %v14191_v62 = vpop.f32.mrf.mxu1 }
 0x3b3   : > { %v14193_v14 = vpop.f32.mrf.mxu1 }
 0x3b5   : > { %v14197_v45 = vpop.f32.mrf.mxu1 }
 0x3b7   : > { %v14199_v46 = vpop.f32.mrf.mxu1 }
 0x3b9   : > { %v14203_v47 = vpop.f32.mrf.mxu1 }
 0x3ba   : > { %15117 = vst [vmem:[#allocation93_spill] sm:$0xff] %v14203_v47 }
 0x3bb   : > { %v14205_v8 = vpop.f32.mrf.mxu1 }
 0x3bc   : > { %15118 = vst [vmem:[#allocation95_spill] sm:$0xff] %v14205_v8 }
 0x3bd   : > { %v14209_v7 = vpop.f32.mrf.mxu1 }
 0x3be   : > { %15119 = vst [vmem:[#allocation61_spill] sm:$0xff] %v14209_v7  ;;  %v14231_v7 = vpop.f32.mrf.mxu0 }
 0x3bf   : > { %v14211_v37 = vpop.f32.mrf.mxu1  ;;  %15127 = vst [vmem:[#allocation102_spill] sm:$0xff] %v14231_v7 }
 0x3c0   : > { %15120 = vst [vmem:[#allocation96_spill] sm:$0xff] %v14211_v37 }
 0x3c1   : > { %v14215_v16 = vpop.f32.mrf.mxu1 }
 0x3c2   : > { %15121 = vst [vmem:[#allocation98_spill] sm:$0xff] %v14215_v16  ;;  %v14237_v16 = vpop.f32.mrf.mxu0 }
 0x3c3   : > { %v14217_v63 = vpop.f32.mrf.mxu1  ;;  %15130 = vst [vmem:[#allocation105_spill] sm:$0xff] %v14237_v16 }
 0x3c4   : > { %15122 = vst [vmem:[#allocation67_spill] sm:$0xff] %v14217_v63 }
 0x3c5   : > { %v14221_v29 = vpop.f32.mrf.mxu1 }
 0x3c6   : > { %15123 = vst [vmem:[#allocation99_spill] sm:$0xff] %v14221_v29  ;;  %v14243_v29 = vpop.f32.mrf.mxu0 }
 0x3c7   : > { %v14223_v58 = vpop.f32.mrf.mxu1  ;;  %15133 = vst [vmem:[#allocation108_spill] sm:$0xff] %v14243_v29 }
 0x3c8   : > { %15124 = vst [vmem:[#allocation101_spill] sm:$0xff] %v14223_v58 }
 0x3c9   : > { %v14227_v8 = vpop.f32.mrf.mxu1 }
 0x3ca   : > { %15125 = vst [vmem:[#allocation66_spill] sm:$0xff] %v14227_v8  ;;  %v6517_v8 = vadd.f32 %v14005_v27, %v14018_v42  ;;  %v6518_v27 = vadd.f32 %v14022_v15, %v14035_v53  ;;  %v6520_v15 = vadd.f32 %v14032_v55, %v14045_v38  ;;  %v7823_v53 = vld [vmem:[%s10445_s7 + $0x8] sm:$0xff] }
 0x3cb   : > { %v14229_v47 = vpop.f32.mrf.mxu1 }
 0x3cc   : > { %15126 = vst [vmem:[#allocation64_spill] sm:$0xff] %v14229_v47  ;;  %v6924_v7 = vadd.f32 %v9978_v54, %v6517_v8 }
 0x3cd   : > { %v14233_v37 = vpop.f32.mrf.mxu1 }
 0x3ce   : > { %15128 = vst [vmem:[#allocation104_spill] sm:$0xff] %v14233_v37  ;;  %v6516_v37 = vadd.f32 %v14010_v41, %v14025_v17  ;;  %v7346_v8 = vadd.f32 %v10028_v25, %v6924_v7  ;;  %v6521_v41 = vadd.f32 %v14027_v60, %v14040_v59 }
 0x3cf   : > { %v14235_v56 = vpop.f32.mrf.mxu1 }
 0x3d0   : > { %15129 = vst [vmem:[#allocation65_spill] sm:$0xff] %v14235_v56  ;;  %v14253_v56 = vpop.f32.mrf.mxu0 }
 0x3d1   : > { %v14239_v63 = vpop.f32.mrf.mxu1 }
 0x3d2   : > { %15131 = vst [vmem:[#allocation107_spill] sm:$0xff] %v14239_v63  ;;  %v6923_v63 = vadd.f32 %v6764_v4, %v6516_v37  ;;  %v14263_v42 = vpop.f32.mrf.mxu0  ;;  %v14270_v37 = vld [vmem:[%s14537_s4] ss:$0 sm:$0xff] }
 0x3d3   : > { %v14241_v22 = vpop.f32.mrf.mxu1 }
 0x3d4   : > { %15132 = vst [vmem:[#allocation71_spill] sm:$0xff] %v14241_v22  ;;  %v6519_v22 = vadd.f32 %v14015_v19, %v14030_v40  ;;  %v6925_v19 = vadd.f32 %v6774_v2, %v6518_v27  ;;  %v7345_v4 = vadd.f32 %v7186_v12, %v6923_v63  ;;  %v14275_v25 = vpop.f32.mrf.mxu0  ;;  %v6523_v63 = vadd.f32 %v14037_v31, %v14050_v43  ;;  %v7822_v12 = vld [vmem:[%s10445_s7] sm:$0xff]  ;;  %v7825_v31 = vld [vmem:[%s10445_s7 + $0x18] sm:$0xff] }
 0x3d5   : > { %v14245_v58 = vpop.f32.mrf.mxu1 }
 0x3d6   : > { %15134 = vst [vmem:[#allocation70_spill] sm:$0xff] %v14245_v58  ;;  %v6926_v58 = vadd.f32 %v9981_v50, %v6519_v22  ;;  %v6928_v22 = vadd.f32 %v9984_v35, %v6521_v41  ;;  %v6927_v50 = vadd.f32 %v14175_v23, %v6520_v15  ;;  %v7347_v27 = vadd.f32 %v14177_v24, %v6925_v19  ;;  %v7824_v19 = vld [vmem:[%s10445_s7 + $0x10] sm:$0xff] }
 0x3d7   : > { %v14249_v47 = vpop.f32.mrf.mxu1  ;;  %v6522_v41 = vadd.f32 %v14042_v48, %v14055_v6  ;;  %v6525_v6 = vadd.f32 %v14047_v13, %v14060_v26 }
 0x3d8   : > { %v7348_v54 = vadd.f32 %v14173_v28, %v6926_v58  ;;  %v7350_v58 = vadd.f32 %v14183_v49, %v6928_v22  ;;  %v14297_v28 = vpop.f32.mrf.mxu0 }
 0x3d9   : > { %v14255_v16 = vpop.f32.mrf.mxu1  ;;  %v6929_v48 = vadd.f32 %v14181_v21, %v6522_v41  ;;  %v6524_v21 = vadd.f32 %v14052_v1, %v14065_v32  ;;  %v6527_v1 = vadd.f32 %v14057_v44, %v14070_v39  ;;  %v7826_v32 = vld [vmem:[%s10445_s7 + $0x20] sm:$0xff] }
 0x3db   : > { %v14259_v29 = vpop.f32.mrf.mxu1 }
 0x3dd   : > { %v10078_v17 = vpop.f32.mrf.mxu1 }
 0x3de   : > { %v7752_v40 = vadd.f32 %v10078_v17, %v7346_v8  ;;  %v6930_v8 = vadd.f32 %v14179_v52, %v6523_v63 }
 0x3df   : > { %v7592_v7 = vpop.f32.mrf.mxu1 }
 0x3e0   : > { %v7791_v60 = vadd.f32 %v14270_v37, %v7752_v40  ;;  %v7751_v59 = vadd.f32 %v7592_v7, %v7345_v4  ;;  %v7349_v4 = vadd.f32 %v14189_v18, %v6927_v50  ;;  %v6932_v7 = vadd.f32 %v14185_v51, %v6525_v6 }
 0x3e1   : > { %v10081_v2 = vpop.f32.mrf.mxu1  ;;  %v7352_v26 = vadd.f32 %v14195_v11, %v6930_v8  ;;  %v6931_v51 = vadd.f32 %v14187_v30, %v6524_v21  ;;  %v7351_v11 = vadd.f32 %v14201_v9, %v6929_v48  ;;  %v6526_v30 = vadd.f32 %v14062_v36, %v14075_v3  ;;  %v7829_v8 = vld [vmem:[%s10445_s7 + $0x38] sm:$0xff]  ;;  %v7828_v3 = vld [vmem:[%s10445_s7 + $0x30] sm:$0xff] }
 0x3e2   : > { %v7855_v35 = vadd.f32 %v7823_v53, %v7791_v60  ;;  %v7790_v55 = vadd.f32 %v14270_v37, %v7751_v59  ;;  %v7754_v38 = vadd.f32 %v10081_v2, %v7348_v54  ;;  %v7827_v60 = vld [vmem:[%s10445_s7 + $0x28] sm:$0xff]  ;;  %v14313_v59 = vpop.f32.mrf.mxu0  ;;  %v7354_v39 = vadd.f32 %v14207_v20, %v6932_v7 }
 0x3e3   : > { %v7602_v43 = vpop.f32.mrf.mxu1  ;;  %v6529_v36 = vadd.f32 %v14067_v34, %v14080_v5  ;;  %v7353_v20 = vadd.f32 %v14213_v57, %v6931_v51  ;;  %v7833_v51 = vld [vmem:[%s10445_s7 + $0x58] sm:$0xff] }
 0x3e4   : > { %v7887_v23 = vmax.f32 %v7855_v35, 0.0  ;;  %v7854_v24 = vadd.f32 %v7822_v12, %v7790_v55  ;;  %v7793_v52 = vadd.f32 %v14270_v37, %v7754_v38  ;;  %v7753_v17 = vadd.f32 %v7602_v43, %v7347_v27  ;;  %v14331_v41 = vpop.f32.mrf.mxu0 }
 0x3e5   : > { %v10084_v40 = vpop.f32.mrf.mxu1  ;;  %v6934_v27 = vadd.f32 %v14191_v62, %v6527_v1  ;;  %v6933_v62 = vadd.f32 %v14193_v14, %v6526_v30  ;;  %v6936_v6 = vadd.f32 %v14197_v45, %v6529_v36  ;;  %v6528_v14 = vadd.f32 %v14072_v33, %v14085_v10  ;;  %v7830_v10 = vld [vmem:[%s10445_s7 + $0x40] sm:$0xff]  ;;  %v15142_v30 = vld [vmem:[#allocation42_spill] sm:$0xff] }
 0x3e6   : > { %7919 = vst.msk [vmem:[%s14293_s25 + $0x8] sm:$0xff] %vm225_vm1, %v7887_v23  ;;  %v7886_v49 = vmax.f32 %v7854_v24, 0.0  ;;  %v7857_v22 = vadd.f32 %v7825_v31, %v7793_v52  ;;  %v7792_v15 = vadd.f32 %v14270_v37, %v7753_v17  ;;  %v7756_v53 = vadd.f32 %v10084_v40, %v7350_v58  ;;  %v14349_v40 = vpop.f32.mrf.mxu0 }
 0x3e7   : > { %v7612_v13 = vpop.f32.mrf.mxu1  ;;  %v7356_v5 = vadd.f32 %v14219_v61, %v6934_v27  ;;  %v6935_v45 = vadd.f32 %v14199_v46, %v6528_v14  ;;  %v7355_v61 = vadd.f32 %v14225_v0, %v6933_v62  ;;  %v15139_v46 = vld [vmem:[#allocation44_spill] sm:$0xff] }
 0x3e8   : > { %7918 = vst.msk [vmem:[%s14293_s25] sm:$0xff] %vm225_vm1, %v7886_v49  ;;  %v7889_v18 = vmax.f32 %v7857_v22, 0.0  ;;  %v7856_v54 = vadd.f32 %v7824_v19, %v7792_v15  ;;  %v7795_v50 = vadd.f32 %v14270_v37, %v7756_v53  ;;  %v7755_v63 = vadd.f32 %v7612_v13, %v7349_v4  ;;  %v7831_v19 = vld [vmem:[%s10445_s7 + $0x48] sm:$0xff]  ;;  %v15135_v15 = vld [vmem:[#allocation50_spill] sm:$0xff]  ;;  %v15136_v53 = vld [vmem:[#allocation80_spill] sm:$0xff] }
 0x3e9   : > { %v10087_v12 = vpop.f32.mrf.mxu1  ;;  %v6531_v33 = vadd.f32 %v15136_v53, %v15135_v15  ;;  %v15148_v14 = vld [vmem:[#allocation108_spill] sm:$0xff]  ;;  %v15150_v15 = vld [vmem:[#allocation83_spill] sm:$0xff]  ;;  %v15151_v53 = vld [vmem:[#allocation85_spill] sm:$0xff] }
 0x3ea   : > { %7921 = vst.msk [vmem:[%s14293_s25 + $0x18] sm:$0xff] %vm225_vm1, %v7889_v18  ;;  %v7888_v2 = vmax.f32 %v7856_v54, 0.0  ;;  %v7859_v35 = vadd.f32 %v7827_v60, %v7795_v50  ;;  %v7794_v55 = vadd.f32 %v14270_v37, %v7755_v63  ;;  %v7758_v38 = vadd.f32 %v10087_v12, %v7352_v26  ;;  %v15137_v18 = vld [vmem:[#allocation93_spill] sm:$0xff] }
 0x3eb   : > { %v7622_v44 = vpop.f32.mrf.mxu1  ;;  %v6938_v54 = vadd.f32 %v15137_v18, %v6531_v33  ;;  %v15138_v50 = vld [vmem:[#allocation81_spill] sm:$0xff]  ;;  %v6535_v33 = vadd.f32 %v15151_v53, %v15150_v15  ;;  %v15152_v18 = vld [vmem:[#allocation98_spill] sm:$0xff] }
 0x3ec   : > { %7920 = vst.msk [vmem:[%s14293_s25 + $0x10] sm:$0xff] %vm225_vm1, %v7888_v2  ;;  %v7891_v9 = vmax.f32 %v7859_v35, 0.0  ;;  %v7858_v31 = vadd.f32 %v7826_v32, %v7794_v55  ;;  %v7797_v43 = vadd.f32 %v14270_v37, %v7758_v38  ;;  %v7757_v58 = vadd.f32 %v7622_v44, %v7351_v11  ;;  %v15140_v32 = vld [vmem:[#allocation102_spill] sm:$0xff]  ;;  %v14367_v11 = vpop.f32.mrf.mxu0  ;;  %v15141_v38 = vld [vmem:[#allocation95_spill] sm:$0xff] }
 0x3ed   : > { %v10090_v23 = vpop.f32.mrf.mxu1  ;;  %v6530_v63 = vadd.f32 %v15139_v46, %v15138_v50  ;;  %v7358_v12 = vadd.f32 %v15140_v32, %v6936_v6  ;;  %v15153_v50 = vld [vmem:[#allocation17_spill] sm:$0xff]  ;;  %v15154_v46 = vld [vmem:[#allocation22_spill] sm:$0xff] }
 0x3ee   : > { %7923 = vst.msk [vmem:[%s14293_s25 + $0x28] sm:$0xff] %vm225_vm1, %v7891_v9  ;;  %v7890_v24 = vmax.f32 %v7858_v31, 0.0  ;;  %v7861_v52 = vadd.f32 %v7829_v8, %v7797_v43  ;;  %v7796_v17 = vadd.f32 %v14270_v37, %v7757_v58  ;;  %v7760_v48 = vadd.f32 %v10090_v23, %v7354_v39  ;;  %v15143_v8 = vld [vmem:[#allocation8_spill] sm:$0xff]  ;;  %v7832_v39 = vld [vmem:[%s10445_s7 + $0x50] sm:$0xff]  ;;  %v15144_v31 = vld [vmem:[#allocation105_spill] sm:$0xff] }
 0x3ef   : > { %v7632_v34 = vpop.f32.mrf.mxu1  ;;  %v6937_v27 = vadd.f32 %v15141_v38, %v6530_v63  ;;  %v6533_v44 = vadd.f32 %v15143_v8, %v15142_v30  ;;  %v7357_v43 = vadd.f32 %v15144_v31, %v6935_v45  ;;  %v15145_v23 = vld [vmem:[#allocation61_spill] sm:$0xff]  ;;  %v6534_v63 = vadd.f32 %v15154_v46, %v15153_v50  ;;  %v15157_v30 = vld [vmem:[#allocation55_spill] sm:$0xff] }
 0x3f0   : > { %7922 = vst.msk [vmem:[%s14293_s25 + $0x20] sm:$0xff] %vm225_vm1, %v7890_v24  ;;  %v7893_v57 = vmax.f32 %v7861_v52, 0.0  ;;  %v7860_v4 = vadd.f32 %v7828_v3, %v7796_v17  ;;  %v7799_v49 = vadd.f32 %v14270_v37, %v7760_v48  ;;  %v7759_v22 = vadd.f32 %v7632_v34, %v7353_v20  ;;  %v15146_v24 = vld [vmem:[#allocation7_spill] sm:$0xff]  ;;  %v15147_v52 = vld [vmem:[#allocation9_spill] sm:$0xff]  ;;  %v14385_v34 = vpop.f32.mrf.mxu0 }
 0x3f1   : > { %v10093_v7 = vpop.f32.mrf.mxu1  ;;  %v6940_v20 = vadd.f32 %v15145_v23, %v6533_v44  ;;  %v6532_v17 = vadd.f32 %v15147_v52, %v15146_v24  ;;  %v7835_v48 = vld [vmem:[%s10445_s7 + $0x68] sm:$0xff]  ;;  %v7836_v44 = vld [vmem:[%s10445_s7 + $0x70] sm:$0xff]  ;;  %v15160_v23 = vld [vmem:[#allocation88_spill] sm:$0xff] }
 0x3f2   : > { %7925 = vst.msk [vmem:[%s14293_s25 + $0x38] sm:$0xff] %vm225_vm1, %v7893_v57  ;;  %v7892_v21 = vmax.f32 %v7860_v4, 0.0  ;;  %v7863_v60 = vadd.f32 %v7831_v19, %v7799_v49  ;;  %v7798_v13 = vadd.f32 %v14270_v37, %v7759_v22  ;;  %v7762_v26 = vadd.f32 %v10093_v7, %v7356_v5  ;;  %v15149_v22 = vld [vmem:[#allocation96_spill] sm:$0xff]  ;;  %v7839_v24 = vld [vmem:[%s10445_s7 + $0x88] sm:$0xff] }
 0x3f3   : > { %v7642_v1 = vpop.f32.mrf.mxu1  ;;  %v7360_v19 = vadd.f32 %v15148_v14, %v6938_v54  ;;  %v6939_v45 = vadd.f32 %v15149_v22, %v6532_v17  ;;  %v6942_v54 = vadd.f32 %v15152_v18, %v6535_v33  ;;  %v7362_v32 = vadd.f32 %v14263_v42, %v6940_v20  ;;  %v7841_v18 = vld [vmem:[%s10445_s7 + $0x98] sm:$0xff] }
 0x3f4   : > { %7924 = vst.msk [vmem:[%s14293_s25 + $0x30] sm:$0xff] %vm225_vm1, %v7892_v21  ;;  %v7895_v0 = vmax.f32 %v7863_v60, 0.0  ;;  %v7862_v2 = vadd.f32 %v7830_v10, %v7798_v13  ;;  %v7801_v35 = vadd.f32 %v14270_v37, %v7762_v26  ;;  %v7761_v55 = vadd.f32 %v7642_v1, %v7355_v61  ;;  %v7834_v10 = vld [vmem:[%s10445_s7 + $0x60] sm:$0xff] }
 0x3f5   : > { %v10096_v9 = vpop.f32.mrf.mxu1  ;;  %v7359_v61 = vadd.f32 %v14253_v56, %v6937_v27  ;;  %v15156_v27 = vld [vmem:[#allocation10_spill] sm:$0xff]  ;;  %v7361_v42 = vadd.f32 %v14275_v25, %v6939_v45  ;;  %v7364_v17 = vadd.f32 %v14297_v28, %v6942_v54  ;;  %v7838_v45 = vld [vmem:[%s10445_s7 + $0x80] sm:$0xff] }
 0x3f6   : > { %7927 = vst.msk [vmem:[%s14293_s25 + $0x48] sm:$0xff] %vm225_vm1, %v7895_v0  ;;  %v7894_v58 = vmax.f32 %v7862_v2, 0.0  ;;  %v7865_v62 = vadd.f32 %v7833_v51, %v7801_v35  ;;  %v7800_v36 = vadd.f32 %v14270_v37, %v7761_v55  ;;  %v7764_v3 = vadd.f32 %v10096_v9, %v7358_v12  ;;  %v7837_v51 = vld [vmem:[%s10445_s7 + $0x78] sm:$0xff]  ;;  %v14403_v12 = vpop.f32.mrf.mxu0 }
 0x3f7   : > { %v7652_v6 = vpop.f32.mrf.mxu1  ;;  %v15155_v55 = vld [vmem:[#allocation67_spill] sm:$0xff]  ;;  %v6537_v8 = vadd.f32 %v15157_v30, %v15156_v27 }
 0x3f8   : > { %7926 = vst.msk [vmem:[%s14293_s25 + $0x40] sm:$0xff] %vm225_vm1, %v7894_v58  ;;  %v7897_v5 = vmax.f32 %v7865_v62, 0.0  ;;  %v7864_v57 = vadd.f32 %v7832_v39, %v7800_v36  ;;  %v7803_v4 = vadd.f32 %v14270_v37, %v7764_v3  ;;  %v7763_v49 = vadd.f32 %v7652_v6, %v7357_v43  ;;  %v15158_v62 = vld [vmem:[#allocation99_spill] sm:$0xff] }
 0x3f9   : > { %v10099_v7 = vpop.f32.mrf.mxu1  ;;  %v6941_v38 = vadd.f32 %v15155_v55, %v6534_v63  ;;  %v6944_v36 = vadd.f32 %v15158_v62, %v6537_v8  ;;  %v15159_v3 = vld [vmem:[#allocation91_spill] sm:$0xff]  ;;  %v7840_v55 = vld [vmem:[%s10445_s7 + $0x90] sm:$0xff] }
 0x3fa   : > { %7929 = vst.msk [vmem:[%s14293_s25 + $0x58] sm:$0xff] %vm225_vm1, %v7897_v5  ;;  %v7896_v21 = vmax.f32 %v7864_v57, 0.0  ;;  %v7867_v60 = vadd.f32 %v7835_v48, %v7803_v4  ;;  %v7802_v13 = vadd.f32 %v14270_v37, %v7763_v49  ;;  %v7766_v26 = vadd.f32 %v10099_v7, %v7360_v19  ;;  %v14421_v48 = vpop.f32.mrf.mxu0  ;;  %v15161_v5 = vld [vmem:[#allocation101_spill] sm:$0xff]  ;;  %v15163_v49 = vld [vmem:[#allocation54_spill] sm:$0xff] }
 0x3fb   : > { %v7662_v1 = vpop.f32.mrf.mxu1  ;;  %v6536_v20 = vadd.f32 %v15160_v23, %v15159_v3  ;;  %v15162_v4 = vld [vmem:[#allocation53_spill] sm:$0xff]  ;;  %v7363_v28 = vadd.f32 %v14313_v59, %v6941_v38  ;;  %v7366_v50 = vadd.f32 %v14331_v41, %v6944_v36 }
 0x3fc   : > { %7928 = vst.msk [vmem:[%s14293_s25 + $0x50] sm:$0xff] %vm225_vm1, %v7896_v21  ;;  %v7899_v56 = vmax.f32 %v7867_v60, 0.0  ;;  %v7866_v0 = vadd.f32 %v7834_v10, %v7802_v13  ;;  %v7805_v2 = vadd.f32 %v14270_v37, %v7766_v26  ;;  %v7765_v35 = vadd.f32 %v7662_v1, %v7359_v61  ;;  %v15164_v61 = vld [vmem:[#allocation66_spill] sm:$0xff]  ;;  %v15165_v60 = vld [vmem:[#allocation56_spill] sm:$0xff]  ;;  %v15166_v13 = vld [vmem:[#allocation59_spill] sm:$0xff]  ;;  %v10067_v46 = vpop.f32.mrf.mxu0 }
 0x3fd   : > { %v10102_v39 = vpop.f32.mrf.mxu1  ;;  %v6943_v57 = vadd.f32 %v15161_v5, %v6536_v20  ;;  %v6539_v22 = vadd.f32 %v15163_v49, %v15162_v4  ;;  %v6538_v26 = vadd.f32 %v15166_v13, %v15165_v60 }
 0x3fe   : > { %7931 = vst.msk [vmem:[%s14293_s25 + $0x68] sm:$0xff] %vm225_vm1, %v7899_v56  ;;  %v7898_v9 = vmax.f32 %v7866_v0, 0.0  ;;  %v7869_v31 = vadd.f32 %v7837_v51, %v7805_v2  ;;  %v7804_v43 = vadd.f32 %v14270_v37, %v7765_v35  ;;  %v7768_v58 = vadd.f32 %v10102_v39, %v7362_v32  ;;  %v15167_v32 = vld [vmem:[#allocation64_spill] sm:$0xff]  ;;  %v15168_v0 = vld [vmem:[#allocation86_spill] sm:$0xff]  ;;  %v7316_v3 = vpop.f32.mrf.mxu0 }
 0x3ff   : > { %v7672_v52 = vpop.f32.mrf.mxu1  ;;  %v6946_v21 = vadd.f32 %v15164_v61, %v6539_v22  ;;  %v6945_v56 = vadd.f32 %v15167_v32, %v6538_v26  ;;  %v15169_v2 = vld [vmem:[#allocation84_spill] sm:$0xff]  ;;  %v7365_v27 = vadd.f32 %v14349_v40, %v6943_v57 }
 0x400   : > { %7930 = vst.msk [vmem:[%s14293_s25 + $0x60] sm:$0xff] %vm225_vm1, %v7898_v9  ;;  %v7901_v25 = vmax.f32 %v7869_v31, 0.0  ;;  %v7868_v6 = vadd.f32 %v7836_v44, %v7804_v43  ;;  %v7807_v14 = vadd.f32 %v14270_v37, %v7768_v58  ;;  %v7767_v19 = vadd.f32 %v7672_v52, %v7361_v42  ;;  %v15170_v39 = vld [vmem:[#allocation104_spill] sm:$0xff]  ;;  %v15171_v9 = vld [vmem:[#allocation87_spill] sm:$0xff]  ;;  %v15172_v31 = vld [vmem:[#allocation58_spill] sm:$0xff] }
 0x401   : > { %v10105_v15 = vpop.f32.mrf.mxu1  ;;  %v6541_v35 = vadd.f32 %v15169_v2, %v15168_v0  ;;  %v6540_v43 = vadd.f32 %v15172_v31, %v15171_v9  ;;  %v7843_v58 = vld [vmem:[%s10445_s7 + $0xa8] sm:$0xff]  ;;  %v7368_v36 = vadd.f32 %v14367_v11, %v6946_v21  ;;  %v7367_v57 = vadd.f32 %v14385_v34, %v6945_v56  ;;  %v10070_v21 = vpop.f32.mrf.mxu0 }
 0x402   : > { %7933 = vst.msk [vmem:[%s14293_s25 + $0x78] sm:$0xff] %vm225_vm1, %v7901_v25  ;;  %v7900_v53 = vmax.f32 %v7868_v6, 0.0  ;;  %v7871_v33 = vadd.f32 %v7839_v24, %v7807_v14  ;;  %v7806_v10 = vadd.f32 %v14270_v37, %v7767_v19  ;;  %v7770_v7 = vadd.f32 %v10105_v15, %v7364_v17  ;;  %v15173_v52 = vld [vmem:[#allocation65_spill] sm:$0xff]  ;;  %v15174_v25 = vld [vmem:[#allocation100_spill] sm:$0xff]  ;;  %v15175_v6 = vld [vmem:[#allocation94_spill] sm:$0xff] }
 0x403   : > { %v7682_v54 = vpop.f32.mrf.mxu1  ;;  %v6948_v42 = vadd.f32 %v15170_v39, %v6541_v35  ;;  %v6947_v17 = vadd.f32 %v15173_v52, %v6540_v43  ;;  %v6543_v14 = vadd.f32 %v15175_v6, %v15174_v25  ;;  %v7842_v19 = vld [vmem:[%s10445_s7 + $0xa0] sm:$0xff]  ;;  %v15182_v35 = vld [vmem:[#allocation70_spill] sm:$0xff]  ;;  %v7326_v39 = vpop.f32.mrf.mxu0 }
 0x404   : > { %7932 = vst.msk [vmem:[%s14293_s25 + $0x70] sm:$0xff] %vm225_vm1, %v7900_v53  ;;  %v7903_v59 = vmax.f32 %v7871_v33, 0.0  ;;  %v7870_v63 = vadd.f32 %v7838_v45, %v7806_v10  ;;  %v7809_v51 = vadd.f32 %v14270_v37, %v7770_v7  ;;  %v7769_v1 = vadd.f32 %v7682_v54, %v7363_v28  ;;  %v15176_v45 = vld [vmem:[#allocation107_spill] sm:$0xff]  ;;  %v15178_v53 = vld [vmem:[#allocation57_spill] sm:$0xff] }
 0x405   : > { %v10108_v38 = vpop.f32.mrf.mxu1  ;;  %v6950_v15 = vadd.f32 %v15176_v45, %v6543_v14  ;;  %v15177_v28 = vld [vmem:[#allocation63_spill] sm:$0xff]  ;;  %v7370_v61 = vadd.f32 %v14403_v12, %v6948_v42  ;;  %v7369_v32 = vadd.f32 %v14421_v48, %v6947_v17  ;;  %v15188_v14 = vld [vmem:[#allocation92_spill] sm:$0xff] }
 0x406   : > { %7935 = vst.msk [vmem:[%s14293_s25 + $0x88] sm:$0xff] %vm225_vm1, %v7903_v59  ;;  %v7902_v41 = vmax.f32 %v7870_v63, 0.0  ;;  %v7873_v30 = vadd.f32 %v7841_v18, %v7809_v51  ;;  %v7808_v8 = vadd.f32 %v14270_v37, %v7769_v1  ;;  %v7772_v44 = vadd.f32 %v10108_v38, %v7366_v50  ;;  %v7845_v10 = vld [vmem:[%s10445_s7 + $0xb8] sm:$0xff]  ;;  %v15180_v50 = vld [vmem:[#allocation90_spill] sm:$0xff]  ;;  %v15181_v59 = vld [vmem:[#allocation97_spill] sm:$0xff] }
 0x407   : > { %v7692_v62 = vpop.f32.mrf.mxu1  ;;  %v6542_v33 = vadd.f32 %v15178_v53, %v15177_v28  ;;  %v15179_v18 = vld [vmem:[#allocation71_spill] sm:$0xff]  ;;  %v6545_v63 = vadd.f32 %v15181_v59, %v15180_v50  ;;  %v7844_v51 = vld [vmem:[%s10445_s7 + $0xb0] sm:$0xff]  ;;  %v7850_v50 = vld [vmem:[%s10445_s7 + $0xe0] sm:$0xff] }
 0x408   : > { %7934 = vst.msk [vmem:[%s14293_s25 + $0x80] sm:$0xff] %vm225_vm1, %v7902_v41  ;;  %v7905_v40 = vmax.f32 %v7873_v30, 0.0  ;;  %v7872_v23 = vadd.f32 %v7840_v55, %v7808_v8  ;;  %v7811_v20 = vadd.f32 %v14270_v37, %v7772_v44  ;;  %v7771_v24 = vadd.f32 %v7692_v62, %v7365_v27  ;;  %v15183_v38 = vld [vmem:[#allocation106_spill] sm:$0xff]  ;;  %v15184_v27 = vld [vmem:[#allocation89_spill] sm:$0xff]  ;;  %v15186_v62 = vld [vmem:[#allocation103_spill] sm:$0xff] }
 0x409   : > { %v10111_v5 = vpop.f32.mrf.mxu1  ;;  %v6949_v54 = vadd.f32 %v15179_v18, %v6542_v33  ;;  %v6952_v55 = vadd.f32 %v15182_v35, %v6545_v63  ;;  %v6544_v41 = vadd.f32 %v15184_v27, %v15183_v38  ;;  %v7847_v30 = vld [vmem:[%s10445_s7 + $0xc8] sm:$0xff]  ;;  %v7372_v44 = vadd.f32 %v10067_v46, %v6950_v15  ;;  %v7848_v15 = vld [vmem:[%s10445_s7 + $0xd0] sm:$0xff] }
 0x40a   : > { %7937 = vst.msk [vmem:[%s14293_s25 + $0x98] sm:$0xff] %vm225_vm1, %v7905_v40  ;;  %v7904_v11 = vmax.f32 %v7872_v23, 0.0  ;;  %v7875_v4 = vadd.f32 %v7843_v58, %v7811_v20  ;;  %v7810_v49 = vadd.f32 %v14270_v37, %v7771_v24  ;;  %v7774_v22 = vadd.f32 %v10111_v5, %v7368_v36  ;;  %v15185_v58 = vld [vmem:[#allocation62_spill] sm:$0xff]  ;;  %v7846_v40 = vld [vmem:[%s10445_s7 + $0xc0] sm:$0xff]  ;;  %v10073_v24 = vpop.f32.mrf.mxu0  ;;  %v7849_v5 = vld [vmem:[%s10445_s7 + $0xd8] sm:$0xff] }
 0x40b   : > { %v7702_v7 = vpop.f32.mrf.mxu1  ;;  %v6951_v43 = vadd.f32 %v14249_v47, %v6544_v41  ;;  %v6547_v36 = vadd.f32 %v15186_v62, %v15185_v58  ;;  %v7371_v20 = vadd.f32 %v7316_v3, %v6949_v54  ;;  %v15187_v47 = vld [vmem:[#allocation60_spill] sm:$0xff]  ;;  %v7852_v38 = vld [vmem:[%s10445_s7 + $0xf0] sm:$0xff] }
 0x40c   : > { %7936 = vst.msk [vmem:[%s14293_s25 + $0x90] sm:$0xff] %vm225_vm1, %v7904_v11  ;;  %v7907_v34 = vmax.f32 %v7875_v4, 0.0  ;;  %v7874_v60 = vadd.f32 %v7842_v19, %v7810_v49  ;;  %v7813_v13 = vadd.f32 %v14270_v37, %v7774_v22  ;;  %v7773_v26 = vadd.f32 %v7702_v7, %v7367_v57  ;;  %v7336_v53 = vpop.f32.mrf.mxu0 }
 0x40d   : > { %v10114_v1 = vpop.f32.mrf.mxu1  ;;  %v6954_v6 = vadd.f32 %v14255_v16, %v6547_v36  ;;  %v6546_v19 = vadd.f32 %v15188_v14, %v15187_v47  ;;  %v7374_v11 = vadd.f32 %v10070_v21, %v6952_v55  ;;  %v7373_v16 = vadd.f32 %v7326_v39, %v6951_v43 }
 0x40e   : > { %7939 = vst.msk [vmem:[%s14293_s25 + $0xa8] sm:$0xff] %vm225_vm1, %v7907_v34  ;;  %v7906_v12 = vmax.f32 %v7874_v60, 0.0  ;;  %v7877_v56 = vadd.f32 %v7845_v10, %v7813_v13  ;;  %v7812_v0 = vadd.f32 %v14270_v37, %v7773_v26  ;;  %v7776_v2 = vadd.f32 %v10114_v1, %v7370_v61  ;;  %v7851_v34 = vld [vmem:[%s10445_s7 + $0xe8] sm:$0xff] }
 0x40f   : > { %v7712_v8 = vpop.f32.mrf.mxu1  ;;  %v6953_v45 = vadd.f32 %v14259_v29, %v6546_v19  ;;  %v7376_v21 = vadd.f32 %v10073_v24, %v6954_v6 }
 0x410   : > { %7938 = vst.msk [vmem:[%s14293_s25 + $0xa0] sm:$0xff] %vm225_vm1, %v7906_v12  ;;  %v7909_v48 = vmax.f32 %v7877_v56, 0.0  ;;  %v7876_v42 = vadd.f32 %v7844_v51, %v7812_v0  ;;  %v7815_v9 = vadd.f32 %v14270_v37, %v7776_v2  ;;  %v7775_v31 = vadd.f32 %v7712_v8, %v7369_v32  ;;  %v7853_v12 = vld [vmem:[%s10445_s7 + $0xf8] sm:$0xff] }
 0x411   : > { %v10117_v23 = vpop.f32.mrf.mxu1  ;;  %v7375_v54 = vadd.f32 %v7336_v53, %v6953_v45 }
 0x412   : > { %7941 = vst.msk [vmem:[%s14293_s25 + $0xb8] sm:$0xff] %vm225_vm1, %v7909_v48  ;;  %v7908_v46 = vmax.f32 %v7876_v42, 0.0  ;;  %v7879_v52 = vadd.f32 %v7847_v30, %v7815_v9  ;;  %v7814_v17 = vadd.f32 %v14270_v37, %v7775_v31  ;;  %v7778_v25 = vadd.f32 %v10117_v23, %v7372_v44 }
 0x413   : > { %v7722_v57 = vpop.f32.mrf.mxu1 }
 0x414   : > { %7940 = vst.msk [vmem:[%s14293_s25 + $0xb0] sm:$0xff] %vm225_vm1, %v7908_v46  ;;  %v7911_v3 = vmax.f32 %v7879_v52, 0.0  ;;  %v7878_v4 = vadd.f32 %v7846_v40, %v7814_v17  ;;  %v7817_v49 = vadd.f32 %v14270_v37, %v7778_v25  ;;  %v7777_v22 = vadd.f32 %v7722_v57, %v7371_v20 }
 0x415   : > { %v10120_v28 = vpop.f32.mrf.mxu1 }
 0x416   : > { %7943 = vst.msk [vmem:[%s14293_s25 + $0xc8] sm:$0xff] %vm225_vm1, %v7911_v3  ;;  %v7910_v33 = vmax.f32 %v7878_v4, 0.0  ;;  %v7881_v10 = vadd.f32 %v7849_v5, %v7817_v49  ;;  %v7816_v7 = vadd.f32 %v14270_v37, %v7777_v22  ;;  %v7780_v61 = vadd.f32 %v10120_v28, %v7374_v11 }
 0x417   : > { %v7732_v60 = vpop.f32.mrf.mxu1 }
 0x418   : > { %7942 = vst.msk [vmem:[%s14293_s25 + $0xc0] sm:$0xff] %vm225_vm1, %v7910_v33  ;;  %v7913_v29 = vmax.f32 %v7881_v10, 0.0  ;;  %v7880_v13 = vadd.f32 %v7848_v15, %v7816_v7  ;;  %v7819_v26 = vadd.f32 %v14270_v37, %v7780_v61  ;;  %v7779_v18 = vadd.f32 %v7732_v60, %v7373_v16 }
 0x419   : > { %v10123_v59 = vpop.f32.mrf.mxu1 }
 0x41a   : > { %7945 = vst.msk [vmem:[%s14293_s25 + $0xd8] sm:$0xff] %vm225_vm1, %v7913_v29  ;;  %v7912_v63 = vmax.f32 %v7880_v13, 0.0  ;;  %v7883_v51 = vadd.f32 %v7851_v34, %v7819_v26  ;;  %v7818_v1 = vadd.f32 %v14270_v37, %v7779_v18  ;;  %v7782_v32 = vadd.f32 %v10123_v59, %v7376_v21 }
 0x41b   : > { %v7742_v56 = vpop.f32.mrf.mxu1 }
 0x41c   : > { %7944 = vst.msk [vmem:[%s14293_s25 + $0xd0] sm:$0xff] %vm225_vm1, %v7912_v63  ;;  %v7915_v0 = vmax.f32 %v7883_v51, 0.0  ;;  %v7882_v2 = vadd.f32 %v7850_v50, %v7818_v1  ;;  %v7821_v35 = vadd.f32 %v14270_v37, %v7782_v32  ;;  %v7781_v55 = vadd.f32 %v7742_v56, %v7375_v54 }
 0x41e   : > { %7947 = vst.msk [vmem:[%s14293_s25 + $0xe8] sm:$0xff] %vm225_vm1, %v7915_v0  ;;  %v7914_v27 = vmax.f32 %v7882_v2, 0.0  ;;  %v7885_v41 = vadd.f32 %v7853_v12, %v7821_v35  ;;  %v7820_v30 = vadd.f32 %v14270_v37, %v7781_v55 }
 0x420   : > { %7946 = vst.msk [vmem:[%s14293_s25 + $0xe0] sm:$0xff] %vm225_vm1, %v7914_v27  ;;  %v7917_v8 = vmax.f32 %v7885_v41, 0.0  ;;  %v7884_v44 = vadd.f32 %v7852_v38, %v7820_v30 }
 0x422   : > { %7949 = vst.msk [vmem:[%s14293_s25 + $0xf8] sm:$0xff] %vm225_vm1, %v7917_v8  ;;  %v7916_v39 = vmax.f32 %v7884_v44, 0.0 }
 0x424   : > { %7948 = vst.msk [vmem:[%s14293_s25 + $0xf0] sm:$0xff] %vm225_vm1, %v7916_v39 }
 0x425 PF: > { %s15_s18 = sadd.s32 1, %s10145_s18  }
 0x426   : > { %p12_p4 = scmp.ge.s32.totalorder %s15_s18, 4  }
 0x428   :  { %14 = sbr.rel (!%p12_p4) target bundleno = 1 (0x1), region = 90 }

</bundles_post_ra>
